<compile_context>
chip_gen: v7x
topology: tpu7x:2x2x1
jax: 0.10.0
libtpu: 0.0.40
codegen_flags: <defaults>
</compile_context>

<pallas_src>
import jax
import jax.numpy as jnp
from jax.experimental import pallas as pl
from jax.experimental.pallas import tpu as pltpu

_BN_EPS = 1e-5


def _round_up(x, m):
    return ((x + m - 1) // m) * m


# ---------------------------------------------------------------------------
# Kernels
# ---------------------------------------------------------------------------
def _elu(y):
    # ELU(alpha=1): y if y > 0 else exp(y) - 1   (exp arg clamped for safety).
    return jnp.where(y > 0, y, jnp.exp(jnp.minimum(y, 0.0)) - 1.0)


def _fused_stage_kernel(p_ref, a_ref, wc_ref, bc_ref, wp_ref, bp_ref,
                        scale_ref, shift_ref, o_ref):
    # Conv2d(2x5) as im2col matmul (+ bias) on the MXU.
    conv = jnp.dot(p_ref[...], wc_ref[...],
                   preferred_element_type=jnp.float32) + bc_ref[...]
    # 1x1 point conv + sigmoid gate.
    logit = jnp.dot(a_ref[...], wp_ref[...],
                    preferred_element_type=jnp.float32) + bp_ref[...]
    gate = 1.0 / (1.0 + jnp.exp(-logit))
    # Gated conv -> BatchNorm (inference affine) -> ELU.
    y = conv * gate
    y = y * scale_ref[...] + shift_ref[...]
    o_ref[...] = _elu(y).astype(o_ref.dtype)


def _conv_bn_elu_kernel(p_ref, wc_ref, bc_ref, scale_ref, shift_ref, o_ref):
    y = jnp.dot(p_ref[...], wc_ref[...],
                preferred_element_type=jnp.float32) + bc_ref[...]
    y = y * scale_ref[...] + shift_ref[...]
    o_ref[...] = _elu(y).astype(o_ref.dtype)


# ---------------------------------------------------------------------------
# Pallas call wrapper (flattened rows, large row blocks)
# ---------------------------------------------------------------------------
def _stage_call(patches, att, wc, bc, wp, bp, scale, shift, *, block_rows=512):
    """Run one fused encoder stage on flattened rows.  `att` may be None."""
    m, k = patches.shape
    c_out = wc.shape[1]

    bm = min(block_rows, _round_up(m, 8))        # sublane-dense row block
    num_blocks = pl.cdiv(m, bm)
    m_pad = num_blocks * bm
    if m_pad != m:
        patches = jnp.pad(patches, ((0, m_pad - m), (0, 0)))
        if att is not None:
            att = jnp.pad(att, ((0, m_pad - m), (0, 0)))

    def row_spec(width):
        return pl.BlockSpec((bm, width), lambda i: (i, 0))

    def full_spec(a):
        return pl.BlockSpec(a.shape, lambda i: (0, 0))

    if att is not None:
        c_att = att.shape[1]
        kernel = _fused_stage_kernel
        operands = (patches, att, wc, bc, wp, bp, scale, shift)
        in_specs = [row_spec(k), row_spec(c_att), full_spec(wc), full_spec(bc),
                    full_spec(wp), full_spec(bp), full_spec(scale),
                    full_spec(shift)]
        flops = 2 * m_pad * (k + c_att) * c_out
        trans = 2 * m_pad * c_out
        bytes_acc = 4 * (m_pad * (k + c_att + c_out)
                         + (k + c_att) * c_out + 4 * c_out)
    else:
        kernel = _conv_bn_elu_kernel
        operands = (patches, wc, bc, scale, shift)
        in_specs = [row_spec(k), full_spec(wc), full_spec(bc),
                    full_spec(scale), full_spec(shift)]
        flops = 2 * m_pad * k * c_out
        trans = m_pad * c_out
        bytes_acc = 4 * (m_pad * (k + c_out) + k * c_out + 3 * c_out)

    out = pl.pallas_call(
        kernel,
        out_shape=jax.ShapeDtypeStruct((m_pad, c_out), patches.dtype),
        grid_spec=pl.GridSpec(
            grid=(num_blocks,),
            in_specs=in_specs,
            out_specs=pl.BlockSpec((bm, c_out), lambda i: (i, 0)),
        ),
        compiler_params=pltpu.CompilerParams(
            dimension_semantics=("parallel",),
            vmem_limit_bytes=32 * 1024 * 1024,
        ),
        cost_estimate=pl.CostEstimate(
            flops=flops, transcendentals=trans, bytes_accessed=bytes_acc),
    )(*operands)
    return out[:m]


# ---------------------------------------------------------------------------
# Layout plumbing (padding, im2col, flattening) — zero FLOPs, done in wrapper
# ---------------------------------------------------------------------------
def _extract_patches(xp, kh, kw, sw):
    """im2col for kernel (kh, kw), stride (1, sw).  xp is padded NHWC."""
    n, hp, wpad, c = xp.shape
    h_out = hp - kh + 1
    w_out = (wpad - kw) // sw + 1
    cols = []
    for i in range(kh):
        for j in range(kw):
            cols.append(jax.lax.slice(
                xp,
                (0, i, j, 0),
                (n, i + h_out, j + sw * (w_out - 1) + 1, c),
                (1, 1, sw, 1)))
    patches = jnp.concatenate(cols, axis=-1)     # (n, h_out, w_out, kh*kw*c)
    return patches, h_out, w_out


def _run_stage(x_nhwc, att_nhwc, p, *, pad_w, stride_w, block_rows=512):
    n = x_nhwc.shape[0]
    xp = jnp.pad(x_nhwc, ((0, 0), (1, 0), pad_w, (0, 0)))   # pad H top by 1
    patches, h_out, w_out = _extract_patches(xp, 2, 5, stride_w)
    k = patches.shape[-1]
    c_out = p['wc'].shape[-1]
    m = n * h_out * w_out

    # TODO(synk): BatchNorm2d is implemented in inference mode (running stats
    # folded to a per-channel scale/shift); train-mode batch statistics are
    # not computed in-kernel.
    inv_std = 1.0 / jnp.sqrt(p['var'] + _BN_EPS)
    scale = (p['gamma'] * inv_std).reshape(1, c_out)
    shift = (p['beta'] - p['mean'] * p['gamma'] * inv_std).reshape(1, c_out)

    wc = p['wc'].reshape(k, c_out)
    bc = p['bc'].reshape(1, c_out)
    patches_rows = patches.reshape(m, k)

    if att_nhwc is not None:
        c_att = att_nhwc.shape[-1]
        att_rows = att_nhwc.reshape(m, c_att)
        out = _stage_call(patches_rows, att_rows, wc, bc,
                          p['wp'], p['bp'].reshape(1, c_out),
                          scale, shift, block_rows=block_rows)
    else:
        out = _stage_call(patches_rows, None, wc, bc, None, None,
                          scale, shift, block_rows=block_rows)
    return out.reshape(n, h_out, w_out, c_out)


def mencoder_forward(params, x_nchw, att_list):
    """Pallas forward of MEncoder.  Inputs/outputs are NCHW like PyTorch."""
    to_nhwc = lambda t: jnp.transpose(t, (0, 2, 3, 1))
    to_nchw = lambda t: jnp.transpose(t, (0, 3, 1, 2))

    x = to_nhwc(x_nchw)
    atts = [to_nhwc(a) for a in att_list]

    x_list = []
    x = _run_stage(x, atts[-1], params['s1'], pad_w=(2, 2), stride_w=1)  # fen1/ben1
    x = _run_stage(x, atts[-2], params['s2'], pad_w=(0, 0), stride_w=2)  # fen2/ben2
    x_list.append(x)
    x = _run_stage(x, atts[-3], params['s3'], pad_w=(1, 1), stride_w=2)  # fen3/ben3
    x_list.append(x)
    x = _run_stage(x, atts[-4], params['s4'], pad_w=(1, 1), stride_w=2)  # fen4/ben4
    x_list.append(x)
    x = _run_stage(x, atts[-5], params['s5'], pad_w=(1, 1), stride_w=2)  # fen5/ben5
    x_list.append(x)
    x = _run_stage(x, None, params['s6'], pad_w=(1, 1), stride_w=2)      # en6
    x_list.append(x)

    return to_nchw(x), [to_nchw(t) for t in x_list]


# ---------------------------------------------------------------------------
# Pure-JAX reference (for correctness verification)
# ---------------------------------------------------------------------------
def ref_forward(params, x, att_list):
    def conv(x, p, pad_w, sw):
        w = jnp.transpose(p['wc'], (3, 2, 0, 1))     # (KH,KW,Cin,Cout) -> OIHW
        y = jax.lax.conv_general_dilated(
            x, w, window_strides=(1, sw), padding=((1, 0), pad_w),
            dimension_numbers=('NCHW', 'OIHW', 'NCHW'))
        return y + p['bc'].reshape(1, -1, 1, 1)

    def gate(a, p):
        g = jnp.einsum('nchw,cd->ndhw', a, p['wp']) + p['bp'].reshape(1, -1, 1, 1)
        return jax.nn.sigmoid(g)

    def bn_elu(y, p):
        z = (y - p['mean'].reshape(1, -1, 1, 1)) / jnp.sqrt(
            p['var'].reshape(1, -1, 1, 1) + _BN_EPS)
        z = z * p['gamma'].reshape(1, -1, 1, 1) + p['beta'].reshape(1, -1, 1, 1)
        return jax.nn.elu(z)

    x_list = []
    x = conv(x, params['s1'], (2, 2), 1)
    x = bn_elu(x * gate(att_list[-1], params['s1']), params['s1'])
    x = conv(x, params['s2'], (0, 0), 2)
    x = bn_elu(x * gate(att_list[-2], params['s2']), params['s2'])
    x_list.append(x)
    x = conv(x, params['s3'], (1, 1), 2)
    x = bn_elu(x * gate(att_list[-3], params['s3']), params['s3'])
    x_list.append(x)
    x = conv(x, params['s4'], (1, 1), 2)
    x = bn_elu(x * gate(att_list[-4], params['s4']), params['s4'])
    x_list.append(x)
    x = conv(x, params['s5'], (1, 1), 2)
    x = bn_elu(x * gate(att_list[-5], params['s5']), params['s5'])
    x_list.append(x)
    x = conv(x, params['s6'], (1, 1), 2)
    x = bn_elu(x, params['s6'])
    x_list.append(x)
    return x, x_list


# ---------------------------------------------------------------------------
# Parameters
# ---------------------------------------------------------------------------
def init_params(key):
    cfg = [('s1', 16, 16, True), ('s2', 16, 16, True), ('s3', 16, 32, True),
           ('s4', 32, 32, True), ('s5', 32, 64, True), ('s6', 64, 64, False)]
    params = {}
    for name, cin, cout, has_gate in cfg:
        key, k0, k1, k2, k3, k4, k5, k6, k7 = jax.random.split(key, 9)
        p = {
            'wc': 0.1 * jax.random.normal(k0, (2, 5, cin, cout), jnp.float32),
            'bc': 0.1 * jax.random.normal(k1, (cout,), jnp.float32),
            'gamma': 1.0 + 0.1 * jax.random.normal(k2, (cout,), jnp.float32),
            'beta': 0.1 * jax.random.normal(k3, (cout,), jnp.float32),
            'mean': 0.1 * jax.random.normal(k4, (cout,), jnp.float32),
            'var': jax.random.uniform(k5, (cout,), jnp.float32, 0.5, 1.5),
        }
        if has_gate:
            p['wp'] = 0.1 * jax.random.normal(k6, (cout, cout), jnp.float32)
            p['bp'] = 0.1 * jax.random.normal(k7, (cout,), jnp.float32)
        params[name] = p
    return params


if __name__ == "__main__":
    root = jax.random.PRNGKey(0)
    kp, kx, k1, k2, k3, k4, k5 = jax.random.split(root, 7)

    # Small but valid shapes: batch=2, 16 input channels, H(time)=8, W(freq)=65
    # (W >= 65 keeps every stride-2 stage non-empty, as the module requires).
    n, h, w = 2, 8, 65
    params = init_params(kp)
    x = jax.random.normal(kx, (n, 16, h, w), jnp.float32)
    # att_list[-k] gates stage k, so its shape matches that stage's conv output.
    att_list = [
        jax.random.normal(k1, (n, 64, h, 3), jnp.float32),    # att_list[-5]
        jax.random.normal(k2, (n, 32, h, 7), jnp.float32),    # att_list[-4]
        jax.random.normal(k3, (n, 32, h, 15), jnp.float32),   # att_list[-3]
        jax.random.normal(k4, (n, 16, h, 31), jnp.float32),   # att_list[-2]
        jax.random.normal(k5, (n, 16, h, 65), jnp.float32),   # att_list[-1]
    ]

    fwd = jax.jit(mencoder_forward)
    out, out_list = fwd(params, x, att_list)
    out = jax.block_until_ready(out)

    ref_out, ref_list = ref_forward(params, x, att_list)

    assert out.shape == ref_out.shape, (out.shape, ref_out.shape)
    assert jnp.allclose(out, ref_out, atol=2e-3, rtol=2e-3), "final output mismatch"
    assert len(out_list) == len(ref_list) == 5
    for got, want in zip(out_list, ref_list):
        assert got.shape == want.shape, (got.shape, want.shape)
        assert jnp.allclose(got, want, atol=2e-3, rtol=2e-3), "x_list mismatch"

    print("KERNEL_OK")
</pallas_src>

<mosaic_0001>
module attributes {stable_mosaic.version = 11 : i64} {
  func.func @_fused_stage_kernel(%arg0: i32, %arg1: memref<512x160xf32, #tpu.memory_space<vmem>>, %arg2: memref<512x16xf32, #tpu.memory_space<vmem>>, %arg3: memref<160x16xf32, #tpu.memory_space<vmem>>, %arg4: memref<1x16xf32, #tpu.memory_space<vmem>>, %arg5: memref<16x16xf32, #tpu.memory_space<vmem>>, %arg6: memref<1x16xf32, #tpu.memory_space<vmem>>, %arg7: memref<1x16xf32, #tpu.memory_space<vmem>>, %arg8: memref<1x16xf32, #tpu.memory_space<vmem>>, %arg9: memref<512x16xf32, #tpu.memory_space<vmem>>) attributes {dimension_semantics = [#tpu.dimension_semantics<parallel>], iteration_bounds = array<i64: 3>, scalar_prefetch = 0 : i64, scratch_operands = 0 : i64, tpu.core_type = #tpu.core_type<tc>, window_params = [{transform_indices = @transform_0, window_bounds = array<i64: 512, 160>}, {transform_indices = @transform_1, window_bounds = array<i64: 512, 16>}, {pipeline_mode = #tpu.pipeline_mode<synchronous>, transform_indices = @transform_2, window_bounds = array<i64: 160, 16>}, {pipeline_mode = #tpu.pipeline_mode<synchronous>, transform_indices = @transform_3, window_bounds = array<i64: 1, 16>}, {pipeline_mode = #tpu.pipeline_mode<synchronous>, transform_indices = @transform_4, window_bounds = array<i64: 16, 16>}, {pipeline_mode = #tpu.pipeline_mode<synchronous>, transform_indices = @transform_5, window_bounds = array<i64: 1, 16>}, {pipeline_mode = #tpu.pipeline_mode<synchronous>, transform_indices = @transform_6, window_bounds = array<i64: 1, 16>}, {pipeline_mode = #tpu.pipeline_mode<synchronous>, transform_indices = @transform_7, window_bounds = array<i64: 1, 16>}, {transform_indices = @transform_8, window_bounds = array<i64: 512, 16>}]} {
    %c0 = arith.constant 0 : index
    %c0_0 = arith.constant 0 : index
    %0 = vector.load %arg1[%c0, %c0_0] : memref<512x160xf32, #tpu.memory_space<vmem>>, vector<512x160xf32>
    %c0_1 = arith.constant 0 : index
    %c0_2 = arith.constant 0 : index
    %1 = vector.load %arg3[%c0_1, %c0_2] : memref<160x16xf32, #tpu.memory_space<vmem>>, vector<160x16xf32>
    %cst = arith.constant dense<0.000000e+00> : vector<512x16xf32>
    %2 = tpu.matmul %0, %1, %cst {dimension_numbers = #tpu.dot_dimension_numbers<[1], [0], [0], [1], [0, 0, 1, 1], [], []>} : vector<512x160xf32>, vector<160x16xf32>, vector<512x16xf32> -> vector<512x16xf32>
    %c0_3 = arith.constant 0 : index
    %c0_4 = arith.constant 0 : index
    %3 = vector.load %arg4[%c0_3, %c0_4] : memref<1x16xf32, #tpu.memory_space<vmem>>, vector<1x16xf32>
    %4 = vector.broadcast %3 : vector<1x16xf32> to vector<512x16xf32>
    %5 = arith.addf %2, %4 : vector<512x16xf32>
    %c0_5 = arith.constant 0 : index
    %c0_6 = arith.constant 0 : index
    %6 = vector.load %arg2[%c0_5, %c0_6] : memref<512x16xf32, #tpu.memory_space<vmem>>, vector<512x16xf32>
    %c0_7 = arith.constant 0 : index
    %c0_8 = arith.constant 0 : index
    %7 = vector.load %arg5[%c0_7, %c0_8] : memref<16x16xf32, #tpu.memory_space<vmem>>, vector<16x16xf32>
    %cst_9 = arith.constant dense<0.000000e+00> : vector<512x16xf32>
    %8 = tpu.matmul %6, %7, %cst_9 {dimension_numbers = #tpu.dot_dimension_numbers<[1], [0], [0], [1], [0, 0, 1, 1], [], []>} : vector<512x16xf32>, vector<16x16xf32>, vector<512x16xf32> -> vector<512x16xf32>
    %c0_10 = arith.constant 0 : index
    %c0_11 = arith.constant 0 : index
    %9 = vector.load %arg6[%c0_10, %c0_11] : memref<1x16xf32, #tpu.memory_space<vmem>>, vector<1x16xf32>
    %10 = vector.broadcast %9 : vector<1x16xf32> to vector<512x16xf32>
    %11 = arith.addf %8, %10 : vector<512x16xf32>
    %cst_12 = arith.constant 0.000000e+00 : f32
    %12 = vector.broadcast %cst_12 : f32 to vector<512x16xf32>
    %13 = arith.subf %12, %11 : vector<512x16xf32>
    %14 = math.exp %13 : vector<512x16xf32>
    %cst_13 = arith.constant 1.000000e+00 : f32
    %15 = vector.broadcast %cst_13 : f32 to vector<512x16xf32>
    %16 = arith.addf %15, %14 : vector<512x16xf32>
    %cst_14 = arith.constant 1.000000e+00 : f32
    %17 = vector.broadcast %cst_14 : f32 to vector<512x16xf32>
    %18 = arith.divf %17, %16 : vector<512x16xf32>
    %19 = arith.mulf %5, %18 : vector<512x16xf32>
    %c0_15 = arith.constant 0 : index
    %c0_16 = arith.constant 0 : index
    %20 = vector.load %arg7[%c0_15, %c0_16] : memref<1x16xf32, #tpu.memory_space<vmem>>, vector<1x16xf32>
    %21 = vector.broadcast %20 : vector<1x16xf32> to vector<512x16xf32>
    %22 = arith.mulf %19, %21 : vector<512x16xf32>
    %c0_17 = arith.constant 0 : index
    %c0_18 = arith.constant 0 : index
    %23 = vector.load %arg8[%c0_17, %c0_18] : memref<1x16xf32, #tpu.memory_space<vmem>>, vector<1x16xf32>
    %24 = vector.broadcast %23 : vector<1x16xf32> to vector<512x16xf32>
    %25 = arith.addf %22, %24 : vector<512x16xf32>
    %cst_19 = arith.constant 0.000000e+00 : f32
    %26 = vector.broadcast %cst_19 : f32 to vector<512x16xf32>
    %27 = arith.cmpf ogt, %25, %26 : vector<512x16xf32>
    %cst_20 = arith.constant 0.000000e+00 : f32
    %28 = vector.broadcast %cst_20 : f32 to vector<512x16xf32>
    %29 = arith.minimumf %25, %28 : vector<512x16xf32>
    %30 = math.exp %29 : vector<512x16xf32>
    %cst_21 = arith.constant 1.000000e+00 : f32
    %31 = vector.broadcast %cst_21 : f32 to vector<512x16xf32>
    %32 = arith.subf %30, %31 : vector<512x16xf32>
    %33 = arith.select %27, %25, %32 : vector<512x16xi1>, vector<512x16xf32>
    %c0_22 = arith.constant 0 : index
    %c0_23 = arith.constant 0 : index
    %34 = vector.load %arg9[%c0_22, %c0_23] : memref<512x16xf32, #tpu.memory_space<vmem>>, vector<512x16xf32>
    tpu.vector_store %arg9[%c0_22, %c0_23], %33 {strides = array<i32>} : memref<512x16xf32, #tpu.memory_space<vmem>>, vector<512x16xf32>,
    return
  }
  func.func @transform_0(%arg0: i32) -> (i32, i32) {
    %c0_i32 = arith.constant 0 : i32
    %c0_i32_0 = arith.constant 0 : i32
    return %arg0, %c0_i32 : i32, i32
  }
  func.func @transform_1(%arg0: i32) -> (i32, i32) {
    %c0_i32 = arith.constant 0 : i32
    %c0_i32_0 = arith.constant 0 : i32
    return %arg0, %c0_i32 : i32, i32
  }
  func.func @transform_2(%arg0: i32) -> (i32, i32) {
    %c0_i32 = arith.constant 0 : i32
    %c0_i32_0 = arith.constant 0 : i32
    %c0_i32_1 = arith.constant 0 : i32
    return %c0_i32, %c0_i32_0 : i32, i32
  }
  func.func @transform_3(%arg0: i32) -> (i32, i32) {
    %c0_i32 = arith.constant 0 : i32
    %c0_i32_0 = arith.constant 0 : i32
    %c0_i32_1 = arith.constant 0 : i32
    return %c0_i32, %c0_i32_0 : i32, i32
  }
  func.func @transform_4(%arg0: i32) -> (i32, i32) {
    %c0_i32 = arith.constant 0 : i32
    %c0_i32_0 = arith.constant 0 : i32
    %c0_i32_1 = arith.constant 0 : i32
    return %c0_i32, %c0_i32_0 : i32, i32
  }
  func.func @transform_5(%arg0: i32) -> (i32, i32) {
    %c0_i32 = arith.constant 0 : i32
    %c0_i32_0 = arith.constant 0 : i32
    %c0_i32_1 = arith.constant 0 : i32
    return %c0_i32, %c0_i32_0 : i32, i32
  }
  func.func @transform_6(%arg0: i32) -> (i32, i32) {
    %c0_i32 = arith.constant 0 : i32
    %c0_i32_0 = arith.constant 0 : i32
    %c0_i32_1 = arith.constant 0 : i32
    return %c0_i32, %c0_i32_0 : i32, i32
  }
  func.func @transform_7(%arg0: i32) -> (i32, i32) {
    %c0_i32 = arith.constant 0 : i32
    %c0_i32_0 = arith.constant 0 : i32
    %c0_i32_1 = arith.constant 0 : i32
    return %c0_i32, %c0_i32_0 : i32, i32
  }
  func.func @transform_8(%arg0: i32) -> (i32, i32) {
    %c0_i32 = arith.constant 0 : i32
    %c0_i32_0 = arith.constant 0 : i32
    return %arg0, %c0_i32 : i32, i32
  }
}

module attributes {stable_mosaic.version = 11 : i64} {
  func.func @_fused_stage_kernel(%arg0: i32, %arg1: memref<496x160xf32, #tpu.memory_space<vmem>>, %arg2: memref<496x16xf32, #tpu.memory_space<vmem>>, %arg3: memref<160x16xf32, #tpu.memory_space<vmem>>, %arg4: memref<1x16xf32, #tpu.memory_space<vmem>>, %arg5: memref<16x16xf32, #tpu.memory_space<vmem>>, %arg6: memref<1x16xf32, #tpu.memory_space<vmem>>, %arg7: memref<1x16xf32, #tpu.memory_space<vmem>>, %arg8: memref<1x16xf32, #tpu.memory_space<vmem>>, %arg9: memref<496x16xf32, #tpu.memory_space<vmem>>) attributes {dimension_semantics = [#tpu.dimension_semantics<parallel>], iteration_bounds = array<i64: 1>, scalar_prefetch = 0 : i64, scratch_operands = 0 : i64, tpu.core_type = #tpu.core_type<tc>, window_params = [{transform_indices = @transform_0, window_bounds = array<i64: 496, 160>}, {transform_indices = @transform_1, window_bounds = array<i64: 496, 16>}, {pipeline_mode = #tpu.pipeline_mode<synchronous>, transform_indices = @transform_2, window_bounds = array<i64: 160, 16>}, {pipeline_mode = #tpu.pipeline_mode<synchronous>, transform_indices = @transform_3, window_bounds = array<i64: 1, 16>}, {pipeline_mode = #tpu.pipeline_mode<synchronous>, transform_indices = @transform_4, window_bounds = array<i64: 16, 16>}, {pipeline_mode = #tpu.pipeline_mode<synchronous>, transform_indices = @transform_5, window_bounds = array<i64: 1, 16>}, {pipeline_mode = #tpu.pipeline_mode<synchronous>, transform_indices = @transform_6, window_bounds = array<i64: 1, 16>}, {pipeline_mode = #tpu.pipeline_mode<synchronous>, transform_indices = @transform_7, window_bounds = array<i64: 1, 16>}, {transform_indices = @transform_8, window_bounds = array<i64: 496, 16>}]} {
    %c0 = arith.constant 0 : index
    %c0_0 = arith.constant 0 : index
    %0 = vector.load %arg1[%c0, %c0_0] : memref<496x160xf32, #tpu.memory_space<vmem>>, vector<496x160xf32>
    %c0_1 = arith.constant 0 : index
    %c0_2 = arith.constant 0 : index
    %1 = vector.load %arg3[%c0_1, %c0_2] : memref<160x16xf32, #tpu.memory_space<vmem>>, vector<160x16xf32>
    %cst = arith.constant dense<0.000000e+00> : vector<496x16xf32>
    %2 = tpu.matmul %0, %1, %cst {dimension_numbers = #tpu.dot_dimension_numbers<[1], [0], [0], [1], [0, 0, 1, 1], [], []>} : vector<496x160xf32>, vector<160x16xf32>, vector<496x16xf32> -> vector<496x16xf32>
    %c0_3 = arith.constant 0 : index
    %c0_4 = arith.constant 0 : index
    %3 = vector.load %arg4[%c0_3, %c0_4] : memref<1x16xf32, #tpu.memory_space<vmem>>, vector<1x16xf32>
    %4 = vector.broadcast %3 : vector<1x16xf32> to vector<496x16xf32>
    %5 = arith.addf %2, %4 : vector<496x16xf32>
    %c0_5 = arith.constant 0 : index
    %c0_6 = arith.constant 0 : index
    %6 = vector.load %arg2[%c0_5, %c0_6] : memref<496x16xf32, #tpu.memory_space<vmem>>, vector<496x16xf32>
    %c0_7 = arith.constant 0 : index
    %c0_8 = arith.constant 0 : index
    %7 = vector.load %arg5[%c0_7, %c0_8] : memref<16x16xf32, #tpu.memory_space<vmem>>, vector<16x16xf32>
    %cst_9 = arith.constant dense<0.000000e+00> : vector<496x16xf32>
    %8 = tpu.matmul %6, %7, %cst_9 {dimension_numbers = #tpu.dot_dimension_numbers<[1], [0], [0], [1], [0, 0, 1, 1], [], []>} : vector<496x16xf32>, vector<16x16xf32>, vector<496x16xf32> -> vector<496x16xf32>
    %c0_10 = arith.constant 0 : index
    %c0_11 = arith.constant 0 : index
    %9 = vector.load %arg6[%c0_10, %c0_11] : memref<1x16xf32, #tpu.memory_space<vmem>>, vector<1x16xf32>
    %10 = vector.broadcast %9 : vector<1x16xf32> to vector<496x16xf32>
    %11 = arith.addf %8, %10 : vector<496x16xf32>
    %cst_12 = arith.constant 0.000000e+00 : f32
    %12 = vector.broadcast %cst_12 : f32 to vector<496x16xf32>
    %13 = arith.subf %12, %11 : vector<496x16xf32>
    %14 = math.exp %13 : vector<496x16xf32>
    %cst_13 = arith.constant 1.000000e+00 : f32
    %15 = vector.broadcast %cst_13 : f32 to vector<496x16xf32>
    %16 = arith.addf %15, %14 : vector<496x16xf32>
    %cst_14 = arith.constant 1.000000e+00 : f32
    %17 = vector.broadcast %cst_14 : f32 to vector<496x16xf32>
    %18 = arith.divf %17, %16 : vector<496x16xf32>
    %19 = arith.mulf %5, %18 : vector<496x16xf32>
    %c0_15 = arith.constant 0 : index
    %c0_16 = arith.constant 0 : index
    %20 = vector.load %arg7[%c0_15, %c0_16] : memref<1x16xf32, #tpu.memory_space<vmem>>, vector<1x16xf32>
    %21 = vector.broadcast %20 : vector<1x16xf32> to vector<496x16xf32>
    %22 = arith.mulf %19, %21 : vector<496x16xf32>
    %c0_17 = arith.constant 0 : index
    %c0_18 = arith.constant 0 : index
    %23 = vector.load %arg8[%c0_17, %c0_18] : memref<1x16xf32, #tpu.memory_space<vmem>>, vector<1x16xf32>
    %24 = vector.broadcast %23 : vector<1x16xf32> to vector<496x16xf32>
    %25 = arith.addf %22, %24 : vector<496x16xf32>
    %cst_19 = arith.constant 0.000000e+00 : f32
    %26 = vector.broadcast %cst_19 : f32 to vector<496x16xf32>
    %27 = arith.cmpf ogt, %25, %26 : vector<496x16xf32>
    %cst_20 = arith.constant 0.000000e+00 : f32
    %28 = vector.broadcast %cst_20 : f32 to vector<496x16xf32>
    %29 = arith.minimumf %25, %28 : vector<496x16xf32>
    %30 = math.exp %29 : vector<496x16xf32>
    %cst_21 = arith.constant 1.000000e+00 : f32
    %31 = vector.broadcast %cst_21 : f32 to vector<496x16xf32>
    %32 = arith.subf %30, %31 : vector<496x16xf32>
    %33 = arith.select %27, %25, %32 : vector<496x16xi1>, vector<496x16xf32>
    %c0_22 = arith.constant 0 : index
    %c0_23 = arith.constant 0 : index
    %34 = vector.load %arg9[%c0_22, %c0_23] : memref<496x16xf32, #tpu.memory_space<vmem>>, vector<496x16xf32>
    tpu.vector_store %arg9[%c0_22, %c0_23], %33 {strides = array<i32>} : memref<496x16xf32, #tpu.memory_space<vmem>>, vector<496x16xf32>,
    return
  }
  func.func @transform_0(%arg0: i32) -> (i32, i32) {
    %c0_i32 = arith.constant 0 : i32
    %c0_i32_0 = arith.constant 0 : i32
    return %arg0, %c0_i32 : i32, i32
  }
  func.func @transform_1(%arg0: i32) -> (i32, i32) {
    %c0_i32 = arith.constant 0 : i32
    %c0_i32_0 = arith.constant 0 : i32
    return %arg0, %c0_i32 : i32, i32
  }
  func.func @transform_2(%arg0: i32) -> (i32, i32) {
    %c0_i32 = arith.constant 0 : i32
    %c0_i32_0 = arith.constant 0 : i32
    %c0_i32_1 = arith.constant 0 : i32
    return %c0_i32, %c0_i32_0 : i32, i32
  }
  func.func @transform_3(%arg0: i32) -> (i32, i32) {
    %c0_i32 = arith.constant 0 : i32
    %c0_i32_0 = arith.constant 0 : i32
    %c0_i32_1 = arith.constant 0 : i32
    return %c0_i32, %c0_i32_0 : i32, i32
  }
  func.func @transform_4(%arg0: i32) -> (i32, i32) {
    %c0_i32 = arith.constant 0 : i32
    %c0_i32_0 = arith.constant 0 : i32
    %c0_i32_1 = arith.constant 0 : i32
    return %c0_i32, %c0_i32_0 : i32, i32
  }
  func.func @transform_5(%arg0: i32) -> (i32, i32) {
    %c0_i32 = arith.constant 0 : i32
    %c0_i32_0 = arith.constant 0 : i32
    %c0_i32_1 = arith.constant 0 : i32
    return %c0_i32, %c0_i32_0 : i32, i32
  }
  func.func @transform_6(%arg0: i32) -> (i32, i32) {
    %c0_i32 = arith.constant 0 : i32
    %c0_i32_0 = arith.constant 0 : i32
    %c0_i32_1 = arith.constant 0 : i32
    return %c0_i32, %c0_i32_0 : i32, i32
  }
  func.func @transform_7(%arg0: i32) -> (i32, i32) {
    %c0_i32 = arith.constant 0 : i32
    %c0_i32_0 = arith.constant 0 : i32
    %c0_i32_1 = arith.constant 0 : i32
    return %c0_i32, %c0_i32_0 : i32, i32
  }
  func.func @transform_8(%arg0: i32) -> (i32, i32) {
    %c0_i32 = arith.constant 0 : i32
    %c0_i32_0 = arith.constant 0 : i32
    return %arg0, %c0_i32 : i32, i32
  }
}

module attributes {stable_mosaic.version = 11 : i64} {
  func.func @_fused_stage_kernel(%arg0: i32, %arg1: memref<240x160xf32, #tpu.memory_space<vmem>>, %arg2: memref<240x32xf32, #tpu.memory_space<vmem>>, %arg3: memref<160x32xf32, #tpu.memory_space<vmem>>, %arg4: memref<1x32xf32, #tpu.memory_space<vmem>>, %arg5: memref<32x32xf32, #tpu.memory_space<vmem>>, %arg6: memref<1x32xf32, #tpu.memory_space<vmem>>, %arg7: memref<1x32xf32, #tpu.memory_space<vmem>>, %arg8: memref<1x32xf32, #tpu.memory_space<vmem>>, %arg9: memref<240x32xf32, #tpu.memory_space<vmem>>) attributes {dimension_semantics = [#tpu.dimension_semantics<parallel>], iteration_bounds = array<i64: 1>, scalar_prefetch = 0 : i64, scratch_operands = 0 : i64, tpu.core_type = #tpu.core_type<tc>, window_params = [{transform_indices = @transform_0, window_bounds = array<i64: 240, 160>}, {transform_indices = @transform_1, window_bounds = array<i64: 240, 32>}, {pipeline_mode = #tpu.pipeline_mode<synchronous>, transform_indices = @transform_2, window_bounds = array<i64: 160, 32>}, {pipeline_mode = #tpu.pipeline_mode<synchronous>, transform_indices = @transform_3, window_bounds = array<i64: 1, 32>}, {pipeline_mode = #tpu.pipeline_mode<synchronous>, transform_indices = @transform_4, window_bounds = array<i64: 32, 32>}, {pipeline_mode = #tpu.pipeline_mode<synchronous>, transform_indices = @transform_5, window_bounds = array<i64: 1, 32>}, {pipeline_mode = #tpu.pipeline_mode<synchronous>, transform_indices = @transform_6, window_bounds = array<i64: 1, 32>}, {pipeline_mode = #tpu.pipeline_mode<synchronous>, transform_indices = @transform_7, window_bounds = array<i64: 1, 32>}, {transform_indices = @transform_8, window_bounds = array<i64: 240, 32>}]} {
    %c0 = arith.constant 0 : index
    %c0_0 = arith.constant 0 : index
    %0 = vector.load %arg1[%c0, %c0_0] : memref<240x160xf32, #tpu.memory_space<vmem>>, vector<240x160xf32>
    %c0_1 = arith.constant 0 : index
    %c0_2 = arith.constant 0 : index
    %1 = vector.load %arg3[%c0_1, %c0_2] : memref<160x32xf32, #tpu.memory_space<vmem>>, vector<160x32xf32>
    %cst = arith.constant dense<0.000000e+00> : vector<240x32xf32>
    %2 = tpu.matmul %0, %1, %cst {dimension_numbers = #tpu.dot_dimension_numbers<[1], [0], [0], [1], [0, 0, 1, 1], [], []>} : vector<240x160xf32>, vector<160x32xf32>, vector<240x32xf32> -> vector<240x32xf32>
    %c0_3 = arith.constant 0 : index
    %c0_4 = arith.constant 0 : index
    %3 = vector.load %arg4[%c0_3, %c0_4] : memref<1x32xf32, #tpu.memory_space<vmem>>, vector<1x32xf32>
    %4 = vector.broadcast %3 : vector<1x32xf32> to vector<240x32xf32>
    %5 = arith.addf %2, %4 : vector<240x32xf32>
    %c0_5 = arith.constant 0 : index
    %c0_6 = arith.constant 0 : index
    %6 = vector.load %arg2[%c0_5, %c0_6] : memref<240x32xf32, #tpu.memory_space<vmem>>, vector<240x32xf32>
    %c0_7 = arith.constant 0 : index
    %c0_8 = arith.constant 0 : index
    %7 = vector.load %arg5[%c0_7, %c0_8] : memref<32x32xf32, #tpu.memory_space<vmem>>, vector<32x32xf32>
    %cst_9 = arith.constant dense<0.000000e+00> : vector<240x32xf32>
    %8 = tpu.matmul %6, %7, %cst_9 {dimension_numbers = #tpu.dot_dimension_numbers<[1], [0], [0], [1], [0, 0, 1, 1], [], []>} : vector<240x32xf32>, vector<32x32xf32>, vector<240x32xf32> -> vector<240x32xf32>
    %c0_10 = arith.constant 0 : index
    %c0_11 = arith.constant 0 : index
    %9 = vector.load %arg6[%c0_10, %c0_11] : memref<1x32xf32, #tpu.memory_space<vmem>>, vector<1x32xf32>
    %10 = vector.broadcast %9 : vector<1x32xf32> to vector<240x32xf32>
    %11 = arith.addf %8, %10 : vector<240x32xf32>
    %cst_12 = arith.constant 0.000000e+00 : f32
    %12 = vector.broadcast %cst_12 : f32 to vector<240x32xf32>
    %13 = arith.subf %12, %11 : vector<240x32xf32>
    %14 = math.exp %13 : vector<240x32xf32>
    %cst_13 = arith.constant 1.000000e+00 : f32
    %15 = vector.broadcast %cst_13 : f32 to vector<240x32xf32>
    %16 = arith.addf %15, %14 : vector<240x32xf32>
    %cst_14 = arith.constant 1.000000e+00 : f32
    %17 = vector.broadcast %cst_14 : f32 to vector<240x32xf32>
    %18 = arith.divf %17, %16 : vector<240x32xf32>
    %19 = arith.mulf %5, %18 : vector<240x32xf32>
    %c0_15 = arith.constant 0 : index
    %c0_16 = arith.constant 0 : index
    %20 = vector.load %arg7[%c0_15, %c0_16] : memref<1x32xf32, #tpu.memory_space<vmem>>, vector<1x32xf32>
    %21 = vector.broadcast %20 : vector<1x32xf32> to vector<240x32xf32>
    %22 = arith.mulf %19, %21 : vector<240x32xf32>
    %c0_17 = arith.constant 0 : index
    %c0_18 = arith.constant 0 : index
    %23 = vector.load %arg8[%c0_17, %c0_18] : memref<1x32xf32, #tpu.memory_space<vmem>>, vector<1x32xf32>
    %24 = vector.broadcast %23 : vector<1x32xf32> to vector<240x32xf32>
    %25 = arith.addf %22, %24 : vector<240x32xf32>
    %cst_19 = arith.constant 0.000000e+00 : f32
    %26 = vector.broadcast %cst_19 : f32 to vector<240x32xf32>
    %27 = arith.cmpf ogt, %25, %26 : vector<240x32xf32>
    %cst_20 = arith.constant 0.000000e+00 : f32
    %28 = vector.broadcast %cst_20 : f32 to vector<240x32xf32>
    %29 = arith.minimumf %25, %28 : vector<240x32xf32>
    %30 = math.exp %29 : vector<240x32xf32>
    %cst_21 = arith.constant 1.000000e+00 : f32
    %31 = vector.broadcast %cst_21 : f32 to vector<240x32xf32>
    %32 = arith.subf %30, %31 : vector<240x32xf32>
    %33 = arith.select %27, %25, %32 : vector<240x32xi1>, vector<240x32xf32>
    %c0_22 = arith.constant 0 : index
    %c0_23 = arith.constant 0 : index
    %34 = vector.load %arg9[%c0_22, %c0_23] : memref<240x32xf32, #tpu.memory_space<vmem>>, vector<240x32xf32>
    tpu.vector_store %arg9[%c0_22, %c0_23], %33 {strides = array<i32>} : memref<240x32xf32, #tpu.memory_space<vmem>>, vector<240x32xf32>,
    return
  }
  func.func @transform_0(%arg0: i32) -> (i32, i32) {
    %c0_i32 = arith.constant 0 : i32
    %c0_i32_0 = arith.constant 0 : i32
    return %arg0, %c0_i32 : i32, i32
  }
  func.func @transform_1(%arg0: i32) -> (i32, i32) {
    %c0_i32 = arith.constant 0 : i32
    %c0_i32_0 = arith.constant 0 : i32
    return %arg0, %c0_i32 : i32, i32
  }
  func.func @transform_2(%arg0: i32) -> (i32, i32) {
    %c0_i32 = arith.constant 0 : i32
    %c0_i32_0 = arith.constant 0 : i32
    %c0_i32_1 = arith.constant 0 : i32
    return %c0_i32, %c0_i32_0 : i32, i32
  }
  func.func @transform_3(%arg0: i32) -> (i32, i32) {
    %c0_i32 = arith.constant 0 : i32
    %c0_i32_0 = arith.constant 0 : i32
    %c0_i32_1 = arith.constant 0 : i32
    return %c0_i32, %c0_i32_0 : i32, i32
  }
  func.func @transform_4(%arg0: i32) -> (i32, i32) {
    %c0_i32 = arith.constant 0 : i32
    %c0_i32_0 = arith.constant 0 : i32
    %c0_i32_1 = arith.constant 0 : i32
    return %c0_i32, %c0_i32_0 : i32, i32
  }
  func.func @transform_5(%arg0: i32) -> (i32, i32) {
    %c0_i32 = arith.constant 0 : i32
    %c0_i32_0 = arith.constant 0 : i32
    %c0_i32_1 = arith.constant 0 : i32
    return %c0_i32, %c0_i32_0 : i32, i32
  }
  func.func @transform_6(%arg0: i32) -> (i32, i32) {
    %c0_i32 = arith.constant 0 : i32
    %c0_i32_0 = arith.constant 0 : i32
    %c0_i32_1 = arith.constant 0 : i32
    return %c0_i32, %c0_i32_0 : i32, i32
  }
  func.func @transform_7(%arg0: i32) -> (i32, i32) {
    %c0_i32 = arith.constant 0 : i32
    %c0_i32_0 = arith.constant 0 : i32
    %c0_i32_1 = arith.constant 0 : i32
    return %c0_i32, %c0_i32_0 : i32, i32
  }
  func.func @transform_8(%arg0: i32) -> (i32, i32) {
    %c0_i32 = arith.constant 0 : i32
    %c0_i32_0 = arith.constant 0 : i32
    return %arg0, %c0_i32 : i32, i32
  }
}

module attributes {stable_mosaic.version = 11 : i64} {
  func.func @_fused_stage_kernel(%arg0: i32, %arg1: memref<112x320xf32, #tpu.memory_space<vmem>>, %arg2: memref<112x32xf32, #tpu.memory_space<vmem>>, %arg3: memref<320x32xf32, #tpu.memory_space<vmem>>, %arg4: memref<1x32xf32, #tpu.memory_space<vmem>>, %arg5: memref<32x32xf32, #tpu.memory_space<vmem>>, %arg6: memref<1x32xf32, #tpu.memory_space<vmem>>, %arg7: memref<1x32xf32, #tpu.memory_space<vmem>>, %arg8: memref<1x32xf32, #tpu.memory_space<vmem>>, %arg9: memref<112x32xf32, #tpu.memory_space<vmem>>) attributes {dimension_semantics = [#tpu.dimension_semantics<parallel>], iteration_bounds = array<i64: 1>, scalar_prefetch = 0 : i64, scratch_operands = 0 : i64, tpu.core_type = #tpu.core_type<tc>, window_params = [{transform_indices = @transform_0, window_bounds = array<i64: 112, 320>}, {transform_indices = @transform_1, window_bounds = array<i64: 112, 32>}, {pipeline_mode = #tpu.pipeline_mode<synchronous>, transform_indices = @transform_2, window_bounds = array<i64: 320, 32>}, {pipeline_mode = #tpu.pipeline_mode<synchronous>, transform_indices = @transform_3, window_bounds = array<i64: 1, 32>}, {pipeline_mode = #tpu.pipeline_mode<synchronous>, transform_indices = @transform_4, window_bounds = array<i64: 32, 32>}, {pipeline_mode = #tpu.pipeline_mode<synchronous>, transform_indices = @transform_5, window_bounds = array<i64: 1, 32>}, {pipeline_mode = #tpu.pipeline_mode<synchronous>, transform_indices = @transform_6, window_bounds = array<i64: 1, 32>}, {pipeline_mode = #tpu.pipeline_mode<synchronous>, transform_indices = @transform_7, window_bounds = array<i64: 1, 32>}, {transform_indices = @transform_8, window_bounds = array<i64: 112, 32>}]} {
    %c0 = arith.constant 0 : index
    %c0_0 = arith.constant 0 : index
    %0 = vector.load %arg1[%c0, %c0_0] : memref<112x320xf32, #tpu.memory_space<vmem>>, vector<112x320xf32>
    %c0_1 = arith.constant 0 : index
    %c0_2 = arith.constant 0 : index
    %1 = vector.load %arg3[%c0_1, %c0_2] : memref<320x32xf32, #tpu.memory_space<vmem>>, vector<320x32xf32>
    %cst = arith.constant dense<0.000000e+00> : vector<112x32xf32>
    %2 = tpu.matmul %0, %1, %cst {dimension_numbers = #tpu.dot_dimension_numbers<[1], [0], [0], [1], [0, 0, 1, 1], [], []>} : vector<112x320xf32>, vector<320x32xf32>, vector<112x32xf32> -> vector<112x32xf32>
    %c0_3 = arith.constant 0 : index
    %c0_4 = arith.constant 0 : index
    %3 = vector.load %arg4[%c0_3, %c0_4] : memref<1x32xf32, #tpu.memory_space<vmem>>, vector<1x32xf32>
    %4 = vector.broadcast %3 : vector<1x32xf32> to vector<112x32xf32>
    %5 = arith.addf %2, %4 : vector<112x32xf32>
    %c0_5 = arith.constant 0 : index
    %c0_6 = arith.constant 0 : index
    %6 = vector.load %arg2[%c0_5, %c0_6] : memref<112x32xf32, #tpu.memory_space<vmem>>, vector<112x32xf32>
    %c0_7 = arith.constant 0 : index
    %c0_8 = arith.constant 0 : index
    %7 = vector.load %arg5[%c0_7, %c0_8] : memref<32x32xf32, #tpu.memory_space<vmem>>, vector<32x32xf32>
    %cst_9 = arith.constant dense<0.000000e+00> : vector<112x32xf32>
    %8 = tpu.matmul %6, %7, %cst_9 {dimension_numbers = #tpu.dot_dimension_numbers<[1], [0], [0], [1], [0, 0, 1, 1], [], []>} : vector<112x32xf32>, vector<32x32xf32>, vector<112x32xf32> -> vector<112x32xf32>
    %c0_10 = arith.constant 0 : index
    %c0_11 = arith.constant 0 : index
    %9 = vector.load %arg6[%c0_10, %c0_11] : memref<1x32xf32, #tpu.memory_space<vmem>>, vector<1x32xf32>
    %10 = vector.broadcast %9 : vector<1x32xf32> to vector<112x32xf32>
    %11 = arith.addf %8, %10 : vector<112x32xf32>
    %cst_12 = arith.constant 0.000000e+00 : f32
    %12 = vector.broadcast %cst_12 : f32 to vector<112x32xf32>
    %13 = arith.subf %12, %11 : vector<112x32xf32>
    %14 = math.exp %13 : vector<112x32xf32>
    %cst_13 = arith.constant 1.000000e+00 : f32
    %15 = vector.broadcast %cst_13 : f32 to vector<112x32xf32>
    %16 = arith.addf %15, %14 : vector<112x32xf32>
    %cst_14 = arith.constant 1.000000e+00 : f32
    %17 = vector.broadcast %cst_14 : f32 to vector<112x32xf32>
    %18 = arith.divf %17, %16 : vector<112x32xf32>
    %19 = arith.mulf %5, %18 : vector<112x32xf32>
    %c0_15 = arith.constant 0 : index
    %c0_16 = arith.constant 0 : index
    %20 = vector.load %arg7[%c0_15, %c0_16] : memref<1x32xf32, #tpu.memory_space<vmem>>, vector<1x32xf32>
    %21 = vector.broadcast %20 : vector<1x32xf32> to vector<112x32xf32>
    %22 = arith.mulf %19, %21 : vector<112x32xf32>
    %c0_17 = arith.constant 0 : index
    %c0_18 = arith.constant 0 : index
    %23 = vector.load %arg8[%c0_17, %c0_18] : memref<1x32xf32, #tpu.memory_space<vmem>>, vector<1x32xf32>
    %24 = vector.broadcast %23 : vector<1x32xf32> to vector<112x32xf32>
    %25 = arith.addf %22, %24 : vector<112x32xf32>
    %cst_19 = arith.constant 0.000000e+00 : f32
    %26 = vector.broadcast %cst_19 : f32 to vector<112x32xf32>
    %27 = arith.cmpf ogt, %25, %26 : vector<112x32xf32>
    %cst_20 = arith.constant 0.000000e+00 : f32
    %28 = vector.broadcast %cst_20 : f32 to vector<112x32xf32>
    %29 = arith.minimumf %25, %28 : vector<112x32xf32>
    %30 = math.exp %29 : vector<112x32xf32>
    %cst_21 = arith.constant 1.000000e+00 : f32
    %31 = vector.broadcast %cst_21 : f32 to vector<112x32xf32>
    %32 = arith.subf %30, %31 : vector<112x32xf32>
    %33 = arith.select %27, %25, %32 : vector<112x32xi1>, vector<112x32xf32>
    %c0_22 = arith.constant 0 : index
    %c0_23 = arith.constant 0 : index
    %34 = vector.load %arg9[%c0_22, %c0_23] : memref<112x32xf32, #tpu.memory_space<vmem>>, vector<112x32xf32>
    tpu.vector_store %arg9[%c0_22, %c0_23], %33 {strides = array<i32>} : memref<112x32xf32, #tpu.memory_space<vmem>>, vector<112x32xf32>,
    return
  }
  func.func @transform_0(%arg0: i32) -> (i32, i32) {
    %c0_i32 = arith.constant 0 : i32
    %c0_i32_0 = arith.constant 0 : i32
    return %arg0, %c0_i32 : i32, i32
  }
  func.func @transform_1(%arg0: i32) -> (i32, i32) {
    %c0_i32 = arith.constant 0 : i32
    %c0_i32_0 = arith.constant 0 : i32
    return %arg0, %c0_i32 : i32, i32
  }
  func.func @transform_2(%arg0: i32) -> (i32, i32) {
    %c0_i32 = arith.constant 0 : i32
    %c0_i32_0 = arith.constant 0 : i32
    %c0_i32_1 = arith.constant 0 : i32
    return %c0_i32, %c0_i32_0 : i32, i32
  }
  func.func @transform_3(%arg0: i32) -> (i32, i32) {
    %c0_i32 = arith.constant 0 : i32
    %c0_i32_0 = arith.constant 0 : i32
    %c0_i32_1 = arith.constant 0 : i32
    return %c0_i32, %c0_i32_0 : i32, i32
  }
  func.func @transform_4(%arg0: i32) -> (i32, i32) {
    %c0_i32 = arith.constant 0 : i32
    %c0_i32_0 = arith.constant 0 : i32
    %c0_i32_1 = arith.constant 0 : i32
    return %c0_i32, %c0_i32_0 : i32, i32
  }
  func.func @transform_5(%arg0: i32) -> (i32, i32) {
    %c0_i32 = arith.constant 0 : i32
    %c0_i32_0 = arith.constant 0 : i32
    %c0_i32_1 = arith.constant 0 : i32
    return %c0_i32, %c0_i32_0 : i32, i32
  }
  func.func @transform_6(%arg0: i32) -> (i32, i32) {
    %c0_i32 = arith.constant 0 : i32
    %c0_i32_0 = arith.constant 0 : i32
    %c0_i32_1 = arith.constant 0 : i32
    return %c0_i32, %c0_i32_0 : i32, i32
  }
  func.func @transform_7(%arg0: i32) -> (i32, i32) {
    %c0_i32 = arith.constant 0 : i32
    %c0_i32_0 = arith.constant 0 : i32
    %c0_i32_1 = arith.constant 0 : i32
    return %c0_i32, %c0_i32_0 : i32, i32
  }
  func.func @transform_8(%arg0: i32) -> (i32, i32) {
    %c0_i32 = arith.constant 0 : i32
    %c0_i32_0 = arith.constant 0 : i32
    return %arg0, %c0_i32 : i32, i32
  }
}

module attributes {stable_mosaic.version = 11 : i64} {
  func.func @_fused_stage_kernel(%arg0: i32, %arg1: memref<48x320xf32, #tpu.memory_space<vmem>>, %arg2: memref<48x64xf32, #tpu.memory_space<vmem>>, %arg3: memref<320x64xf32, #tpu.memory_space<vmem>>, %arg4: memref<1x64xf32, #tpu.memory_space<vmem>>, %arg5: memref<64x64xf32, #tpu.memory_space<vmem>>, %arg6: memref<1x64xf32, #tpu.memory_space<vmem>>, %arg7: memref<1x64xf32, #tpu.memory_space<vmem>>, %arg8: memref<1x64xf32, #tpu.memory_space<vmem>>, %arg9: memref<48x64xf32, #tpu.memory_space<vmem>>) attributes {dimension_semantics = [#tpu.dimension_semantics<parallel>], iteration_bounds = array<i64: 1>, scalar_prefetch = 0 : i64, scratch_operands = 0 : i64, tpu.core_type = #tpu.core_type<tc>, window_params = [{transform_indices = @transform_0, window_bounds = array<i64: 48, 320>}, {transform_indices = @transform_1, window_bounds = array<i64: 48, 64>}, {pipeline_mode = #tpu.pipeline_mode<synchronous>, transform_indices = @transform_2, window_bounds = array<i64: 320, 64>}, {pipeline_mode = #tpu.pipeline_mode<synchronous>, transform_indices = @transform_3, window_bounds = array<i64: 1, 64>}, {pipeline_mode = #tpu.pipeline_mode<synchronous>, transform_indices = @transform_4, window_bounds = array<i64: 64, 64>}, {pipeline_mode = #tpu.pipeline_mode<synchronous>, transform_indices = @transform_5, window_bounds = array<i64: 1, 64>}, {pipeline_mode = #tpu.pipeline_mode<synchronous>, transform_indices = @transform_6, window_bounds = array<i64: 1, 64>}, {pipeline_mode = #tpu.pipeline_mode<synchronous>, transform_indices = @transform_7, window_bounds = array<i64: 1, 64>}, {transform_indices = @transform_8, window_bounds = array<i64: 48, 64>}]} {
    %c0 = arith.constant 0 : index
    %c0_0 = arith.constant 0 : index
    %0 = vector.load %arg1[%c0, %c0_0] : memref<48x320xf32, #tpu.memory_space<vmem>>, vector<48x320xf32>
    %c0_1 = arith.constant 0 : index
    %c0_2 = arith.constant 0 : index
    %1 = vector.load %arg3[%c0_1, %c0_2] : memref<320x64xf32, #tpu.memory_space<vmem>>, vector<320x64xf32>
    %cst = arith.constant dense<0.000000e+00> : vector<48x64xf32>
    %2 = tpu.matmul %0, %1, %cst {dimension_numbers = #tpu.dot_dimension_numbers<[1], [0], [0], [1], [0, 0, 1, 1], [], []>} : vector<48x320xf32>, vector<320x64xf32>, vector<48x64xf32> -> vector<48x64xf32>
    %c0_3 = arith.constant 0 : index
    %c0_4 = arith.constant 0 : index
    %3 = vector.load %arg4[%c0_3, %c0_4] : memref<1x64xf32, #tpu.memory_space<vmem>>, vector<1x64xf32>
    %4 = vector.broadcast %3 : vector<1x64xf32> to vector<48x64xf32>
    %5 = arith.addf %2, %4 : vector<48x64xf32>
    %c0_5 = arith.constant 0 : index
    %c0_6 = arith.constant 0 : index
    %6 = vector.load %arg2[%c0_5, %c0_6] : memref<48x64xf32, #tpu.memory_space<vmem>>, vector<48x64xf32>
    %c0_7 = arith.constant 0 : index
    %c0_8 = arith.constant 0 : index
    %7 = vector.load %arg5[%c0_7, %c0_8] : memref<64x64xf32, #tpu.memory_space<vmem>>, vector<64x64xf32>
    %cst_9 = arith.constant dense<0.000000e+00> : vector<48x64xf32>
    %8 = tpu.matmul %6, %7, %cst_9 {dimension_numbers = #tpu.dot_dimension_numbers<[1], [0], [0], [1], [0, 0, 1, 1], [], []>} : vector<48x64xf32>, vector<64x64xf32>, vector<48x64xf32> -> vector<48x64xf32>
    %c0_10 = arith.constant 0 : index
    %c0_11 = arith.constant 0 : index
    %9 = vector.load %arg6[%c0_10, %c0_11] : memref<1x64xf32, #tpu.memory_space<vmem>>, vector<1x64xf32>
    %10 = vector.broadcast %9 : vector<1x64xf32> to vector<48x64xf32>
    %11 = arith.addf %8, %10 : vector<48x64xf32>
    %cst_12 = arith.constant 0.000000e+00 : f32
    %12 = vector.broadcast %cst_12 : f32 to vector<48x64xf32>
    %13 = arith.subf %12, %11 : vector<48x64xf32>
    %14 = math.exp %13 : vector<48x64xf32>
    %cst_13 = arith.constant 1.000000e+00 : f32
    %15 = vector.broadcast %cst_13 : f32 to vector<48x64xf32>
    %16 = arith.addf %15, %14 : vector<48x64xf32>
    %cst_14 = arith.constant 1.000000e+00 : f32
    %17 = vector.broadcast %cst_14 : f32 to vector<48x64xf32>
    %18 = arith.divf %17, %16 : vector<48x64xf32>
    %19 = arith.mulf %5, %18 : vector<48x64xf32>
    %c0_15 = arith.constant 0 : index
    %c0_16 = arith.constant 0 : index
    %20 = vector.load %arg7[%c0_15, %c0_16] : memref<1x64xf32, #tpu.memory_space<vmem>>, vector<1x64xf32>
    %21 = vector.broadcast %20 : vector<1x64xf32> to vector<48x64xf32>
    %22 = arith.mulf %19, %21 : vector<48x64xf32>
    %c0_17 = arith.constant 0 : index
    %c0_18 = arith.constant 0 : index
    %23 = vector.load %arg8[%c0_17, %c0_18] : memref<1x64xf32, #tpu.memory_space<vmem>>, vector<1x64xf32>
    %24 = vector.broadcast %23 : vector<1x64xf32> to vector<48x64xf32>
    %25 = arith.addf %22, %24 : vector<48x64xf32>
    %cst_19 = arith.constant 0.000000e+00 : f32
    %26 = vector.broadcast %cst_19 : f32 to vector<48x64xf32>
    %27 = arith.cmpf ogt, %25, %26 : vector<48x64xf32>
    %cst_20 = arith.constant 0.000000e+00 : f32
    %28 = vector.broadcast %cst_20 : f32 to vector<48x64xf32>
    %29 = arith.minimumf %25, %28 : vector<48x64xf32>
    %30 = math.exp %29 : vector<48x64xf32>
    %cst_21 = arith.constant 1.000000e+00 : f32
    %31 = vector.broadcast %cst_21 : f32 to vector<48x64xf32>
    %32 = arith.subf %30, %31 : vector<48x64xf32>
    %33 = arith.select %27, %25, %32 : vector<48x64xi1>, vector<48x64xf32>
    %c0_22 = arith.constant 0 : index
    %c0_23 = arith.constant 0 : index
    %34 = vector.load %arg9[%c0_22, %c0_23] : memref<48x64xf32, #tpu.memory_space<vmem>>, vector<48x64xf32>
    tpu.vector_store %arg9[%c0_22, %c0_23], %33 {strides = array<i32>} : memref<48x64xf32, #tpu.memory_space<vmem>>, vector<48x64xf32>,
    return
  }
  func.func @transform_0(%arg0: i32) -> (i32, i32) {
    %c0_i32 = arith.constant 0 : i32
    %c0_i32_0 = arith.constant 0 : i32
    return %arg0, %c0_i32 : i32, i32
  }
  func.func @transform_1(%arg0: i32) -> (i32, i32) {
    %c0_i32 = arith.constant 0 : i32
    %c0_i32_0 = arith.constant 0 : i32
    return %arg0, %c0_i32 : i32, i32
  }
  func.func @transform_2(%arg0: i32) -> (i32, i32) {
    %c0_i32 = arith.constant 0 : i32
    %c0_i32_0 = arith.constant 0 : i32
    %c0_i32_1 = arith.constant 0 : i32
    return %c0_i32, %c0_i32_0 : i32, i32
  }
  func.func @transform_3(%arg0: i32) -> (i32, i32) {
    %c0_i32 = arith.constant 0 : i32
    %c0_i32_0 = arith.constant 0 : i32
    %c0_i32_1 = arith.constant 0 : i32
    return %c0_i32, %c0_i32_0 : i32, i32
  }
  func.func @transform_4(%arg0: i32) -> (i32, i32) {
    %c0_i32 = arith.constant 0 : i32
    %c0_i32_0 = arith.constant 0 : i32
    %c0_i32_1 = arith.constant 0 : i32
    return %c0_i32, %c0_i32_0 : i32, i32
  }
  func.func @transform_5(%arg0: i32) -> (i32, i32) {
    %c0_i32 = arith.constant 0 : i32
    %c0_i32_0 = arith.constant 0 : i32
    %c0_i32_1 = arith.constant 0 : i32
    return %c0_i32, %c0_i32_0 : i32, i32
  }
  func.func @transform_6(%arg0: i32) -> (i32, i32) {
    %c0_i32 = arith.constant 0 : i32
    %c0_i32_0 = arith.constant 0 : i32
    %c0_i32_1 = arith.constant 0 : i32
    return %c0_i32, %c0_i32_0 : i32, i32
  }
  func.func @transform_7(%arg0: i32) -> (i32, i32) {
    %c0_i32 = arith.constant 0 : i32
    %c0_i32_0 = arith.constant 0 : i32
    %c0_i32_1 = arith.constant 0 : i32
    return %c0_i32, %c0_i32_0 : i32, i32
  }
  func.func @transform_8(%arg0: i32) -> (i32, i32) {
    %c0_i32 = arith.constant 0 : i32
    %c0_i32_0 = arith.constant 0 : i32
    return %arg0, %c0_i32 : i32, i32
  }
}

module attributes {stable_mosaic.version = 11 : i64} {
  func.func @_conv_bn_elu_kernel(%arg0: i32, %arg1: memref<16x640xf32, #tpu.memory_space<vmem>>, %arg2: memref<640x64xf32, #tpu.memory_space<vmem>>, %arg3: memref<1x64xf32, #tpu.memory_space<vmem>>, %arg4: memref<1x64xf32, #tpu.memory_space<vmem>>, %arg5: memref<1x64xf32, #tpu.memory_space<vmem>>, %arg6: memref<16x64xf32, #tpu.memory_space<vmem>>) attributes {dimension_semantics = [#tpu.dimension_semantics<parallel>], iteration_bounds = array<i64: 1>, scalar_prefetch = 0 : i64, scratch_operands = 0 : i64, tpu.core_type = #tpu.core_type<tc>, window_params = [{transform_indices = @transform_0, window_bounds = array<i64: 16, 640>}, {pipeline_mode = #tpu.pipeline_mode<synchronous>, transform_indices = @transform_1, window_bounds = array<i64: 640, 64>}, {pipeline_mode = #tpu.pipeline_mode<synchronous>, transform_indices = @transform_2, window_bounds = array<i64: 1, 64>}, {pipeline_mode = #tpu.pipeline_mode<synchronous>, transform_indices = @transform_3, window_bounds = array<i64: 1, 64>}, {pipeline_mode = #tpu.pipeline_mode<synchronous>, transform_indices = @transform_4, window_bounds = array<i64: 1, 64>}, {transform_indices = @transform_5, window_bounds = array<i64: 16, 64>}]} {
    %c0 = arith.constant 0 : index
    %c0_0 = arith.constant 0 : index
    %0 = vector.load %arg1[%c0, %c0_0] : memref<16x640xf32, #tpu.memory_space<vmem>>, vector<16x640xf32>
    %c0_1 = arith.constant 0 : index
    %c0_2 = arith.constant 0 : index
    %1 = vector.load %arg2[%c0_1, %c0_2] : memref<640x64xf32, #tpu.memory_space<vmem>>, vector<640x64xf32>
    %cst = arith.constant dense<0.000000e+00> : vector<16x64xf32>
    %2 = tpu.matmul %0, %1, %cst {dimension_numbers = #tpu.dot_dimension_numbers<[1], [0], [0], [1], [0, 0, 1, 1], [], []>} : vector<16x640xf32>, vector<640x64xf32>, vector<16x64xf32> -> vector<16x64xf32>
    %c0_3 = arith.constant 0 : index
    %c0_4 = arith.constant 0 : index
    %3 = vector.load %arg3[%c0_3, %c0_4] : memref<1x64xf32, #tpu.memory_space<vmem>>, vector<1x64xf32>
    %4 = vector.broadcast %3 : vector<1x64xf32> to vector<16x64xf32>
    %5 = arith.addf %2, %4 : vector<16x64xf32>
    %c0_5 = arith.constant 0 : index
    %c0_6 = arith.constant 0 : index
    %6 = vector.load %arg4[%c0_5, %c0_6] : memref<1x64xf32, #tpu.memory_space<vmem>>, vector<1x64xf32>
    %7 = vector.broadcast %6 : vector<1x64xf32> to vector<16x64xf32>
    %8 = arith.mulf %5, %7 : vector<16x64xf32>
    %c0_7 = arith.constant 0 : index
    %c0_8 = arith.constant 0 : index
    %9 = vector.load %arg5[%c0_7, %c0_8] : memref<1x64xf32, #tpu.memory_space<vmem>>, vector<1x64xf32>
    %10 = vector.broadcast %9 : vector<1x64xf32> to vector<16x64xf32>
    %11 = arith.addf %8, %10 : vector<16x64xf32>
    %cst_9 = arith.constant 0.000000e+00 : f32
    %12 = vector.broadcast %cst_9 : f32 to vector<16x64xf32>
    %13 = arith.cmpf ogt, %11, %12 : vector<16x64xf32>
    %cst_10 = arith.constant 0.000000e+00 : f32
    %14 = vector.broadcast %cst_10 : f32 to vector<16x64xf32>
    %15 = arith.minimumf %11, %14 : vector<16x64xf32>
    %16 = math.exp %15 : vector<16x64xf32>
    %cst_11 = arith.constant 1.000000e+00 : f32
    %17 = vector.broadcast %cst_11 : f32 to vector<16x64xf32>
    %18 = arith.subf %16, %17 : vector<16x64xf32>
    %19 = arith.select %13, %11, %18 : vector<16x64xi1>, vector<16x64xf32>
    %c0_12 = arith.constant 0 : index
    %c0_13 = arith.constant 0 : index
    %20 = vector.load %arg6[%c0_12, %c0_13] : memref<16x64xf32, #tpu.memory_space<vmem>>, vector<16x64xf32>
    tpu.vector_store %arg6[%c0_12, %c0_13], %19 {strides = array<i32>} : memref<16x64xf32, #tpu.memory_space<vmem>>, vector<16x64xf32>,
    return
  }
  func.func @transform_0(%arg0: i32) -> (i32, i32) {
    %c0_i32 = arith.constant 0 : i32
    %c0_i32_0 = arith.constant 0 : i32
    return %arg0, %c0_i32 : i32, i32
  }
  func.func @transform_1(%arg0: i32) -> (i32, i32) {
    %c0_i32 = arith.constant 0 : i32
    %c0_i32_0 = arith.constant 0 : i32
    %c0_i32_1 = arith.constant 0 : i32
    return %c0_i32, %c0_i32_0 : i32, i32
  }
  func.func @transform_2(%arg0: i32) -> (i32, i32) {
    %c0_i32 = arith.constant 0 : i32
    %c0_i32_0 = arith.constant 0 : i32
    %c0_i32_1 = arith.constant 0 : i32
    return %c0_i32, %c0_i32_0 : i32, i32
  }
  func.func @transform_3(%arg0: i32) -> (i32, i32) {
    %c0_i32 = arith.constant 0 : i32
    %c0_i32_0 = arith.constant 0 : i32
    %c0_i32_1 = arith.constant 0 : i32
    return %c0_i32, %c0_i32_0 : i32, i32
  }
  func.func @transform_4(%arg0: i32) -> (i32, i32) {
    %c0_i32 = arith.constant 0 : i32
    %c0_i32_0 = arith.constant 0 : i32
    %c0_i32_1 = arith.constant 0 : i32
    return %c0_i32, %c0_i32_0 : i32, i32
  }
  func.func @transform_5(%arg0: i32) -> (i32, i32) {
    %c0_i32 = arith.constant 0 : i32
    %c0_i32_0 = arith.constant 0 : i32
    return %arg0, %c0_i32 : i32, i32
  }
}

</mosaic_0001>

<bundles_post_ra>
// kernel: mencoder_forward.6
= control target key start
LH: loop header
LB: loop body
LE: loop exit
PB: predicated region body
PF: predicated region fallthrough
CT: control target
= control target key end

     0   :  { %s3710_s27 = smov 0   ;;  %s5454_s0 = inlined_call_operand.vmem [shape: f32[1536,160], index: 0, kind: input, shape index: {}]   ;;  %s5455_s1 = inlined_call_operand.vmem [shape: f32[1536,16], index: 1, kind: input, shape index: {}]   ;;  %s5456_s2 = inlined_call_operand.vmem [shape: f32[160,16], index: 2, kind: input, shape index: {}]   ;;  %s5457_s3 = inlined_call_operand.vmem [shape: f32[1,16], index: 3, kind: input, shape index: {}]   ;;  %s5458_s4 = inlined_call_operand.vmem [shape: f32[16,16], index: 4, kind: input, shape index: {}]   ;;  %s5459_s5 = inlined_call_operand.vmem [shape: f32[1,16], index: 5, kind: input, shape index: {}]   ;;  %s5460_s6 = inlined_call_operand.vmem [shape: f32[1,16], index: 6, kind: input, shape index: {}]   ;;  %s5461_s7 = inlined_call_operand.vmem [shape: f32[1,16], index: 7, kind: input, shape index: {}]   ;;  %s5462_s8 = inlined_call_operand.vmem [shape: f32[1536,16], index: 8, kind: output, shape index: {}]  }
   0x1 LB: > { %s2824_s28 = sadd.s32 4294967295, %s3662_s27   ;;  %p2828_p0 = scmp.ge.s32.totalorder %s3662_s27, 1  ;;  %s3662_s27 = sphi %s3710_s27, %s18_s27  }
   0x2   : > { %p275_p1 = scmp.lt.s32.totalorder %s3662_s27, 4 }
   0x4   : > { %p276_p2 = pnand %p2828_p0, %p275_p1 }
   0x6   : > { %279 = sbr.rel (%p276_p2) target bundleno = 621 (0x26d), region = 52 }
   0xd   : > { %v462_v0 = vld [vmem:[%s5456_s2] sm:$0xff]  ;;  %v463_v1 = vld [vmem:[%s5456_s2 + $0x8] sm:$0xff]  ;;  %v464_v2 = vld [vmem:[%s5456_s2 + $0x10] sm:$0xff]  ;;  %s2829_s13 = sshll.u32 %s2824_s28, 6  ;;  %v3664_v3 = vmov 0.0|0.0   ;;  %vm489_vm0 = vcmask 261120  }
   0xe   : > { %3201 = vmatprep.subr.bf16.mxu0 %v3664_v3  ;;  %3235 = vmatprep.subr.bf16.mxu1 %v3664_v3  ;;  %v3202_v4 = vpack.c.bf16 %v463_v1, %v462_v0  ;;  %v465_v5 = vld [vmem:[%s5456_s2 + $0x18] sm:$0xff]  ;;  %p316_p3 = scmp.lt.s32.totalorder %s2829_s13, 191  ;;  %v466_v7 = vld [vmem:[%s5456_s2 + $0x20] sm:$0xff]  ;;  %v467_v8 = vld [vmem:[%s5456_s2 + $0x28] sm:$0xff]  ;;  %vm1140_vm1 = vcmask 130048  }
   0xf   : > { %v3205_v6 = vpack.c.bf16 %v465_v5, %v464_v2  ;;  %v3208_v9 = vpack.c.bf16 %v467_v8, %v466_v7  ;;  %v468_v12 = vld [vmem:[%s5456_s2 + $0x30] sm:$0xff]  ;;  %v469_v13 = vld [vmem:[%s5456_s2 + $0x38] sm:$0xff]  ;;  %v470_v15 = vld [vmem:[%s5456_s2 + $0x40] sm:$0xff] }
  0x10   : > { %3203 = vmatpush1.bf16.msra.mxu0 %v3202_v4  ;;  %3245 = vmatpush1.bf16.msra.mxu1 %v3202_v4  ;;  %s5519_s13 = smov (!%p316_p3, %s2829_s13), 191  ;;  %v3211_v14 = vpack.c.bf16 %v469_v13, %v468_v12  ;;  %v471_v16 = vld [vmem:[%s5456_s2 + $0x48] sm:$0xff]  ;;  %v472_v18 = vld [vmem:[%s5456_s2 + $0x50] sm:$0xff]  ;;  %v473_v19 = vld [vmem:[%s5456_s2 + $0x58] sm:$0xff] }
  0x11   : > { %3204 = vmatprep.subr.bf16.mxu0 %v3664_v3  ;;  %3236 = vmatprep.subr.bf16.mxu1 %v3664_v3  ;;  %s3034_s20 = sshll.u32 %s5519_s13, 4  ;;  %v3214_v17 = vpack.c.bf16 %v471_v16, %v470_v15  ;;  %v3217_v20 = vpack.c.bf16 %v473_v19, %v472_v18  ;;  %v474_v21 = vld [vmem:[%s5456_s2 + $0x60] sm:$0xff]  ;;  %v475_v22 = vld [vmem:[%s5456_s2 + $0x68] sm:$0xff]  ;;  %v476_v24 = vld [vmem:[%s5456_s2 + $0x70] sm:$0xff]  ;;  %s2833_s17 = sshll.u32 %s5519_s13, 3 }
  0x12   : > { %s3746_s23 = scalar_lea.vmem %s5454_s0, %s3034_s20  ;;  %v3220_v23 = vpack.c.bf16 %v475_v22, %v474_v21  ;;  %v477_v25 = vld [vmem:[%s5456_s2 + $0x78] sm:$0xff]  ;;  %v478_v27 = vld [vmem:[%s5456_s2 + $0x80] sm:$0xff]  ;;  %v479_v28 = vld [vmem:[%s5456_s2 + $0x88] sm:$0xff]  ;;  %s3910_s20 = scalar_lea.vmem %s5455_s1, %s2833_s17 }
  0x13   : > { %v335_v10 = vld [vmem:[%s3746_s23 + $0x8] sm:$0xff]  ;;  %v3223_v26 = vpack.c.bf16 %v477_v25, %v476_v24  ;;  %v3226_v29 = vpack.c.bf16 %v479_v28, %v478_v27  ;;  %v480_v30 = vld [vmem:[%s5456_s2 + $0x90] sm:$0xff]  ;;  %v481_v31 = vld [vmem:[%s5456_s2 + $0x98] sm:$0xff]  ;;  %s4452_s10 = scalar_lea.vmem %s5462_s8, %s2833_s17 }
  0x14   : > { %3206 = vmatpush1.bf16.msra.mxu0 %v3205_v6  ;;  %3246 = vmatpush1.bf16.msra.mxu1 %v3205_v6  ;;  %v431_v11 = vld [vmem:[%s3746_s23 + $0x308] sm:$0xff]  ;;  %v1131_v32 = vld [vmem:[%s5458_s4] sm:$0xff]  ;;  %v3229_v34 = vpack.c.bf16 %v481_v31, %v480_v30  ;;  %v337_v38 = vld [vmem:[%s3746_s23 + $0x18] sm:$0xff] }
  0x15   : > { %3207 = vmatprep.subr.bf16.mxu0 %v3664_v3  ;;  %3237 = vmatprep.subr.bf16.mxu1 %v3664_v3  ;;  %v1132_v33 = vld [vmem:[%s5458_s4 + $0x8] sm:$0xff]  ;;  %v334_v36 = vld [vmem:[%s3746_s23] sm:$0xff]  ;;  %v433_v39 = vld [vmem:[%s3746_s23 + $0x318] sm:$0xff] }
  0x16   : > { %2837 = vmatprep.mubr.msk.f32.mxu0 %vm489_vm0, %v335_v10  ;;  %2885 = vmatprep.mubr.msk.f32.mxu1 %vm489_vm0, %v431_v11  ;;  %v3231_v35 = vpack.c.bf16 %v1132_v33, %v1131_v32  ;;  %v430_v37 = vld [vmem:[%s3746_s23 + $0x300] sm:$0xff]  ;;  %v336_v40 = vld [vmem:[%s3746_s23 + $0x10] sm:$0xff]  ;;  %v339_v42 = vld [vmem:[%s3746_s23 + $0x28] sm:$0xff] }
  0x17   : > { %v432_v41 = vld [vmem:[%s3746_s23 + $0x310] sm:$0xff]  ;;  %v435_v43 = vld [vmem:[%s3746_s23 + $0x328] sm:$0xff]  ;;  %v338_v44 = vld [vmem:[%s3746_s23 + $0x20] sm:$0xff] }
  0x18   : > { %3209 = vmatpush1.bf16.msra.mxu0 %v3208_v9  ;;  %3247 = vmatpush1.bf16.msra.mxu1 %v3208_v9  ;;  %v434_v45 = vld [vmem:[%s3746_s23 + $0x320] sm:$0xff]  ;;  %v341_v46 = vld [vmem:[%s3746_s23 + $0x38] sm:$0xff]  ;;  %v340_v48 = vld [vmem:[%s3746_s23 + $0x30] sm:$0xff] }
  0x19   : > { %3210 = vmatprep.subr.bf16.mxu0 %v3664_v3  ;;  %3238 = vmatprep.subr.bf16.mxu1 %v3664_v3  ;;  %v437_v47 = vld [vmem:[%s3746_s23 + $0x338] sm:$0xff]  ;;  %v436_v49 = vld [vmem:[%s3746_s23 + $0x330] sm:$0xff]  ;;  %v343_v50 = vld [vmem:[%s3746_s23 + $0x48] sm:$0xff] }
  0x1a   : > { %v439_v51 = vld [vmem:[%s3746_s23 + $0x348] sm:$0xff]  ;;  %v342_v52 = vld [vmem:[%s3746_s23 + $0x40] sm:$0xff]  ;;  %v345_v54 = vld [vmem:[%s3746_s23 + $0x58] sm:$0xff] }
  0x1b   : > { %v438_v53 = vld [vmem:[%s3746_s23 + $0x340] sm:$0xff]  ;;  %v441_v55 = vld [vmem:[%s3746_s23 + $0x358] sm:$0xff]  ;;  %v344_v56 = vld [vmem:[%s3746_s23 + $0x50] sm:$0xff] }
  0x1c   : > { %3212 = vmatpush1.bf16.msra.mxu0 %v3211_v14  ;;  %3248 = vmatpush1.bf16.msra.mxu1 %v3211_v14  ;;  %v440_v57 = vld [vmem:[%s3746_s23 + $0x350] sm:$0xff]  ;;  %v347_v58 = vld [vmem:[%s3746_s23 + $0x68] sm:$0xff]  ;;  %v346_v60 = vld [vmem:[%s3746_s23 + $0x60] sm:$0xff] }
  0x1d   : > { %3213 = vmatprep.subr.bf16.mxu0 %v3664_v3  ;;  %3239 = vmatprep.subr.bf16.mxu1 %v3664_v3  ;;  %v443_v59 = vld [vmem:[%s3746_s23 + $0x368] sm:$0xff]  ;;  %v442_v61 = vld [vmem:[%s3746_s23 + $0x360] sm:$0xff]  ;;  %v349_v62 = vld [vmem:[%s3746_s23 + $0x78] sm:$0xff] }
  0x1e   : > { %v445_v63 = vld [vmem:[%s3746_s23 + $0x378] sm:$0xff]  ;;  %v348_v0 = vld [vmem:[%s3746_s23 + $0x70] sm:$0xff]  ;;  %v351_v2 = vld [vmem:[%s3746_s23 + $0x88] sm:$0xff] }
  0x1f   : > { %v444_v1 = vld [vmem:[%s3746_s23 + $0x370] sm:$0xff]  ;;  %v350_v4 = vld [vmem:[%s3746_s23 + $0x80] sm:$0xff]  ;;  %v353_v6 = vld [vmem:[%s3746_s23 + $0x98] sm:$0xff] }
  0x20   : > { %3215 = vmatpush1.bf16.msra.mxu0 %v3214_v17  ;;  %3249 = vmatpush1.bf16.msra.mxu1 %v3214_v17  ;;  %v446_v5 = vld [vmem:[%s3746_s23 + $0x380] sm:$0xff]  ;;  %v449_v7 = vld [vmem:[%s3746_s23 + $0x398] sm:$0xff]  ;;  %v352_v8 = vld [vmem:[%s3746_s23 + $0x90] sm:$0xff] }
  0x21   : > { %3216 = vmatprep.subr.bf16.mxu0 %v3664_v3  ;;  %3240 = vmatprep.subr.bf16.mxu1 %v3664_v3  ;;  %v448_v9 = vld [vmem:[%s3746_s23 + $0x390] sm:$0xff]  ;;  %v355_v10 = vld [vmem:[%s3746_s23 + $0xa8] sm:$0xff]  ;;  %v354_v12 = vld [vmem:[%s3746_s23 + $0xa0] sm:$0xff] }
  0x22   : > { %v451_v11 = vld [vmem:[%s3746_s23 + $0x3a8] sm:$0xff]  ;;  %v450_v13 = vld [vmem:[%s3746_s23 + $0x3a0] sm:$0xff]  ;;  %v357_v14 = vld [vmem:[%s3746_s23 + $0xb8] sm:$0xff] }
  0x23   : > { %v453_v15 = vld [vmem:[%s3746_s23 + $0x3b8] sm:$0xff]  ;;  %v356_v16 = vld [vmem:[%s3746_s23 + $0xb0] sm:$0xff]  ;;  %v359_v18 = vld [vmem:[%s3746_s23 + $0xc8] sm:$0xff] }
  0x24   : > { %3218 = vmatpush1.bf16.msra.mxu0 %v3217_v20  ;;  %3250 = vmatpush1.bf16.msra.mxu1 %v3217_v20  ;;  %v452_v17 = vld [vmem:[%s3746_s23 + $0x3b0] sm:$0xff]  ;;  %v455_v19 = vld [vmem:[%s3746_s23 + $0x3c8] sm:$0xff]  ;;  %v358_v20 = vld [vmem:[%s3746_s23 + $0xc0] sm:$0xff] }
  0x25   : > { %3219 = vmatprep.subr.bf16.mxu0 %v3664_v3  ;;  %3241 = vmatprep.subr.bf16.mxu1 %v3664_v3  ;;  %v454_v21 = vld [vmem:[%s3746_s23 + $0x3c0] sm:$0xff]  ;;  %v361_v22 = vld [vmem:[%s3746_s23 + $0xd8] sm:$0xff]  ;;  %v360_v24 = vld [vmem:[%s3746_s23 + $0xd0] sm:$0xff] }
  0x26   : > { %v456_v25 = vld [vmem:[%s3746_s23 + $0x3d0] sm:$0xff]  ;;  %v459_v27 = vld [vmem:[%s3746_s23 + $0x3e8] sm:$0xff]  ;;  %v362_v28 = vld [vmem:[%s3746_s23 + $0xe0] sm:$0xff] }
  0x27   : > { %v365_v30 = vld [vmem:[%s3746_s23 + $0xf8] sm:$0xff]  ;;  %v364_v32 = vld [vmem:[%s3746_s23 + $0xf0] sm:$0xff] }
  0x28   : > { %3221 = vmatpush1.bf16.msra.mxu0 %v3220_v23  ;;  %3251 = vmatpush1.bf16.msra.mxu1 %v3220_v23  ;;  %v457_v23 = vld [vmem:[%s3746_s23 + $0x3d8] sm:$0xff]  ;;  %v460_v33 = vld [vmem:[%s3746_s23 + $0x3f0] sm:$0xff] }
  0x29   : > { %3222 = vmatprep.subr.bf16.mxu0 %v3664_v3  ;;  %3242 = vmatprep.subr.bf16.mxu1 %v3664_v3  ;;  %v461_v31 = vld [vmem:[%s3746_s23 + $0x3f8] sm:$0xff] }
  0x2c   : > { %3224 = vmatpush1.bf16.msra.mxu0 %v3223_v26  ;;  %3252 = vmatpush1.bf16.msra.mxu1 %v3223_v26  ;;  %v363_v26 = vld [vmem:[%s3746_s23 + $0xe8] sm:$0xff] }
  0x2d   : > { %3225 = vmatprep.subr.bf16.mxu0 %v3664_v3  ;;  %3243 = vmatprep.subr.bf16.mxu1 %v3664_v3 }
  0x30   : > { %3227 = vmatpush1.bf16.msra.mxu0 %v3226_v29  ;;  %3253 = vmatpush1.bf16.msra.mxu1 %v3226_v29  ;;  %v458_v29 = vld [vmem:[%s3746_s23 + $0x3e0] sm:$0xff] }
  0x31   : > { %3228 = vmatprep.subr.bf16.mxu0 %v3664_v3  ;;  %3244 = vmatprep.subr.bf16.mxu1 %v3664_v3  ;;  %v447_v3 = vld [vmem:[%s3746_s23 + $0x388] sm:$0xff] }
  0x34   : > { %3230 = vmatpush1.bf16.msra.mxu0 %v3229_v34  ;;  %3254 = vmatpush1.bf16.msra.mxu1 %v3229_v34  ;;  %v367_v34 = vld [vmem:[%s3746_s23 + $0x108] sm:$0xff] }
  0x35   : > { %3232 = vmatprep.subr.bf16.mxu1 %v3231_v35 }
  0x37   : > { %747 = vmatmul.mubr.f32.vlgmr.msra.gmra.mrb[0].mxu0 %v334_v36  ;;  %987 = vmatmul.mubr.f32.vlgmr.msra.gmra.mrb[0].mxu1 %v430_v37  ;;  %v366_v36 = vld [vmem:[%s3746_s23 + $0x100] sm:$0xff]  ;;  %v1068_v37 = vld [vmem:[%s3910_s20 + $0x8] sm:$0xff] }
  0x38   : > { %3234 = vmatpush3.bf16.msra.mxu1 %v3231_v35  ;;  %2838 = vmatprep.mubr.msk.f32.mxu0 %vm489_vm0, %v337_v38  ;;  %v1067_v35 = vld [vmem:[%s3910_s20] sm:$0xff]  ;;  %v369_v38 = vld [vmem:[%s3746_s23 + $0x118] sm:$0xff] }
  0x39   : > { %2886 = vmatprep.mubr.msk.f32.mxu1 %vm489_vm0, %v433_v39  ;;  %v1069_v39 = vld [vmem:[%s3910_s20 + $0x10] sm:$0xff] }
  0x3b   : > { %752 = vmatmul.mubr.f32.gmra.mrb[2].mxu0 %v336_v40  ;;  %992 = vmatmul.mubr.f32.gmra.mrb[2].mxu1 %v432_v41  ;;  %v368_v40 = vld [vmem:[%s3746_s23 + $0x110] sm:$0xff]  ;;  %v1070_v41 = vld [vmem:[%s3910_s20 + $0x18] sm:$0xff] }
  0x3c   : > { %2839 = vmatprep.mubr.msk.f32.mxu0 %vm489_vm0, %v339_v42  ;;  %2887 = vmatprep.mubr.msk.f32.mxu1 %vm489_vm0, %v435_v43  ;;  %v371_v42 = vld [vmem:[%s3746_s23 + $0x128] sm:$0xff]  ;;  %v1071_v43 = vld [vmem:[%s3910_s20 + $0x20] sm:$0xff] }
  0x3f   : > { %757 = vmatmul.mubr.f32.gmra.mrb[4].mxu0 %v338_v44  ;;  %997 = vmatmul.mubr.f32.gmra.mrb[4].mxu1 %v434_v45  ;;  %v370_v44 = vld [vmem:[%s3746_s23 + $0x120] sm:$0xff]  ;;  %v1072_v45 = vld [vmem:[%s3910_s20 + $0x28] sm:$0xff] }
  0x40   : > { %2840 = vmatprep.mubr.msk.f32.mxu0 %vm489_vm0, %v341_v46  ;;  %2888 = vmatprep.mubr.msk.f32.mxu1 %vm489_vm0, %v437_v47  ;;  %v373_v46 = vld [vmem:[%s3746_s23 + $0x138] sm:$0xff]  ;;  %v1073_v47 = vld [vmem:[%s3910_s20 + $0x30] sm:$0xff] }
  0x43   : > { %762 = vmatmul.mubr.f32.gmra.mrb[6].mxu0 %v340_v48  ;;  %1002 = vmatmul.mubr.f32.gmra.mrb[6].mxu1 %v436_v49  ;;  %v372_v48 = vld [vmem:[%s3746_s23 + $0x130] sm:$0xff]  ;;  %v1074_v49 = vld [vmem:[%s3910_s20 + $0x38] sm:$0xff] }
  0x44   : > { %2841 = vmatprep.mubr.msk.f32.mxu0 %vm489_vm0, %v343_v50  ;;  %2889 = vmatprep.mubr.msk.f32.mxu1 %vm489_vm0, %v439_v51  ;;  %v375_v50 = vld [vmem:[%s3746_s23 + $0x148] sm:$0xff]  ;;  %v1075_v51 = vld [vmem:[%s3910_s20 + $0x40] sm:$0xff] }
  0x47   : > { %767 = vmatmul.mubr.f32.gmra.mrb[8].mxu0 %v342_v52  ;;  %1007 = vmatmul.mubr.f32.gmra.mrb[8].mxu1 %v438_v53  ;;  %v374_v52 = vld [vmem:[%s3746_s23 + $0x140] sm:$0xff]  ;;  %v1076_v53 = vld [vmem:[%s3910_s20 + $0x48] sm:$0xff] }
  0x48   : > { %2842 = vmatprep.mubr.msk.f32.mxu0 %vm489_vm0, %v345_v54  ;;  %2890 = vmatprep.mubr.msk.f32.mxu1 %vm489_vm0, %v441_v55  ;;  %v377_v54 = vld [vmem:[%s3746_s23 + $0x158] sm:$0xff]  ;;  %v1077_v55 = vld [vmem:[%s3910_s20 + $0x50] sm:$0xff] }
  0x4b   : > { %772 = vmatmul.mubr.f32.gmra.mrb[10].mxu0 %v344_v56  ;;  %1012 = vmatmul.mubr.f32.gmra.mrb[10].mxu1 %v440_v57  ;;  %v376_v56 = vld [vmem:[%s3746_s23 + $0x150] sm:$0xff]  ;;  %v1078_v57 = vld [vmem:[%s3910_s20 + $0x58] sm:$0xff] }
  0x4c   : > { %2843 = vmatprep.mubr.msk.f32.mxu0 %vm489_vm0, %v347_v58  ;;  %2891 = vmatprep.mubr.msk.f32.mxu1 %vm489_vm0, %v443_v59  ;;  %v379_v58 = vld [vmem:[%s3746_s23 + $0x168] sm:$0xff]  ;;  %v1079_v59 = vld [vmem:[%s3910_s20 + $0x60] sm:$0xff] }
  0x4f   : > { %777 = vmatmul.mubr.f32.gmra.mrb[12].mxu0 %v346_v60  ;;  %1017 = vmatmul.mubr.f32.gmra.mrb[12].mxu1 %v442_v61  ;;  %v378_v60 = vld [vmem:[%s3746_s23 + $0x160] sm:$0xff]  ;;  %v1080_v61 = vld [vmem:[%s3910_s20 + $0x68] sm:$0xff] }
  0x50   : > { %2844 = vmatprep.mubr.msk.f32.mxu0 %vm489_vm0, %v349_v62  ;;  %2892 = vmatprep.mubr.msk.f32.mxu1 %vm489_vm0, %v445_v63  ;;  %v381_v62 = vld [vmem:[%s3746_s23 + $0x178] sm:$0xff]  ;;  %v1081_v63 = vld [vmem:[%s3910_s20 + $0x70] sm:$0xff] }
  0x53   : > { %782 = vmatmul.mubr.f32.gmra.mrb[14].mxu0 %v348_v0  ;;  %1022 = vmatmul.mubr.f32.gmra.mrb[14].mxu1 %v444_v1  ;;  %v380_v0 = vld [vmem:[%s3746_s23 + $0x170] sm:$0xff]  ;;  %v1082_v1 = vld [vmem:[%s3910_s20 + $0x78] sm:$0xff] }
  0x54   : > { %2845 = vmatprep.mubr.msk.f32.mxu0 %vm489_vm0, %v351_v2  ;;  %2893 = vmatprep.mubr.msk.f32.mxu1 %vm489_vm0, %v447_v3  ;;  %v383_v2 = vld [vmem:[%s3746_s23 + $0x188] sm:$0xff]  ;;  %v1083_v3 = vld [vmem:[%s3910_s20 + $0x80] sm:$0xff] }
  0x57   : > { %787 = vmatmul.mubr.f32.gmra.mrb[16].mxu0 %v350_v4  ;;  %1027 = vmatmul.mubr.f32.gmra.mrb[16].mxu1 %v446_v5  ;;  %v382_v4 = vld [vmem:[%s3746_s23 + $0x180] sm:$0xff]  ;;  %v1084_v5 = vld [vmem:[%s3910_s20 + $0x88] sm:$0xff] }
  0x58   : > { %2846 = vmatprep.mubr.msk.f32.mxu0 %vm489_vm0, %v353_v6  ;;  %2894 = vmatprep.mubr.msk.f32.mxu1 %vm489_vm0, %v449_v7  ;;  %v385_v6 = vld [vmem:[%s3746_s23 + $0x198] sm:$0xff]  ;;  %v1085_v7 = vld [vmem:[%s3910_s20 + $0x90] sm:$0xff] }
  0x5b   : > { %792 = vmatmul.mubr.f32.gmra.mrb[18].mxu0 %v352_v8  ;;  %1032 = vmatmul.mubr.f32.gmra.mrb[18].mxu1 %v448_v9  ;;  %v384_v8 = vld [vmem:[%s3746_s23 + $0x190] sm:$0xff]  ;;  %v1086_v9 = vld [vmem:[%s3910_s20 + $0x98] sm:$0xff] }
  0x5c   : > { %2847 = vmatprep.mubr.msk.f32.mxu0 %vm489_vm0, %v355_v10  ;;  %2895 = vmatprep.mubr.msk.f32.mxu1 %vm489_vm0, %v451_v11  ;;  %v387_v10 = vld [vmem:[%s3746_s23 + $0x1a8] sm:$0xff]  ;;  %v1087_v11 = vld [vmem:[%s3910_s20 + $0xa0] sm:$0xff] }
  0x5f   : > { %797 = vmatmul.mubr.f32.gmra.mrb[20].mxu0 %v354_v12  ;;  %1037 = vmatmul.mubr.f32.gmra.mrb[20].mxu1 %v450_v13  ;;  %v386_v12 = vld [vmem:[%s3746_s23 + $0x1a0] sm:$0xff]  ;;  %v1088_v13 = vld [vmem:[%s3910_s20 + $0xa8] sm:$0xff] }
  0x60   : > { %2848 = vmatprep.mubr.msk.f32.mxu0 %vm489_vm0, %v357_v14  ;;  %2896 = vmatprep.mubr.msk.f32.mxu1 %vm489_vm0, %v453_v15  ;;  %v389_v14 = vld [vmem:[%s3746_s23 + $0x1b8] sm:$0xff]  ;;  %v1089_v15 = vld [vmem:[%s3910_s20 + $0xb0] sm:$0xff] }
  0x63   : > { %802 = vmatmul.mubr.f32.gmra.mrb[22].mxu0 %v356_v16  ;;  %1042 = vmatmul.mubr.f32.gmra.mrb[22].mxu1 %v452_v17  ;;  %v388_v16 = vld [vmem:[%s3746_s23 + $0x1b0] sm:$0xff]  ;;  %v1090_v17 = vld [vmem:[%s3910_s20 + $0xb8] sm:$0xff] }
  0x64   : > { %2849 = vmatprep.mubr.msk.f32.mxu0 %vm489_vm0, %v359_v18  ;;  %2897 = vmatprep.mubr.msk.f32.mxu1 %vm489_vm0, %v455_v19  ;;  %v391_v18 = vld [vmem:[%s3746_s23 + $0x1c8] sm:$0xff]  ;;  %v1091_v19 = vld [vmem:[%s3910_s20 + $0xc0] sm:$0xff] }
  0x67   : > { %807 = vmatmul.mubr.f32.gmra.mrb[24].mxu0 %v358_v20  ;;  %1047 = vmatmul.mubr.f32.gmra.mrb[24].mxu1 %v454_v21  ;;  %v390_v20 = vld [vmem:[%s3746_s23 + $0x1c0] sm:$0xff]  ;;  %v1092_v21 = vld [vmem:[%s3910_s20 + $0xc8] sm:$0xff] }
  0x68   : > { %2850 = vmatprep.mubr.msk.f32.mxu0 %vm489_vm0, %v361_v22  ;;  %2898 = vmatprep.mubr.msk.f32.mxu1 %vm489_vm0, %v457_v23  ;;  %v393_v22 = vld [vmem:[%s3746_s23 + $0x1d8] sm:$0xff]  ;;  %v1093_v23 = vld [vmem:[%s3910_s20 + $0xd0] sm:$0xff] }
  0x6b   : > { %812 = vmatmul.mubr.f32.gmra.mrb[26].mxu0 %v360_v24  ;;  %1052 = vmatmul.mubr.f32.gmra.mrb[26].mxu1 %v456_v25  ;;  %v392_v24 = vld [vmem:[%s3746_s23 + $0x1d0] sm:$0xff]  ;;  %v1094_v25 = vld [vmem:[%s3910_s20 + $0xd8] sm:$0xff] }
  0x6c   : > { %2851 = vmatprep.mubr.msk.f32.mxu0 %vm489_vm0, %v363_v26  ;;  %2899 = vmatprep.mubr.msk.f32.mxu1 %vm489_vm0, %v459_v27  ;;  %v395_v26 = vld [vmem:[%s3746_s23 + $0x1e8] sm:$0xff]  ;;  %v1095_v27 = vld [vmem:[%s3910_s20 + $0xe0] sm:$0xff] }
  0x6f   : > { %817 = vmatmul.mubr.f32.gmra.mrb[28].mxu0 %v362_v28  ;;  %1057 = vmatmul.mubr.f32.gmra.mrb[28].mxu1 %v458_v29  ;;  %v394_v28 = vld [vmem:[%s3746_s23 + $0x1e0] sm:$0xff]  ;;  %v1096_v29 = vld [vmem:[%s3910_s20 + $0xe8] sm:$0xff] }
  0x70   : > { %2852 = vmatprep.mubr.msk.f32.mxu0 %vm489_vm0, %v365_v30  ;;  %2900 = vmatprep.mubr.msk.f32.mxu1 %vm489_vm0, %v461_v31  ;;  %v397_v30 = vld [vmem:[%s3746_s23 + $0x1f8] sm:$0xff]  ;;  %v1097_v31 = vld [vmem:[%s3910_s20 + $0xf0] sm:$0xff] }
  0x73   : > { %822 = vmatmul.mubr.f32.gmra.mrb[30].mxu0 %v364_v32  ;;  %1062 = vmatmul.mubr.f32.gmra.mrb[30].mxu1 %v460_v33  ;;  %v396_v32 = vld [vmem:[%s3746_s23 + $0x1f0] sm:$0xff]  ;;  %v1098_v33 = vld [vmem:[%s3910_s20 + $0xf8] sm:$0xff] }
  0x74   : > { %2853 = vmatprep.mubr.msk.f32.mxu0 %vm489_vm0, %v367_v34  ;;  %3105 = vmatprep.mubr.msk.f32.mxu1 %vm1140_vm1, %v1067_v35  ;;  %v399_v34 = vld [vmem:[%s3746_s23 + $0x208] sm:$0xff]  ;;  %v1099_v35 = vld [vmem:[%s3910_s20 + $0x100] sm:$0xff] }
  0x77   : > { %827 = vmatmul.mubr.f32.gmra.mrb[32].mxu0 %v366_v36  ;;  %3106 = vmatmul.mubr.msk.f32.vlgmr.msra.gmra.mrb[32].mxu1 %vm1140_vm1, %v1068_v37  ;;  %v398_v36 = vld [vmem:[%s3746_s23 + $0x200] sm:$0xff]  ;;  %v1100_v37 = vld [vmem:[%s3910_s20 + $0x108] sm:$0xff] }
  0x78   : > { %2854 = vmatprep.mubr.msk.f32.mxu0 %vm489_vm0, %v369_v38  ;;  %3108 = vmatprep.mubr.msk.f32.mxu1 %vm1140_vm1, %v1069_v39  ;;  %v401_v38 = vld [vmem:[%s3746_s23 + $0x218] sm:$0xff]  ;;  %v1101_v39 = vld [vmem:[%s3910_s20 + $0x110] sm:$0xff] }
  0x7b   : > { %832 = vmatmul.mubr.f32.gmra.mrb[34].mxu0 %v368_v40  ;;  %3109 = vmatmul.mubr.msk.f32.gmra.mrb[34].mxu1 %vm1140_vm1, %v1070_v41  ;;  %v400_v40 = vld [vmem:[%s3746_s23 + $0x210] sm:$0xff]  ;;  %v1102_v41 = vld [vmem:[%s3910_s20 + $0x118] sm:$0xff] }
  0x7c   : > { %2855 = vmatprep.mubr.msk.f32.mxu0 %vm489_vm0, %v371_v42  ;;  %3111 = vmatprep.mubr.msk.f32.mxu1 %vm1140_vm1, %v1071_v43  ;;  %v403_v42 = vld [vmem:[%s3746_s23 + $0x228] sm:$0xff]  ;;  %v1103_v43 = vld [vmem:[%s3910_s20 + $0x120] sm:$0xff] }
  0x7f   : > { %837 = vmatmul.mubr.f32.gmra.mrb[36].mxu0 %v370_v44  ;;  %3112 = vmatmul.mubr.msk.f32.gmra.mrb[36].mxu1 %vm1140_vm1, %v1072_v45  ;;  %v402_v44 = vld [vmem:[%s3746_s23 + $0x220] sm:$0xff]  ;;  %v1104_v45 = vld [vmem:[%s3910_s20 + $0x128] sm:$0xff] }
  0x80   : > { %2856 = vmatprep.mubr.msk.f32.mxu0 %vm489_vm0, %v373_v46  ;;  %3114 = vmatprep.mubr.msk.f32.mxu1 %vm1140_vm1, %v1073_v47  ;;  %v405_v46 = vld [vmem:[%s3746_s23 + $0x238] sm:$0xff]  ;;  %v1105_v47 = vld [vmem:[%s3910_s20 + $0x130] sm:$0xff] }
  0x83   : > { %842 = vmatmul.mubr.f32.gmra.mrb[38].mxu0 %v372_v48  ;;  %3115 = vmatmul.mubr.msk.f32.gmra.mrb[38].mxu1 %vm1140_vm1, %v1074_v49  ;;  %v404_v48 = vld [vmem:[%s3746_s23 + $0x230] sm:$0xff]  ;;  %v1106_v49 = vld [vmem:[%s3910_s20 + $0x138] sm:$0xff] }
  0x84   : > { %2857 = vmatprep.mubr.msk.f32.mxu0 %vm489_vm0, %v375_v50  ;;  %3117 = vmatprep.mubr.msk.f32.mxu1 %vm1140_vm1, %v1075_v51  ;;  %v407_v50 = vld [vmem:[%s3746_s23 + $0x248] sm:$0xff]  ;;  %v1107_v51 = vld [vmem:[%s3910_s20 + $0x140] sm:$0xff] }
  0x87   : > { %847 = vmatmul.mubr.f32.gmra.mrb[40].mxu0 %v374_v52  ;;  %3118 = vmatmul.mubr.msk.f32.gmra.mrb[40].mxu1 %vm1140_vm1, %v1076_v53  ;;  %v406_v52 = vld [vmem:[%s3746_s23 + $0x240] sm:$0xff]  ;;  %v1108_v53 = vld [vmem:[%s3910_s20 + $0x148] sm:$0xff] }
  0x88   : > { %2858 = vmatprep.mubr.msk.f32.mxu0 %vm489_vm0, %v377_v54  ;;  %3120 = vmatprep.mubr.msk.f32.mxu1 %vm1140_vm1, %v1077_v55  ;;  %v409_v54 = vld [vmem:[%s3746_s23 + $0x258] sm:$0xff]  ;;  %v1109_v55 = vld [vmem:[%s3910_s20 + $0x150] sm:$0xff] }
  0x8b   : > { %852 = vmatmul.mubr.f32.gmra.mrb[42].mxu0 %v376_v56  ;;  %3121 = vmatmul.mubr.msk.f32.gmra.mrb[42].mxu1 %vm1140_vm1, %v1078_v57  ;;  %v408_v56 = vld [vmem:[%s3746_s23 + $0x250] sm:$0xff]  ;;  %v1110_v57 = vld [vmem:[%s3910_s20 + $0x158] sm:$0xff] }
  0x8c   : > { %2859 = vmatprep.mubr.msk.f32.mxu0 %vm489_vm0, %v379_v58  ;;  %3123 = vmatprep.mubr.msk.f32.mxu1 %vm1140_vm1, %v1079_v59  ;;  %v411_v58 = vld [vmem:[%s3746_s23 + $0x268] sm:$0xff]  ;;  %v1111_v59 = vld [vmem:[%s3910_s20 + $0x160] sm:$0xff] }
  0x8f   : > { %857 = vmatmul.mubr.f32.gmra.mrb[44].mxu0 %v378_v60  ;;  %3124 = vmatmul.mubr.msk.f32.gmra.mrb[44].mxu1 %vm1140_vm1, %v1080_v61  ;;  %v410_v60 = vld [vmem:[%s3746_s23 + $0x260] sm:$0xff]  ;;  %v1112_v61 = vld [vmem:[%s3910_s20 + $0x168] sm:$0xff] }
  0x90   : > { %2860 = vmatprep.mubr.msk.f32.mxu0 %vm489_vm0, %v381_v62  ;;  %3126 = vmatprep.mubr.msk.f32.mxu1 %vm1140_vm1, %v1081_v63  ;;  %v413_v62 = vld [vmem:[%s3746_s23 + $0x278] sm:$0xff]  ;;  %v1113_v63 = vld [vmem:[%s3910_s20 + $0x170] sm:$0xff] }
  0x93   : > { %862 = vmatmul.mubr.f32.gmra.mrb[46].mxu0 %v380_v0  ;;  %3127 = vmatmul.mubr.msk.f32.gmra.mrb[46].mxu1 %vm1140_vm1, %v1082_v1  ;;  %v412_v0 = vld [vmem:[%s3746_s23 + $0x270] sm:$0xff]  ;;  %v1114_v1 = vld [vmem:[%s3910_s20 + $0x178] sm:$0xff] }
  0x94   : > { %2861 = vmatprep.mubr.msk.f32.mxu0 %vm489_vm0, %v383_v2  ;;  %3129 = vmatprep.mubr.msk.f32.mxu1 %vm1140_vm1, %v1083_v3  ;;  %v415_v2 = vld [vmem:[%s3746_s23 + $0x288] sm:$0xff]  ;;  %v1115_v3 = vld [vmem:[%s3910_s20 + $0x180] sm:$0xff] }
  0x97   : > { %867 = vmatmul.mubr.f32.gmra.mrb[48].mxu0 %v382_v4  ;;  %3130 = vmatmul.mubr.msk.f32.gmra.mrb[48].mxu1 %vm1140_vm1, %v1084_v5  ;;  %v414_v4 = vld [vmem:[%s3746_s23 + $0x280] sm:$0xff]  ;;  %v1116_v5 = vld [vmem:[%s3910_s20 + $0x188] sm:$0xff] }
  0x98   : > { %2862 = vmatprep.mubr.msk.f32.mxu0 %vm489_vm0, %v385_v6  ;;  %3132 = vmatprep.mubr.msk.f32.mxu1 %vm1140_vm1, %v1085_v7  ;;  %v417_v6 = vld [vmem:[%s3746_s23 + $0x298] sm:$0xff]  ;;  %v1117_v7 = vld [vmem:[%s3910_s20 + $0x190] sm:$0xff] }
  0x9b   : > { %872 = vmatmul.mubr.f32.gmra.mrb[50].mxu0 %v384_v8  ;;  %3133 = vmatmul.mubr.msk.f32.gmra.mrb[50].mxu1 %vm1140_vm1, %v1086_v9  ;;  %v416_v8 = vld [vmem:[%s3746_s23 + $0x290] sm:$0xff]  ;;  %v1118_v9 = vld [vmem:[%s3910_s20 + $0x198] sm:$0xff] }
  0x9c   : > { %2863 = vmatprep.mubr.msk.f32.mxu0 %vm489_vm0, %v387_v10  ;;  %3135 = vmatprep.mubr.msk.f32.mxu1 %vm1140_vm1, %v1087_v11  ;;  %v419_v10 = vld [vmem:[%s3746_s23 + $0x2a8] sm:$0xff]  ;;  %v1119_v11 = vld [vmem:[%s3910_s20 + $0x1a0] sm:$0xff] }
  0x9f   : > { %877 = vmatmul.mubr.f32.gmra.mrb[52].mxu0 %v386_v12  ;;  %3136 = vmatmul.mubr.msk.f32.gmra.mrb[52].mxu1 %vm1140_vm1, %v1088_v13  ;;  %v418_v12 = vld [vmem:[%s3746_s23 + $0x2a0] sm:$0xff]  ;;  %v1120_v13 = vld [vmem:[%s3910_s20 + $0x1a8] sm:$0xff] }
  0xa0   : > { %2864 = vmatprep.mubr.msk.f32.mxu0 %vm489_vm0, %v389_v14  ;;  %3138 = vmatprep.mubr.msk.f32.mxu1 %vm1140_vm1, %v1089_v15  ;;  %v421_v14 = vld [vmem:[%s3746_s23 + $0x2b8] sm:$0xff]  ;;  %v1121_v15 = vld [vmem:[%s3910_s20 + $0x1b0] sm:$0xff] }
  0xa3   : > { %882 = vmatmul.mubr.f32.gmra.mrb[54].mxu0 %v388_v16  ;;  %3139 = vmatmul.mubr.msk.f32.gmra.mrb[54].mxu1 %vm1140_vm1, %v1090_v17  ;;  %v420_v16 = vld [vmem:[%s3746_s23 + $0x2b0] sm:$0xff]  ;;  %v1122_v17 = vld [vmem:[%s3910_s20 + $0x1b8] sm:$0xff] }
  0xa4   : > { %2865 = vmatprep.mubr.msk.f32.mxu0 %vm489_vm0, %v391_v18  ;;  %3141 = vmatprep.mubr.msk.f32.mxu1 %vm1140_vm1, %v1091_v19  ;;  %v423_v18 = vld [vmem:[%s3746_s23 + $0x2c8] sm:$0xff]  ;;  %v1123_v19 = vld [vmem:[%s3910_s20 + $0x1c0] sm:$0xff] }
  0xa7   : > { %887 = vmatmul.mubr.f32.gmra.mrb[56].mxu0 %v390_v20  ;;  %3142 = vmatmul.mubr.msk.f32.gmra.mrb[56].mxu1 %vm1140_vm1, %v1092_v21  ;;  %v422_v20 = vld [vmem:[%s3746_s23 + $0x2c0] sm:$0xff]  ;;  %v1124_v21 = vld [vmem:[%s3910_s20 + $0x1c8] sm:$0xff] }
  0xa8   : > { %2866 = vmatprep.mubr.msk.f32.mxu0 %vm489_vm0, %v393_v22  ;;  %3144 = vmatprep.mubr.msk.f32.mxu1 %vm1140_vm1, %v1093_v23  ;;  %v425_v22 = vld [vmem:[%s3746_s23 + $0x2d8] sm:$0xff]  ;;  %v1125_v23 = vld [vmem:[%s3910_s20 + $0x1d0] sm:$0xff] }
  0xab   : > { %892 = vmatmul.mubr.f32.gmra.mrb[58].mxu0 %v392_v24  ;;  %3145 = vmatmul.mubr.msk.f32.gmra.mrb[58].mxu1 %vm1140_vm1, %v1094_v25  ;;  %v424_v24 = vld [vmem:[%s3746_s23 + $0x2d0] sm:$0xff]  ;;  %v1126_v25 = vld [vmem:[%s3910_s20 + $0x1d8] sm:$0xff] }
  0xac   : > { %2867 = vmatprep.mubr.msk.f32.mxu0 %vm489_vm0, %v395_v26  ;;  %3147 = vmatprep.mubr.msk.f32.mxu1 %vm1140_vm1, %v1095_v27  ;;  %v427_v26 = vld [vmem:[%s3746_s23 + $0x2e8] sm:$0xff]  ;;  %v1127_v27 = vld [vmem:[%s3910_s20 + $0x1e0] sm:$0xff] }
  0xaf   : > { %897 = vmatmul.mubr.f32.gmra.mrb[60].mxu0 %v394_v28  ;;  %3148 = vmatmul.mubr.msk.f32.gmra.mrb[60].mxu1 %vm1140_vm1, %v1096_v29  ;;  %v426_v28 = vld [vmem:[%s3746_s23 + $0x2e0] sm:$0xff]  ;;  %v1128_v29 = vld [vmem:[%s3910_s20 + $0x1e8] sm:$0xff] }
  0xb0   : > { %2868 = vmatprep.mubr.msk.f32.mxu0 %vm489_vm0, %v397_v30  ;;  %3150 = vmatprep.mubr.msk.f32.mxu1 %vm1140_vm1, %v1097_v31  ;;  %v429_v30 = vld [vmem:[%s3746_s23 + $0x2f8] sm:$0xff]  ;;  %v1129_v31 = vld [vmem:[%s3910_s20 + $0x1f0] sm:$0xff] }
  0xb3   : > { %902 = vmatmul.mubr.f32.gmra.mrb[62].mxu0 %v396_v32  ;;  %3151 = vmatmul.mubr.msk.f32.gmra.mrb[62].mxu1 %vm1140_vm1, %v1098_v33  ;;  %v428_v32 = vld [vmem:[%s3746_s23 + $0x2f0] sm:$0xff]  ;;  %v1130_v33 = vld [vmem:[%s3910_s20 + $0x1f8] sm:$0xff] }
  0xb4   : > { %2869 = vmatprep.mubr.msk.f32.mxu0 %vm489_vm0, %v399_v34  ;;  %3153 = vmatprep.mubr.msk.f32.mxu1 %vm1140_vm1, %v1099_v35 }
  0xb7   : > { %907 = vmatmul.mubr.f32.gmra.mrb[64].mxu0 %v398_v36  ;;  %3154 = vmatmul.mubr.msk.f32.gmra.mrb[64].mxu1 %vm1140_vm1, %v1100_v37 }
  0xb8   : > { %2870 = vmatprep.mubr.msk.f32.mxu0 %vm489_vm0, %v401_v38  ;;  %3156 = vmatprep.mubr.msk.f32.mxu1 %vm1140_vm1, %v1101_v39 }
  0xbb   : > { %912 = vmatmul.mubr.f32.gmra.mrb[66].mxu0 %v400_v40  ;;  %3157 = vmatmul.mubr.msk.f32.gmra.mrb[66].mxu1 %vm1140_vm1, %v1102_v41 }
  0xbc   : > { %2871 = vmatprep.mubr.msk.f32.mxu0 %vm489_vm0, %v403_v42  ;;  %3159 = vmatprep.mubr.msk.f32.mxu1 %vm1140_vm1, %v1103_v43 }
  0xbf   : > { %917 = vmatmul.mubr.f32.gmra.mrb[68].mxu0 %v402_v44  ;;  %3160 = vmatmul.mubr.msk.f32.gmra.mrb[68].mxu1 %vm1140_vm1, %v1104_v45 }
  0xc0   : > { %2872 = vmatprep.mubr.msk.f32.mxu0 %vm489_vm0, %v405_v46  ;;  %3162 = vmatprep.mubr.msk.f32.mxu1 %vm1140_vm1, %v1105_v47 }
  0xc3   : > { %922 = vmatmul.mubr.f32.gmra.mrb[70].mxu0 %v404_v48  ;;  %3163 = vmatmul.mubr.msk.f32.gmra.mrb[70].mxu1 %vm1140_vm1, %v1106_v49 }
  0xc4   : > { %2873 = vmatprep.mubr.msk.f32.mxu0 %vm489_vm0, %v407_v50  ;;  %3165 = vmatprep.mubr.msk.f32.mxu1 %vm1140_vm1, %v1107_v51 }
  0xc7   : > { %927 = vmatmul.mubr.f32.gmra.mrb[72].mxu0 %v406_v52  ;;  %3166 = vmatmul.mubr.msk.f32.gmra.mrb[72].mxu1 %vm1140_vm1, %v1108_v53 }
  0xc8   : > { %2874 = vmatprep.mubr.msk.f32.mxu0 %vm489_vm0, %v409_v54  ;;  %3168 = vmatprep.mubr.msk.f32.mxu1 %vm1140_vm1, %v1109_v55 }
  0xcb   : > { %932 = vmatmul.mubr.f32.gmra.mrb[74].mxu0 %v408_v56  ;;  %3169 = vmatmul.mubr.msk.f32.gmra.mrb[74].mxu1 %vm1140_vm1, %v1110_v57 }
  0xcc   : > { %2875 = vmatprep.mubr.msk.f32.mxu0 %vm489_vm0, %v411_v58  ;;  %3171 = vmatprep.mubr.msk.f32.mxu1 %vm1140_vm1, %v1111_v59 }
  0xcf   : > { %937 = vmatmul.mubr.f32.gmra.mrb[76].mxu0 %v410_v60  ;;  %3172 = vmatmul.mubr.msk.f32.gmra.mrb[76].mxu1 %vm1140_vm1, %v1112_v61 }
  0xd0   : > { %2876 = vmatprep.mubr.msk.f32.mxu0 %vm489_vm0, %v413_v62  ;;  %3174 = vmatprep.mubr.msk.f32.mxu1 %vm1140_vm1, %v1113_v63 }
  0xd3   : > { %942 = vmatmul.mubr.f32.gmra.mrb[78].mxu0 %v412_v0  ;;  %3175 = vmatmul.mubr.msk.f32.gmra.mrb[78].mxu1 %vm1140_vm1, %v1114_v1 }
  0xd4   : > { %2877 = vmatprep.mubr.msk.f32.mxu0 %vm489_vm0, %v415_v2  ;;  %3177 = vmatprep.mubr.msk.f32.mxu1 %vm1140_vm1, %v1115_v3 }
  0xd7   : > { %947 = vmatmul.mubr.f32.gmra.mrb[80].mxu0 %v414_v4  ;;  %3178 = vmatmul.mubr.msk.f32.gmra.mrb[80].mxu1 %vm1140_vm1, %v1116_v5 }
  0xd8   : > { %2878 = vmatprep.mubr.msk.f32.mxu0 %vm489_vm0, %v417_v6  ;;  %3180 = vmatprep.mubr.msk.f32.mxu1 %vm1140_vm1, %v1117_v7 }
  0xdb   : > { %952 = vmatmul.mubr.f32.gmra.mrb[82].mxu0 %v416_v8  ;;  %3181 = vmatmul.mubr.msk.f32.gmra.mrb[82].mxu1 %vm1140_vm1, %v1118_v9 }
  0xdc   : > { %2879 = vmatprep.mubr.msk.f32.mxu0 %vm489_vm0, %v419_v10  ;;  %3183 = vmatprep.mubr.msk.f32.mxu1 %vm1140_vm1, %v1119_v11 }
  0xdf   : > { %957 = vmatmul.mubr.f32.gmra.mrb[84].mxu0 %v418_v12  ;;  %3184 = vmatmul.mubr.msk.f32.gmra.mrb[84].mxu1 %vm1140_vm1, %v1120_v13 }
  0xe0   : > { %2880 = vmatprep.mubr.msk.f32.mxu0 %vm489_vm0, %v421_v14  ;;  %3186 = vmatprep.mubr.msk.f32.mxu1 %vm1140_vm1, %v1121_v15 }
  0xe3   : > { %962 = vmatmul.mubr.f32.gmra.mrb[86].mxu0 %v420_v16  ;;  %3187 = vmatmul.mubr.msk.f32.gmra.mrb[86].mxu1 %vm1140_vm1, %v1122_v17 }
  0xe4   : > { %2881 = vmatprep.mubr.msk.f32.mxu0 %vm489_vm0, %v423_v18  ;;  %3189 = vmatprep.mubr.msk.f32.mxu1 %vm1140_vm1, %v1123_v19 }
  0xe7   : > { %967 = vmatmul.mubr.f32.gmra.mrb[88].mxu0 %v422_v20  ;;  %3190 = vmatmul.mubr.msk.f32.gmra.mrb[88].mxu1 %vm1140_vm1, %v1124_v21 }
  0xe8   : > { %2882 = vmatprep.mubr.msk.f32.mxu0 %vm489_vm0, %v425_v22  ;;  %3192 = vmatprep.mubr.msk.f32.mxu1 %vm1140_vm1, %v1125_v23 }
  0xeb   : > { %972 = vmatmul.mubr.f32.gmra.mrb[90].mxu0 %v424_v24  ;;  %3193 = vmatmul.mubr.msk.f32.gmra.mrb[90].mxu1 %vm1140_vm1, %v1126_v25 }
  0xec   : > { %2883 = vmatprep.mubr.msk.f32.mxu0 %vm489_vm0, %v427_v26  ;;  %3195 = vmatprep.mubr.msk.f32.mxu1 %vm1140_vm1, %v1127_v27 }
  0xef   : > { %977 = vmatmul.mubr.f32.gmra.mrb[92].mxu0 %v426_v28  ;;  %3196 = vmatmul.mubr.msk.f32.gmra.mrb[92].mxu1 %vm1140_vm1, %v1128_v29 }
  0xf0   : > { %2884 = vmatprep.mubr.msk.f32.mxu0 %vm489_vm0, %v429_v30  ;;  %3198 = vmatprep.mubr.msk.f32.mxu1 %vm1140_vm1, %v1129_v31 }
  0xf3   : > { %982 = vmatmul.mubr.f32.gmra.mrb[94].mxu0 %v428_v32  ;;  %3199 = vmatmul.mubr.msk.f32.gmra.mrb[94].mxu1 %vm1140_vm1, %v1130_v33 }
 0x10a   : > { %v4140_v34 = vpop.f32.mrb[0].mxu1  ;;  %v4142_v35 = vpop.f32.mrb[0].mxu0 }
 0x10b   : > { %v990_v36 = vpop.f32.mrb[1].mxu1  ;;  %v750_v37 = vpop.f32.mrb[1].mxu0 }
 0x10c   : > { %v4207_v36 = vld [vmem:[%s5459_s5] ss:$0 sm:$0xff] }
 0x10e   : > { %v4144_v38 = vpop.f32.mrb[2].mxu1  ;;  %v4146_v39 = vpop.f32.mrb[2].mxu0 }
 0x10f   : > { %v995_v40 = vpop.f32.mrb[3].mxu1  ;;  %v755_v41 = vpop.f32.mrb[3].mxu0 }
 0x112   : > { %v4148_v42 = vpop.f32.mrb[4].mxu1  ;;  %v4150_v43 = vpop.f32.mrb[4].mxu0 }
 0x113   : > { %v1000_v44 = vpop.f32.mrb[5].mxu1  ;;  %v760_v45 = vpop.f32.mrb[5].mxu0 }
 0x116   : > { %v4152_v46 = vpop.f32.mrb[6].mxu1  ;;  %v4154_v47 = vpop.f32.mrb[6].mxu0 }
 0x117   : > { %v1005_v48 = vpop.f32.mrb[7].mxu1  ;;  %v765_v49 = vpop.f32.mrb[7].mxu0 }
 0x11a   : > { %v4156_v50 = vpop.f32.mrb[8].mxu1  ;;  %v4158_v51 = vpop.f32.mrb[8].mxu0 }
 0x11b   : > { %v1010_v52 = vpop.f32.mrb[9].mxu1  ;;  %v770_v53 = vpop.f32.mrb[9].mxu0 }
 0x11e   : > { %v4160_v54 = vpop.f32.mrb[10].mxu1  ;;  %v4162_v55 = vpop.f32.mrb[10].mxu0 }
 0x11f   : > { %v1015_v56 = vpop.f32.mrb[11].mxu1  ;;  %v775_v57 = vpop.f32.mrb[11].mxu0 }
 0x122   : > { %v4164_v58 = vpop.f32.mrb[12].mxu1  ;;  %v4166_v59 = vpop.f32.mrb[12].mxu0 }
 0x123   : > { %5463 = vst [vmem:[#allocation2_spill] sm:$0xff] %v4164_v58  ;;  %v1020_v60 = vpop.f32.mrb[13].mxu1  ;;  %v780_v61 = vpop.f32.mrb[13].mxu0 }
 0x126   : > { %v4168_v62 = vpop.f32.mrb[14].mxu1  ;;  %v4170_v63 = vpop.f32.mrb[14].mxu0 }
 0x127   : > { %5464 = vst [vmem:[#allocation3_spill] sm:$0xff] %v4168_v62  ;;  %v1025_v0 = vpop.f32.mrb[15].mxu1  ;;  %v785_v1 = vpop.f32.mrb[15].mxu0 }
 0x12a   : > { %v4172_v2 = vpop.f32.mrb[16].mxu1  ;;  %v4174_v3 = vpop.f32.mrb[16].mxu0 }
 0x12b   : > { %5465 = vst [vmem:[#allocation4_spill] sm:$0xff] %v4172_v2  ;;  %v1030_v4 = vpop.f32.mrb[17].mxu1  ;;  %v790_v5 = vpop.f32.mrb[17].mxu0 }
 0x12e   : > { %v4176_v6 = vpop.f32.mrb[18].mxu1  ;;  %v4178_v7 = vpop.f32.mrb[18].mxu0 }
 0x12f   : > { %5466 = vst [vmem:[#allocation5_spill] sm:$0xff] %v4176_v6  ;;  %v1035_v8 = vpop.f32.mrb[19].mxu1  ;;  %v795_v9 = vpop.f32.mrb[19].mxu0 }
 0x132   : > { %v4180_v10 = vpop.f32.mrb[20].mxu1  ;;  %v4182_v11 = vpop.f32.mrb[20].mxu0 }
 0x133   : > { %5467 = vst [vmem:[#allocation6_spill] sm:$0xff] %v4180_v10  ;;  %v1040_v12 = vpop.f32.mrb[21].mxu1  ;;  %v800_v13 = vpop.f32.mrb[21].mxu0 }
 0x136   : > { %v4184_v14 = vpop.f32.mrb[22].mxu1  ;;  %v4186_v15 = vpop.f32.mrb[22].mxu0 }
 0x137   : > { %5468 = vst [vmem:[#allocation7_spill] sm:$0xff] %v4184_v14  ;;  %v1045_v16 = vpop.f32.mrb[23].mxu1  ;;  %v805_v17 = vpop.f32.mrb[23].mxu0 }
 0x13a   : > { %v4188_v18 = vpop.f32.mrb[24].mxu1  ;;  %v4190_v19 = vpop.f32.mrb[24].mxu0 }
 0x13b   : > { %5469 = vst [vmem:[#allocation8_spill] sm:$0xff] %v4188_v18  ;;  %v1050_v20 = vpop.f32.mrb[25].mxu1  ;;  %v810_v21 = vpop.f32.mrb[25].mxu0 }
 0x13e   : > { %v4192_v22 = vpop.f32.mrb[26].mxu1  ;;  %v4194_v23 = vpop.f32.mrb[26].mxu0 }
 0x13f   : > { %5470 = vst [vmem:[#allocation9_spill] sm:$0xff] %v4192_v22  ;;  %v1055_v24 = vpop.f32.mrb[27].mxu1  ;;  %v815_v25 = vpop.f32.mrb[27].mxu0 }
 0x142   : > { %v4196_v26 = vpop.f32.mrb[28].mxu1  ;;  %v4198_v27 = vpop.f32.mrb[28].mxu0 }
 0x143   : > { %5471 = vst [vmem:[#allocation10_spill] sm:$0xff] %v4196_v26  ;;  %v1060_v28 = vpop.f32.mrb[29].mxu1  ;;  %v820_v29 = vpop.f32.mrb[29].mxu0 }
 0x146   : > { %v4200_v30 = vpop.f32.mrb[30].mxu1  ;;  %v4202_v31 = vpop.f32.mrb[30].mxu0 }
 0x147   : > { %5472 = vst [vmem:[#allocation11_spill] sm:$0xff] %v4200_v30  ;;  %v1065_v32 = vpop.f32.mrb[31].mxu1  ;;  %v825_v33 = vpop.f32.mrb[31].mxu0 }
 0x148   : > { %v4226_v33 = vld [vmem:[%s5457_s3] ss:$0 sm:$0xff] }
 0x14a   : > { %v3107_v37 = vpop.f32.mrb[32].mxu1  ;;  %v4209_v40 = vpop.f32.mrb[32].mxu0 }
 0x14b   : > { %v1405_v41 = vadd.f32 %v3107_v37, %v4207_v36  ;;  %v1399_v44 = vpop.f32.mrb[33].mxu1  ;;  %v830_v45 = vpop.f32.mrb[33].mxu0 }
 0x14c   : > { %v1400_v48 = vadd.f32 %v4207_v36, %v1399_v44 }
 0x14d   : > { %v1719_v49 = vsub.f32 0.0, %v1405_v41 }
 0x14e   : > { %v1718_v52 = vsub.f32 0.0, %v1400_v48  ;;  %v3110_v53 = vpop.f32.mrb[34].mxu1  ;;  %v4213_v56 = vpop.f32.mrb[34].mxu0 }
 0x14f   : > { %v1784_v57 = vmul.f32 1.442695, %v1719_v49  ;;  %v1415_v60 = vadd.f32 %v3110_v53, %v4207_v36  ;;  %v1409_v61 = vpop.f32.mrb[35].mxu1  ;;  %v835_v0 = vpop.f32.mrb[35].mxu0  ;;  %v4232_v53 = vadd.f32 %v4226_v33, %v4140_v34 }
 0x150   : > { %v1782_v1 = vmul.f32 1.442695, %v1718_v52  ;;  %v1410_v4 = vadd.f32 %v4207_v36, %v1409_v61 }
 0x151   : > { %3264 = vpow2.f32 %v1784_v57  ;;  %v1721_v5 = vsub.f32 0.0, %v1415_v60  ;;  %5473 = vst [vmem:[#allocation12_spill] sm:$0xff] %v4232_v53  ;;  %v4236_v57 = vadd.f32 %v4226_v33, %v4142_v35 }
 0x152   : > { %3266 = vpow2.f32 %v1782_v1  ;;  %v1720_v8 = vsub.f32 0.0, %v1410_v4  ;;  %v3113_v9 = vpop.f32.mrb[36].mxu1  ;;  %v4217_v12 = vpop.f32.mrb[36].mxu0  ;;  %v4242_v4 = vadd.f32 %v4226_v33, %v4144_v38  ;;  %v4256_v38 = vadd.f32 %v4226_v33, %v4150_v43 }
 0x153   : > { %v1788_v13 = vmul.f32 1.442695, %v1721_v5  ;;  %v1425_v16 = vadd.f32 %v3113_v9, %v4207_v36  ;;  %v1419_v17 = vpop.f32.mrb[37].mxu1  ;;  %v840_v20 = vpop.f32.mrb[37].mxu0  ;;  %v4246_v5 = vadd.f32 %v4226_v33, %v4146_v39  ;;  %v4270_v43 = vadd.f32 %v4226_v33, %v4162_v55 }
 0x154   : > { %v1786_v21 = vmul.f32 1.442695, %v1720_v8  ;;  %v1420_v24 = vadd.f32 %v4207_v36, %v1419_v17  ;;  %5474 = vst [vmem:[#allocation13_spill] sm:$0xff] %v4242_v4 }
 0x155   : > { %3268 = vpow2.f32 %v1788_v13  ;;  %v1723_v25 = vsub.f32 0.0, %v1425_v16  ;;  %v4251_v16 = vadd.f32 %v4226_v33, %v4148_v42 }
 0x156   : > { %3270 = vpow2.f32 %v1786_v21  ;;  %v1722_v28 = vsub.f32 0.0, %v1420_v24  ;;  %v3116_v29 = vpop.f32.mrb[38].mxu1  ;;  %v4221_v32 = vpop.f32.mrb[38].mxu0 }
 0x157   : > { %v1792_v37 = vmul.f32 1.442695, %v1723_v25  ;;  %v1435_v41 = vadd.f32 %v3116_v29, %v4207_v36  ;;  %v1429_v44 = vpop.f32.mrb[39].mxu1  ;;  %v845_v45 = vpop.f32.mrb[39].mxu0  ;;  %5475 = vst [vmem:[#allocation14_spill] sm:$0xff] %v4251_v16  ;;  %v4260_v25 = vadd.f32 %v4226_v33, %v4154_v47 }
 0x158   : > { %v1790_v48 = vmul.f32 1.442695, %v1722_v28  ;;  %v1430_v49 = vadd.f32 %v4207_v36, %v1429_v44  ;;  %v4264_v28 = vadd.f32 %v4226_v33, %v4158_v51 }
 0x159   : > { %3272 = vpow2.f32 %v1792_v37  ;;  %v1725_v52 = vsub.f32 0.0, %v1435_v41 }
 0x15a   : > { %3274 = vpow2.f32 %v1790_v48  ;;  %v1724_v60 = vsub.f32 0.0, %v1430_v49  ;;  %v3119_v61 = vpop.f32.mrb[40].mxu1  ;;  %v4238_v0 = vpop.f32.mrb[40].mxu0 }
 0x15b   : > { %v3265_v1 = vpop.eup %3264  ;;  %v1796_v34 = vmul.f32 1.442695, %v1725_v52  ;;  %v1445_v8 = vadd.f32 %v3119_v61, %v4207_v36  ;;  %v1439_v9 = vpop.f32.mrb[41].mxu1  ;;  %v4276_v61 = vadd.f32 %v4226_v33, %v4166_v59  ;;  %v4290_v59 = vadd.f32 %v4226_v33, %v4178_v7 }
 0x15c   : > { %v850_v35 = vpop.f32.mrb[41].mxu0  ;;  %v3267_v13 = vpop.eup %3266  ;;  %v1911_v17 = vadd.f32 1.0, %v3265_v1  ;;  %v1794_v20 = vmul.f32 1.442695, %v1724_v60  ;;  %v1440_v21 = vadd.f32 %v4207_v36, %v1439_v9 }
 0x15d   : > { %v1910_v39 = vadd.f32 1.0, %v3267_v13  ;;  %3276 = vpow2.f32 %v1796_v34  ;;  %v1727_v24 = vsub.f32 0.0, %v1445_v8  ;;  %v4280_v34 = vadd.f32 %v4226_v33, %v4170_v63 }
 0x15e   : > { %3278 = vrcp.f32 %v1911_v17  ;;  %v1726_v42 = vsub.f32 0.0, %v1440_v21  ;;  %v3122_v29 = vpop.f32.mrb[42].mxu1  ;;  %v4266_v37 = vpop.f32.mrb[42].mxu0  ;;  %v4284_v8 = vadd.f32 %v4226_v33, %v4174_v3 }
 0x15f   : > { %v3269_v41 = vpop.eup %3268  ;;  %3280 = vrcp.f32 %v1910_v39  ;;  %v1800_v44 = vmul.f32 1.442695, %v1727_v24  ;;  %v1455_v45 = vadd.f32 %v3122_v29, %v4207_v36  ;;  %v1449_v47 = vpop.f32.mrb[43].mxu1 }
 0x160   : > { %v855_v48 = vpop.f32.mrb[43].mxu0  ;;  %v3271_v49 = vpop.eup %3270  ;;  %v1913_v52 = vadd.f32 1.0, %v3269_v41  ;;  %3282 = vpow2.f32 %v1794_v20  ;;  %v1798_v51 = vmul.f32 1.442695, %v1726_v42  ;;  %v1450_v60 = vadd.f32 %v4207_v36, %v1449_v47 }
 0x161   : > { %v1912_v1 = vadd.f32 1.0, %v3271_v49  ;;  %3284 = vpow2.f32 %v1800_v44  ;;  %v1729_v55 = vsub.f32 0.0, %v1455_v45  ;;  %v4296_v41 = vadd.f32 %v4226_v33, %v4182_v11 }
 0x162   : > { %3286 = vrcp.f32 %v1913_v52  ;;  %v1728_v9 = vsub.f32 0.0, %v1450_v60  ;;  %v3125_v35 = vpop.f32.mrb[44].mxu1  ;;  %v4286_v13 = vpop.f32.mrb[44].mxu0  ;;  %v4300_v45 = vadd.f32 %v4226_v33, %v4186_v15  ;;  %v4304_v47 = vadd.f32 %v4226_v33, %v4190_v19  ;;  %v4316_v19 = vld [vmem:[%s5460_s6] ss:$0 sm:$0xff] }
 0x163   : > { %v3273_v17 = vpop.eup %3272  ;;  %3288 = vrcp.f32 %v1912_v1  ;;  %v1804_v20 = vmul.f32 1.442695, %v1729_v55  ;;  %v1465_v21 = vadd.f32 %v3125_v35, %v4207_v36  ;;  %v1459_v63 = vpop.f32.mrb[45].mxu1  ;;  %v4310_v11 = vadd.f32 %v4226_v33, %v4194_v23 }
 0x164   : > { %v860_v39 = vpop.f32.mrb[45].mxu0  ;;  %v3275_v24 = vpop.eup %3274  ;;  %v1915_v42 = vadd.f32 1.0, %v3273_v17  ;;  %3290 = vpow2.f32 %v1798_v51  ;;  %v1802_v3 = vmul.f32 1.442695, %v1728_v9  ;;  %v1460_v29 = vadd.f32 %v4207_v36, %v1459_v63 }
 0x165   : > { %v1914_v44 = vadd.f32 1.0, %v3275_v24  ;;  %3292 = vpow2.f32 %v1804_v20  ;;  %v1731_v7 = vsub.f32 0.0, %v1465_v21  ;;  %v4320_v17 = vadd.f32 %v4226_v33, %v4198_v27  ;;  %v4334_v27 = vld [vmem:[%s5461_s7] ss:$0 sm:$0xff] }
 0x166   : > { %3294 = vrcp.f32 %v1915_v42  ;;  %v1730_v48 = vsub.f32 0.0, %v1460_v29  ;;  %v3128_v49 = vpop.f32.mrb[46].mxu1  ;;  %v4306_v52 = vpop.f32.mrb[46].mxu0  ;;  %v4325_v63 = vadd.f32 %v4226_v33, %v4202_v31  ;;  %v4329_v39 = vadd.f32 %v4226_v33, %v4209_v40 }
 0x167   : > { %v3277_v51 = vpop.eup %3276  ;;  %3296 = vrcp.f32 %v1914_v44  ;;  %v1808_v60 = vmul.f32 1.442695, %v1731_v7  ;;  %v1475_v1 = vadd.f32 %v3128_v49, %v4207_v36  ;;  %v1469_v55 = vpop.f32.mrb[47].mxu1  ;;  %v4340_v31 = vadd.f32 %v4226_v33, %v4213_v56 }
 0x168   : > { %v865_v15 = vpop.f32.mrb[47].mxu0  ;;  %v3279_v9 = vpop.eup %3278  ;;  %v1917_v35 = vadd.f32 1.0, %v3277_v51  ;;  %3298 = vpow2.f32 %v1802_v3  ;;  %v1806_v20 = vmul.f32 1.442695, %v1730_v48  ;;  %v4352_v56 = vadd.f32 %v4226_v33, %v4221_v32 }
 0x169   : > { %v3281_v23 = vpop.eup %3280  ;;  %v2103_v21 = vmul.f32 %v3279_v9, %v4246_v5  ;;  %3300 = vpow2.f32 %v1808_v60  ;;  %v1470_v5 = vadd.f32 %v4207_v36, %v1469_v55  ;;  %v1733_v48 = vsub.f32 0.0, %v1475_v1 }
 0x16a   : > { %v3283_v24 = vpop.eup %3282  ;;  %v2102_v42 = vmul.f32 %v3281_v23, %v4236_v57  ;;  %3302 = vrcp.f32 %v1917_v35  ;;  %v3131_v3 = vpop.f32.mrb[48].mxu1  ;;  %v4348_v55 = vadd.f32 %v4226_v33, %v4217_v12 }
 0x16b   : > { %v4342_v29 = vpop.f32.mrb[48].mxu0  ;;  %v3285_v40 = vpop.eup %3284  ;;  %v2174_v44 = vmul.f32 %v4316_v19, %v2103_v21  ;;  %v1916_v7 = vadd.f32 1.0, %v3283_v24  ;;  %3304 = vpow2.f32 %v1806_v20  ;;  %v4360_v20 = vadd.f32 %v4226_v33, %v4238_v0 }
 0x16c   : > { %v1479_v49 = vpop.f32.mrb[49].mxu1  ;;  %v870_v51 = vpop.f32.mrb[49].mxu0  ;;  %v2173_v57 = vmul.f32 %v4316_v19, %v2102_v42  ;;  %v1919_v15 = vadd.f32 1.0, %v3285_v40  ;;  %v1732_v32 = vsub.f32 0.0, %v1470_v5  ;;  %v4372_v0 = vmul.f32 1.442695, %v1733_v48 }
 0x16d   : > { %v3287_v60 = vpop.eup %3286  ;;  %v4355_v35 = vadd.f32 %v4334_v27, %v2174_v44  ;;  %3306 = vrcp.f32 %v1916_v7 }
 0x16e   : > { %v3289_v9 = vpop.eup %3288  ;;  %v2105_v1 = vmul.f32 %v3287_v60, %v4260_v25  ;;  %v4363_v21 = vadd.f32 %v4334_v27, %v2173_v57  ;;  %3308 = vrcp.f32 %v1919_v15  ;;  %v4366_v24 = vpop.f32.mrb[50].mxu1 }
 0x16f   : > { %v3291_v23 = vpop.eup %3290  ;;  %v2104_v12 = vmul.f32 %v3289_v9, %v4256_v38  ;;  %v4368_v42 = vpop.f32.mrb[50].mxu0  ;;  %v2373_v25 = vmin.f32 %v4355_v35, 0.0  ;;  %v4379_v9 = vadd.f32 %v3131_v3, %v4207_v36  ;;  %vm2309_vm2 = vcmp.gt.f32.partialorder %v4355_v35, 0.0 }
 0x170   : > { %v3293_v40 = vpop.eup %3292  ;;  %v2176_v44 = vmul.f32 %v4316_v19, %v2105_v1  ;;  %v1918_v7 = vadd.f32 1.0, %v3291_v23  ;;  %v4374_v51 = vpop.f32.mrb[51].mxu1  ;;  %v2372_v38 = vmin.f32 %v4363_v21, 0.0  ;;  %vm2308_vm3 = vcmp.gt.f32.partialorder %v4363_v21, 0.0 }
 0x171   : > { %v875_v60 = vpop.f32.mrb[51].mxu0  ;;  %v3295_v57 = vpop.eup %3294  ;;  %v2175_v5 = vmul.f32 %v4316_v19, %v2104_v12  ;;  %v1921_v15 = vadd.f32 1.0, %v3293_v40  ;;  %v2438_v30 = vmul.f32 1.442695, %v2373_v25 }
 0x172   : > { %v3297_v26 = vpop.eup %3296  ;;  %v4382_v18 = vadd.f32 %v4334_v27, %v2176_v44  ;;  %v2107_v48 = vmul.f32 %v3295_v57, %v4270_v43  ;;  %3310 = vrcp.f32 %v1918_v7  ;;  %v2436_v23 = vmul.f32 1.442695, %v2372_v38  ;;  %v4389_v12 = vpop.f32.mrb[52].mxu1 }
 0x173   : > { %v3299_v1 = vpop.eup %3298  ;;  %v4386_v60 = vadd.f32 %v4334_v27, %v2175_v5  ;;  %v2106_v22 = vmul.f32 %v3297_v26, %v4264_v28  ;;  %3312 = vrcp.f32 %v1921_v15  ;;  %v4391_v3 = vpop.f32.mrb[52].mxu0  ;;  %v4395_v43 = vmul.f32 1.442695, %v1732_v32 }
 0x174   : > { %v3301_v40 = vpop.eup %3300  ;;  %3314 = vpow2.f32 %v2438_v30  ;;  %v2375_v25 = vmin.f32 %v4382_v18, 0.0  ;;  %v2178_v44 = vmul.f32 %v4316_v19, %v2107_v48  ;;  %v4397_v7 = vpop.f32.mrb[53].mxu1  ;;  %v4402_v5 = vadd.f32 %v4207_v36, %v1479_v49 }
 0x175   : > { %v880_v57 = vpop.f32.mrb[53].mxu0  ;;  %v3303_v38 = vpop.eup %3302  ;;  %3316 = vpow2.f32 %v2436_v23  ;;  %v2374_v26 = vmin.f32 %v4386_v60, 0.0  ;;  %v2177_v28 = vmul.f32 %v4316_v19, %v2106_v22  ;;  %v1920_v48 = vadd.f32 1.0, %v3299_v1 }
 0x176   : > { %v3305_v15 = vpop.eup %3304  ;;  %v2442_v30 = vmul.f32 1.442695, %v2375_v25  ;;  %v4405_v10 = vadd.f32 %v4334_v27, %v2178_v44  ;;  %v2109_v32 = vmul.f32 %v3303_v38, %v4280_v34  ;;  %v1923_v23 = vadd.f32 1.0, %v3301_v40  ;;  %v4412_v16 = vpop.f32.mrb[54].mxu1 }
 0x177   : > { %v2440_v14 = vmul.f32 1.442695, %v2374_v26  ;;  %v4409_v57 = vadd.f32 %v4334_v27, %v2177_v28  ;;  %v4414_v22 = vpop.f32.mrb[54].mxu0  ;;  %v3307_v49 = vpop.eup %3306  ;;  %v1922_v28 = vadd.f32 1.0, %v3305_v15  ;;  %vm2311_vm4 = vcmp.gt.f32.partialorder %v4382_v18, 0.0 }
 0x178   : > { %3318 = vpow2.f32 %v2442_v30  ;;  %v2377_v25 = vmin.f32 %v4405_v10, 0.0  ;;  %v2180_v34 = vmul.f32 %v4316_v19, %v2109_v32  ;;  %v4419_v1 = vpop.f32.mrb[55].mxu1  ;;  %v885_v44 = vpop.f32.mrb[55].mxu0  ;;  %v2108_v26 = vmul.f32 %v3307_v49, %v4276_v61 }
 0x179   : > { %v3309_v38 = vpop.eup %3308  ;;  %3320 = vpow2.f32 %v2440_v14  ;;  %v2376_v40 = vmin.f32 %v4409_v57, 0.0  ;;  %vm2310_vm5 = vcmp.gt.f32.partialorder %v4386_v60, 0.0  ;;  %vm2313_vm6 = vcmp.gt.f32.partialorder %v4405_v10, 0.0 }
 0x17a   : > { %v2446_v2 = vmul.f32 1.442695, %v2377_v25  ;;  %v4424_v6 = vadd.f32 %v4334_v27, %v2180_v34  ;;  %v2111_v30 = vmul.f32 %v3309_v38, %v4290_v59  ;;  %3322 = vrcp.f32 %v1920_v48  ;;  %v4429_v44 = vpop.f32.mrb[56].mxu1  ;;  %v4431_v14 = vpop.f32.mrb[56].mxu0 }
 0x17b   : > { %v2444_v32 = vmul.f32 1.442695, %v2376_v40  ;;  %v2179_v53 = vmul.f32 %v4316_v19, %v2108_v26  ;;  %3324 = vrcp.f32 %v1923_v23  ;;  %v4436_v15 = vpop.f32.mrb[57].mxu1  ;;  %v890_v48 = vpop.f32.mrb[57].mxu0  ;;  %vm2312_vm7 = vcmp.gt.f32.partialorder %v4409_v57, 0.0 }
 0x17c   : > { %v3311_v4 = vpop.eup %3310  ;;  %3326 = vpow2.f32 %v2446_v2  ;;  %v2379_v61 = vmin.f32 %v4424_v6, 0.0  ;;  %v2182_v59 = vmul.f32 %v4316_v19, %v2111_v30  ;;  %vm2315_vm8 = vcmp.gt.f32.partialorder %v4424_v6, 0.0 }
 0x17d   : > { %v3313_v49 = vpop.eup %3312  ;;  %3328 = vpow2.f32 %v2444_v32  ;;  %v4440_v23 = vadd.f32 %v4334_v27, %v2179_v53  ;;  %v2110_v25 = vmul.f32 %v3311_v4, %v4284_v8  ;;  %v1734_v8 = vsub.f32 0.0, %v4402_v5 }
 0x17e   : > { %v3315_v34 = vpop.eup %3314  ;;  %v2450_v38 = vmul.f32 1.442695, %v2379_v61  ;;  %v4444_v2 = vadd.f32 %v4334_v27, %v2182_v59  ;;  %v2113_v40 = vmul.f32 %v3313_v49, %v4300_v45  ;;  %3330 = vrcp.f32 %v1922_v28  ;;  %v4457_v32 = vpop.f32.mrb[58].mxu1 }
 0x17f   : > { %v3317_v26 = vpop.eup %3316  ;;  %v2969_v30 = vadd.f32 -1.0, %v3315_v34  ;;  %v2378_v53 = vmin.f32 %v4440_v23, 0.0  ;;  %v2181_v4 = vmul.f32 %v4316_v19, %v2110_v25  ;;  %v4459_v61 = vpop.f32.mrb[58].mxu0  ;;  %vm2314_vm9 = vcmp.gt.f32.partialorder %v4440_v23, 0.0 }
 0x180   : > { %v2968_v45 = vadd.f32 -1.0, %v3317_v26  ;;  %3332 = vpow2.f32 %v2450_v38  ;;  %v2381_v28 = vmin.f32 %v4444_v2, 0.0  ;;  %v4463_v59 = vpop.f32.mrb[59].mxu1  ;;  %v895_v48 = vpop.f32.mrb[59].mxu0  ;;  %v2184_v34 = vmul.f32 %v4316_v19, %v2113_v40 }
 0x181   : > { %v2629_v49 = vsel %vm2309_vm2, %v4355_v35, %v2969_v30  ;;  %v2448_v5 = vmul.f32 1.442695, %v2378_v53  ;;  %v4470_v25 = vadd.f32 %v4334_v27, %v2181_v4  ;;  %3334 = vpow2.f32 %v4372_v0 }
 0x182   : > { %v3319_v26 = vpop.eup %3318  ;;  %2693 = vst.msk [vmem:[%s4452_s10 + $0x8] sm:$0xff] %vm1140_vm1, %v2629_v49  ;;  %v2628_v38 = vsel %vm2308_vm3, %v4363_v21, %v2968_v45  ;;  %v2454_v48 = vmul.f32 1.442695, %v2381_v28  ;;  %v5476_v35 = vsub.f32 0.0, %v4379_v9  ;;  %v1814_v4 = vmul.f32 1.442695, %v1734_v8 }
 0x183   : > { %v3321_v62 = vpop.eup %3320  ;;  %2692 = vst.msk [vmem:[%s4452_s10] sm:$0xff] %vm1140_vm1, %v2628_v38  ;;  %v2971_v53 = vadd.f32 -1.0, %v3319_v26  ;;  %3336 = vpow2.f32 %v2448_v5  ;;  %v2380_v40 = vmin.f32 %v4470_v25, 0.0  ;;  %v4484_v49 = vpop.f32.mrb[60].mxu1  ;;  %v4489_v0 = vadd.f32 %v4334_v27, %v2184_v34 }
 0x184   : > { %v1816_v30 = vmul.f32 1.442695, %v5476_v35  ;;  %v4486_v58 = vpop.f32.mrb[60].mxu0  ;;  %v3323_v21 = vpop.eup %3322  ;;  %v2970_v45 = vadd.f32 -1.0, %v3321_v62  ;;  %3338 = vpow2.f32 %v2454_v48  ;;  %v1495_v9 = vadd.f32 %v4366_v24, %v4207_v36 }
 0x185   : > { %v4493_v28 = vpop.f32.mrb[61].mxu1  ;;  %v900_v5 = vpop.f32.mrb[61].mxu0  ;;  %v2631_v8 = vsel %vm2311_vm4, %v4382_v18, %v2971_v53  ;;  %v2452_v38 = vmul.f32 1.442695, %v2380_v40  ;;  %v2112_v35 = vmul.f32 %v3323_v21, %v4296_v41  ;;  %3340 = vpow2.f32 %v4395_v43 }
 0x186   : > { %v3325_v26 = vpop.eup %3324  ;;  %2695 = vst.msk [vmem:[%s4452_s10 + $0x18] sm:$0xff] %vm1140_vm1, %v2631_v8  ;;  %v2630_v24 = vsel %vm2310_vm5, %v4386_v60, %v2970_v45  ;;  %v2383_v34 = vmin.f32 %v4489_v0, 0.0  ;;  %v1737_v43 = vsub.f32 0.0, %v1495_v9  ;;  %v4512_v53 = vpop.f32.mrb[62].mxu1  ;;  %vm2317_vm10 = vcmp.gt.f32.partialorder %v4444_v2, 0.0 }
 0x187   : > { %v3327_v62 = vpop.eup %3326  ;;  %v2115_v48 = vmul.f32 %v3325_v26, %v4310_v11  ;;  %2694 = vst.msk [vmem:[%s4452_s10 + $0x10] sm:$0xff] %vm1140_vm1, %v2630_v24  ;;  %3342 = vpow2.f32 %v2452_v38  ;;  %v2183_v41 = vmul.f32 %v4316_v19, %v2112_v35  ;;  %v4514_v60 = vpop.f32.mrb[62].mxu0  ;;  %vm2316_vm11 = vcmp.gt.f32.partialorder %v4470_v25, 0.0 }
 0x188   : > { %v3329_v5 = vpop.eup %3328  ;;  %v2973_v18 = vadd.f32 -1.0, %v3327_v62  ;;  %v2458_v45 = vmul.f32 1.442695, %v2383_v34  ;;  %3344 = vpow2.f32 %v1816_v30  ;;  %v4517_v26 = vpop.f32.mrb[63].mxu1  ;;  %v1820_v34 = vmul.f32 1.442695, %v1737_v43 }
 0x189   : > { %v3331_v40 = vpop.eup %3330  ;;  %v2972_v21 = vadd.f32 -1.0, %v3329_v5  ;;  %v2186_v11 = vmul.f32 %v4316_v19, %v2115_v48  ;;  %v905_v8 = vpop.f32.mrb[63].mxu0  ;;  %v4523_v9 = vadd.f32 %v4334_v27, %v2183_v41  ;;  %3346 = vpow2.f32 %v1814_v4 }
 0x18a   : > { %v2633_v38 = vsel %vm2313_vm6, %v4405_v10, %v2973_v18  ;;  %v2114_v35 = vmul.f32 %v3331_v40, %v4304_v47  ;;  %v3333_v62 = vpop.eup %3332  ;;  %3348 = vpow2.f32 %v2458_v45  ;;  %v4539_v48 = vpop.f32.mrb[64].mxu1  ;;  %v1490_v41 = vadd.f32 %v4207_v36, %v4374_v51 }
 0x18b   : > { %2697 = vst.msk [vmem:[%s4452_s10 + $0x28] sm:$0xff] %vm1140_vm1, %v2633_v38  ;;  %v2632_v30 = vsel %vm2312_vm7, %v4409_v57, %v2972_v21  ;;  %v4532_v24 = vadd.f32 %v4334_v27, %v2186_v11  ;;  %v2975_v10 = vadd.f32 -1.0, %v3333_v62  ;;  %v2382_v47 = vmin.f32 %v4523_v9, 0.0  ;;  %v4541_v5 = vpop.f32.mrb[64].mxu0  ;;  %v3335_v57 = vpop.eup %3334 }
 0x18c   : > { %2696 = vst.msk [vmem:[%s4452_s10 + $0x20] sm:$0xff] %vm1140_vm1, %v2632_v30  ;;  %v2185_v4 = vmul.f32 %v4316_v19, %v2114_v35  ;;  %5477 = vst [vmem:[#allocation15_spill] sm:$0xff] %v4541_v5  ;;  %3350 = vpow2.f32 %v1820_v34  ;;  %v4547_v43 = vpop.f32.mrb[65].mxu1  ;;  %v910_v40 = vpop.f32.mrb[65].mxu0  ;;  %v1925_v38 = vadd.f32 1.0, %v3335_v57  ;;  %v1736_v34 = vsub.f32 0.0, %v1490_v41 }
 0x18d   : > { %v2385_v18 = vmin.f32 %v4532_v24, 0.0  ;;  %v3337_v21 = vpop.eup %3336  ;;  %v2635_v45 = vsel %vm2315_vm8, %v4424_v6, %v2975_v10  ;;  %v2456_v11 = vmul.f32 1.442695, %v2382_v47  ;;  %v1505_v51 = vadd.f32 %v4389_v12, %v4207_v36 }
 0x18e   : > { %v4553_v8 = vadd.f32 %v4334_v27, %v2185_v4  ;;  %v3339_v35 = vpop.eup %3338  ;;  %2699 = vst.msk [vmem:[%s4452_s10 + $0x38] sm:$0xff] %vm1140_vm1, %v2635_v45  ;;  %v2974_v62 = vadd.f32 -1.0, %v3337_v21  ;;  %vm2319_vm12 = vcmp.gt.f32.partialorder %v4489_v0, 0.0  ;;  %v4561_v10 = vpop.f32.mrb[66].mxu1  ;;  %vm2318_vm13 = vcmp.gt.f32.partialorder %v4523_v9, 0.0 }
 0x18f   : > { %v2462_v30 = vmul.f32 1.442695, %v2385_v18  ;;  %v3341_v40 = vpop.eup %3340  ;;  %v2977_v5 = vadd.f32 -1.0, %v3339_v35  ;;  %3352 = vpow2.f32 %v2456_v11  ;;  %v4563_v47 = vpop.f32.mrb[66].mxu0  ;;  %v1818_v18 = vmul.f32 1.442695, %v1736_v34 }
 0x190   : > { %v2384_v6 = vmin.f32 %v4553_v8, 0.0  ;;  %5478 = vst [vmem:[#allocation16_spill] sm:$0xff] %v4563_v47  ;;  %v2634_v4 = vsel %vm2314_vm9, %v4440_v23, %v2974_v62  ;;  %v1924_v57 = vadd.f32 1.0, %v3341_v40  ;;  %v4568_v12 = vpop.f32.mrb[67].mxu1  ;;  %v915_v41 = vpop.f32.mrb[67].mxu0  ;;  %v1739_v35 = vsub.f32 0.0, %v1505_v51 }
 0x191   : > { %3354 = vpow2.f32 %v2462_v30  ;;  %v3343_v21 = vpop.eup %3342  ;;  %2698 = vst.msk [vmem:[%s4452_s10 + $0x30] sm:$0xff] %vm1140_vm1, %v2634_v4  ;;  %v2637_v45 = vsel %vm2317_vm10, %v4444_v2, %v2977_v5  ;;  %v1500_v62 = vadd.f32 %v4207_v36, %v4397_v7  ;;  %v1515_v30 = vadd.f32 %v4412_v16, %v4207_v36 }
 0x192   : > { %v2460_v11 = vmul.f32 1.442695, %v2384_v6  ;;  %3356 = vrcp.f32 %v1925_v38  ;;  %v3345_v47 = vpop.eup %3344  ;;  %2701 = vst.msk [vmem:[%s4452_s10 + $0x48] sm:$0xff] %vm1140_vm1, %v2637_v45  ;;  %v2976_v23 = vadd.f32 -1.0, %v3343_v21  ;;  %v1824_v4 = vmul.f32 1.442695, %v1739_v35 }
 0x193   : > { %3358 = vrcp.f32 %v1924_v57  ;;  %v3347_v34 = vpop.eup %3346  ;;  %v1927_v40 = vadd.f32 1.0, %v3345_v47  ;;  %v1510_v2 = vadd.f32 %v4207_v36, %v4419_v1  ;;  %v4583_v5 = vpop.f32.mrb[68].mxu1  ;;  %v1738_v57 = vsub.f32 0.0, %v1500_v62 }
 0x194   : > { %3360 = vpow2.f32 %v2460_v11  ;;  %v4585_v38 = vpop.f32.mrb[68].mxu0  ;;  %v3349_v51 = vpop.eup %3348  ;;  %v2636_v7 = vsel %vm2316_vm11, %v4470_v25, %v2976_v23  ;;  %v1926_v6 = vadd.f32 1.0, %v3347_v34  ;;  %v1741_v1 = vsub.f32 0.0, %v1515_v30 }
 0x195   : > { %3362 = vpow2.f32 %v1818_v18  ;;  %v4590_v16 = vpop.f32.mrb[69].mxu1  ;;  %v920_v41 = vpop.f32.mrb[69].mxu0  ;;  %2700 = vst.msk [vmem:[%s4452_s10 + $0x40] sm:$0xff] %vm1140_vm1, %v2636_v7  ;;  %v2979_v47 = vadd.f32 -1.0, %v3349_v51  ;;  %v1740_v21 = vsub.f32 0.0, %v1510_v2  ;;  %v1525_v35 = vadd.f32 %v4429_v44, %v4207_v36 }
 0x196   : > { %3364 = vrcp.f32 %v1927_v40  ;;  %v3351_v45 = vpop.eup %3350  ;;  %v1822_v11 = vmul.f32 1.442695, %v1738_v57  ;;  %v1520_v25 = vadd.f32 %v4207_v36, %v4436_v15  ;;  %v1828_v62 = vmul.f32 1.442695, %v1741_v1  ;;  %v4601_v34 = vpop.f32.mrb[70].mxu1 }
 0x197   : > { %3366 = vrcp.f32 %v1926_v6  ;;  %v2639_v18 = vsel %vm2319_vm12, %v4489_v0, %v2979_v47  ;;  %v1929_v23 = vadd.f32 1.0, %v3351_v45  ;;  %v4603_v30 = vpop.f32.mrb[70].mxu0  ;;  %v1826_v40 = vmul.f32 1.442695, %v1740_v21  ;;  %v4607_v51 = vpop.f32.mrb[71].mxu1 }
 0x198   : > { %3368 = vpow2.f32 %v1824_v4  ;;  %2703 = vst.msk [vmem:[%s4452_s10 + $0x58] sm:$0xff] %vm1140_vm1, %v2639_v18  ;;  %v1743_v2 = vsub.f32 0.0, %v1525_v35  ;;  %v1742_v44 = vsub.f32 0.0, %v1520_v25  ;;  %v925_v15 = vpop.f32.mrb[71].mxu0  ;;  %v1535_v0 = vadd.f32 %v4457_v32, %v4207_v36 }
 0x199   : > { %3370 = vpow2.f32 %v1822_v11  ;;  %v3353_v7 = vpop.eup %3352  ;;  %v1530_v4 = vadd.f32 %v4207_v36, %v4463_v59  ;;  %vm2321_vm14 = vcmp.gt.f32.partialorder %v4532_v24, 0.0  ;;  %vm2320_vm15 = vcmp.gt.f32.partialorder %v4553_v8, 0.0 }
 0x19a   : > { %3372 = vrcp.f32 %v1929_v23  ;;  %v2978_v57 = vadd.f32 -1.0, %v3353_v7  ;;  %v1832_v41 = vmul.f32 1.442695, %v1743_v2  ;;  %v1830_v47 = vmul.f32 1.442695, %v1742_v44  ;;  %v4614_v35 = vpop.f32.mrb[72].mxu1 }
 0x19b   : > { %v3355_v6 = vpop.eup %3354  ;;  %3374 = vpow2.f32 %v1828_v62  ;;  %v1745_v45 = vsub.f32 0.0, %v1535_v0  ;;  %v1744_v11 = vsub.f32 0.0, %v1530_v4  ;;  %v4616_v25 = vpop.f32.mrb[72].mxu0 }
 0x19c   : > { %v3357_v1 = vpop.eup %3356  ;;  %v2981_v21 = vadd.f32 -1.0, %v3355_v6  ;;  %3376 = vpow2.f32 %v1826_v40  ;;  %5479 = vst [vmem:[#allocation17_spill] sm:$0xff] %v4616_v25  ;;  %v2638_v59 = vsel %vm2318_vm13, %v4523_v9, %v2978_v57  ;;  %v4623_v23 = vpop.f32.mrb[73].mxu1 }
 0x19d   : > { %v3359_v32 = vpop.eup %3358  ;;  %v2117_v18 = vmul.f32 %v3357_v1, %v4325_v63  ;;  %3378 = vpow2.f32 %v1832_v41  ;;  %v930_v62 = vpop.f32.mrb[73].mxu0  ;;  %2702 = vst.msk [vmem:[%s4452_s10 + $0x50] sm:$0xff] %vm1140_vm1, %v2638_v59  ;;  %v1836_v15 = vmul.f32 1.442695, %v1745_v45  ;;  %v1834_v0 = vmul.f32 1.442695, %v1744_v11 }
 0x19e   : > { %v3361_v40 = vpop.eup %3360  ;;  %v2641_v2 = vsel %vm2321_vm14, %v4532_v24, %v2981_v21  ;;  %v2116_v44 = vmul.f32 %v3359_v32, %v4320_v17  ;;  %3380 = vpow2.f32 %v1830_v47  ;;  %v1545_v17 = vadd.f32 %v4484_v49, %v4207_v36  ;;  %v4636_v24 = vpop.f32.mrb[74].mxu1 }
 0x19f   : > { %v3363_v7 = vpop.eup %3362  ;;  %2705 = vst.msk [vmem:[%s4452_s10 + $0x68] sm:$0xff] %vm1140_vm1, %v2641_v2  ;;  %v2980_v9 = vadd.f32 -1.0, %v3361_v40  ;;  %v2188_v63 = vmul.f32 %v4316_v19, %v2117_v18  ;;  %3382 = vpow2.f32 %v1836_v15  ;;  %v4638_v41 = vpop.f32.mrb[74].mxu0 }
 0x1a0   : > { %v3365_v4 = vpop.eup %3364  ;;  %v2187_v6 = vmul.f32 %v4316_v19, %v2116_v44  ;;  %v1928_v57 = vadd.f32 1.0, %v3363_v7  ;;  %5480 = vst [vmem:[#allocation18_spill] sm:$0xff] %v4638_v41  ;;  %3384 = vpow2.f32 %v1834_v0  ;;  %v4645_v11 = vpop.f32.mrb[75].mxu1  ;;  %v4661_v44 = vadd.f32 %v4226_v33, %v4286_v13 }
 0x1a1   : > { %v3367_v47 = vpop.eup %3366  ;;  %v2640_v1 = vsel %vm2320_vm15, %v4553_v8, %v2980_v9  ;;  %v4642_v21 = vadd.f32 %v4334_v27, %v2188_v63  ;;  %v2119_v45 = vmul.f32 %v3365_v4, %v4340_v31  ;;  %v935_v32 = vpop.f32.mrb[75].mxu0  ;;  %v4655_v8 = vadd.f32 %v4226_v33, %v4266_v37 }
 0x1a2   : > { %v3369_v59 = vpop.eup %3368  ;;  %2704 = vst.msk [vmem:[%s4452_s10 + $0x60] sm:$0xff] %vm1140_vm1, %v2640_v1  ;;  %v4650_v49 = vadd.f32 %v4334_v27, %v2187_v6  ;;  %v2118_v18 = vmul.f32 %v3367_v47, %v4329_v39  ;;  %3386 = vrcp.f32 %v1928_v57  ;;  %v1747_v63 = vsub.f32 0.0, %v1545_v17  ;;  %v4665_v0 = vpop.f32.mrb[76].mxu1 }
 0x1a3   : > { %v3371_v62 = vpop.eup %3370  ;;  %v2387_v31 = vmin.f32 %v4642_v21, 0.0  ;;  %v2190_v40 = vmul.f32 %v4316_v19, %v2119_v45  ;;  %v1931_v2 = vadd.f32 1.0, %v3369_v59  ;;  %v4667_v37 = vpop.f32.mrb[76].mxu0  ;;  %vm2323_vm0 = vcmp.gt.f32.partialorder %v4642_v21, 0.0 }
 0x1a4   : > { %v3373_v15 = vpop.eup %3372  ;;  %v2386_v7 = vmin.f32 %v4650_v49, 0.0  ;;  %v2189_v39 = vmul.f32 %v4316_v19, %v2118_v18  ;;  %v1930_v9 = vadd.f32 1.0, %v3371_v62  ;;  %5481 = vst [vmem:[#allocation19_spill] sm:$0xff] %v4667_v37  ;;  %v4673_v47 = vpop.f32.mrb[77].mxu1  ;;  %v1840_v37 = vmul.f32 1.442695, %v1747_v63 }
 0x1a5   : > { %v3375_v4 = vpop.eup %3374  ;;  %v2466_v6 = vmul.f32 1.442695, %v2387_v31  ;;  %v4670_v57 = vadd.f32 %v4334_v27, %v2190_v40  ;;  %3388 = vrcp.f32 %v1931_v2  ;;  %v2121_v13 = vmul.f32 %v3373_v15, %v4352_v56  ;;  %v940_v1 = vpop.f32.mrb[77].mxu0 }
 0x1a6   : > { %v3377_v45 = vpop.eup %3376  ;;  %v2464_v32 = vmul.f32 1.442695, %v2386_v7  ;;  %v4676_v59 = vadd.f32 %v4334_v27, %v2189_v39  ;;  %3390 = vrcp.f32 %v1930_v9  ;;  %v1933_v17 = vadd.f32 1.0, %v3375_v4  ;;  %v4687_v39 = vpop.f32.mrb[78].mxu1 }
 0x1a7   : > { %v3379_v18 = vpop.eup %3378  ;;  %3392 = vpow2.f32 %v2466_v6  ;;  %v2389_v62 = vmin.f32 %v4670_v57, 0.0  ;;  %v2192_v31 = vmul.f32 %v4316_v19, %v2121_v13  ;;  %v1540_v40 = vadd.f32 %v4207_v36, %v4493_v28  ;;  %v4689_v9 = vpop.f32.mrb[78].mxu0 }
 0x1a8   : > { %v3381_v56 = vpop.eup %3380  ;;  %3394 = vpow2.f32 %v2464_v32  ;;  %v2388_v2 = vmin.f32 %v4676_v59, 0.0  ;;  %v1932_v15 = vadd.f32 1.0, %v3377_v45  ;;  %v4685_v7 = vadd.f32 %v4226_v33, %v4306_v52  ;;  %5482 = vst [vmem:[#allocation20_spill] sm:$0xff] %v4689_v9  ;;  %v4694_v36 = vpop.f32.mrb[79].mxu1 }
 0x1a9   : > { %v2470_v4 = vmul.f32 1.442695, %v2389_v62  ;;  %v4692_v6 = vadd.f32 %v4334_v27, %v2192_v31  ;;  %3396 = vrcp.f32 %v1933_v17  ;;  %v1935_v13 = vadd.f32 1.0, %v3379_v18  ;;  %v945_v28 = vpop.f32.mrb[79].mxu0  ;;  %v3383_v1 = vpop.eup %3382  ;;  %v4702_v18 = vld [vmem:[%s5459_s5] ss:$0 sm:$0xff] }
 0x1aa   : > { %v2468_v32 = vmul.f32 1.442695, %v2388_v2  ;;  %3398 = vrcp.f32 %v1932_v15  ;;  %v1934_v45 = vadd.f32 1.0, %v3381_v56  ;;  %v3385_v33 = vpop.eup %3384  ;;  %v1746_v62 = vsub.f32 0.0, %v1540_v40  ;;  %v4706_v31 = vpop.f32.mrb[80].mxu1 }
 0x1ab   : > { %3400 = vpow2.f32 %v2470_v4  ;;  %v2391_v52 = vmin.f32 %v4692_v6, 0.0  ;;  %vm2322_vm2 = vcmp.gt.f32.partialorder %v4650_v49, 0.0  ;;  %v1937_v17 = vadd.f32 1.0, %v3383_v1  ;;  %v4708_v56 = vpop.f32.mrb[80].mxu0  ;;  %v4713_v4 = vpop.f32.mrb[81].mxu1 }
 0x1ac   : > { %v3387_v9 = vpop.eup %3386  ;;  %3402 = vpow2.f32 %v2468_v32  ;;  %v1555_v63 = vadd.f32 %v4702_v18, %v4512_v53  ;;  %5483 = vst [vmem:[#allocation21_spill] sm:$0xff] %v4708_v56  ;;  %v1550_v15 = vadd.f32 %v4702_v18, %v4517_v26  ;;  %5484 = vst [vmem:[#allocation22_spill] sm:$0xff] %v4713_v4  ;;  %v950_v28 = vpop.f32.mrb[81].mxu0  ;;  %v1936_v1 = vadd.f32 1.0, %v3385_v33 }
 0x1ad   : > { %v2120_v2 = vmul.f32 %v3387_v9, %v4348_v55  ;;  %v2474_v40 = vmul.f32 1.442695, %v2391_v52  ;;  %3404 = vrcp.f32 %v1935_v13  ;;  %v1565_v53 = vadd.f32 %v4702_v18, %v4539_v48  ;;  %v4724_v13 = vld [vmem:[%s5457_s3] ss:$0 sm:$0xff] }
 0x1ae   : > { %3406 = vrcp.f32 %v1934_v45  ;;  %v1749_v32 = vsub.f32 0.0, %v1555_v63  ;;  %vm2325_vm3 = vcmp.gt.f32.partialorder %v4670_v57, 0.0  ;;  %v1838_v55 = vmul.f32 1.442695, %v1746_v62  ;;  %v4732_v52 = vpop.f32.mrb[82].mxu1  ;;  %v4734_v62 = vpop.f32.mrb[82].mxu0 }
 0x1af   : > { %v3389_v41 = vpop.eup %3388  ;;  %v2191_v56 = vmul.f32 %v4316_v19, %v2120_v2  ;;  %3408 = vpow2.f32 %v2474_v40  ;;  %vm2324_vm4 = vcmp.gt.f32.partialorder %v4676_v59, 0.0  ;;  %v869_v48 = vadd.f32 %v4724_v13, %v4342_v29  ;;  %5485 = vst [vmem:[#allocation23_spill] sm:$0xff] %v4732_v52  ;;  %5486 = vst [vmem:[#allocation24_spill] sm:$0xff] %v4734_v62  ;;  %v4740_v40 = vpop.f32.mrb[83].mxu1 }
 0x1b0   : > { %v3391_v9 = vpop.eup %3390  ;;  %v2123_v26 = vmul.f32 %v3389_v41, %v4655_v8  ;;  %v1748_v45 = vsub.f32 0.0, %v1550_v15  ;;  %v4730_v33 = vadd.f32 %v4724_v13, %v4368_v42  ;;  %3410 = vrcp.f32 %v1937_v17  ;;  %v955_v29 = vpop.f32.mrb[83].mxu0 }
 0x1b1   : > { %v3393_v63 = vpop.eup %3392  ;;  %v4737_v41 = vadd.f32 %v4334_v27, %v2191_v56  ;;  %v2122_v8 = vmul.f32 %v3391_v9, %v4360_v20  ;;  %v1844_v2 = vmul.f32 1.442695, %v1749_v32  ;;  %3412 = vrcp.f32 %v1936_v1 }
 0x1b2   : > { %v3395_v15 = vpop.eup %3394  ;;  %v2983_v28 = vadd.f32 -1.0, %v3393_v63  ;;  %v2194_v42 = vmul.f32 %v4316_v19, %v2123_v26  ;;  %v1751_v52 = vsub.f32 0.0, %v1565_v53  ;;  %vm2327_vm5 = vcmp.gt.f32.partialorder %v4692_v6, 0.0  ;;  %v4753_v53 = vpop.f32.mrb[84].mxu1 }
 0x1b3   : > { %v3397_v25 = vpop.eup %3396  ;;  %v2982_v62 = vadd.f32 -1.0, %v3395_v15  ;;  %v2390_v4 = vmin.f32 %v4737_v41, 0.0  ;;  %v2193_v20 = vmul.f32 %v4316_v19, %v2122_v8  ;;  %3414 = vpow2.f32 %v1840_v37  ;;  %v4755_v9 = vpop.f32.mrb[84].mxu0 }
 0x1b4   : > { %v3399_v17 = vpop.eup %3398  ;;  %v2643_v56 = vsel %vm2323_vm0, %v4642_v21, %v2983_v28  ;;  %v4750_v32 = vadd.f32 %v4334_v27, %v2194_v42  ;;  %v2125_v1 = vmul.f32 %v3397_v25, %v4685_v7  ;;  %3416 = vpow2.f32 %v1838_v55  ;;  %v4766_v29 = vpop.f32.mrb[85].mxu1 }
 0x1b5   : > { %v3401_v26 = vpop.eup %3400  ;;  %2707 = vst.msk [vmem:[%s4452_s10 + $0x78] sm:$0xff] %vm1140_vm1, %v2643_v56  ;;  %v2642_v37 = vsel %vm2322_vm2, %v4650_v49, %v2982_v62  ;;  %v2472_v63 = vmul.f32 1.442695, %v2390_v4  ;;  %v4763_v21 = vadd.f32 %v4334_v27, %v2193_v20  ;;  %v2124_v8 = vmul.f32 %v3399_v17, %v4661_v44  ;;  %v960_v25 = vpop.f32.mrb[85].mxu0 }
 0x1b6   : > { %v3403_v7 = vpop.eup %3402  ;;  %2706 = vst.msk [vmem:[%s4452_s10 + $0x70] sm:$0xff] %vm1140_vm1, %v2642_v37  ;;  %v2985_v55 = vadd.f32 -1.0, %v3401_v26  ;;  %v2393_v15 = vmin.f32 %v4750_v32, 0.0  ;;  %v2196_v28 = vmul.f32 %v4316_v19, %v2125_v1  ;;  %v1842_v42 = vmul.f32 1.442695, %v1748_v45  ;;  %v4780_v1 = vpop.f32.mrb[86].mxu1 }
 0x1b7   : > { %v3405_v49 = vpop.eup %3404  ;;  %v2984_v4 = vadd.f32 -1.0, %v3403_v7  ;;  %3418 = vpow2.f32 %v2472_v63  ;;  %v2392_v62 = vmin.f32 %v4763_v21, 0.0  ;;  %v1848_v20 = vmul.f32 1.442695, %v1751_v52  ;;  %v4782_v45 = vpop.f32.mrb[86].mxu0 }
 0x1b8   : > { %v3407_v44 = vpop.eup %3406  ;;  %v2645_v17 = vsel %vm2325_vm3, %v4670_v57, %v2985_v55  ;;  %v2478_v56 = vmul.f32 1.442695, %v2393_v15  ;;  %v2195_v26 = vmul.f32 %v4316_v19, %v2124_v8  ;;  %v4778_v37 = vadd.f32 %v4334_v27, %v2196_v28  ;;  %v4789_v7 = vpop.f32.mrb[87].mxu1 }
 0x1b9   : > { %v3409_v63 = vpop.eup %3408  ;;  %2709 = vst.msk [vmem:[%s4452_s10 + $0x88] sm:$0xff] %vm1140_vm1, %v2645_v17  ;;  %v2644_v52 = vsel %vm2324_vm4, %v4676_v59, %v2984_v4  ;;  %v2476_v25 = vmul.f32 1.442695, %v2392_v62  ;;  %3420 = vpow2.f32 %v1844_v2  ;;  %v2126_v57 = vmul.f32 %v3407_v44, %v869_v48  ;;  %v965_v8 = vpop.f32.mrb[87].mxu0 }
 0x1ba   : > { %2708 = vst.msk [vmem:[%s4452_s10 + $0x80] sm:$0xff] %vm1140_vm1, %v2644_v52  ;;  %v2987_v55 = vadd.f32 -1.0, %v3409_v63  ;;  %3422 = vpow2.f32 %v2478_v56  ;;  %v4794_v15 = vadd.f32 %v4334_v27, %v2195_v26  ;;  %v1560_v28 = vadd.f32 %v4702_v18, %v4547_v43  ;;  %v4798_v17 = vpop.eup %3410  ;;  %v4811_v56 = vpop.f32.mrb[88].mxu1 }
 0x1bb   : > { %3424 = vpow2.f32 %v2476_v25  ;;  %v2395_v59 = vmin.f32 %v4778_v37, 0.0  ;;  %v2197_v48 = vmul.f32 %v4316_v19, %v2126_v57  ;;  %v2127_v2 = vmul.f32 %v3405_v49, %v4730_v33  ;;  %v3413_v4 = vpop.eup %3412  ;;  %v4813_v26 = vpop.f32.mrb[88].mxu0 }
 0x1bc   : > { %v4805_v62 = vadd.f32 %v4724_v13, %v4152_v46  ;;  %v2647_v44 = vsel %vm2327_vm5, %v4692_v6, %v2987_v55  ;;  %v2394_v43 = vmin.f32 %v4794_v15, 0.0  ;;  %3426 = vpow2.f32 %v1842_v42  ;;  %5487 = vst [vmem:[#allocation25_spill] sm:$0xff] %v4813_v26  ;;  %v4821_v33 = vpop.f32.mrb[89].mxu1  ;;  %v970_v6 = vpop.f32.mrb[89].mxu0  ;;  %v4826_v42 = vld [vmem:[%s5460_s6] ss:$0 sm:$0xff] }
 0x1bd   : > { %v3415_v63 = vpop.eup %3414  ;;  %vm2326_vm6 = vcmp.gt.f32.partialorder %v4737_v41, 0.0  ;;  %2711 = vst.msk [vmem:[%s4452_s10 + $0x98] sm:$0xff] %vm1140_vm1, %v2647_v44  ;;  %v2482_v19 = vmul.f32 1.442695, %v2395_v59  ;;  %v4819_v46 = vadd.f32 %v4334_v27, %v2197_v48  ;;  %3428 = vpow2.f32 %v1848_v20  ;;  %5488 = vst [vmem:[#allocation26_spill] sm:$0xff] %v4821_v33 }
 0x1be   : > { %v3417_v49 = vpop.eup %3416  ;;  %v2480_v52 = vmul.f32 1.442695, %v2394_v43  ;;  %v2198_v25 = vmul.f32 %v4826_v42, %v2127_v2  ;;  %v1750_v57 = vsub.f32 0.0, %v1560_v28  ;;  %v1575_v8 = vadd.f32 %v4702_v18, %v4561_v10  ;;  %v4837_v55 = vld [vmem:[%s5461_s7] ss:$0 sm:$0xff]  ;;  %v4842_v2 = vpop.f32.mrb[90].mxu0 }
 0x1bf   : > { %vm2328_vm7 = vcmp.gt.f32.partialorder %v4763_v21, 0.0  ;;  %vm2329_vm8 = vcmp.gt.f32.partialorder %v4750_v32, 0.0  ;;  %v1938_v27 = vadd.f32 1.0, %v3417_v49  ;;  %v2396_v20 = vmin.f32 %v4819_v46, 0.0  ;;  %5489 = vst [vmem:[#allocation27_spill] sm:$0xff] %v4842_v2  ;;  %v4844_v10 = vpop.f32.mrb[90].mxu1 }
 0x1c0   : > { %3430 = vpow2.f32 %v2480_v52  ;;  %v4840_v59 = vadd.f32 %v4837_v55, %v2198_v25  ;;  %v1846_v28 = vmul.f32 1.442695, %v1750_v57  ;;  %v1753_v48 = vsub.f32 0.0, %v1575_v8  ;;  %5490 = vst [vmem:[#allocation28_spill] sm:$0xff] %v4844_v10  ;;  %v4850_v52 = vpop.f32.mrb[91].mxu1  ;;  %v975_v26 = vpop.f32.mrb[91].mxu0 }
 0x1c1   : > { %v3419_v44 = vpop.eup %3418  ;;  %3432 = vpow2.f32 %v2482_v19  ;;  %v2484_v43 = vmul.f32 1.442695, %v2396_v20  ;;  %v879_v6 = vadd.f32 %v4724_v13, %v4391_v3  ;;  %v1570_v49 = vadd.f32 %v4702_v18, %v4568_v12 }
 0x1c2   : > { %v2986_v25 = vadd.f32 -1.0, %v3419_v44  ;;  %v1939_v33 = vadd.f32 1.0, %v3415_v63  ;;  %3434 = vrcp.f32 %v1938_v27  ;;  %v2397_v57 = vmin.f32 %v4840_v59, 0.0  ;;  %v4857_v63 = vpop.f32.mrb[92].mxu1  ;;  %v4859_v27 = vpop.f32.mrb[92].mxu0 }
 0x1c3   : > { %v3421_v8 = vpop.eup %3420  ;;  %3436 = vpow2.f32 %v2484_v43  ;;  %v1852_v10 = vmul.f32 1.442695, %v1753_v48  ;;  %v2128_v19 = vmul.f32 %v3413_v4, %v879_v6  ;;  %v1752_v20 = vsub.f32 0.0, %v1570_v49  ;;  %v4865_v43 = vpop.f32.mrb[93].mxu1 }
 0x1c4   : > { %v3423_v2 = vpop.eup %3422  ;;  %v2646_v3 = vsel %vm2326_vm6, %v4737_v41, %v2986_v25  ;;  %vm2330_vm9 = vcmp.gt.f32.partialorder %v4794_v15, 0.0  ;;  %v1941_v12 = vadd.f32 1.0, %v3421_v8  ;;  %v2486_v26 = vmul.f32 1.442695, %v2397_v57  ;;  %v980_v6 = vpop.f32.mrb[93].mxu0 }
 0x1c5   : > { %3438 = vpow2.f32 %v1846_v28  ;;  %v3425_v44 = vpop.eup %3424  ;;  %2710 = vst.msk [vmem:[%s4452_s10 + $0x90] sm:$0xff] %vm1140_vm1, %v2646_v3  ;;  %v2989_v48 = vadd.f32 -1.0, %v3423_v2  ;;  %vm2331_vm10 = vcmp.gt.f32.partialorder %v4778_v37, 0.0  ;;  %v2199_v4 = vmul.f32 %v4826_v42, %v2128_v19 }
 0x1c6   : > { %3440 = vpow2.f32 %v1852_v10  ;;  %v1850_v41 = vmul.f32 1.442695, %v1752_v20  ;;  %v3427_v49 = vpop.eup %3426  ;;  %v2988_v28 = vadd.f32 -1.0, %v3425_v44  ;;  %v1585_v25 = vadd.f32 %v4702_v18, %v4583_v5  ;;  %v4883_v5 = vpop.f32.mrb[94].mxu0 }
 0x1c7   : > { %3442 = vrcp.f32 %v1939_v33  ;;  %v884_v2 = vadd.f32 %v4724_v13, %v4414_v22  ;;  %v3429_v57 = vpop.eup %3428  ;;  %v2649_v10 = vsel %vm2329_vm8, %v4750_v32, %v2989_v48  ;;  %v1940_v8 = vadd.f32 1.0, %v3427_v49  ;;  %v4885_v20 = vpop.f32.mrb[94].mxu1 }
 0x1c8   : > { %3444 = vpow2.f32 %v2486_v26  ;;  %v4875_v19 = vadd.f32 %v4837_v55, %v2199_v4  ;;  %v2648_v33 = vsel %vm2328_vm7, %v4763_v21, %v2988_v28  ;;  %2713 = vst.msk [vmem:[%s4452_s10 + $0xa8] sm:$0xff] %vm1140_vm1, %v2649_v10  ;;  %vm2332_vm11 = vcmp.gt.f32.partialorder %v4819_v46, 0.0  ;;  %v4891_v44 = vpop.f32.mrb[95].mxu1  ;;  %v985_v21 = vpop.f32.mrb[95].mxu0 }
 0x1c9   : > { %3446 = vpow2.f32 %v1850_v41  ;;  %v1755_v22 = vsub.f32 0.0, %v1585_v25  ;;  %2712 = vst.msk [vmem:[%s4452_s10 + $0xa0] sm:$0xff] %vm1140_vm1, %v2648_v33  ;;  %v1943_v32 = vadd.f32 1.0, %v3429_v57  ;;  %v2129_v26 = vmul.f32 %v4798_v17, %v884_v2 }
 0x1ca   : > { %3448 = vrcp.f32 %v1941_v12  ;;  %v2398_v3 = vmin.f32 %v4875_v19, 0.0  ;;  %v3431_v48 = vpop.eup %3430  ;;  %v1580_v41 = vadd.f32 %v4702_v18, %v4590_v16  ;;  %v1595_v6 = vadd.f32 %v4702_v18, %v4601_v34 }
 0x1cb   : > { %3450 = vrcp.f32 %v1940_v8  ;;  %v1856_v4 = vmul.f32 1.442695, %v1755_v22  ;;  %v3433_v49 = vpop.eup %3432  ;;  %v2990_v12 = vadd.f32 -1.0, %v3431_v48  ;;  %v2200_v25 = vmul.f32 %v4826_v42, %v2129_v26 }
 0x1cc   : > { %v2488_v28 = vmul.f32 1.442695, %v2398_v3  ;;  %v889_v17 = vadd.f32 %v4724_v13, %v4431_v14  ;;  %v3435_v2 = vpop.eup %3434  ;;  %v2991_v57 = vadd.f32 -1.0, %v3433_v49  ;;  %v1754_v10 = vsub.f32 0.0, %v1580_v41 }
 0x1cd   : > { %3452 = vpow2.f32 %v1856_v4  ;;  %v1757_v8 = vsub.f32 0.0, %v1595_v6  ;;  %v3437_v33 = vpop.eup %3436  ;;  %v2650_v16 = vsel %vm2330_vm9, %v4794_v15, %v2990_v12  ;;  %v4904_v34 = vadd.f32 %v4837_v55, %v2200_v25 }
 0x1ce   : > { %3454 = vpow2.f32 %v2488_v28  ;;  %v2130_v22 = vmul.f32 %v3435_v2, %v889_v17  ;;  %2714 = vst.msk [vmem:[%s4452_s10 + $0xb0] sm:$0xff] %vm1140_vm1, %v2650_v16  ;;  %v2651_v14 = vsel %vm2331_vm10, %v4778_v37, %v2991_v57  ;;  %v2992_v26 = vadd.f32 -1.0, %v3437_v33 }
 0x1cf   : > { %v3439_v3 = vpop.eup %3438  ;;  %3456 = vrcp.f32 %v1943_v32  ;;  %v1854_v21 = vmul.f32 1.442695, %v1754_v10  ;;  %2715 = vst.msk [vmem:[%s4452_s10 + $0xb8] sm:$0xff] %vm1140_vm1, %v2651_v14  ;;  %v2399_v4 = vmin.f32 %v4904_v34, 0.0  ;;  %v1860_v41 = vmul.f32 1.442695, %v1757_v8 }
 0x1d0   : > { %v3441_v48 = vpop.eup %3440  ;;  %v1942_v15 = vadd.f32 1.0, %v3439_v3  ;;  %v2201_v6 = vmul.f32 %v4826_v42, %v2130_v22  ;;  %v2652_v12 = vsel %vm2332_vm11, %v4819_v46, %v2992_v26  ;;  %v1590_v37 = vadd.f32 %v4702_v18, %v4607_v51 }
 0x1d1   : > { %v3443_v49 = vpop.eup %3442  ;;  %v1945_v28 = vadd.f32 1.0, %v3441_v48  ;;  %3458 = vpow2.f32 %v1854_v21  ;;  %2716 = vst.msk [vmem:[%s4452_s10 + $0xc0] sm:$0xff] %vm1140_vm1, %v2652_v12  ;;  %v2490_v25 = vmul.f32 1.442695, %v2399_v4  ;;  %v1605_v2 = vadd.f32 %v4702_v18, %v4614_v35 }
 0x1d2   : > { %v3445_v32 = vpop.eup %3444  ;;  %3460 = vrcp.f32 %v1942_v15  ;;  %v4923_v17 = vadd.f32 %v4837_v55, %v2201_v6  ;;  %vm2333_vm12 = vcmp.gt.f32.partialorder %v4840_v59, 0.0  ;;  %v1756_v10 = vsub.f32 0.0, %v1590_v37 }
 0x1d3   : > { %v3447_v57 = vpop.eup %3446  ;;  %v2993_v46 = vadd.f32 -1.0, %v3445_v32  ;;  %3462 = vrcp.f32 %v1945_v28  ;;  %vm2334_vm13 = vcmp.gt.f32.partialorder %v4875_v19, 0.0  ;;  %v894_v33 = vadd.f32 %v4724_v13, %v4459_v61 }
 0x1d4   : > { %v3449_v8 = vpop.eup %3448  ;;  %3464 = vpow2.f32 %v2490_v25  ;;  %v2400_v51 = vmin.f32 %v4923_v17, 0.0  ;;  %v1858_v35 = vmul.f32 1.442695, %v1756_v10  ;;  %v1759_v3 = vsub.f32 0.0, %v1605_v2 }
 0x1d5   : > { %v3451_v16 = vpop.eup %3450  ;;  %v2653_v22 = vsel %vm2333_vm12, %v4840_v59, %v2993_v46  ;;  %3466 = vpow2.f32 %v1860_v41  ;;  %v1944_v14 = vadd.f32 1.0, %v3447_v57  ;;  %v2131_v21 = vmul.f32 %v3443_v49, %v894_v33 }
 0x1d6   : > { %2717 = vst.msk [vmem:[%s4452_s10 + $0xc8] sm:$0xff] %vm1140_vm1, %v2653_v22  ;;  %v2492_v26 = vmul.f32 1.442695, %v2400_v51  ;;  %v1600_v48 = vadd.f32 %v4702_v18, %v4623_v23  ;;  %3468 = vpow2.f32 %v1858_v35  ;;  %v1864_v4 = vmul.f32 1.442695, %v1759_v3 }
 0x1d7   : > { %v3453_v15 = vpop.eup %3452  ;;  %v1615_v61 = vadd.f32 %v4702_v18, %v4636_v24  ;;  %v899_v59 = vadd.f32 %v4724_v13, %v4486_v58  ;;  %v2202_v12 = vmul.f32 %v4826_v42, %v2131_v21  ;;  %v1610_v58 = vadd.f32 %v4702_v18, %v4645_v11 }
 0x1d8   : > { %v3455_v41 = vpop.eup %3454  ;;  %v1947_v6 = vadd.f32 1.0, %v3453_v15  ;;  %3470 = vpow2.f32 %v2492_v26  ;;  %v1758_v28 = vsub.f32 0.0, %v1600_v48  ;;  %v904_v51 = vadd.f32 %v4724_v13, %v4514_v60 }
 0x1d9   : > { %v4942_v49 = vpop.eup %3456  ;;  %v2994_v37 = vadd.f32 -1.0, %v3455_v41  ;;  %3472 = vpow2.f32 %v1864_v4  ;;  %v1761_v23 = vsub.f32 0.0, %v1615_v61  ;;  %v2132_v32 = vmul.f32 %v3451_v16, %v899_v59 }
 0x1da   : > { %3474 = vrcp.f32 %v1944_v14  ;;  %v4945_v25 = vadd.f32 %v4837_v55, %v2202_v12  ;;  %v1862_v24 = vmul.f32 1.442695, %v1758_v28  ;;  %vm2335_vm14 = vcmp.gt.f32.partialorder %v4904_v34, 0.0 }
 0x1db   : > { %v3459_v2 = vpop.eup %3458  ;;  %v2654_v57 = vsel %vm2334_vm13, %v4875_v19, %v2994_v37  ;;  %v1868_v46 = vmul.f32 1.442695, %v1761_v23  ;;  %v2203_v10 = vmul.f32 %v4826_v42, %v2132_v32  ;;  %v1760_v35 = vsub.f32 0.0, %v1610_v58 }
 0x1dc   : > { %v3461_v33 = vpop.eup %3460  ;;  %2718 = vst.msk [vmem:[%s4452_s10 + $0xd0] sm:$0xff] %vm1140_vm1, %v2654_v57  ;;  %v1946_v16 = vadd.f32 1.0, %v3459_v2  ;;  %v2401_v22 = vmin.f32 %v4945_v25, 0.0  ;;  %3476 = vpow2.f32 %v1862_v24  ;;  %v2133_v3 = vmul.f32 %v3449_v8, %v904_v51 }
 0x1dd   : > { %v4959_v11 = vpop.eup %3462  ;;  %3478 = vrcp.f32 %v1947_v6  ;;  %v4962_v19 = vadd.f32 %v4837_v55, %v2203_v10  ;;  %v1625_v60 = vadd.f32 %v4702_v18, %v4665_v0  ;;  %v1620_v21 = vadd.f32 %v4702_v18, %v4673_v47 }
 0x1de   : > { %v3465_v14 = vpop.eup %3464  ;;  %v2494_v26 = vmul.f32 1.442695, %v2401_v22  ;;  %3480 = vpow2.f32 %v1868_v46  ;;  %v1866_v61 = vmul.f32 1.442695, %v1760_v35  ;;  %v2204_v8 = vmul.f32 %v4826_v42, %v2133_v3  ;;  %v5492_v35 = vld [vmem:[#allocation16_spill] sm:$0xff] }
 0x1df   : > { %v3467_v48 = vpop.eup %3466  ;;  %v2995_v15 = vadd.f32 -1.0, %v3465_v14  ;;  %3482 = vrcp.f32 %v1946_v16  ;;  %v2402_v4 = vmin.f32 %v4962_v19, 0.0  ;;  %v1763_v41 = vsub.f32 0.0, %v1625_v60 }
 0x1e0   : > { %v1949_v59 = vadd.f32 1.0, %v3467_v48  ;;  %3484 = vpow2.f32 %v2494_v26  ;;  %v3469_v6 = vpop.eup %3468  ;;  %v4972_v12 = vadd.f32 %v4724_v13, %v4156_v50  ;;  %v4980_v23 = vadd.f32 %v4837_v55, %v2204_v8  ;;  %v5493_v48 = vld [vmem:[#allocation2_spill] sm:$0xff] }
 0x1e1   : > { %v2655_v0 = vsel %vm2335_vm14, %v4904_v34, %v2995_v15  ;;  %v2496_v47 = vmul.f32 1.442695, %v2402_v4  ;;  %3486 = vpow2.f32 %v1866_v61  ;;  %v1948_v37 = vadd.f32 1.0, %v3469_v6  ;;  %v5491_v34 = vld [vmem:[#allocation15_spill] sm:$0xff] }
 0x1e2   : > { %v3471_v28 = vpop.eup %3470  ;;  %2719 = vst.msk [vmem:[%s4452_s10 + $0xd8] sm:$0xff] %vm1140_vm1, %v2655_v0  ;;  %v1872_v32 = vmul.f32 1.442695, %v1763_v41  ;;  %v1762_v24 = vsub.f32 0.0, %v1620_v21  ;;  %v4984_v50 = vadd.f32 %v4724_v13, %v4160_v54  ;;  %v909_v57 = vadd.f32 %v4724_v13, %v5491_v34 }
 0x1e3   : > { %v3473_v58 = vpop.eup %3472  ;;  %v2996_v2 = vadd.f32 -1.0, %v3471_v28  ;;  %3488 = vpow2.f32 %v2496_v47  ;;  %vm2336_vm15 = vcmp.gt.f32.partialorder %v4923_v17, 0.0  ;;  %v2403_v51 = vmin.f32 %v4980_v23, 0.0 }
 0x1e4   : > { %v3475_v46 = vpop.eup %3474  ;;  %3490 = vrcp.f32 %v1949_v59  ;;  %v1951_v10 = vadd.f32 1.0, %v3473_v58  ;;  %v2134_v22 = vmul.f32 %v3461_v33, %v909_v57  ;;  %v914_v54 = vadd.f32 %v4724_v13, %v5492_v35 }
 0x1e5   : > { %v2656_v16 = vsel %vm2336_vm15, %v4923_v17, %v2996_v2  ;;  %3492 = vrcp.f32 %v1948_v37  ;;  %v2498_v14 = vmul.f32 1.442695, %v2403_v51  ;;  %v1870_v26 = vmul.f32 1.442695, %v1762_v24 }
 0x1e6   : > { %v3477_v3 = vpop.eup %3476  ;;  %2720 = vst.msk [vmem:[%s4452_s10 + $0xe0] sm:$0xff] %vm1140_vm1, %v2656_v16  ;;  %3494 = vpow2.f32 %v1872_v32  ;;  %v1635_v60 = vadd.f32 %v4702_v18, %v4687_v39  ;;  %v5001_v15 = vadd.f32 %v4724_v13, %v5493_v48  ;;  %v2205_v17 = vmul.f32 %v4826_v42, %v2134_v22 }
 0x1e7   : > { %v4997_v21 = vpop.eup %3478  ;;  %3496 = vrcp.f32 %v1951_v10  ;;  %v2135_v33 = vmul.f32 %v4942_v49, %v914_v54  ;;  %vm2337_vm0 = vcmp.gt.f32.partialorder %v4945_v25, 0.0  ;;  %v1630_v59 = vadd.f32 %v4702_v18, %v4694_v36 }
 0x1e8   : > { %v3481_v4 = vpop.eup %3480  ;;  %3498 = vpow2.f32 %v2498_v14  ;;  %v1765_v61 = vsub.f32 0.0, %v1635_v60  ;;  %v1950_v8 = vadd.f32 1.0, %v3477_v3  ;;  %v5011_v41 = vadd.f32 %v4837_v55, %v2205_v17  ;;  %v5494_v14 = vld [vmem:[#allocation22_spill] sm:$0xff] }
 0x1e9   : > { %v5008_v39 = vpop.eup %3482  ;;  %v2206_v6 = vmul.f32 %v4826_v42, %v2135_v33  ;;  %v919_v0 = vadd.f32 %v4724_v13, %v4585_v38  ;;  %vm2338_vm2 = vcmp.gt.f32.partialorder %v4962_v19, 0.0  ;;  %3500 = vpow2.f32 %v1870_v26 }
 0x1ea   : > { %v3485_v49 = vpop.eup %3484  ;;  %v1876_v47 = vmul.f32 1.442695, %v1765_v61  ;;  %v924_v28 = vadd.f32 %v4724_v13, %v4603_v30  ;;  %v1953_v32 = vadd.f32 1.0, %v3481_v4  ;;  %v2404_v24 = vmin.f32 %v5011_v41, 0.0 }
 0x1eb   : > { %v3487_v36 = vpop.eup %3486  ;;  %v2997_v37 = vadd.f32 -1.0, %v3485_v49  ;;  %v5021_v58 = vadd.f32 %v4837_v55, %v2206_v6  ;;  %v1764_v2 = vsub.f32 0.0, %v1630_v59  ;;  %v2136_v38 = vmul.f32 %v3475_v46, %v919_v0  ;;  %v5495_v6 = vld [vmem:[#allocation3_spill] sm:$0xff] }
 0x1ec   : > { %3502 = vpow2.f32 %v1876_v47  ;;  %v2137_v34 = vmul.f32 %v4959_v11, %v924_v28  ;;  %v2500_v30 = vmul.f32 1.442695, %v2404_v24  ;;  %v1952_v35 = vadd.f32 1.0, %v3487_v36 }
 0x1ed   : > { %v3489_v57 = vpop.eup %3488  ;;  %v2657_v10 = vsel %vm2337_vm0, %v4945_v25, %v2997_v37  ;;  %3504 = vrcp.f32 %v1950_v8  ;;  %v2405_v51 = vmin.f32 %v5021_v58, 0.0  ;;  %v2207_v46 = vmul.f32 %v4826_v42, %v2136_v38 }
 0x1ee   : > { %v5028_v16 = vpop.eup %3490  ;;  %2721 = vst.msk [vmem:[%s4452_s10 + $0xe8] sm:$0xff] %vm1140_vm1, %v2657_v10  ;;  %v2998_v22 = vadd.f32 -1.0, %v3489_v57  ;;  %v2208_v11 = vmul.f32 %v4826_v42, %v2137_v34  ;;  %3506 = vpow2.f32 %v2500_v30  ;;  %v1645_v25 = vadd.f32 %v4702_v18, %v4706_v31  ;;  %v5497_v10 = vld [vmem:[#allocation18_spill] sm:$0xff] }
 0x1ef   : > { %v3493_v54 = vpop.eup %3492  ;;  %v2502_v3 = vmul.f32 1.442695, %v2405_v51  ;;  %v1640_v26 = vadd.f32 %v4702_v18, %v5494_v14  ;;  %3508 = vrcp.f32 %v1953_v32  ;;  %v1874_v17 = vmul.f32 1.442695, %v1764_v2  ;;  %v5496_v2 = vld [vmem:[#allocation17_spill] sm:$0xff]  ;;  %v5499_v14 = vld [vmem:[#allocation19_spill] sm:$0xff] }
 0x1f0   : > { %v3495_v60 = vpop.eup %3494  ;;  %v2658_v48 = vsel %vm2338_vm2, %v4962_v19, %v2998_v22  ;;  %v5042_v33 = vadd.f32 %v4837_v55, %v2207_v46  ;;  %v5049_v31 = vadd.f32 %v4837_v55, %v2208_v11  ;;  %v1767_v61 = vsub.f32 0.0, %v1645_v25 }
 0x1f1   : > { %v5044_v4 = vpop.eup %3496  ;;  %2722 = vst.msk [vmem:[%s4452_s10 + $0xf0] sm:$0xff] %vm1140_vm1, %v2658_v48  ;;  %3510 = vpow2.f32 %v2502_v3  ;;  %v1766_v59 = vsub.f32 0.0, %v1640_v26  ;;  %v5053_v0 = vadd.f32 %v4724_v13, %v5495_v6  ;;  %vm2339_vm3 = vcmp.gt.f32.partialorder %v4980_v23, 0.0 }
 0x1f2   : > { %v3499_v8 = vpop.eup %3498  ;;  %3512 = vrcp.f32 %v1952_v35  ;;  %v2406_v19 = vmin.f32 %v5042_v33, 0.0  ;;  %v1955_v47 = vadd.f32 1.0, %v3495_v60  ;;  %vm2340_vm4 = vcmp.gt.f32.partialorder %v5011_v41, 0.0  ;;  %v5498_v35 = vld [vmem:[#allocation23_spill] sm:$0xff] }
 0x1f3   : > { %v2999_v49 = vadd.f32 -1.0, %v3499_v8  ;;  %v2407_v28 = vmin.f32 %v5049_v31, 0.0  ;;  %v1880_v36 = vmul.f32 1.442695, %v1767_v61  ;;  %v3501_v37 = vpop.eup %3500  ;;  %3514 = vpow2.f32 %v1874_v17 }
 0x1f4   : > { %v2504_v32 = vmul.f32 1.442695, %v2406_v19  ;;  %v1878_v24 = vmul.f32 1.442695, %v1766_v59  ;;  %v929_v38 = vadd.f32 %v4724_v13, %v5496_v2  ;;  %vm2341_vm5 = vcmp.gt.f32.partialorder %v5021_v58, 0.0 }
 0x1f5   : > { %v2659_v34 = vsel %vm2339_vm3, %v4980_v23, %v2999_v49  ;;  %v2506_v57 = vmul.f32 1.442695, %v2407_v28  ;;  %3516 = vpow2.f32 %v1880_v36  ;;  %v934_v30 = vadd.f32 %v4724_v13, %v5497_v10 }
 0x1f6   : > { %v3503_v51 = vpop.eup %3502  ;;  %2723 = vst.msk [vmem:[%s4452_s10 + $0xf8] sm:$0xff] %vm1140_vm1, %v2659_v34  ;;  %3518 = vpow2.f32 %v2504_v32  ;;  %v2138_v22 = vmul.f32 %v5008_v39, %v929_v38  ;;  %v1655_v46 = vadd.f32 %v4702_v18, %v5498_v35  ;;  %v1650_v11 = vadd.f32 %v4702_v18, %v4740_v40  ;;  %v5500_v40 = vld [vmem:[#allocation20_spill] sm:$0xff] }
 0x1f7   : > { %v5072_v23 = vpop.eup %3504  ;;  %v1954_v3 = vadd.f32 1.0, %v3501_v37  ;;  %3520 = vpow2.f32 %v2506_v57  ;;  %v2139_v25 = vmul.f32 %v4997_v21, %v934_v30  ;;  %v939_v26 = vadd.f32 %v4724_v13, %v5499_v14 }
 0x1f8   : > { %3522 = vpow2.f32 %v1878_v24  ;;  %v2209_v60 = vmul.f32 %v4826_v42, %v2138_v22  ;;  %v1769_v48 = vsub.f32 0.0, %v1655_v46  ;;  %v1768_v39 = vsub.f32 0.0, %v1650_v11  ;;  %v3507_v17 = vpop.eup %3506 }
 0x1f9   : > { %v1957_v61 = vadd.f32 1.0, %v3503_v51  ;;  %v2210_v59 = vmul.f32 %v4826_v42, %v2139_v25  ;;  %v2140_v8 = vmul.f32 %v3493_v54, %v939_v26  ;;  %v944_v6 = vadd.f32 %v4724_v13, %v5500_v40  ;;  %v5081_v19 = vpop.eup %3508 }
 0x1fa   : > { %3524 = vrcp.f32 %v1955_v47  ;;  %v3000_v21 = vadd.f32 -1.0, %v3507_v17  ;;  %v5084_v49 = vadd.f32 %v4837_v55, %v2209_v60  ;;  %v1884_v28 = vmul.f32 1.442695, %v1769_v48 }
 0x1fb   : > { %v3511_v36 = vpop.eup %3510  ;;  %v5087_v37 = vadd.f32 %v4837_v55, %v2210_v59  ;;  %v1882_v32 = vmul.f32 1.442695, %v1768_v39  ;;  %v2211_v24 = vmul.f32 %v4826_v42, %v2140_v8  ;;  %v2141_v54 = vmul.f32 %v5028_v16, %v944_v6 }
 0x1fc   : > { %v5091_v2 = vpop.eup %3512  ;;  %3526 = vrcp.f32 %v1954_v3  ;;  %v2660_v47 = vsel %vm2340_vm4, %v5011_v41, %v3000_v21  ;;  %v3001_v38 = vadd.f32 -1.0, %v3511_v36  ;;  %v2408_v34 = vmin.f32 %v5084_v49, 0.0  ;;  %v5501_v36 = vld [vmem:[#allocation21_spill] sm:$0xff] }
 0x1fd   : > { %2724 = vst.msk [vmem:[%s4452_s10 + $0x100] sm:$0xff] %vm1140_vm1, %v2660_v47  ;;  %3528 = vrcp.f32 %v1957_v61  ;;  %vm2342_vm6 = vcmp.gt.f32.partialorder %v5042_v33, 0.0  ;;  %v2409_v57 = vmin.f32 %v5087_v37, 0.0  ;;  %v5102_v16 = vadd.f32 %v4837_v55, %v2211_v24  ;;  %v3515_v10 = vpop.eup %3514  ;;  %v5502_v24 = vld [vmem:[#allocation24_spill] sm:$0xff] }
 0x1fe   : > { %v2661_v30 = vsel %vm2341_vm5, %v5021_v58, %v3001_v38  ;;  %v2508_v51 = vmul.f32 1.442695, %v2408_v34  ;;  %3530 = vpow2.f32 %v1884_v28  ;;  %v2212_v41 = vmul.f32 %v4826_v42, %v2141_v54 }
 0x1ff   : > { %v3517_v22 = vpop.eup %3516  ;;  %2725 = vst.msk [vmem:[%s4452_s10 + $0x108] sm:$0xff] %vm1140_vm1, %v2661_v30  ;;  %vm2343_vm7 = vcmp.gt.f32.partialorder %v5049_v31, 0.0  ;;  %v2510_v35 = vmul.f32 1.442695, %v2409_v57  ;;  %3532 = vpow2.f32 %v1882_v32  ;;  %v2410_v46 = vmin.f32 %v5102_v16, 0.0 }
 0x200   : > { %v3519_v11 = vpop.eup %3518  ;;  %v1959_v3 = vadd.f32 1.0, %v3517_v22  ;;  %3534 = vpow2.f32 %v2508_v51  ;;  %v5113_v25 = vadd.f32 %v4837_v55, %v2212_v41  ;;  %v1665_v58 = vadd.f32 %v4702_v18, %v4753_v53 }
 0x201   : > { %v3521_v14 = vpop.eup %3520  ;;  %v3002_v26 = vadd.f32 -1.0, %v3519_v11  ;;  %3536 = vpow2.f32 %v2510_v35  ;;  %v2512_v60 = vmul.f32 1.442695, %v2410_v46  ;;  %v1660_v48 = vadd.f32 %v4702_v18, %v4766_v29 }
 0x202   : > { %v3523_v39 = vpop.eup %3522  ;;  %v5119_v17 = vadd.f32 1.0, %v3515_v10  ;;  %v3003_v61 = vadd.f32 -1.0, %v3521_v14  ;;  %3538 = vrcp.f32 %v1959_v3  ;;  %v2411_v59 = vmin.f32 %v5113_v25, 0.0 }
 0x203   : > { %v2662_v53 = vsel %vm2342_vm6, %v5042_v33, %v3002_v26  ;;  %v1958_v8 = vadd.f32 1.0, %v3523_v39  ;;  %3540 = vpow2.f32 %v2512_v60  ;;  %v1771_v40 = vsub.f32 0.0, %v1665_v58 }
 0x204   : > { %v5125_v6 = vpop.eup %3524  ;;  %2726 = vst.msk [vmem:[%s4452_s10 + $0x110] sm:$0xff] %vm1140_vm1, %v2662_v53  ;;  %v2663_v29 = vsel %vm2343_vm7, %v5049_v31, %v3003_v61  ;;  %vm2344_vm8 = vcmp.gt.f32.partialorder %v5084_v49, 0.0  ;;  %v2514_v21 = vmul.f32 1.442695, %v2411_v59  ;;  %v1770_v28 = vsub.f32 0.0, %v1660_v48  ;;  %v5503_v53 = vld [vmem:[#allocation13_spill] sm:$0xff] }
 0x205   : > { %v949_v32 = vadd.f32 %v4724_v13, %v5501_v36  ;;  %2727 = vst.msk [vmem:[%s4452_s10 + $0x118] sm:$0xff] %vm1140_vm1, %v2663_v29  ;;  %3542 = vrcp.f32 %v1958_v8  ;;  %v1888_v33 = vmul.f32 1.442695, %v1771_v40  ;;  %v954_v54 = vadd.f32 %v4724_v13, %v5502_v24 }
 0x206   : > { %v1675_v47 = vadd.f32 %v4702_v18, %v4780_v1  ;;  %v5141_v38 = vpop.eup %3526  ;;  %3544 = vpow2.f32 %v2514_v21  ;;  %v1886_v31 = vmul.f32 1.442695, %v1770_v28  ;;  %v1670_v57 = vadd.f32 %v4702_v18, %v4789_v7 }
 0x207   : > { %v2142_v34 = vmul.f32 %v5072_v23, %v949_v32  ;;  %v5146_v10 = vpop.eup %3528  ;;  %3546 = vpow2.f32 %v1888_v33  ;;  %v2143_v30 = vmul.f32 %v5044_v4, %v954_v54  ;;  %v959_v41 = vadd.f32 %v4724_v13, %v4755_v9  ;;  %v5504_v54 = vld [vmem:[#allocation12_spill] sm:$0xff] }
 0x208   : > { %v1773_v51 = vsub.f32 0.0, %v1675_v47  ;;  %v3531_v22 = vpop.eup %3530  ;;  %3548 = vpow2.f32 %v1886_v31  ;;  %v1772_v35 = vsub.f32 0.0, %v1670_v57  ;;  %v964_v23 = vadd.f32 %v4724_v13, %v4782_v45 }
 0x209   : > { %v2213_v1 = vmul.f32 %v4826_v42, %v2142_v34  ;;  %v3533_v46 = vpop.eup %3532  ;;  %v1961_v11 = vadd.f32 1.0, %v3531_v22  ;;  %v2214_v18 = vmul.f32 %v4826_v42, %v2143_v30  ;;  %v2144_v3 = vmul.f32 %v5091_v2, %v959_v41 }
 0x20a   : > { %v1892_v7 = vmul.f32 1.442695, %v1773_v51  ;;  %v3535_v4 = vpop.eup %3534  ;;  %v1960_v58 = vadd.f32 1.0, %v3533_v46  ;;  %v1890_v9 = vmul.f32 1.442695, %v1772_v35  ;;  %v2145_v26 = vmul.f32 %v5081_v19, %v964_v23 }
 0x20b   : > { %v5157_v14 = vadd.f32 %v4837_v55, %v2213_v1  ;;  %v3537_v60 = vpop.eup %3536  ;;  %v3004_v48 = vadd.f32 -1.0, %v3535_v4  ;;  %3550 = vrcp.f32 %v1961_v11  ;;  %v5161_v13 = vadd.f32 %v4837_v55, %v2214_v18  ;;  %v5201_v11 = vld [vmem:[%s5457_s3] ss:$0 sm:$0xff]  ;;  %v5505_v18 = vld [vmem:[#allocation5_spill] sm:$0xff] }
 0x20c   : > { %v2215_v45 = vmul.f32 %v4826_v42, %v2144_v3  ;;  %v3539_v39 = vpop.eup %3538  ;;  %vm2345_vm9 = vcmp.gt.f32.partialorder %v5087_v37, 0.0  ;;  %v3005_v2 = vadd.f32 -1.0, %v3537_v60  ;;  %3552 = vrcp.f32 %v1960_v58 }
 0x20d   : > { %v2412_v61 = vmin.f32 %v5157_v14, 0.0  ;;  %v3541_v59 = vpop.eup %3540  ;;  %v2151_v19 = vmul.f32 %v3539_v39, %v5503_v53  ;;  %v2664_v8 = vsel %vm2344_vm8, %v5084_v49, %v3004_v48  ;;  %vm2346_vm10 = vcmp.gt.f32.partialorder %v5102_v16, 0.0  ;;  %v5506_v39 = vld [vmem:[#allocation14_spill] sm:$0xff] }
 0x20e   : > { %v2413_v40 = vmin.f32 %v5161_v13, 0.0  ;;  %2728 = vst.msk [vmem:[%s4452_s10 + $0x120] sm:$0xff] %vm1140_vm1, %v2664_v8  ;;  %v2665_v29 = vsel %vm2345_vm9, %v5087_v37, %v3005_v2  ;;  %v3006_v21 = vadd.f32 -1.0, %v3541_v59  ;;  %3554 = vpow2.f32 %v1892_v7 }
 0x20f   : > { %v2516_v28 = vmul.f32 1.442695, %v2412_v61  ;;  %v3543_v36 = vpop.eup %3542  ;;  %v2222_v32 = vmul.f32 %v4826_v42, %v2151_v19  ;;  %2729 = vst.msk [vmem:[%s4452_s10 + $0x128] sm:$0xff] %vm1140_vm1, %v2665_v29  ;;  %3556 = vpow2.f32 %v1890_v9  ;;  %v5179_v49 = vadd.f32 %v4837_v55, %v2215_v45  ;;  %v5216_v9 = vld [vmem:[%s5459_s5] ss:$0 sm:$0xff]  ;;  %v5508_v29 = vld [vmem:[#allocation25_spill] sm:$0xff] }
 0x210   : > { %v2518_v33 = vmul.f32 1.442695, %v2413_v40  ;;  %v3545_v24 = vpop.eup %3544  ;;  %v2150_v47 = vmul.f32 %v3543_v36, %v5504_v54  ;;  %v2666_v31 = vsel %vm2346_vm10, %v5102_v16, %v3006_v21  ;;  %v2216_v37 = vmul.f32 %v4826_v42, %v2145_v26  ;;  %v5507_v40 = vld [vmem:[#allocation26_spill] sm:$0xff] }
 0x211   : > { %3558 = vpow2.f32 %v2516_v28  ;;  %v3547_v34 = vpop.eup %3546  ;;  %v5185_v57 = vadd.f32 %v4837_v55, %v2222_v32  ;;  %2730 = vst.msk [vmem:[%s4452_s10 + $0x130] sm:$0xff] %vm1140_vm1, %v2666_v31  ;;  %vm2347_vm11 = vcmp.gt.f32.partialorder %v5113_v25, 0.0  ;;  %v3007_v30 = vadd.f32 -1.0, %v3545_v24 }
 0x212   : > { %3560 = vpow2.f32 %v2518_v33  ;;  %v3549_v51 = vpop.eup %3548  ;;  %v2221_v41 = vmul.f32 %v4826_v42, %v2150_v47  ;;  %v1963_v22 = vadd.f32 1.0, %v3547_v34  ;;  %v2414_v16 = vmin.f32 %v5179_v49, 0.0 }
 0x213   : > { %v5193_v1 = vadd.f32 %v4837_v55, %v2216_v37  ;;  %3562 = vrcp.f32 %v5119_v17  ;;  %v2421_v35 = vmin.f32 %v5185_v57, 0.0  ;;  %v2667_v23 = vsel %vm2347_vm11, %v5113_v25, %v3007_v30 }
 0x214   : > { %v1962_v46 = vadd.f32 1.0, %v3549_v51  ;;  %v5205_v7 = vadd.f32 %v5201_v11, %v5505_v18  ;;  %v5208_v3 = vadd.f32 %v4837_v55, %v2221_v41  ;;  %2731 = vst.msk [vmem:[%s4452_s10 + $0x138] sm:$0xff] %vm1140_vm1, %v2667_v23  ;;  %3564 = vrcp.f32 %v1963_v22 }
 0x215   : > { %v2520_v17 = vmul.f32 1.442695, %v2414_v16  ;;  %v3551_v4 = vpop.eup %3550  ;;  %v2534_v58 = vmul.f32 1.442695, %v2421_v35  ;;  %v2415_v25 = vmin.f32 %v5193_v1, 0.0  ;;  %v1685_v26 = vadd.f32 %v5216_v9, %v4811_v56 }
 0x216   : > { %3566 = vrcp.f32 %v1962_v46  ;;  %v3553_v60 = vpop.eup %3552  ;;  %v2420_v48 = vmin.f32 %v5208_v3, 0.0  ;;  %v2153_v45 = vmul.f32 %v3551_v4, %v4805_v62  ;;  %vm2348_vm12 = vcmp.gt.f32.partialorder %v5157_v14, 0.0 }
 0x217   : > { %3568 = vpow2.f32 %v2520_v17  ;;  %v2152_v2 = vmul.f32 %v3553_v60, %v5506_v39  ;;  %v2522_v61 = vmul.f32 1.442695, %v2415_v25  ;;  %v1775_v59 = vsub.f32 0.0, %v1685_v26 }
 0x218   : > { %3570 = vpow2.f32 %v2534_v58  ;;  %v3555_v53 = vpop.eup %3554  ;;  %v2532_v19 = vmul.f32 1.442695, %v2420_v48  ;;  %v2224_v8 = vmul.f32 %v4826_v42, %v2153_v45  ;;  %v1680_v56 = vadd.f32 %v5216_v9, %v5507_v40 }
 0x219   : > { %v969_v21 = vadd.f32 %v5201_v11, %v5508_v29  ;;  %v3557_v28 = vpop.eup %3556  ;;  %v2223_v62 = vmul.f32 %v4826_v42, %v2152_v2  ;;  %v1965_v36 = vadd.f32 1.0, %v3555_v53  ;;  %3572 = vpow2.f32 %v2522_v61  ;;  %v5510_v53 = vld [vmem:[#allocation28_spill] sm:$0xff] }
 0x21a   : > { %v1896_v32 = vmul.f32 1.442695, %v1775_v59  ;;  %3574 = vpow2.f32 %v2532_v19  ;;  %v5231_v24 = vadd.f32 %v4837_v55, %v2224_v8  ;;  %v1964_v54 = vadd.f32 1.0, %v3557_v28  ;;  %v5266_v59 = vld [vmem:[%s5460_s6] ss:$0 sm:$0xff] }
 0x21b   : > { %v3559_v33 = vpop.eup %3558  ;;  %v1774_v47 = vsub.f32 0.0, %v1680_v56  ;;  %v5234_v37 = vadd.f32 %v4837_v55, %v2223_v62  ;;  %3576 = vrcp.f32 %v1965_v36  ;;  %v2146_v30 = vmul.f32 %v5141_v38, %v969_v21  ;;  %v5285_v21 = vld [vmem:[%s5461_s7] ss:$0 sm:$0xff] }
 0x21c   : > { %v3561_v31 = vpop.eup %3560  ;;  %v3008_v34 = vadd.f32 -1.0, %v3559_v33  ;;  %v2423_v51 = vmin.f32 %v5231_v24, 0.0  ;;  %vm2349_vm13 = vcmp.gt.f32.partialorder %v5161_v13, 0.0  ;;  %3578 = vrcp.f32 %v1964_v54 }
 0x21d   : > { %v3009_v41 = vadd.f32 -1.0, %v3561_v31  ;;  %v5239_v22 = vpop.eup %3562  ;;  %v2422_v16 = vmin.f32 %v5234_v37, 0.0  ;;  %vm2350_vm14 = vcmp.gt.f32.partialorder %v5179_v49, 0.0  ;;  %3580 = vpow2.f32 %v1896_v32 }
 0x21e   : > { %v2668_v35 = vsel %vm2348_vm12, %v5157_v14, %v3008_v34  ;;  %v3565_v23 = vpop.eup %3564  ;;  %v2538_v38 = vmul.f32 1.442695, %v2423_v51  ;;  %v1894_v18 = vmul.f32 1.442695, %v1774_v47  ;;  %v2217_v17 = vmul.f32 %v4826_v42, %v2146_v30  ;;  %v5509_v14 = vld [vmem:[#allocation27_spill] sm:$0xff] }
 0x21f   : > { %2732 = vst.msk [vmem:[%s4452_s10 + $0x140] sm:$0xff] %vm1140_vm1, %v2668_v35  ;;  %v2669_v46 = vsel %vm2349_vm13, %v5161_v13, %v3009_v41  ;;  %vm2357_vm15 = vcmp.gt.f32.partialorder %v5185_v57, 0.0  ;;  %v2536_v58 = vmul.f32 1.442695, %v2422_v16  ;;  %v2155_v25 = vmul.f32 %v3565_v23, %v4984_v50 }
 0x220   : > { %v3567_v4 = vpop.eup %3566  ;;  %2733 = vst.msk [vmem:[%s4452_s10 + $0x148] sm:$0xff] %vm1140_vm1, %v2669_v46  ;;  %v974_v26 = vadd.f32 %v5201_v11, %v5509_v14  ;;  %3582 = vpow2.f32 %v2538_v38  ;;  %vm2351_vm0 = vcmp.gt.f32.partialorder %v5193_v1, 0.0  ;;  %v5259_v13 = vadd.f32 %v4837_v55, %v2217_v17 }
 0x221   : > { %v3569_v60 = vpop.eup %3568  ;;  %v2154_v48 = vmul.f32 %v3567_v4, %v4972_v12  ;;  %3584 = vpow2.f32 %v2536_v58  ;;  %v2226_v39 = vmul.f32 %v4826_v42, %v2155_v25  ;;  %v1695_v19 = vadd.f32 %v5216_v9, %v5510_v53 }
 0x222   : > { %v3571_v45 = vpop.eup %3570  ;;  %v3010_v2 = vadd.f32 -1.0, %v3569_v60  ;;  %v2147_v50 = vmul.f32 %v5125_v6, %v974_v26  ;;  %3586 = vpow2.f32 %v1894_v18  ;;  %vm2356_vm2 = vcmp.gt.f32.partialorder %v5208_v3, 0.0 }
 0x223   : > { %v3017_v61 = vadd.f32 -1.0, %v3571_v45  ;;  %v2225_v12 = vmul.f32 %v5266_v59, %v2154_v48  ;;  %v3573_v8 = vpop.eup %3572  ;;  %v5273_v42 = vadd.f32 %v4837_v55, %v2226_v39  ;;  %v2416_v40 = vmin.f32 %v5259_v13, 0.0 }
 0x224   : > { %v2670_v6 = vsel %vm2350_vm14, %v5179_v49, %v3010_v2  ;;  %v3575_v56 = vpop.eup %3574  ;;  %v3011_v55 = vadd.f32 -1.0, %v3573_v8  ;;  %v2218_v49 = vmul.f32 %v5266_v59, %v2147_v50  ;;  %v1690_v33 = vadd.f32 %v5216_v9, %v4850_v52 }
 0x225   : > { %v2677_v29 = vsel %vm2357_vm15, %v5185_v57, %v3017_v61  ;;  %v5288_v28 = vadd.f32 %v5285_v21, %v2225_v12  ;;  %2734 = vst.msk [vmem:[%s4452_s10 + $0x150] sm:$0xff] %vm1140_vm1, %v2670_v6  ;;  %v3577_v62 = vpop.eup %3576  ;;  %v3016_v36 = vadd.f32 -1.0, %v3575_v56  ;;  %v2425_v57 = vmin.f32 %v5273_v42, 0.0 }
 0x226   : > { %2741 = vst.msk [vmem:[%s4452_s10 + $0x188] sm:$0xff] %vm1140_vm1, %v2677_v29  ;;  %v2524_v32 = vmul.f32 1.442695, %v2416_v40  ;;  %v3579_v54 = vpop.eup %3578  ;;  %v2157_v31 = vmul.f32 %v3577_v62, %v5053_v0  ;;  %v2671_v34 = vsel %vm2351_vm0, %v5193_v1, %v3011_v55  ;;  %v1777_v30 = vsub.f32 0.0, %v1695_v19 }
 0x227   : > { %v2424_v47 = vmin.f32 %v5288_v28, 0.0  ;;  %v3581_v51 = vpop.eup %3580  ;;  %v2676_v41 = vsel %vm2356_vm2, %v5208_v3, %v3016_v36  ;;  %v2542_v16 = vmul.f32 1.442695, %v2425_v57  ;;  %v2156_v35 = vmul.f32 %v3579_v54, %v5001_v15  ;;  %2735 = vst.msk [vmem:[%s4452_s10 + $0x158] sm:$0xff] %vm1140_vm1, %v2671_v34 }
 0x228   : > { %3588 = vpow2.f32 %v2524_v32  ;;  %2740 = vst.msk [vmem:[%s4452_s10 + $0x180] sm:$0xff] %vm1140_vm1, %v2676_v41  ;;  %v2228_v0 = vmul.f32 %v5266_v59, %v2157_v31  ;;  %v1967_v23 = vadd.f32 1.0, %v3581_v51  ;;  %v5313_v1 = vadd.f32 %v5285_v21, %v2218_v49 }
 0x229   : > { %v2540_v52 = vmul.f32 1.442695, %v2424_v47  ;;  %vm2359_vm3 = vcmp.gt.f32.partialorder %v5231_v24, 0.0  ;;  %3590 = vpow2.f32 %v2542_v16  ;;  %v2227_v3 = vmul.f32 %v5266_v59, %v2156_v35  ;;  %v5511_v16 = vld [vmem:[#allocation4_spill] sm:$0xff] }
 0x22a   : > { %v1776_v38 = vsub.f32 0.0, %v1690_v33  ;;  %v3583_v46 = vpop.eup %3582  ;;  %vm2358_vm4 = vcmp.gt.f32.partialorder %v5234_v37, 0.0  ;;  %v5319_v15 = vadd.f32 %v5285_v21, %v2228_v0  ;;  %v2417_v18 = vmin.f32 %v5313_v1, 0.0 }
 0x22b   : > { %3592 = vpow2.f32 %v2540_v52  ;;  %v3585_v17 = vpop.eup %3584  ;;  %v3019_v4 = vadd.f32 -1.0, %v3583_v46  ;;  %v5323_v58 = vadd.f32 %v5285_v21, %v2227_v3  ;;  %vm2352_vm5 = vcmp.gt.f32.partialorder %v5259_v13, 0.0 }
 0x22c   : > { %3594 = vrcp.f32 %v1967_v23  ;;  %v3587_v25 = vpop.eup %3586  ;;  %v3018_v14 = vadd.f32 -1.0, %v3585_v17  ;;  %v2427_v26 = vmin.f32 %v5319_v15, 0.0  ;;  %v2526_v60 = vmul.f32 1.442695, %v2417_v18 }
 0x22d   : > { %v1900_v48 = vmul.f32 1.442695, %v1777_v30  ;;  %v2679_v45 = vsel %vm2359_vm3, %v5231_v24, %v3019_v4  ;;  %vm2361_vm6 = vcmp.gt.f32.partialorder %v5273_v42, 0.0  ;;  %v2426_v39 = vmin.f32 %v5323_v58, 0.0 }
 0x22e   : > { %v1966_v2 = vadd.f32 1.0, %v3587_v25  ;;  %v1898_v50 = vmul.f32 1.442695, %v1776_v38  ;;  %2743 = vst.msk [vmem:[%s4452_s10 + $0x198] sm:$0xff] %vm1140_vm1, %v2679_v45  ;;  %v2678_v61 = vsel %vm2358_vm4, %v5234_v37, %v3018_v14  ;;  %vm2360_vm7 = vcmp.gt.f32.partialorder %v5288_v28, 0.0 }
 0x22f   : > { %v2546_v12 = vmul.f32 1.442695, %v2427_v26  ;;  %3596 = vpow2.f32 %v2526_v60  ;;  %v1705_v53 = vadd.f32 %v5216_v9, %v4857_v63  ;;  %2742 = vst.msk [vmem:[%s4452_s10 + $0x190] sm:$0xff] %vm1140_vm1, %v2678_v61  ;;  %v2544_v24 = vmul.f32 1.442695, %v2426_v39 }
 0x230   : > { %3598 = vrcp.f32 %v1966_v2  ;;  %v979_v19 = vadd.f32 %v5201_v11, %v4859_v27  ;;  %v1700_v8 = vadd.f32 %v5216_v9, %v4865_v43  ;;  %v984_v37 = vadd.f32 %v5201_v11, %v4883_v5 }
 0x231   : > { %3600 = vpow2.f32 %v2546_v12  ;;  %v1779_v6 = vsub.f32 0.0, %v1705_v53  ;;  %v1715_v40 = vadd.f32 %v5216_v9, %v4885_v20  ;;  %v1710_v55 = vadd.f32 %v5216_v9, %v4891_v44 }
 0x232   : > { %v3589_v56 = vpop.eup %3588  ;;  %3602 = vpow2.f32 %v2544_v24  ;;  %v2148_v63 = vmul.f32 %v5239_v22, %v979_v19  ;;  %v1778_v29 = vsub.f32 0.0, %v1700_v8  ;;  %v2149_v49 = vmul.f32 %v5146_v10, %v984_v37 }
 0x233   : > { %v3012_v27 = vadd.f32 -1.0, %v3589_v56  ;;  %3604 = vpow2.f32 %v1900_v48  ;;  %v1904_v43 = vmul.f32 1.442695, %v1779_v6  ;;  %v3591_v62 = vpop.eup %3590  ;;  %v1781_v20 = vsub.f32 0.0, %v1715_v40 }
 0x234   : > { %3606 = vpow2.f32 %v1898_v50  ;;  %v2219_v5 = vmul.f32 %v5266_v59, %v2148_v63  ;;  %v1902_v36 = vmul.f32 1.442695, %v1778_v29  ;;  %v3021_v32 = vadd.f32 -1.0, %v3591_v62 }
 0x235   : > { %v3593_v57 = vpop.eup %3592  ;;  %v2672_v22 = vsel %vm2352_vm5, %v5259_v13, %v3012_v27  ;;  %3608 = vpow2.f32 %v1904_v43  ;;  %v2220_v44 = vmul.f32 %v5266_v59, %v2149_v49  ;;  %v1908_v54 = vmul.f32 1.442695, %v1781_v20  ;;  %v5512_v27 = vld [vmem:[#allocation7_spill] sm:$0xff]  ;;  %v5513_v20 = vld [vmem:[#allocation6_spill] sm:$0xff] }
 0x236   : > { %v3595_v9 = vpop.eup %3594  ;;  %v3020_v33 = vadd.f32 -1.0, %v3593_v57  ;;  %2736 = vst.msk [vmem:[%s4452_s10 + $0x160] sm:$0xff] %vm1140_vm1, %v2672_v22  ;;  %v5362_v10 = vadd.f32 %v5285_v21, %v2219_v5  ;;  %3610 = vpow2.f32 %v1902_v36  ;;  %v2681_v47 = vsel %vm2361_vm6, %v5273_v42, %v3021_v32 }
 0x237   : > { %v2159_v31 = vmul.f32 %v3595_v9, %v5205_v7  ;;  %v5369_v13 = vadd.f32 %v5285_v21, %v2220_v44  ;;  %v1780_v34 = vsub.f32 0.0, %v1710_v55  ;;  %2745 = vst.msk [vmem:[%s4452_s10 + $0x1a8] sm:$0xff] %vm1140_vm1, %v2681_v47  ;;  %3612 = vpow2.f32 %v1908_v54  ;;  %v5514_v9 = vld [vmem:[#allocation9_spill] sm:$0xff]  ;;  %v5515_v47 = vld [vmem:[#allocation8_spill] sm:$0xff] }
 0x238   : > { %v2680_v30 = vsel %vm2360_vm7, %v5288_v28, %v3020_v33  ;;  %v2418_v51 = vmin.f32 %v5362_v10, 0.0  ;;  %v1029_v35 = vadd.f32 %v5201_v11, %v5511_v16  ;;  %vm2353_vm8 = vcmp.gt.f32.partialorder %v5313_v1, 0.0 }
 0x239   : > { %v3597_v41 = vpop.eup %3596  ;;  %2744 = vst.msk [vmem:[%s4452_s10 + $0x1a0] sm:$0xff] %vm1140_vm1, %v2680_v30  ;;  %v2230_v7 = vmul.f32 %v5266_v59, %v2159_v31  ;;  %v2419_v42 = vmin.f32 %v5369_v13, 0.0  ;;  %v1906_v52 = vmul.f32 1.442695, %v1780_v34  ;;  %vm2363_vm9 = vcmp.gt.f32.partialorder %v5319_v15, 0.0 }
 0x23a   : > { %v3599_v0 = vpop.eup %3598  ;;  %v3013_v23 = vadd.f32 -1.0, %v3597_v41  ;;  %v2528_v28 = vmul.f32 1.442695, %v2418_v51  ;;  %vm2362_vm10 = vcmp.gt.f32.partialorder %v5323_v58, 0.0  ;;  %vm2354_vm11 = vcmp.gt.f32.partialorder %v5362_v10, 0.0 }
 0x23b   : > { %v3601_v3 = vpop.eup %3600  ;;  %v5385_v38 = vadd.f32 %v5285_v21, %v2230_v7  ;;  %v2158_v46 = vmul.f32 %v3599_v0, %v1029_v35  ;;  %v2530_v18 = vmul.f32 1.442695, %v2419_v42  ;;  %3614 = vpow2.f32 %v1906_v52  ;;  %v5516_v0 = vld [vmem:[#allocation11_spill] sm:$0xff] }
 0x23c   : > { %v3603_v17 = vpop.eup %3602  ;;  %v3023_v4 = vadd.f32 -1.0, %v3601_v3  ;;  %v2673_v25 = vsel %vm2353_vm8, %v5313_v1, %v3013_v23  ;;  %3616 = vpow2.f32 %v2528_v28  ;;  %v1044_v43 = vadd.f32 %v5201_v11, %v5512_v27 }
 0x23d   : > { %v3605_v14 = vpop.eup %3604  ;;  %v3022_v26 = vadd.f32 -1.0, %v3603_v17  ;;  %v2429_v60 = vmin.f32 %v5385_v38, 0.0  ;;  %v2229_v48 = vmul.f32 %v5266_v59, %v2158_v46  ;;  %2737 = vst.msk [vmem:[%s4452_s10 + $0x168] sm:$0xff] %vm1140_vm1, %v2673_v25  ;;  %3618 = vpow2.f32 %v2530_v18 }
 0x23e   : > { %v3607_v45 = vpop.eup %3606  ;;  %v2683_v39 = vsel %vm2363_vm9, %v5319_v15, %v3023_v4  ;;  %v1969_v2 = vadd.f32 1.0, %v3605_v14  ;;  %vm2355_vm12 = vcmp.gt.f32.partialorder %v5369_v13, 0.0  ;;  %v1039_v57 = vadd.f32 %v5201_v11, %v5513_v20  ;;  %v5517_v4 = vld [vmem:[#allocation10_spill] sm:$0xff] }
 0x23f   : > { %v3609_v1 = vpop.eup %3608  ;;  %2747 = vst.msk [vmem:[%s4452_s10 + $0x1b8] sm:$0xff] %vm1140_vm1, %v2683_v39  ;;  %v2682_v50 = vsel %vm2362_vm10, %v5323_v58, %v3022_v26  ;;  %v2550_v61 = vmul.f32 1.442695, %v2429_v60  ;;  %v2300_v12 = vadd.f32 %v5285_v21, %v2229_v48  ;;  %v1968_v53 = vadd.f32 1.0, %v3607_v45 }
 0x240   : > { %v3611_v24 = vpop.eup %3610  ;;  %2746 = vst.msk [vmem:[%s4452_s10 + $0x1b0] sm:$0xff] %vm1140_vm1, %v2682_v50  ;;  %3620 = vrcp.f32 %v1969_v2  ;;  %v1971_v19 = vadd.f32 1.0, %v3609_v1  ;;  %v1054_v33 = vadd.f32 %v5201_v11, %v5514_v9  ;;  %v1049_v31 = vadd.f32 %v5201_v11, %v5515_v47 }
 0x241   : > { %3622 = vpow2.f32 %v2550_v61  ;;  %v2428_v15 = vmin.f32 %v2300_v12, 0.0  ;;  %v1970_v8 = vadd.f32 1.0, %v3611_v24  ;;  %v3613_v6 = vpop.eup %3612  ;;  %vm2365_vm13 = vcmp.gt.f32.partialorder %v5385_v38, 0.0 }
 0x242   : > { %3624 = vrcp.f32 %v1968_v53  ;;  %v1973_v40 = vadd.f32 1.0, %v3613_v6  ;;  %v1064_v23 = vadd.f32 %v5201_v11, %v5516_v0  ;;  %vm2364_vm14 = vcmp.gt.f32.partialorder %v2300_v12, 0.0 }
 0x243   : > { %v2548_v37 = vmul.f32 1.442695, %v2428_v15  ;;  %3626 = vrcp.f32 %v1971_v19  ;;  %v1059_v25 = vadd.f32 %v5201_v11, %v5517_v4 }
 0x244   : > { %3628 = vrcp.f32 %v1970_v8 }
 0x245   : > { %v3615_v58 = vpop.eup %3614  ;;  %3630 = vpow2.f32 %v2548_v37 }
 0x246   : > { %v3617_v56 = vpop.eup %3616  ;;  %3632 = vrcp.f32 %v1973_v40  ;;  %v1972_v63 = vadd.f32 1.0, %v3615_v58 }
 0x247   : > { %v3014_v29 = vadd.f32 -1.0, %v3617_v56  ;;  %v3619_v55 = vpop.eup %3618 }
 0x248   : > { %3634 = vrcp.f32 %v1972_v63  ;;  %v3015_v62 = vadd.f32 -1.0, %v3619_v55 }
 0x249   : > { %v2674_v49 = vsel %vm2354_vm11, %v5362_v10, %v3014_v29 }
 0x24a   : > { %v3621_v5 = vpop.eup %3620  ;;  %2738 = vst.msk [vmem:[%s4452_s10 + $0x170] sm:$0xff] %vm1140_vm1, %v2674_v49  ;;  %v2675_v22 = vsel %vm2355_vm12, %v5369_v13, %v3015_v62 }
 0x24b   : > { %v3623_v36 = vpop.eup %3622  ;;  %v2161_v32 = vmul.f32 %v3621_v5, %v1044_v43  ;;  %2739 = vst.msk [vmem:[%s4452_s10 + $0x178] sm:$0xff] %vm1140_vm1, %v2675_v22 }
 0x24c   : > { %v3625_v44 = vpop.eup %3624  ;;  %v3025_v54 = vadd.f32 -1.0, %v3623_v36 }
 0x24d   : > { %v3627_v10 = vpop.eup %3626  ;;  %v2232_v34 = vmul.f32 %v5266_v59, %v2161_v32  ;;  %v2160_v30 = vmul.f32 %v3625_v44, %v1039_v57 }
 0x24e   : > { %v3629_v51 = vpop.eup %3628  ;;  %v2685_v41 = vsel %vm2365_vm13, %v5385_v38, %v3025_v54  ;;  %v2163_v13 = vmul.f32 %v3627_v10, %v1054_v33 }
 0x24f   : > { %v3631_v16 = vpop.eup %3630  ;;  %2749 = vst.msk [vmem:[%s4452_s10 + $0x1c8] sm:$0xff] %vm1140_vm1, %v2685_v41  ;;  %v2303_v35 = vadd.f32 %v5285_v21, %v2232_v34  ;;  %v2231_v7 = vmul.f32 %v5266_v59, %v2160_v30  ;;  %v2162_v42 = vmul.f32 %v3629_v51, %v1049_v31 }
 0x250   : > { %v3633_v52 = vpop.eup %3632  ;;  %v3024_v28 = vadd.f32 -1.0, %v3631_v16  ;;  %v2234_v3 = vmul.f32 %v5266_v59, %v2163_v13 }
 0x251   : > { %v2431_v46 = vmin.f32 %v2303_v35, 0.0  ;;  %v2302_v38 = vadd.f32 %v5285_v21, %v2231_v7  ;;  %v2233_v18 = vmul.f32 %v5266_v59, %v2162_v42  ;;  %v2165_v60 = vmul.f32 %v3633_v52, %v1064_v23 }
 0x252   : > { %v3635_v17 = vpop.eup %3634  ;;  %v2684_v14 = vsel %vm2364_vm14, %v2300_v12, %v3024_v28  ;;  %v2305_v26 = vadd.f32 %v5285_v21, %v2234_v3  ;;  %vm2367_vm15 = vcmp.gt.f32.partialorder %v2303_v35, 0.0 }
 0x253   : > { %2748 = vst.msk [vmem:[%s4452_s10 + $0x1c0] sm:$0xff] %vm1140_vm1, %v2684_v14  ;;  %v2554_v48 = vmul.f32 1.442695, %v2431_v46  ;;  %v2430_v45 = vmin.f32 %v2302_v38, 0.0  ;;  %v2304_v39 = vadd.f32 %v5285_v21, %v2233_v18  ;;  %v2236_v1 = vmul.f32 %v5266_v59, %v2165_v60 }
 0x254   : > { %v2433_v2 = vmin.f32 %v2305_v26, 0.0  ;;  %v2164_v50 = vmul.f32 %v3635_v17, %v1059_v25  ;;  %vm2366_vm0 = vcmp.gt.f32.partialorder %v2302_v38, 0.0  ;;  %vm2369_vm2 = vcmp.gt.f32.partialorder %v2305_v26, 0.0 }
 0x255   : > { %3636 = vpow2.f32 %v2554_v48  ;;  %v2552_v61 = vmul.f32 1.442695, %v2430_v45  ;;  %v2432_v53 = vmin.f32 %v2304_v39, 0.0  ;;  %v2307_v11 = vadd.f32 %v5285_v21, %v2236_v1 }
 0x256   : > { %v2558_v24 = vmul.f32 1.442695, %v2433_v2  ;;  %v2235_v12 = vmul.f32 %v5266_v59, %v2164_v50  ;;  %vm2368_vm3 = vcmp.gt.f32.partialorder %v2304_v39, 0.0 }
 0x257   : > { %3638 = vpow2.f32 %v2552_v61  ;;  %v2556_v19 = vmul.f32 1.442695, %v2432_v53  ;;  %v2435_v15 = vmin.f32 %v2307_v11, 0.0  ;;  %vm2371_vm4 = vcmp.gt.f32.partialorder %v2307_v11, 0.0 }
 0x258   : > { %3640 = vpow2.f32 %v2558_v24  ;;  %v2306_v8 = vadd.f32 %v5285_v21, %v2235_v12 }
 0x259   : > { %3642 = vpow2.f32 %v2556_v19  ;;  %v2562_v6 = vmul.f32 1.442695, %v2435_v15 }
 0x25a   : > { %v2434_v37 = vmin.f32 %v2306_v8, 0.0  ;;  %vm2370_vm5 = vcmp.gt.f32.partialorder %v2306_v8, 0.0 }
 0x25b   : > { %3644 = vpow2.f32 %v2562_v6 }
 0x25c   : > { %v2560_v40 = vmul.f32 1.442695, %v2434_v37 }
 0x25e   : > { %3646 = vpow2.f32 %v2560_v40 }
 0x25f   : > { %v3637_v58 = vpop.eup %3636 }
 0x260   : > { %v3027_v56 = vadd.f32 -1.0, %v3637_v58 }
 0x261   : > { %v3639_v63 = vpop.eup %3638 }
 0x262   : > { %v3641_v59 = vpop.eup %3640  ;;  %v2687_v29 = vsel %vm2367_vm15, %v2303_v35, %v3027_v56  ;;  %v3026_v55 = vadd.f32 -1.0, %v3639_v63 }
 0x263   : > { %v3643_v27 = vpop.eup %3642  ;;  %2751 = vst.msk [vmem:[%s4452_s10 + $0x1d8] sm:$0xff] %vm1140_vm1, %v2687_v29  ;;  %v3029_v21 = vadd.f32 -1.0, %v3641_v59 }
 0x264   : > { %v2686_v43 = vsel %vm2366_vm0, %v2302_v38, %v3026_v55  ;;  %v3028_v49 = vadd.f32 -1.0, %v3643_v27 }
 0x265   : > { %2750 = vst.msk [vmem:[%s4452_s10 + $0x1d0] sm:$0xff] %vm1140_vm1, %v2686_v43  ;;  %v2689_v62 = vsel %vm2369_vm2, %v2305_v26, %v3029_v21  ;;  %v3645_v5 = vpop.eup %3644 }
 0x266   : > { %2753 = vst.msk [vmem:[%s4452_s10 + $0x1e8] sm:$0xff] %vm1140_vm1, %v2689_v62  ;;  %v2688_v36 = vsel %vm2368_vm3, %v2304_v39, %v3028_v49  ;;  %v3031_v20 = vadd.f32 -1.0, %v3645_v5 }
 0x267   : > { %2752 = vst.msk [vmem:[%s4452_s10 + $0x1e0] sm:$0xff] %vm1140_vm1, %v2688_v36 }
 0x268   : > { %v3647_v57 = vpop.eup %3646  ;;  %v2691_v32 = vsel %vm2371_vm4, %v2307_v11, %v3031_v20 }
 0x269   : > { %v3030_v22 = vadd.f32 -1.0, %v3647_v57  ;;  %2755 = vst.msk [vmem:[%s4452_s10 + $0x1f8] sm:$0xff] %vm1140_vm1, %v2691_v32 }
 0x26b   : > { %v2690_v44 = vsel %vm2370_vm5, %v2306_v8, %v3030_v22 }
 0x26c   : > { %2754 = vst.msk [vmem:[%s4452_s10 + $0x1f0] sm:$0xff] %vm1140_vm1, %v2690_v44 }
 0x26d PF: > { %s18_s27 = sadd.s32 1, %s3662_s27  }
 0x26e   : > { %p15_p4 = scmp.ge.s32.totalorder %s18_s27, 5  }
 0x270   :  { %17 = sbr.rel (!%p15_p4) target bundleno = 1 (0x1), region = 85 }

// kernel: mencoder_forward.7
= control target key start
LH: loop header
LB: loop body
LE: loop exit
PB: predicated region body
PF: predicated region fallthrough
CT: control target
= control target key end

     0   :  { %v3171_v0 = vmov 0.0|0.0   ;;  %vm180_vm0 = vcmask 261120   ;;  %vm813_vm1 = vcmask 130048   ;;  %s5364_s2 = inlined_call_operand.vmem [shape: f32[160,16], index: 2, kind: input, shape index: {}]   ;;  %s5365_s0 = inlined_call_operand.vmem [shape: f32[496,160], index: 0, kind: input, shape index: {}]   ;;  %s5366_s4 = inlined_call_operand.vmem [shape: f32[16,16], index: 4, kind: input, shape index: {}]   ;;  %s5367_s1 = inlined_call_operand.vmem [shape: f32[496,16], index: 1, kind: input, shape index: {}]   ;;  %s5368_s5 = inlined_call_operand.vmem [shape: f32[1,16], index: 5, kind: input, shape index: {}]   ;;  %s5369_s3 = inlined_call_operand.vmem [shape: f32[1,16], index: 3, kind: input, shape index: {}]   ;;  %s5370_s6 = inlined_call_operand.vmem [shape: f32[1,16], index: 6, kind: input, shape index: {}]   ;;  %s5371_s7 = inlined_call_operand.vmem [shape: f32[1,16], index: 7, kind: input, shape index: {}]   ;;  %s5372_s8 = inlined_call_operand.vmem [shape: f32[496,16], index: 8, kind: output, shape index: {}]  }
   0x1   :  { %2736 = vmatprep.subr.bf16.mxu0 %v3171_v0  ;;  %2770 = vmatprep.subr.bf16.mxu1 %v3171_v0  ;;  %v153_v1 = vld [vmem:[%s5364_s2] sm:$0xff]  ;;  %v154_v2 = vld [vmem:[%s5364_s2 + $0x8] sm:$0xff]  ;;  %v155_v3 = vld [vmem:[%s5364_s2 + $0x10] sm:$0xff] }
   0x2   :  { %v2737_v4 = vpack.c.bf16 %v154_v2, %v153_v1  ;;  %v156_v5 = vld [vmem:[%s5364_s2 + $0x18] sm:$0xff]  ;;  %v157_v7 = vld [vmem:[%s5364_s2 + $0x20] sm:$0xff]  ;;  %v158_v8 = vld [vmem:[%s5364_s2 + $0x28] sm:$0xff] }
   0x3   :  { %v2740_v6 = vpack.c.bf16 %v156_v5, %v155_v3  ;;  %v30_v9 = vld [vmem:[%s5365_s0 + $0x8] sm:$0xff]  ;;  %v2743_v10 = vpack.c.bf16 %v158_v8, %v157_v7  ;;  %v124_v11 = vld [vmem:[%s5365_s0 + $0x2f8] sm:$0xff]  ;;  %v159_v12 = vld [vmem:[%s5364_s2 + $0x30] sm:$0xff] }
   0x4   :  { %2738 = vmatpush1.bf16.msra.mxu0 %v2737_v4  ;;  %2780 = vmatpush1.bf16.msra.mxu1 %v2737_v4  ;;  %v160_v13 = vld [vmem:[%s5364_s2 + $0x38] sm:$0xff]  ;;  %v161_v15 = vld [vmem:[%s5364_s2 + $0x40] sm:$0xff]  ;;  %v162_v16 = vld [vmem:[%s5364_s2 + $0x48] sm:$0xff] }
   0x5   :  { %2739 = vmatprep.subr.bf16.mxu0 %v3171_v0  ;;  %2771 = vmatprep.subr.bf16.mxu1 %v3171_v0  ;;  %v2746_v14 = vpack.c.bf16 %v160_v13, %v159_v12  ;;  %v2749_v17 = vpack.c.bf16 %v162_v16, %v161_v15  ;;  %v163_v18 = vld [vmem:[%s5364_s2 + $0x50] sm:$0xff]  ;;  %v164_v19 = vld [vmem:[%s5364_s2 + $0x58] sm:$0xff]  ;;  %v165_v21 = vld [vmem:[%s5364_s2 + $0x60] sm:$0xff] }
   0x6   :  { %2386 = vmatprep.mubr.msk.f32.mxu0 %vm180_vm0, %v30_v9  ;;  %2433 = vmatprep.mubr.msk.f32.mxu1 %vm180_vm0, %v124_v11  ;;  %v2752_v20 = vpack.c.bf16 %v164_v19, %v163_v18  ;;  %v166_v22 = vld [vmem:[%s5364_s2 + $0x68] sm:$0xff]  ;;  %v167_v24 = vld [vmem:[%s5364_s2 + $0x70] sm:$0xff]  ;;  %v168_v25 = vld [vmem:[%s5364_s2 + $0x78] sm:$0xff] }
   0x7   :  { %v2755_v23 = vpack.c.bf16 %v166_v22, %v165_v21  ;;  %v2758_v26 = vpack.c.bf16 %v168_v25, %v167_v24  ;;  %v169_v27 = vld [vmem:[%s5364_s2 + $0x80] sm:$0xff]  ;;  %v170_v28 = vld [vmem:[%s5364_s2 + $0x88] sm:$0xff]  ;;  %v171_v30 = vld [vmem:[%s5364_s2 + $0x90] sm:$0xff] }
   0x8   :  { %2741 = vmatpush1.bf16.msra.mxu0 %v2740_v6  ;;  %2781 = vmatpush1.bf16.msra.mxu1 %v2740_v6  ;;  %v2761_v29 = vpack.c.bf16 %v170_v28, %v169_v27  ;;  %v172_v31 = vld [vmem:[%s5364_s2 + $0x98] sm:$0xff]  ;;  %v804_v32 = vld [vmem:[%s5366_s4] sm:$0xff]  ;;  %v805_v33 = vld [vmem:[%s5366_s4 + $0x8] sm:$0xff] }
   0x9   :  { %2742 = vmatprep.subr.bf16.mxu0 %v3171_v0  ;;  %2772 = vmatprep.subr.bf16.mxu1 %v3171_v0  ;;  %v2764_v34 = vpack.c.bf16 %v172_v31, %v171_v30  ;;  %v2766_v35 = vpack.c.bf16 %v805_v33, %v804_v32  ;;  %v29_v36 = vld [vmem:[%s5365_s0] sm:$0xff]  ;;  %v123_v37 = vld [vmem:[%s5365_s0 + $0x2f0] sm:$0xff]  ;;  %v32_v38 = vld [vmem:[%s5365_s0 + $0x18] sm:$0xff] }
   0xa   :  { %v126_v39 = vld [vmem:[%s5365_s0 + $0x308] sm:$0xff]  ;;  %v31_v40 = vld [vmem:[%s5365_s0 + $0x10] sm:$0xff]  ;;  %v125_v41 = vld [vmem:[%s5365_s0 + $0x300] sm:$0xff] }
   0xb   :  { %v34_v42 = vld [vmem:[%s5365_s0 + $0x28] sm:$0xff]  ;;  %v128_v43 = vld [vmem:[%s5365_s0 + $0x318] sm:$0xff]  ;;  %v33_v44 = vld [vmem:[%s5365_s0 + $0x20] sm:$0xff] }
   0xc   :  { %2744 = vmatpush1.bf16.msra.mxu0 %v2743_v10  ;;  %2782 = vmatpush1.bf16.msra.mxu1 %v2743_v10  ;;  %v127_v45 = vld [vmem:[%s5365_s0 + $0x310] sm:$0xff]  ;;  %v36_v46 = vld [vmem:[%s5365_s0 + $0x38] sm:$0xff]  ;;  %v130_v47 = vld [vmem:[%s5365_s0 + $0x328] sm:$0xff] }
   0xd   :  { %2745 = vmatprep.subr.bf16.mxu0 %v3171_v0  ;;  %2773 = vmatprep.subr.bf16.mxu1 %v3171_v0  ;;  %v35_v48 = vld [vmem:[%s5365_s0 + $0x30] sm:$0xff]  ;;  %v129_v49 = vld [vmem:[%s5365_s0 + $0x320] sm:$0xff]  ;;  %v38_v50 = vld [vmem:[%s5365_s0 + $0x48] sm:$0xff] }
   0xe   :  { %v132_v51 = vld [vmem:[%s5365_s0 + $0x338] sm:$0xff]  ;;  %v37_v52 = vld [vmem:[%s5365_s0 + $0x40] sm:$0xff]  ;;  %v131_v53 = vld [vmem:[%s5365_s0 + $0x330] sm:$0xff] }
   0xf   :  { %v40_v54 = vld [vmem:[%s5365_s0 + $0x58] sm:$0xff]  ;;  %v134_v55 = vld [vmem:[%s5365_s0 + $0x348] sm:$0xff]  ;;  %v39_v56 = vld [vmem:[%s5365_s0 + $0x50] sm:$0xff] }
  0x10   :  { %2747 = vmatpush1.bf16.msra.mxu0 %v2746_v14  ;;  %2783 = vmatpush1.bf16.msra.mxu1 %v2746_v14  ;;  %v133_v57 = vld [vmem:[%s5365_s0 + $0x340] sm:$0xff]  ;;  %v42_v58 = vld [vmem:[%s5365_s0 + $0x68] sm:$0xff]  ;;  %v136_v59 = vld [vmem:[%s5365_s0 + $0x358] sm:$0xff] }
  0x11   :  { %2748 = vmatprep.subr.bf16.mxu0 %v3171_v0  ;;  %2774 = vmatprep.subr.bf16.mxu1 %v3171_v0  ;;  %v41_v60 = vld [vmem:[%s5365_s0 + $0x60] sm:$0xff]  ;;  %v135_v61 = vld [vmem:[%s5365_s0 + $0x350] sm:$0xff]  ;;  %v44_v62 = vld [vmem:[%s5365_s0 + $0x78] sm:$0xff] }
  0x12   :  { %v138_v63 = vld [vmem:[%s5365_s0 + $0x368] sm:$0xff]  ;;  %v137_v1 = vld [vmem:[%s5365_s0 + $0x360] sm:$0xff]  ;;  %v140_v3 = vld [vmem:[%s5365_s0 + $0x378] sm:$0xff] }
  0x13   :  { %v46_v2 = vld [vmem:[%s5365_s0 + $0x88] sm:$0xff]  ;;  %v45_v4 = vld [vmem:[%s5365_s0 + $0x80] sm:$0xff]  ;;  %v139_v5 = vld [vmem:[%s5365_s0 + $0x370] sm:$0xff] }
  0x14   :  { %2750 = vmatpush1.bf16.msra.mxu0 %v2749_v17  ;;  %2784 = vmatpush1.bf16.msra.mxu1 %v2749_v17  ;;  %v48_v6 = vld [vmem:[%s5365_s0 + $0x98] sm:$0xff]  ;;  %v142_v7 = vld [vmem:[%s5365_s0 + $0x388] sm:$0xff]  ;;  %v47_v8 = vld [vmem:[%s5365_s0 + $0x90] sm:$0xff] }
  0x15   :  { %2751 = vmatprep.subr.bf16.mxu0 %v3171_v0  ;;  %2775 = vmatprep.subr.bf16.mxu1 %v3171_v0  ;;  %v141_v9 = vld [vmem:[%s5365_s0 + $0x380] sm:$0xff]  ;;  %v50_v10 = vld [vmem:[%s5365_s0 + $0xa8] sm:$0xff]  ;;  %v144_v11 = vld [vmem:[%s5365_s0 + $0x398] sm:$0xff] }
  0x16   :  { %v49_v12 = vld [vmem:[%s5365_s0 + $0xa0] sm:$0xff]  ;;  %v143_v13 = vld [vmem:[%s5365_s0 + $0x390] sm:$0xff]  ;;  %v52_v14 = vld [vmem:[%s5365_s0 + $0xb8] sm:$0xff] }
  0x17   :  { %v146_v15 = vld [vmem:[%s5365_s0 + $0x3a8] sm:$0xff]  ;;  %v51_v16 = vld [vmem:[%s5365_s0 + $0xb0] sm:$0xff]  ;;  %v145_v17 = vld [vmem:[%s5365_s0 + $0x3a0] sm:$0xff] }
  0x18   :  { %2753 = vmatpush1.bf16.msra.mxu0 %v2752_v20  ;;  %2785 = vmatpush1.bf16.msra.mxu1 %v2752_v20  ;;  %v54_v18 = vld [vmem:[%s5365_s0 + $0xc8] sm:$0xff]  ;;  %v148_v19 = vld [vmem:[%s5365_s0 + $0x3b8] sm:$0xff]  ;;  %v53_v20 = vld [vmem:[%s5365_s0 + $0xc0] sm:$0xff] }
  0x19   :  { %2754 = vmatprep.subr.bf16.mxu0 %v3171_v0  ;;  %2776 = vmatprep.subr.bf16.mxu1 %v3171_v0  ;;  %v147_v21 = vld [vmem:[%s5365_s0 + $0x3b0] sm:$0xff]  ;;  %v56_v22 = vld [vmem:[%s5365_s0 + $0xd8] sm:$0xff]  ;;  %v149_v25 = vld [vmem:[%s5365_s0 + $0x3c0] sm:$0xff] }
  0x1a   :  { %v55_v24 = vld [vmem:[%s5365_s0 + $0xd0] sm:$0xff]  ;;  %v152_v27 = vld [vmem:[%s5365_s0 + $0x3d8] sm:$0xff]  ;;  %v57_v28 = vld [vmem:[%s5365_s0 + $0xe0] sm:$0xff] }
  0x1b   :  { %v60_v30 = vld [vmem:[%s5365_s0 + $0xf8] sm:$0xff]  ;;  %v742_v31 = vld [vmem:[%s5367_s1] sm:$0xff]  ;;  %v59_v32 = vld [vmem:[%s5365_s0 + $0xf0] sm:$0xff] }
  0x1c   :  { %2756 = vmatpush1.bf16.msra.mxu0 %v2755_v23  ;;  %2786 = vmatpush1.bf16.msra.mxu1 %v2755_v23  ;;  %v150_v23 = vld [vmem:[%s5365_s0 + $0x3c8] sm:$0xff] }
  0x1d   :  { %2757 = vmatprep.subr.bf16.mxu0 %v3171_v0  ;;  %2777 = vmatprep.subr.bf16.mxu1 %v3171_v0  ;;  %v743_v33 = vld [vmem:[%s5367_s1 + $0x8] sm:$0xff] }
  0x20   :  { %2759 = vmatpush1.bf16.msra.mxu0 %v2758_v26  ;;  %2787 = vmatpush1.bf16.msra.mxu1 %v2758_v26  ;;  %v58_v26 = vld [vmem:[%s5365_s0 + $0xe8] sm:$0xff] }
  0x21   :  { %2760 = vmatprep.subr.bf16.mxu0 %v3171_v0  ;;  %2778 = vmatprep.subr.bf16.mxu1 %v3171_v0 }
  0x24   :  { %2762 = vmatpush1.bf16.msra.mxu0 %v2761_v29  ;;  %2788 = vmatpush1.bf16.msra.mxu1 %v2761_v29  ;;  %v151_v29 = vld [vmem:[%s5365_s0 + $0x3d0] sm:$0xff] }
  0x25   :  { %2763 = vmatprep.subr.bf16.mxu0 %v3171_v0  ;;  %2779 = vmatprep.subr.bf16.mxu1 %v3171_v0  ;;  %v43_v0 = vld [vmem:[%s5365_s0 + $0x70] sm:$0xff] }
  0x28   :  { %2765 = vmatpush1.bf16.msra.mxu0 %v2764_v34  ;;  %2789 = vmatpush1.bf16.msra.mxu1 %v2764_v34  ;;  %v62_v34 = vld [vmem:[%s5365_s0 + $0x108] sm:$0xff] }
  0x29   :  { %2767 = vmatprep.subr.bf16.mxu1 %v2766_v35 }
  0x2b   :  { %432 = vmatmul.mubr.f32.vlgmr.msra.gmra.mrb[0].mxu0 %v29_v36  ;;  %667 = vmatmul.mubr.f32.vlgmr.msra.gmra.mrb[0].mxu1 %v123_v37  ;;  %v61_v36 = vld [vmem:[%s5365_s0 + $0x100] sm:$0xff]  ;;  %v745_v37 = vld [vmem:[%s5367_s1 + $0x18] sm:$0xff] }
  0x2c   :  { %2769 = vmatpush3.bf16.msra.mxu1 %v2766_v35  ;;  %2387 = vmatprep.mubr.msk.f32.mxu0 %vm180_vm0, %v32_v38  ;;  %v744_v35 = vld [vmem:[%s5367_s1 + $0x10] sm:$0xff]  ;;  %v64_v38 = vld [vmem:[%s5365_s0 + $0x118] sm:$0xff] }
  0x2d   :  { %2434 = vmatprep.mubr.msk.f32.mxu1 %vm180_vm0, %v126_v39  ;;  %v746_v39 = vld [vmem:[%s5367_s1 + $0x20] sm:$0xff] }
  0x2f   :  { %437 = vmatmul.mubr.f32.gmra.mrb[2].mxu0 %v31_v40  ;;  %672 = vmatmul.mubr.f32.gmra.mrb[2].mxu1 %v125_v41  ;;  %v63_v40 = vld [vmem:[%s5365_s0 + $0x110] sm:$0xff]  ;;  %v747_v41 = vld [vmem:[%s5367_s1 + $0x28] sm:$0xff] }
  0x30   :  { %2388 = vmatprep.mubr.msk.f32.mxu0 %vm180_vm0, %v34_v42  ;;  %2435 = vmatprep.mubr.msk.f32.mxu1 %vm180_vm0, %v128_v43  ;;  %v66_v42 = vld [vmem:[%s5365_s0 + $0x128] sm:$0xff]  ;;  %v748_v43 = vld [vmem:[%s5367_s1 + $0x30] sm:$0xff] }
  0x33   :  { %442 = vmatmul.mubr.f32.gmra.mrb[4].mxu0 %v33_v44  ;;  %677 = vmatmul.mubr.f32.gmra.mrb[4].mxu1 %v127_v45  ;;  %v65_v44 = vld [vmem:[%s5365_s0 + $0x120] sm:$0xff]  ;;  %v749_v45 = vld [vmem:[%s5367_s1 + $0x38] sm:$0xff] }
  0x34   :  { %2389 = vmatprep.mubr.msk.f32.mxu0 %vm180_vm0, %v36_v46  ;;  %2436 = vmatprep.mubr.msk.f32.mxu1 %vm180_vm0, %v130_v47  ;;  %v68_v46 = vld [vmem:[%s5365_s0 + $0x138] sm:$0xff]  ;;  %v750_v47 = vld [vmem:[%s5367_s1 + $0x40] sm:$0xff] }
  0x37   :  { %447 = vmatmul.mubr.f32.gmra.mrb[6].mxu0 %v35_v48  ;;  %682 = vmatmul.mubr.f32.gmra.mrb[6].mxu1 %v129_v49  ;;  %v67_v48 = vld [vmem:[%s5365_s0 + $0x130] sm:$0xff]  ;;  %v751_v49 = vld [vmem:[%s5367_s1 + $0x48] sm:$0xff] }
  0x38   :  { %2390 = vmatprep.mubr.msk.f32.mxu0 %vm180_vm0, %v38_v50  ;;  %2437 = vmatprep.mubr.msk.f32.mxu1 %vm180_vm0, %v132_v51  ;;  %v70_v50 = vld [vmem:[%s5365_s0 + $0x148] sm:$0xff]  ;;  %v752_v51 = vld [vmem:[%s5367_s1 + $0x50] sm:$0xff] }
  0x3b   :  { %452 = vmatmul.mubr.f32.gmra.mrb[8].mxu0 %v37_v52  ;;  %687 = vmatmul.mubr.f32.gmra.mrb[8].mxu1 %v131_v53  ;;  %v69_v52 = vld [vmem:[%s5365_s0 + $0x140] sm:$0xff]  ;;  %v753_v53 = vld [vmem:[%s5367_s1 + $0x58] sm:$0xff] }
  0x3c   :  { %2391 = vmatprep.mubr.msk.f32.mxu0 %vm180_vm0, %v40_v54  ;;  %2438 = vmatprep.mubr.msk.f32.mxu1 %vm180_vm0, %v134_v55  ;;  %v72_v54 = vld [vmem:[%s5365_s0 + $0x158] sm:$0xff]  ;;  %v754_v55 = vld [vmem:[%s5367_s1 + $0x60] sm:$0xff] }
  0x3f   :  { %457 = vmatmul.mubr.f32.gmra.mrb[10].mxu0 %v39_v56  ;;  %692 = vmatmul.mubr.f32.gmra.mrb[10].mxu1 %v133_v57  ;;  %v71_v56 = vld [vmem:[%s5365_s0 + $0x150] sm:$0xff]  ;;  %v755_v57 = vld [vmem:[%s5367_s1 + $0x68] sm:$0xff] }
  0x40   :  { %2392 = vmatprep.mubr.msk.f32.mxu0 %vm180_vm0, %v42_v58  ;;  %2439 = vmatprep.mubr.msk.f32.mxu1 %vm180_vm0, %v136_v59  ;;  %v74_v58 = vld [vmem:[%s5365_s0 + $0x168] sm:$0xff]  ;;  %v756_v59 = vld [vmem:[%s5367_s1 + $0x70] sm:$0xff] }
  0x43   :  { %462 = vmatmul.mubr.f32.gmra.mrb[12].mxu0 %v41_v60  ;;  %697 = vmatmul.mubr.f32.gmra.mrb[12].mxu1 %v135_v61  ;;  %v73_v60 = vld [vmem:[%s5365_s0 + $0x160] sm:$0xff]  ;;  %v757_v61 = vld [vmem:[%s5367_s1 + $0x78] sm:$0xff] }
  0x44   :  { %2393 = vmatprep.mubr.msk.f32.mxu0 %vm180_vm0, %v44_v62  ;;  %2440 = vmatprep.mubr.msk.f32.mxu1 %vm180_vm0, %v138_v63  ;;  %v76_v62 = vld [vmem:[%s5365_s0 + $0x178] sm:$0xff]  ;;  %v758_v63 = vld [vmem:[%s5367_s1 + $0x80] sm:$0xff] }
  0x47   :  { %467 = vmatmul.mubr.f32.gmra.mrb[14].mxu0 %v43_v0  ;;  %702 = vmatmul.mubr.f32.gmra.mrb[14].mxu1 %v137_v1  ;;  %v75_v0 = vld [vmem:[%s5365_s0 + $0x170] sm:$0xff]  ;;  %v759_v1 = vld [vmem:[%s5367_s1 + $0x88] sm:$0xff] }
  0x48   :  { %2394 = vmatprep.mubr.msk.f32.mxu0 %vm180_vm0, %v46_v2  ;;  %2441 = vmatprep.mubr.msk.f32.mxu1 %vm180_vm0, %v140_v3  ;;  %v78_v2 = vld [vmem:[%s5365_s0 + $0x188] sm:$0xff]  ;;  %v760_v3 = vld [vmem:[%s5367_s1 + $0x90] sm:$0xff] }
  0x4b   :  { %472 = vmatmul.mubr.f32.gmra.mrb[16].mxu0 %v45_v4  ;;  %707 = vmatmul.mubr.f32.gmra.mrb[16].mxu1 %v139_v5  ;;  %v77_v4 = vld [vmem:[%s5365_s0 + $0x180] sm:$0xff]  ;;  %v761_v5 = vld [vmem:[%s5367_s1 + $0x98] sm:$0xff] }
  0x4c   :  { %2395 = vmatprep.mubr.msk.f32.mxu0 %vm180_vm0, %v48_v6  ;;  %2442 = vmatprep.mubr.msk.f32.mxu1 %vm180_vm0, %v142_v7  ;;  %v80_v6 = vld [vmem:[%s5365_s0 + $0x198] sm:$0xff]  ;;  %v762_v7 = vld [vmem:[%s5367_s1 + $0xa0] sm:$0xff] }
  0x4f   :  { %477 = vmatmul.mubr.f32.gmra.mrb[18].mxu0 %v47_v8  ;;  %712 = vmatmul.mubr.f32.gmra.mrb[18].mxu1 %v141_v9  ;;  %v79_v8 = vld [vmem:[%s5365_s0 + $0x190] sm:$0xff]  ;;  %v763_v9 = vld [vmem:[%s5367_s1 + $0xa8] sm:$0xff] }
  0x50   :  { %2396 = vmatprep.mubr.msk.f32.mxu0 %vm180_vm0, %v50_v10  ;;  %2443 = vmatprep.mubr.msk.f32.mxu1 %vm180_vm0, %v144_v11  ;;  %v82_v10 = vld [vmem:[%s5365_s0 + $0x1a8] sm:$0xff]  ;;  %v764_v11 = vld [vmem:[%s5367_s1 + $0xb0] sm:$0xff] }
  0x53   :  { %482 = vmatmul.mubr.f32.gmra.mrb[20].mxu0 %v49_v12  ;;  %717 = vmatmul.mubr.f32.gmra.mrb[20].mxu1 %v143_v13  ;;  %v81_v12 = vld [vmem:[%s5365_s0 + $0x1a0] sm:$0xff]  ;;  %v765_v13 = vld [vmem:[%s5367_s1 + $0xb8] sm:$0xff] }
  0x54   :  { %2397 = vmatprep.mubr.msk.f32.mxu0 %vm180_vm0, %v52_v14  ;;  %2444 = vmatprep.mubr.msk.f32.mxu1 %vm180_vm0, %v146_v15  ;;  %v84_v14 = vld [vmem:[%s5365_s0 + $0x1b8] sm:$0xff]  ;;  %v766_v15 = vld [vmem:[%s5367_s1 + $0xc0] sm:$0xff] }
  0x57   :  { %487 = vmatmul.mubr.f32.gmra.mrb[22].mxu0 %v51_v16  ;;  %722 = vmatmul.mubr.f32.gmra.mrb[22].mxu1 %v145_v17  ;;  %v83_v16 = vld [vmem:[%s5365_s0 + $0x1b0] sm:$0xff]  ;;  %v767_v17 = vld [vmem:[%s5367_s1 + $0xc8] sm:$0xff] }
  0x58   :  { %2398 = vmatprep.mubr.msk.f32.mxu0 %vm180_vm0, %v54_v18  ;;  %2445 = vmatprep.mubr.msk.f32.mxu1 %vm180_vm0, %v148_v19  ;;  %v86_v18 = vld [vmem:[%s5365_s0 + $0x1c8] sm:$0xff]  ;;  %v768_v19 = vld [vmem:[%s5367_s1 + $0xd0] sm:$0xff] }
  0x5b   :  { %492 = vmatmul.mubr.f32.gmra.mrb[24].mxu0 %v53_v20  ;;  %727 = vmatmul.mubr.f32.gmra.mrb[24].mxu1 %v147_v21  ;;  %v85_v20 = vld [vmem:[%s5365_s0 + $0x1c0] sm:$0xff]  ;;  %v769_v21 = vld [vmem:[%s5367_s1 + $0xd8] sm:$0xff] }
  0x5c   :  { %2399 = vmatprep.mubr.msk.f32.mxu0 %vm180_vm0, %v56_v22  ;;  %2446 = vmatprep.mubr.msk.f32.mxu1 %vm180_vm0, %v150_v23  ;;  %v88_v22 = vld [vmem:[%s5365_s0 + $0x1d8] sm:$0xff]  ;;  %v770_v23 = vld [vmem:[%s5367_s1 + $0xe0] sm:$0xff] }
  0x5f   :  { %497 = vmatmul.mubr.f32.gmra.mrb[26].mxu0 %v55_v24  ;;  %732 = vmatmul.mubr.f32.gmra.mrb[26].mxu1 %v149_v25  ;;  %v87_v24 = vld [vmem:[%s5365_s0 + $0x1d0] sm:$0xff]  ;;  %v771_v25 = vld [vmem:[%s5367_s1 + $0xe8] sm:$0xff] }
  0x60   :  { %2400 = vmatprep.mubr.msk.f32.mxu0 %vm180_vm0, %v58_v26  ;;  %2447 = vmatprep.mubr.msk.f32.mxu1 %vm180_vm0, %v152_v27  ;;  %v90_v26 = vld [vmem:[%s5365_s0 + $0x1e8] sm:$0xff]  ;;  %v772_v27 = vld [vmem:[%s5367_s1 + $0xf0] sm:$0xff] }
  0x63   :  { %502 = vmatmul.mubr.f32.gmra.mrb[28].mxu0 %v57_v28  ;;  %737 = vmatmul.mubr.f32.gmra.mrb[28].mxu1 %v151_v29  ;;  %v89_v28 = vld [vmem:[%s5365_s0 + $0x1e0] sm:$0xff]  ;;  %v773_v29 = vld [vmem:[%s5367_s1 + $0xf8] sm:$0xff] }
  0x64   :  { %2401 = vmatprep.mubr.msk.f32.mxu0 %vm180_vm0, %v60_v30  ;;  %2643 = vmatprep.mubr.msk.f32.mxu1 %vm813_vm1, %v742_v31  ;;  %v92_v30 = vld [vmem:[%s5365_s0 + $0x1f8] sm:$0xff]  ;;  %v774_v31 = vld [vmem:[%s5367_s1 + $0x100] sm:$0xff] }
  0x67   :  { %507 = vmatmul.mubr.f32.gmra.mrb[30].mxu0 %v59_v32  ;;  %2644 = vmatmul.mubr.msk.f32.vlgmr.msra.gmra.mrb[30].mxu1 %vm813_vm1, %v743_v33  ;;  %v91_v32 = vld [vmem:[%s5365_s0 + $0x1f0] sm:$0xff]  ;;  %v775_v33 = vld [vmem:[%s5367_s1 + $0x108] sm:$0xff] }
  0x68   :  { %2402 = vmatprep.mubr.msk.f32.mxu0 %vm180_vm0, %v62_v34  ;;  %2646 = vmatprep.mubr.msk.f32.mxu1 %vm813_vm1, %v744_v35  ;;  %v94_v34 = vld [vmem:[%s5365_s0 + $0x208] sm:$0xff]  ;;  %v776_v35 = vld [vmem:[%s5367_s1 + $0x110] sm:$0xff] }
  0x6b   :  { %512 = vmatmul.mubr.f32.gmra.mrb[32].mxu0 %v61_v36  ;;  %2647 = vmatmul.mubr.msk.f32.gmra.mrb[32].mxu1 %vm813_vm1, %v745_v37  ;;  %v93_v36 = vld [vmem:[%s5365_s0 + $0x200] sm:$0xff]  ;;  %v777_v37 = vld [vmem:[%s5367_s1 + $0x118] sm:$0xff] }
  0x6c   :  { %2403 = vmatprep.mubr.msk.f32.mxu0 %vm180_vm0, %v64_v38  ;;  %2649 = vmatprep.mubr.msk.f32.mxu1 %vm813_vm1, %v746_v39  ;;  %v96_v38 = vld [vmem:[%s5365_s0 + $0x218] sm:$0xff]  ;;  %v778_v39 = vld [vmem:[%s5367_s1 + $0x120] sm:$0xff] }
  0x6f   :  { %517 = vmatmul.mubr.f32.gmra.mrb[34].mxu0 %v63_v40  ;;  %2650 = vmatmul.mubr.msk.f32.gmra.mrb[34].mxu1 %vm813_vm1, %v747_v41  ;;  %v95_v40 = vld [vmem:[%s5365_s0 + $0x210] sm:$0xff]  ;;  %v779_v41 = vld [vmem:[%s5367_s1 + $0x128] sm:$0xff] }
  0x70   :  { %2404 = vmatprep.mubr.msk.f32.mxu0 %vm180_vm0, %v66_v42  ;;  %2652 = vmatprep.mubr.msk.f32.mxu1 %vm813_vm1, %v748_v43  ;;  %v98_v42 = vld [vmem:[%s5365_s0 + $0x228] sm:$0xff]  ;;  %v780_v43 = vld [vmem:[%s5367_s1 + $0x130] sm:$0xff] }
  0x73   :  { %522 = vmatmul.mubr.f32.gmra.mrb[36].mxu0 %v65_v44  ;;  %2653 = vmatmul.mubr.msk.f32.gmra.mrb[36].mxu1 %vm813_vm1, %v749_v45  ;;  %v97_v44 = vld [vmem:[%s5365_s0 + $0x220] sm:$0xff]  ;;  %v781_v45 = vld [vmem:[%s5367_s1 + $0x138] sm:$0xff] }
  0x74   :  { %2405 = vmatprep.mubr.msk.f32.mxu0 %vm180_vm0, %v68_v46  ;;  %2655 = vmatprep.mubr.msk.f32.mxu1 %vm813_vm1, %v750_v47  ;;  %v100_v46 = vld [vmem:[%s5365_s0 + $0x238] sm:$0xff]  ;;  %v782_v47 = vld [vmem:[%s5367_s1 + $0x140] sm:$0xff] }
  0x77   :  { %527 = vmatmul.mubr.f32.gmra.mrb[38].mxu0 %v67_v48  ;;  %2656 = vmatmul.mubr.msk.f32.gmra.mrb[38].mxu1 %vm813_vm1, %v751_v49  ;;  %v99_v48 = vld [vmem:[%s5365_s0 + $0x230] sm:$0xff]  ;;  %v783_v49 = vld [vmem:[%s5367_s1 + $0x148] sm:$0xff] }
  0x78   :  { %2406 = vmatprep.mubr.msk.f32.mxu0 %vm180_vm0, %v70_v50  ;;  %2658 = vmatprep.mubr.msk.f32.mxu1 %vm813_vm1, %v752_v51  ;;  %v102_v50 = vld [vmem:[%s5365_s0 + $0x248] sm:$0xff]  ;;  %v784_v51 = vld [vmem:[%s5367_s1 + $0x150] sm:$0xff] }
  0x7b   :  { %532 = vmatmul.mubr.f32.gmra.mrb[40].mxu0 %v69_v52  ;;  %2659 = vmatmul.mubr.msk.f32.gmra.mrb[40].mxu1 %vm813_vm1, %v753_v53  ;;  %v101_v52 = vld [vmem:[%s5365_s0 + $0x240] sm:$0xff]  ;;  %v785_v53 = vld [vmem:[%s5367_s1 + $0x158] sm:$0xff] }
  0x7c   :  { %2407 = vmatprep.mubr.msk.f32.mxu0 %vm180_vm0, %v72_v54  ;;  %2661 = vmatprep.mubr.msk.f32.mxu1 %vm813_vm1, %v754_v55  ;;  %v104_v54 = vld [vmem:[%s5365_s0 + $0x258] sm:$0xff]  ;;  %v786_v55 = vld [vmem:[%s5367_s1 + $0x160] sm:$0xff] }
  0x7f   :  { %537 = vmatmul.mubr.f32.gmra.mrb[42].mxu0 %v71_v56  ;;  %2662 = vmatmul.mubr.msk.f32.gmra.mrb[42].mxu1 %vm813_vm1, %v755_v57  ;;  %v103_v56 = vld [vmem:[%s5365_s0 + $0x250] sm:$0xff]  ;;  %v787_v57 = vld [vmem:[%s5367_s1 + $0x168] sm:$0xff] }
  0x80   :  { %2408 = vmatprep.mubr.msk.f32.mxu0 %vm180_vm0, %v74_v58  ;;  %2664 = vmatprep.mubr.msk.f32.mxu1 %vm813_vm1, %v756_v59  ;;  %v106_v58 = vld [vmem:[%s5365_s0 + $0x268] sm:$0xff]  ;;  %v788_v59 = vld [vmem:[%s5367_s1 + $0x170] sm:$0xff] }
  0x83   :  { %542 = vmatmul.mubr.f32.gmra.mrb[44].mxu0 %v73_v60  ;;  %2665 = vmatmul.mubr.msk.f32.gmra.mrb[44].mxu1 %vm813_vm1, %v757_v61  ;;  %v105_v60 = vld [vmem:[%s5365_s0 + $0x260] sm:$0xff]  ;;  %v789_v61 = vld [vmem:[%s5367_s1 + $0x178] sm:$0xff] }
  0x84   :  { %2409 = vmatprep.mubr.msk.f32.mxu0 %vm180_vm0, %v76_v62  ;;  %2667 = vmatprep.mubr.msk.f32.mxu1 %vm813_vm1, %v758_v63  ;;  %v108_v62 = vld [vmem:[%s5365_s0 + $0x278] sm:$0xff]  ;;  %v790_v63 = vld [vmem:[%s5367_s1 + $0x180] sm:$0xff] }
  0x87   :  { %547 = vmatmul.mubr.f32.gmra.mrb[46].mxu0 %v75_v0  ;;  %2668 = vmatmul.mubr.msk.f32.gmra.mrb[46].mxu1 %vm813_vm1, %v759_v1  ;;  %v107_v0 = vld [vmem:[%s5365_s0 + $0x270] sm:$0xff]  ;;  %v791_v1 = vld [vmem:[%s5367_s1 + $0x188] sm:$0xff] }
  0x88   :  { %2410 = vmatprep.mubr.msk.f32.mxu0 %vm180_vm0, %v78_v2  ;;  %2670 = vmatprep.mubr.msk.f32.mxu1 %vm813_vm1, %v760_v3  ;;  %v110_v2 = vld [vmem:[%s5365_s0 + $0x288] sm:$0xff]  ;;  %v792_v3 = vld [vmem:[%s5367_s1 + $0x190] sm:$0xff] }
  0x8b   :  { %552 = vmatmul.mubr.f32.gmra.mrb[48].mxu0 %v77_v4  ;;  %2671 = vmatmul.mubr.msk.f32.gmra.mrb[48].mxu1 %vm813_vm1, %v761_v5  ;;  %v109_v4 = vld [vmem:[%s5365_s0 + $0x280] sm:$0xff]  ;;  %v793_v5 = vld [vmem:[%s5367_s1 + $0x198] sm:$0xff] }
  0x8c   :  { %2411 = vmatprep.mubr.msk.f32.mxu0 %vm180_vm0, %v80_v6  ;;  %2673 = vmatprep.mubr.msk.f32.mxu1 %vm813_vm1, %v762_v7  ;;  %v112_v6 = vld [vmem:[%s5365_s0 + $0x298] sm:$0xff]  ;;  %v794_v7 = vld [vmem:[%s5367_s1 + $0x1a0] sm:$0xff] }
  0x8f   :  { %557 = vmatmul.mubr.f32.gmra.mrb[50].mxu0 %v79_v8  ;;  %2674 = vmatmul.mubr.msk.f32.gmra.mrb[50].mxu1 %vm813_vm1, %v763_v9  ;;  %v111_v8 = vld [vmem:[%s5365_s0 + $0x290] sm:$0xff]  ;;  %v795_v9 = vld [vmem:[%s5367_s1 + $0x1a8] sm:$0xff] }
  0x90   :  { %2412 = vmatprep.mubr.msk.f32.mxu0 %vm180_vm0, %v82_v10  ;;  %2676 = vmatprep.mubr.msk.f32.mxu1 %vm813_vm1, %v764_v11  ;;  %v114_v10 = vld [vmem:[%s5365_s0 + $0x2a8] sm:$0xff]  ;;  %v796_v11 = vld [vmem:[%s5367_s1 + $0x1b0] sm:$0xff] }
  0x93   :  { %562 = vmatmul.mubr.f32.gmra.mrb[52].mxu0 %v81_v12  ;;  %2677 = vmatmul.mubr.msk.f32.gmra.mrb[52].mxu1 %vm813_vm1, %v765_v13  ;;  %v113_v12 = vld [vmem:[%s5365_s0 + $0x2a0] sm:$0xff]  ;;  %v797_v13 = vld [vmem:[%s5367_s1 + $0x1b8] sm:$0xff] }
  0x94   :  { %2413 = vmatprep.mubr.msk.f32.mxu0 %vm180_vm0, %v84_v14  ;;  %2679 = vmatprep.mubr.msk.f32.mxu1 %vm813_vm1, %v766_v15  ;;  %v116_v14 = vld [vmem:[%s5365_s0 + $0x2b8] sm:$0xff]  ;;  %v798_v15 = vld [vmem:[%s5367_s1 + $0x1c0] sm:$0xff] }
  0x97   :  { %567 = vmatmul.mubr.f32.gmra.mrb[54].mxu0 %v83_v16  ;;  %2680 = vmatmul.mubr.msk.f32.gmra.mrb[54].mxu1 %vm813_vm1, %v767_v17  ;;  %v115_v16 = vld [vmem:[%s5365_s0 + $0x2b0] sm:$0xff]  ;;  %v799_v17 = vld [vmem:[%s5367_s1 + $0x1c8] sm:$0xff] }
  0x98   :  { %2414 = vmatprep.mubr.msk.f32.mxu0 %vm180_vm0, %v86_v18  ;;  %2682 = vmatprep.mubr.msk.f32.mxu1 %vm813_vm1, %v768_v19  ;;  %v118_v18 = vld [vmem:[%s5365_s0 + $0x2c8] sm:$0xff]  ;;  %v800_v19 = vld [vmem:[%s5367_s1 + $0x1d0] sm:$0xff] }
  0x9b   :  { %572 = vmatmul.mubr.f32.gmra.mrb[56].mxu0 %v85_v20  ;;  %2683 = vmatmul.mubr.msk.f32.gmra.mrb[56].mxu1 %vm813_vm1, %v769_v21  ;;  %v117_v20 = vld [vmem:[%s5365_s0 + $0x2c0] sm:$0xff]  ;;  %v801_v21 = vld [vmem:[%s5367_s1 + $0x1d8] sm:$0xff] }
  0x9c   :  { %2415 = vmatprep.mubr.msk.f32.mxu0 %vm180_vm0, %v88_v22  ;;  %2685 = vmatprep.mubr.msk.f32.mxu1 %vm813_vm1, %v770_v23  ;;  %v120_v22 = vld [vmem:[%s5365_s0 + $0x2d8] sm:$0xff]  ;;  %v802_v23 = vld [vmem:[%s5367_s1 + $0x1e0] sm:$0xff] }
  0x9f   :  { %577 = vmatmul.mubr.f32.gmra.mrb[58].mxu0 %v87_v24  ;;  %2686 = vmatmul.mubr.msk.f32.gmra.mrb[58].mxu1 %vm813_vm1, %v771_v25  ;;  %v119_v24 = vld [vmem:[%s5365_s0 + $0x2d0] sm:$0xff]  ;;  %v803_v25 = vld [vmem:[%s5367_s1 + $0x1e8] sm:$0xff] }
  0xa0   :  { %2416 = vmatprep.mubr.msk.f32.mxu0 %vm180_vm0, %v90_v26  ;;  %2688 = vmatprep.mubr.msk.f32.mxu1 %vm813_vm1, %v772_v27  ;;  %v122_v26 = vld [vmem:[%s5365_s0 + $0x2e8] sm:$0xff]  ;;  %v121_v27 = vld [vmem:[%s5365_s0 + $0x2e0] sm:$0xff] }
  0xa3   :  { %582 = vmatmul.mubr.f32.gmra.mrb[60].mxu0 %v89_v28  ;;  %2689 = vmatmul.mubr.msk.f32.gmra.mrb[60].mxu1 %vm813_vm1, %v773_v29 }
  0xa4   :  { %2417 = vmatprep.mubr.msk.f32.mxu0 %vm180_vm0, %v92_v30  ;;  %2691 = vmatprep.mubr.msk.f32.mxu1 %vm813_vm1, %v774_v31 }
  0xa7   :  { %587 = vmatmul.mubr.f32.gmra.mrb[62].mxu0 %v91_v32  ;;  %2692 = vmatmul.mubr.msk.f32.gmra.mrb[62].mxu1 %vm813_vm1, %v775_v33 }
  0xa8   :  { %2418 = vmatprep.mubr.msk.f32.mxu0 %vm180_vm0, %v94_v34  ;;  %2694 = vmatprep.mubr.msk.f32.mxu1 %vm813_vm1, %v776_v35 }
  0xab   :  { %592 = vmatmul.mubr.f32.gmra.mrb[64].mxu0 %v93_v36  ;;  %2695 = vmatmul.mubr.msk.f32.gmra.mrb[64].mxu1 %vm813_vm1, %v777_v37 }
  0xac   :  { %2419 = vmatprep.mubr.msk.f32.mxu0 %vm180_vm0, %v96_v38  ;;  %2697 = vmatprep.mubr.msk.f32.mxu1 %vm813_vm1, %v778_v39 }
  0xaf   :  { %597 = vmatmul.mubr.f32.gmra.mrb[66].mxu0 %v95_v40  ;;  %2698 = vmatmul.mubr.msk.f32.gmra.mrb[66].mxu1 %vm813_vm1, %v779_v41 }
  0xb0   :  { %2420 = vmatprep.mubr.msk.f32.mxu0 %vm180_vm0, %v98_v42  ;;  %2700 = vmatprep.mubr.msk.f32.mxu1 %vm813_vm1, %v780_v43 }
  0xb3   :  { %602 = vmatmul.mubr.f32.gmra.mrb[68].mxu0 %v97_v44  ;;  %2701 = vmatmul.mubr.msk.f32.gmra.mrb[68].mxu1 %vm813_vm1, %v781_v45 }
  0xb4   :  { %2421 = vmatprep.mubr.msk.f32.mxu0 %vm180_vm0, %v100_v46  ;;  %2703 = vmatprep.mubr.msk.f32.mxu1 %vm813_vm1, %v782_v47 }
  0xb7   :  { %607 = vmatmul.mubr.f32.gmra.mrb[70].mxu0 %v99_v48  ;;  %2704 = vmatmul.mubr.msk.f32.gmra.mrb[70].mxu1 %vm813_vm1, %v783_v49 }
  0xb8   :  { %2422 = vmatprep.mubr.msk.f32.mxu0 %vm180_vm0, %v102_v50  ;;  %2706 = vmatprep.mubr.msk.f32.mxu1 %vm813_vm1, %v784_v51 }
  0xbb   :  { %612 = vmatmul.mubr.f32.gmra.mrb[72].mxu0 %v101_v52  ;;  %2707 = vmatmul.mubr.msk.f32.gmra.mrb[72].mxu1 %vm813_vm1, %v785_v53 }
  0xbc   :  { %2423 = vmatprep.mubr.msk.f32.mxu0 %vm180_vm0, %v104_v54  ;;  %2709 = vmatprep.mubr.msk.f32.mxu1 %vm813_vm1, %v786_v55 }
  0xbf   :  { %617 = vmatmul.mubr.f32.gmra.mrb[74].mxu0 %v103_v56  ;;  %2710 = vmatmul.mubr.msk.f32.gmra.mrb[74].mxu1 %vm813_vm1, %v787_v57 }
  0xc0   :  { %2424 = vmatprep.mubr.msk.f32.mxu0 %vm180_vm0, %v106_v58  ;;  %2712 = vmatprep.mubr.msk.f32.mxu1 %vm813_vm1, %v788_v59 }
  0xc3   :  { %622 = vmatmul.mubr.f32.gmra.mrb[76].mxu0 %v105_v60  ;;  %2713 = vmatmul.mubr.msk.f32.gmra.mrb[76].mxu1 %vm813_vm1, %v789_v61 }
  0xc4   :  { %2425 = vmatprep.mubr.msk.f32.mxu0 %vm180_vm0, %v108_v62  ;;  %2715 = vmatprep.mubr.msk.f32.mxu1 %vm813_vm1, %v790_v63 }
  0xc7   :  { %627 = vmatmul.mubr.f32.gmra.mrb[78].mxu0 %v107_v0  ;;  %2716 = vmatmul.mubr.msk.f32.gmra.mrb[78].mxu1 %vm813_vm1, %v791_v1 }
  0xc8   :  { %2426 = vmatprep.mubr.msk.f32.mxu0 %vm180_vm0, %v110_v2  ;;  %2718 = vmatprep.mubr.msk.f32.mxu1 %vm813_vm1, %v792_v3 }
  0xcb   :  { %632 = vmatmul.mubr.f32.gmra.mrb[80].mxu0 %v109_v4  ;;  %2719 = vmatmul.mubr.msk.f32.gmra.mrb[80].mxu1 %vm813_vm1, %v793_v5 }
  0xcc   :  { %2427 = vmatprep.mubr.msk.f32.mxu0 %vm180_vm0, %v112_v6  ;;  %2721 = vmatprep.mubr.msk.f32.mxu1 %vm813_vm1, %v794_v7 }
  0xcf   :  { %637 = vmatmul.mubr.f32.gmra.mrb[82].mxu0 %v111_v8  ;;  %2722 = vmatmul.mubr.msk.f32.gmra.mrb[82].mxu1 %vm813_vm1, %v795_v9 }
  0xd0   :  { %2428 = vmatprep.mubr.msk.f32.mxu0 %vm180_vm0, %v114_v10  ;;  %2724 = vmatprep.mubr.msk.f32.mxu1 %vm813_vm1, %v796_v11 }
  0xd3   :  { %642 = vmatmul.mubr.f32.gmra.mrb[84].mxu0 %v113_v12  ;;  %2725 = vmatmul.mubr.msk.f32.gmra.mrb[84].mxu1 %vm813_vm1, %v797_v13 }
  0xd4   :  { %2429 = vmatprep.mubr.msk.f32.mxu0 %vm180_vm0, %v116_v14  ;;  %2727 = vmatprep.mubr.msk.f32.mxu1 %vm813_vm1, %v798_v15 }
  0xd7   :  { %647 = vmatmul.mubr.f32.gmra.mrb[86].mxu0 %v115_v16  ;;  %2728 = vmatmul.mubr.msk.f32.gmra.mrb[86].mxu1 %vm813_vm1, %v799_v17 }
  0xd8   :  { %2430 = vmatprep.mubr.msk.f32.mxu0 %vm180_vm0, %v118_v18  ;;  %2730 = vmatprep.mubr.msk.f32.mxu1 %vm813_vm1, %v800_v19 }
  0xdb   :  { %652 = vmatmul.mubr.f32.gmra.mrb[88].mxu0 %v117_v20  ;;  %2731 = vmatmul.mubr.msk.f32.gmra.mrb[88].mxu1 %vm813_vm1, %v801_v21 }
  0xdc   :  { %2431 = vmatprep.mubr.msk.f32.mxu0 %vm180_vm0, %v120_v22  ;;  %2733 = vmatprep.mubr.msk.f32.mxu1 %vm813_vm1, %v802_v23 }
  0xdf   :  { %657 = vmatmul.mubr.f32.gmra.mrb[90].mxu0 %v119_v24  ;;  %2734 = vmatmul.mubr.msk.f32.gmra.mrb[90].mxu1 %vm813_vm1, %v803_v25  ;;  %v4048_v24 = vld [vmem:[%s5368_s5] ss:$0 sm:$0xff] }
  0xe0   :  { %2432 = vmatprep.mubr.msk.f32.mxu0 %vm180_vm0, %v122_v26 }
  0xe3   :  { %662 = vmatmul.mubr.f32.gmra.mrb[92].mxu0 %v121_v27 }
  0xfe   :  { %v3985_v28 = vpop.f32.mrb[0].mxu1  ;;  %v3987_v29 = vpop.f32.mrb[0].mxu0 }
  0xff   :  { %v670_v30 = vpop.f32.mrb[1].mxu1  ;;  %v435_v31 = vpop.f32.mrb[1].mxu0 }
 0x102   :  { %v3989_v32 = vpop.f32.mrb[2].mxu1  ;;  %v3991_v33 = vpop.f32.mrb[2].mxu0 }
 0x103   :  { %v675_v34 = vpop.f32.mrb[3].mxu1  ;;  %v440_v35 = vpop.f32.mrb[3].mxu0 }
 0x106   :  { %v3993_v36 = vpop.f32.mrb[4].mxu1  ;;  %v3995_v37 = vpop.f32.mrb[4].mxu0 }
 0x107   :  { %v680_v38 = vpop.f32.mrb[5].mxu1  ;;  %v445_v39 = vpop.f32.mrb[5].mxu0 }
 0x10a   :  { %v3997_v40 = vpop.f32.mrb[6].mxu1  ;;  %v3999_v41 = vpop.f32.mrb[6].mxu0 }
 0x10b   :  { %v685_v42 = vpop.f32.mrb[7].mxu1  ;;  %v450_v43 = vpop.f32.mrb[7].mxu0 }
 0x10e   :  { %v4001_v44 = vpop.f32.mrb[8].mxu1  ;;  %v4003_v45 = vpop.f32.mrb[8].mxu0 }
 0x10f   :  { %v690_v46 = vpop.f32.mrb[9].mxu1  ;;  %v455_v47 = vpop.f32.mrb[9].mxu0 }
 0x112   :  { %v4005_v48 = vpop.f32.mrb[10].mxu1  ;;  %v4007_v49 = vpop.f32.mrb[10].mxu0 }
 0x113   :  { %5373 = vst [vmem:[#allocation2_spill] sm:$0xff] %v4005_v48  ;;  %v695_v50 = vpop.f32.mrb[11].mxu1  ;;  %v460_v51 = vpop.f32.mrb[11].mxu0 }
 0x116   :  { %v4009_v52 = vpop.f32.mrb[12].mxu1  ;;  %v4011_v53 = vpop.f32.mrb[12].mxu0 }
 0x117   :  { %5374 = vst [vmem:[#allocation3_spill] sm:$0xff] %v4009_v52  ;;  %v700_v54 = vpop.f32.mrb[13].mxu1  ;;  %v465_v55 = vpop.f32.mrb[13].mxu0 }
 0x11a   :  { %v4013_v56 = vpop.f32.mrb[14].mxu1  ;;  %v4015_v57 = vpop.f32.mrb[14].mxu0 }
 0x11b   :  { %5375 = vst [vmem:[#allocation4_spill] sm:$0xff] %v4013_v56  ;;  %v705_v58 = vpop.f32.mrb[15].mxu1  ;;  %v470_v59 = vpop.f32.mrb[15].mxu0 }
 0x11e   :  { %v4017_v60 = vpop.f32.mrb[16].mxu1  ;;  %v4019_v61 = vpop.f32.mrb[16].mxu0 }
 0x11f   :  { %5376 = vst [vmem:[#allocation5_spill] sm:$0xff] %v4017_v60  ;;  %v710_v62 = vpop.f32.mrb[17].mxu1  ;;  %v475_v63 = vpop.f32.mrb[17].mxu0 }
 0x122   :  { %v4021_v0 = vpop.f32.mrb[18].mxu1  ;;  %v4023_v1 = vpop.f32.mrb[18].mxu0 }
 0x123   :  { %5377 = vst [vmem:[#allocation6_spill] sm:$0xff] %v4021_v0  ;;  %v715_v2 = vpop.f32.mrb[19].mxu1  ;;  %v480_v3 = vpop.f32.mrb[19].mxu0 }
 0x126   :  { %v4025_v4 = vpop.f32.mrb[20].mxu1  ;;  %v4027_v5 = vpop.f32.mrb[20].mxu0 }
 0x127   :  { %5378 = vst [vmem:[#allocation7_spill] sm:$0xff] %v4025_v4  ;;  %v720_v6 = vpop.f32.mrb[21].mxu1  ;;  %v485_v7 = vpop.f32.mrb[21].mxu0 }
 0x12a   :  { %v4029_v8 = vpop.f32.mrb[22].mxu1  ;;  %v4031_v9 = vpop.f32.mrb[22].mxu0 }
 0x12b   :  { %5379 = vst [vmem:[#allocation8_spill] sm:$0xff] %v4029_v8  ;;  %v725_v10 = vpop.f32.mrb[23].mxu1  ;;  %v490_v11 = vpop.f32.mrb[23].mxu0 }
 0x12e   :  { %v4033_v12 = vpop.f32.mrb[24].mxu1  ;;  %v4035_v13 = vpop.f32.mrb[24].mxu0 }
 0x12f   :  { %5380 = vst [vmem:[#allocation9_spill] sm:$0xff] %v4033_v12  ;;  %v730_v14 = vpop.f32.mrb[25].mxu1  ;;  %v495_v15 = vpop.f32.mrb[25].mxu0 }
 0x132   :  { %v4037_v16 = vpop.f32.mrb[26].mxu1  ;;  %v4039_v17 = vpop.f32.mrb[26].mxu0 }
 0x133   :  { %5381 = vst [vmem:[#allocation10_spill] sm:$0xff] %v4037_v16  ;;  %v735_v18 = vpop.f32.mrb[27].mxu1  ;;  %v500_v19 = vpop.f32.mrb[27].mxu0 }
 0x136   :  { %v4041_v20 = vpop.f32.mrb[28].mxu1  ;;  %v4043_v21 = vpop.f32.mrb[28].mxu0 }
 0x137   :  { %5382 = vst [vmem:[#allocation11_spill] sm:$0xff] %v4041_v20  ;;  %v740_v22 = vpop.f32.mrb[29].mxu1  ;;  %v505_v23 = vpop.f32.mrb[29].mxu0 }
 0x13a   :  { %v2645_v25 = vpop.f32.mrb[30].mxu1  ;;  %v4050_v26 = vpop.f32.mrb[30].mxu0 }
 0x13b   :  { %v1072_v27 = vadd.f32 %v2645_v25, %v4048_v24  ;;  %v1066_v30 = vpop.f32.mrb[31].mxu1  ;;  %v510_v31 = vpop.f32.mrb[31].mxu0 }
 0x13c   :  { %v1067_v34 = vadd.f32 %v4048_v24, %v1066_v30  ;;  %v4069_v31 = vld [vmem:[%s5369_s3] ss:$0 sm:$0xff] }
 0x13d   :  { %v1376_v35 = vsub.f32 0.0, %v1072_v27 }
 0x13e   :  { %v1375_v38 = vsub.f32 0.0, %v1067_v34  ;;  %v2648_v39 = vpop.f32.mrb[32].mxu1  ;;  %v4054_v42 = vpop.f32.mrb[32].mxu0 }
 0x13f   :  { %v1439_v43 = vmul.f32 1.442695, %v1376_v35  ;;  %v1082_v46 = vadd.f32 %v2648_v39, %v4048_v24  ;;  %v1076_v47 = vpop.f32.mrb[33].mxu1  ;;  %v515_v50 = vpop.f32.mrb[33].mxu0 }
 0x140   :  { %v1437_v51 = vmul.f32 1.442695, %v1375_v38  ;;  %v1077_v54 = vadd.f32 %v4048_v24, %v1076_v47 }
 0x141   :  { %2791 = vpow2.f32 %v1439_v43  ;;  %v1378_v55 = vsub.f32 0.0, %v1082_v46 }
 0x142   :  { %2793 = vpow2.f32 %v1437_v51  ;;  %v1377_v58 = vsub.f32 0.0, %v1077_v54  ;;  %v2651_v59 = vpop.f32.mrb[34].mxu1  ;;  %v4058_v62 = vpop.f32.mrb[34].mxu0 }
 0x143   :  { %v1443_v63 = vmul.f32 1.442695, %v1378_v55  ;;  %v1092_v2 = vadd.f32 %v2651_v59, %v4048_v24  ;;  %v1086_v3 = vpop.f32.mrb[35].mxu1  ;;  %v520_v6 = vpop.f32.mrb[35].mxu0  ;;  %v4076_v55 = vadd.f32 %v4069_v31, %v3985_v28 }
 0x144   :  { %v1441_v7 = vmul.f32 1.442695, %v1377_v58  ;;  %v1087_v10 = vadd.f32 %v4048_v24, %v1086_v3 }
 0x145   :  { %2795 = vpow2.f32 %v1443_v63  ;;  %v1380_v11 = vsub.f32 0.0, %v1092_v2  ;;  %5383 = vst [vmem:[#allocation12_spill] sm:$0xff] %v4076_v55  ;;  %v4081_v2 = vadd.f32 %v4069_v31, %v3987_v29  ;;  %v4095_v29 = vadd.f32 %v4069_v31, %v3995_v37 }
 0x146   :  { %2797 = vpow2.f32 %v1441_v7  ;;  %v1379_v14 = vsub.f32 0.0, %v1087_v10  ;;  %v2654_v15 = vpop.f32.mrb[36].mxu1  ;;  %v4062_v18 = vpop.f32.mrb[36].mxu0  ;;  %v4085_v7 = vadd.f32 %v4069_v31, %v3989_v32  ;;  %v4089_v10 = vadd.f32 %v4069_v31, %v3991_v33 }
 0x147   :  { %v1447_v19 = vmul.f32 1.442695, %v1380_v11  ;;  %v1102_v22 = vadd.f32 %v2654_v15, %v4048_v24  ;;  %v1096_v23 = vpop.f32.mrb[37].mxu1  ;;  %v525_v25 = vpop.f32.mrb[37].mxu0 }
 0x148   :  { %v1445_v27 = vmul.f32 1.442695, %v1379_v14  ;;  %v1097_v30 = vadd.f32 %v4048_v24, %v1096_v23  ;;  %5384 = vst [vmem:[#allocation13_spill] sm:$0xff] %v4085_v7 }
 0x149   :  { %2799 = vpow2.f32 %v1447_v19  ;;  %v1382_v34 = vsub.f32 0.0, %v1102_v22 }
 0x14a   :  { %2801 = vpow2.f32 %v1445_v27  ;;  %v1381_v35 = vsub.f32 0.0, %v1097_v30  ;;  %v2657_v38 = vpop.f32.mrb[38].mxu1  ;;  %v4071_v39 = vpop.f32.mrb[38].mxu0 }
 0x14b   :  { %v2792_v43 = vpop.eup %2791  ;;  %v1451_v46 = vmul.f32 1.442695, %v1382_v34  ;;  %v1112_v47 = vadd.f32 %v2657_v38, %v4048_v24  ;;  %v1106_v50 = vpop.f32.mrb[39].mxu1  ;;  %v4101_v34 = vadd.f32 %v4069_v31, %v3999_v41  ;;  %v4105_v38 = vadd.f32 %v4069_v31, %v4003_v45 }
 0x14c   :  { %v530_v51 = vpop.f32.mrb[39].mxu0  ;;  %v2794_v54 = vpop.eup %2793  ;;  %v1562_v58 = vadd.f32 1.0, %v2792_v43  ;;  %v1449_v59 = vmul.f32 1.442695, %v1381_v35  ;;  %v1107_v63 = vadd.f32 %v4048_v24, %v1106_v50  ;;  %v4109_v43 = vadd.f32 %v4069_v31, %v4007_v49 }
 0x14d   :  { %v1561_v3 = vadd.f32 1.0, %v2794_v54  ;;  %2803 = vpow2.f32 %v1451_v46  ;;  %v1384_v6 = vsub.f32 0.0, %v1112_v47  ;;  %v4115_v41 = vadd.f32 %v4069_v31, %v4011_v53 }
 0x14e   :  { %2805 = vrcp.f32 %v1562_v58  ;;  %v1383_v28 = vsub.f32 0.0, %v1107_v63  ;;  %v2660_v11 = vpop.f32.mrb[40].mxu1  ;;  %v4091_v14 = vpop.f32.mrb[40].mxu0 }
 0x14f   :  { %v2796_v15 = vpop.eup %2795  ;;  %2807 = vrcp.f32 %v1561_v3  ;;  %v1455_v19 = vmul.f32 1.442695, %v1384_v6  ;;  %v1122_v22 = vadd.f32 %v2660_v11, %v4048_v24  ;;  %v1116_v32 = vpop.f32.mrb[41].mxu1 }
 0x150   :  { %v535_v23 = vpop.f32.mrb[41].mxu0  ;;  %v2798_v25 = vpop.eup %2797  ;;  %v1564_v27 = vadd.f32 1.0, %v2796_v15  ;;  %2809 = vpow2.f32 %v1449_v59  ;;  %v1453_v33 = vmul.f32 1.442695, %v1383_v28  ;;  %v1117_v30 = vadd.f32 %v4048_v24, %v1116_v32 }
 0x151   :  { %v1563_v35 = vadd.f32 1.0, %v2798_v25  ;;  %2811 = vpow2.f32 %v1455_v19  ;;  %v1386_v37 = vsub.f32 0.0, %v1122_v22  ;;  %v4121_v28 = vadd.f32 %v4069_v31, %v4015_v57 }
 0x152   :  { %2813 = vrcp.f32 %v1564_v27  ;;  %v1385_v46 = vsub.f32 0.0, %v1117_v30  ;;  %v2663_v47 = vpop.f32.mrb[42].mxu1  ;;  %v4111_v50 = vpop.f32.mrb[42].mxu0  ;;  %v4125_v15 = vadd.f32 %v4069_v31, %v4019_v61  ;;  %v4129_v19 = vadd.f32 %v4069_v31, %v4023_v1  ;;  %v4141_v1 = vld [vmem:[%s5370_s6] ss:$0 sm:$0xff] }
 0x153   :  { %v2800_v51 = vpop.eup %2799  ;;  %2815 = vrcp.f32 %v1563_v35  ;;  %v1459_v54 = vmul.f32 1.442695, %v1386_v37  ;;  %v1132_v58 = vadd.f32 %v2663_v47, %v4048_v24  ;;  %v1126_v45 = vpop.f32.mrb[43].mxu1  ;;  %v4135_v57 = vadd.f32 %v4069_v31, %v4027_v5 }
 0x154   :  { %v540_v59 = vpop.f32.mrb[43].mxu0  ;;  %v2802_v63 = vpop.eup %2801  ;;  %v1566_v3 = vadd.f32 1.0, %v2800_v51  ;;  %2817 = vpow2.f32 %v1453_v33  ;;  %v1457_v49 = vmul.f32 1.442695, %v1385_v46  ;;  %v1127_v6 = vadd.f32 %v4048_v24, %v1126_v45 }
 0x155   :  { %v1565_v11 = vadd.f32 1.0, %v2802_v63  ;;  %2819 = vpow2.f32 %v1459_v54  ;;  %v1388_v53 = vsub.f32 0.0, %v1132_v58  ;;  %v4145_v37 = vadd.f32 %v4069_v31, %v4031_v9  ;;  %v4159_v9 = vld [vmem:[%s5371_s7] ss:$0 sm:$0xff] }
 0x156   :  { %2821 = vrcp.f32 %v1566_v3  ;;  %v1387_v22 = vsub.f32 0.0, %v1127_v6  ;;  %v2666_v32 = vpop.f32.mrb[44].mxu1  ;;  %v4131_v23 = vpop.f32.mrb[44].mxu0  ;;  %v4150_v54 = vadd.f32 %v4069_v31, %v4035_v13  ;;  %v4154_v58 = vadd.f32 %v4069_v31, %v4039_v17 }
 0x157   :  { %v2804_v25 = vpop.eup %2803  ;;  %2823 = vrcp.f32 %v1565_v11  ;;  %v1463_v27 = vmul.f32 1.442695, %v1388_v53  ;;  %v1142_v33 = vadd.f32 %v2666_v32, %v4048_v24  ;;  %v1136_v61 = vpop.f32.mrb[45].mxu1 }
 0x158   :  { %v545_v30 = vpop.f32.mrb[45].mxu0  ;;  %v2806_v35 = vpop.eup %2805  ;;  %v1568_v46 = vadd.f32 1.0, %v2804_v25  ;;  %2825 = vpow2.f32 %v1457_v49  ;;  %v1461_v5 = vmul.f32 1.442695, %v1387_v22  ;;  %v1137_v13 = vadd.f32 %v4048_v24, %v1136_v61 }
 0x159   :  { %v2808_v47 = vpop.eup %2807  ;;  %v1748_v51 = vmul.f32 %v2806_v35, %v4089_v10  ;;  %2827 = vpow2.f32 %v1463_v27  ;;  %v4164_v10 = vadd.f32 %v4069_v31, %v4043_v21  ;;  %v1390_v11 = vsub.f32 0.0, %v1142_v33 }
 0x15a   :  { %v2810_v45 = vpop.eup %2809  ;;  %v1747_v59 = vmul.f32 %v2808_v47, %v4081_v2  ;;  %2829 = vrcp.f32 %v1568_v46  ;;  %v2669_v63 = vpop.f32.mrb[46].mxu1  ;;  %v4173_v21 = vadd.f32 %v4069_v31, %v4050_v26  ;;  %v4177_v27 = vadd.f32 %v4069_v31, %v4054_v42 }
 0x15b   :  { %v4167_v3 = vpop.f32.mrb[46].mxu0  ;;  %v2812_v17 = vpop.eup %2811  ;;  %v1817_v49 = vmul.f32 %v4141_v1, %v1748_v51  ;;  %v1567_v6 = vadd.f32 1.0, %v2810_v45  ;;  %2831 = vpow2.f32 %v1461_v5  ;;  %v4185_v35 = vadd.f32 %v4069_v31, %v4058_v62 }
 0x15c   :  { %v1146_v53 = vpop.f32.mrb[47].mxu1  ;;  %v550_v22 = vpop.f32.mrb[47].mxu0  ;;  %v1816_v2 = vmul.f32 %v4141_v1, %v1747_v59  ;;  %v1570_v25 = vadd.f32 1.0, %v2812_v17  ;;  %v1389_v42 = vsub.f32 0.0, %v1137_v13  ;;  %v4197_v62 = vmul.f32 1.442695, %v1390_v11 }
 0x15d   :  { %v2814_v32 = vpop.eup %2813  ;;  %v4180_v30 = vadd.f32 %v4159_v9, %v1817_v49  ;;  %2833 = vrcp.f32 %v1567_v6 }
 0x15e   :  { %v2816_v61 = vpop.eup %2815  ;;  %v1750_v33 = vmul.f32 %v2814_v32, %v4101_v34  ;;  %v4188_v5 = vadd.f32 %v4159_v9, %v1816_v2  ;;  %2835 = vrcp.f32 %v1570_v25  ;;  %v4191_v47 = vpop.f32.mrb[48].mxu1  ;;  %v4204_v2 = vadd.f32 %v2669_v63, %v4048_v24 }
 0x15f   :  { %v2818_v46 = vpop.eup %2817  ;;  %v1749_v26 = vmul.f32 %v2816_v61, %v4095_v29  ;;  %v4193_v51 = vpop.f32.mrb[48].mxu0  ;;  %v2010_v34 = vmin.f32 %v4180_v30, 0.0  ;;  %vm1948_vm2 = vcmp.gt.f32.partialorder %v4180_v30, 0.0 }
 0x160   :  { %v2820_v45 = vpop.eup %2819  ;;  %v1819_v59 = vmul.f32 %v4141_v1, %v1750_v33  ;;  %v1569_v17 = vadd.f32 1.0, %v2818_v46  ;;  %v4199_v49 = vpop.f32.mrb[49].mxu1  ;;  %v2009_v29 = vmin.f32 %v4188_v5, 0.0  ;;  %vm1947_vm3 = vcmp.gt.f32.partialorder %v4188_v5, 0.0 }
 0x161   :  { %v555_v6 = vpop.f32.mrb[49].mxu0  ;;  %v2822_v22 = vpop.eup %2821  ;;  %v1818_v13 = vmul.f32 %v4141_v1, %v1749_v26  ;;  %v1572_v32 = vadd.f32 1.0, %v2820_v45  ;;  %v2073_v61 = vmul.f32 1.442695, %v2010_v34 }
 0x162   :  { %v2824_v25 = vpop.eup %2823  ;;  %v4207_v16 = vadd.f32 %v4159_v9, %v1819_v59  ;;  %v1752_v11 = vmul.f32 %v2822_v22, %v4109_v43  ;;  %2837 = vrcp.f32 %v1569_v17  ;;  %v2071_v46 = vmul.f32 1.442695, %v2009_v29  ;;  %v4214_v26 = vpop.f32.mrb[50].mxu1 }
 0x163   :  { %v2826_v33 = vpop.eup %2825  ;;  %v4211_v6 = vadd.f32 %v4159_v9, %v1818_v13  ;;  %v1751_v20 = vmul.f32 %v2824_v25, %v4105_v38  ;;  %2839 = vrcp.f32 %v1572_v32  ;;  %v4216_v63 = vpop.f32.mrb[50].mxu0  ;;  %v4220_v43 = vmul.f32 1.442695, %v1389_v42 }
 0x164   :  { %v2828_v45 = vpop.eup %2827  ;;  %2841 = vpow2.f32 %v2073_v61  ;;  %v2012_v34 = vmin.f32 %v4207_v16, 0.0  ;;  %v1821_v59 = vmul.f32 %v4141_v1, %v1752_v11  ;;  %v4222_v17 = vpop.f32.mrb[51].mxu1  ;;  %v4227_v32 = vadd.f32 %v4048_v24, %v1146_v53 }
 0x165   :  { %v560_v22 = vpop.f32.mrb[51].mxu0  ;;  %v2830_v29 = vpop.eup %2829  ;;  %2843 = vpow2.f32 %v2071_v46  ;;  %v2011_v38 = vmin.f32 %v4211_v6, 0.0  ;;  %v1820_v13 = vmul.f32 %v4141_v1, %v1751_v20  ;;  %v1571_v11 = vadd.f32 1.0, %v2826_v33 }
 0x166   :  { %v2832_v25 = vpop.eup %2831  ;;  %v2077_v61 = vmul.f32 1.442695, %v2012_v34  ;;  %v4230_v8 = vadd.f32 %v4159_v9, %v1821_v59  ;;  %v1754_v42 = vmul.f32 %v2830_v29, %v4121_v28  ;;  %v1574_v46 = vadd.f32 1.0, %v2828_v45  ;;  %v4237_v4 = vpop.f32.mrb[52].mxu1 }
 0x167   :  { %v2075_v12 = vmul.f32 1.442695, %v2011_v38  ;;  %v4234_v22 = vadd.f32 %v4159_v9, %v1820_v13  ;;  %v4239_v20 = vpop.f32.mrb[52].mxu0  ;;  %v2834_v53 = vpop.eup %2833  ;;  %v1573_v13 = vadd.f32 1.0, %v2832_v25  ;;  %vm1950_vm4 = vcmp.gt.f32.partialorder %v4207_v16, 0.0 }
 0x168   :  { %2845 = vpow2.f32 %v2077_v61  ;;  %v2014_v34 = vmin.f32 %v4230_v8, 0.0  ;;  %v1823_v28 = vmul.f32 %v4141_v1, %v1754_v42  ;;  %v4244_v33 = vpop.f32.mrb[53].mxu1  ;;  %v565_v59 = vpop.f32.mrb[53].mxu0  ;;  %v1753_v38 = vmul.f32 %v2834_v53, %v4115_v41 }
 0x169   :  { %v2836_v29 = vpop.eup %2835  ;;  %2847 = vpow2.f32 %v2075_v12  ;;  %v2013_v45 = vmin.f32 %v4234_v22, 0.0  ;;  %vm1949_vm5 = vcmp.gt.f32.partialorder %v4211_v6, 0.0  ;;  %vm1952_vm6 = vcmp.gt.f32.partialorder %v4230_v8, 0.0 }
 0x16a   :  { %v2081_v0 = vmul.f32 1.442695, %v2014_v34  ;;  %v4249_v56 = vadd.f32 %v4159_v9, %v1823_v28  ;;  %v1756_v61 = vmul.f32 %v2836_v29, %v4129_v19  ;;  %2849 = vrcp.f32 %v1571_v11  ;;  %v4254_v59 = vpop.f32.mrb[54].mxu1  ;;  %v4256_v12 = vpop.f32.mrb[54].mxu0 }
 0x16b   :  { %v2079_v42 = vmul.f32 1.442695, %v2013_v45  ;;  %v1822_v60 = vmul.f32 %v4141_v1, %v1753_v38  ;;  %2851 = vrcp.f32 %v1574_v46  ;;  %v4261_v19 = vpop.f32.mrb[55].mxu1  ;;  %v570_v11 = vpop.f32.mrb[55].mxu0  ;;  %vm1951_vm7 = vcmp.gt.f32.partialorder %v4234_v22, 0.0 }
 0x16c   :  { %v2838_v7 = vpop.eup %2837  ;;  %2853 = vpow2.f32 %v2081_v0  ;;  %v2016_v41 = vmin.f32 %v4249_v56, 0.0  ;;  %v1825_v25 = vmul.f32 %v4141_v1, %v1756_v61  ;;  %vm1954_vm8 = vcmp.gt.f32.partialorder %v4249_v56, 0.0 }
 0x16d   :  { %v2840_v53 = vpop.eup %2839  ;;  %2855 = vpow2.f32 %v2079_v42  ;;  %v4265_v46 = vadd.f32 %v4159_v9, %v1822_v60  ;;  %v1755_v34 = vmul.f32 %v2838_v7, %v4125_v15  ;;  %v1391_v42 = vsub.f32 0.0, %v4227_v32 }
 0x16e   :  { %v2842_v28 = vpop.eup %2841  ;;  %v2085_v29 = vmul.f32 1.442695, %v2016_v41  ;;  %v4269_v0 = vadd.f32 %v4159_v9, %v1825_v25  ;;  %v1758_v45 = vmul.f32 %v2840_v53, %v4145_v37  ;;  %2857 = vrcp.f32 %v1573_v13  ;;  %v4275_v60 = vpop.f32.mrb[56].mxu1 }
 0x16f   :  { %v2844_v38 = vpop.eup %2843  ;;  %v2514_v61 = vadd.f32 -1.0, %v2842_v28  ;;  %v2015_v11 = vmin.f32 %v4265_v46, 0.0  ;;  %v1824_v55 = vmul.f32 %v4141_v1, %v1755_v34  ;;  %v4277_v52 = vpop.f32.mrb[56].mxu0  ;;  %vm1953_vm9 = vcmp.gt.f32.partialorder %v4265_v46, 0.0 }
 0x170   :  { %v2513_v7 = vadd.f32 -1.0, %v2844_v38  ;;  %2859 = vpow2.f32 %v2085_v29  ;;  %v2018_v15 = vmin.f32 %v4269_v0, 0.0  ;;  %v4281_v37 = vpop.f32.mrb[57].mxu1  ;;  %v575_v13 = vpop.f32.mrb[57].mxu0  ;;  %v1827_v53 = vmul.f32 %v4141_v1, %v1758_v45 }
 0x171   :  { %v2258_v41 = vsel %vm1948_vm2, %v4180_v30, %v2514_v61  ;;  %v2083_v32 = vmul.f32 1.442695, %v2015_v11  ;;  %v4288_v25 = vadd.f32 %v4159_v9, %v1824_v55  ;;  %2861 = vpow2.f32 %v4197_v62 }
 0x172   :  { %v2846_v34 = vpop.eup %2845  ;;  %2320 = vst.msk [vmem:[%s5372_s8 + $0x8] sm:$0xff] %vm813_vm1, %v2258_v41  ;;  %v2257_v28 = vsel %vm1947_vm3, %v4188_v5, %v2513_v7  ;;  %v2089_v29 = vmul.f32 1.442695, %v2018_v15  ;;  %v5385_v30 = vsub.f32 0.0, %v4204_v2  ;;  %v1469_v11 = vmul.f32 1.442695, %v1391_v42 }
 0x173   :  { %v2848_v55 = vpop.eup %2847  ;;  %2319 = vst.msk [vmem:[%s5372_s8] sm:$0xff] %vm813_vm1, %v2257_v28  ;;  %v2516_v45 = vadd.f32 -1.0, %v2846_v34  ;;  %2863 = vpow2.f32 %v2083_v32  ;;  %v2017_v61 = vmin.f32 %v4288_v25, 0.0  ;;  %v4306_v13 = vpop.f32.mrb[58].mxu1  ;;  %v4311_v2 = vadd.f32 %v4159_v9, %v1827_v53 }
 0x174   :  { %v1471_v38 = vmul.f32 1.442695, %v5385_v30  ;;  %v4308_v5 = vpop.f32.mrb[58].mxu0  ;;  %v2850_v7 = vpop.eup %2849  ;;  %v2515_v62 = vadd.f32 -1.0, %v2848_v55  ;;  %2865 = vpow2.f32 %v2089_v29  ;;  %v1162_v15 = vadd.f32 %v4191_v47, %v4048_v24 }
 0x175   :  { %v4315_v41 = vpop.f32.mrb[59].mxu1  ;;  %v580_v34 = vpop.f32.mrb[59].mxu0  ;;  %v2260_v42 = vsel %vm1950_vm4, %v4207_v16, %v2516_v45  ;;  %v2087_v28 = vmul.f32 1.442695, %v2017_v61  ;;  %v1757_v30 = vmul.f32 %v2850_v7, %v4135_v57  ;;  %2867 = vpow2.f32 %v4220_v43 }
 0x176   :  { %v2852_v32 = vpop.eup %2851  ;;  %2322 = vst.msk [vmem:[%s5372_s8 + $0x18] sm:$0xff] %vm813_vm1, %v2260_v42  ;;  %v2259_v47 = vsel %vm1949_vm5, %v4211_v6, %v2515_v62  ;;  %v2020_v53 = vmin.f32 %v4311_v2, 0.0  ;;  %v1394_v45 = vsub.f32 0.0, %v1162_v15  ;;  %v4338_v6 = vpop.f32.mrb[60].mxu1  ;;  %vm1956_vm10 = vcmp.gt.f32.partialorder %v4269_v0, 0.0 }
 0x177   :  { %v2854_v29 = vpop.eup %2853  ;;  %v1760_v16 = vmul.f32 %v2852_v32, %v4154_v58  ;;  %2321 = vst.msk [vmem:[%s5372_s8 + $0x10] sm:$0xff] %vm813_vm1, %v2259_v47  ;;  %2869 = vpow2.f32 %v2087_v28  ;;  %v1826_v43 = vmul.f32 %v4141_v1, %v1757_v30  ;;  %v4340_v61 = vpop.f32.mrb[60].mxu0  ;;  %vm1955_vm11 = vcmp.gt.f32.partialorder %v4288_v25, 0.0 }
 0x178   :  { %v2856_v55 = vpop.eup %2855  ;;  %v2518_v57 = vadd.f32 -1.0, %v2854_v29  ;;  %v2093_v58 = vmul.f32 1.442695, %v2020_v53  ;;  %2871 = vpow2.f32 %v1471_v38  ;;  %v4343_v32 = vpop.f32.mrb[61].mxu1  ;;  %vm1958_vm12 = vcmp.gt.f32.partialorder %v4311_v2, 0.0 }
 0x179   :  { %v2858_v7 = vpop.eup %2857  ;;  %v2517_v62 = vadd.f32 -1.0, %v2856_v55  ;;  %v1829_v34 = vmul.f32 %v4141_v1, %v1760_v16  ;;  %v585_v42 = vpop.f32.mrb[61].mxu0  ;;  %v4349_v30 = vadd.f32 %v4159_v9, %v1826_v43  ;;  %2873 = vpow2.f32 %v1469_v11 }
 0x17a   :  { %v2262_v28 = vsel %vm1952_vm6, %v4230_v8, %v2518_v57  ;;  %v1759_v15 = vmul.f32 %v2858_v7, %v4150_v54  ;;  %v2860_v29 = vpop.eup %2859  ;;  %2875 = vpow2.f32 %v2093_v58  ;;  %v1475_v8 = vmul.f32 1.442695, %v1394_v45  ;;  %v4369_v16 = vpop.f32.mrb[62].mxu1 }
 0x17b   :  { %2324 = vst.msk [vmem:[%s5372_s8 + $0x28] sm:$0xff] %vm813_vm1, %v2262_v28  ;;  %v2261_v38 = vsel %vm1951_vm7, %v4234_v22, %v2517_v62  ;;  %v4360_v47 = vadd.f32 %v4159_v9, %v1829_v34  ;;  %v2520_v54 = vadd.f32 -1.0, %v2860_v29  ;;  %v2019_v11 = vmin.f32 %v4349_v30, 0.0  ;;  %v4371_v22 = vpop.f32.mrb[62].mxu0  ;;  %v2862_v55 = vpop.eup %2861 }
 0x17c   :  { %2323 = vst.msk [vmem:[%s5372_s8 + $0x20] sm:$0xff] %vm813_vm1, %v2261_v38  ;;  %v1828_v53 = vmul.f32 %v4141_v1, %v1759_v15  ;;  %2877 = vpow2.f32 %v1475_v8  ;;  %v1157_v43 = vadd.f32 %v4048_v24, %v4199_v49  ;;  %v4377_v45 = vpop.f32.mrb[63].mxu1  ;;  %v590_v7 = vpop.f32.mrb[63].mxu0  ;;  %v1576_v28 = vadd.f32 1.0, %v2862_v55 }
 0x17d   :  { %v2022_v57 = vmin.f32 %v4360_v47, 0.0  ;;  %v2864_v62 = vpop.eup %2863  ;;  %v2264_v58 = vsel %vm1954_vm8, %v4249_v56, %v2520_v54  ;;  %v2091_v34 = vmul.f32 1.442695, %v2019_v11  ;;  %v1172_v8 = vadd.f32 %v4214_v26, %v4048_v24 }
 0x17e   :  { %v4383_v42 = vadd.f32 %v4159_v9, %v1828_v53  ;;  %v2866_v15 = vpop.eup %2865  ;;  %2326 = vst.msk [vmem:[%s5372_s8 + $0x38] sm:$0xff] %vm813_vm1, %v2264_v58  ;;  %v2519_v49 = vadd.f32 -1.0, %v2864_v62  ;;  %v1393_v38 = vsub.f32 0.0, %v1157_v43  ;;  %v4393_v54 = vpop.f32.mrb[64].mxu1  ;;  %vm1957_vm13 = vcmp.gt.f32.partialorder %v4349_v30, 0.0 }
 0x17f   :  { %v2097_v29 = vmul.f32 1.442695, %v2022_v57  ;;  %v2868_v7 = vpop.eup %2867  ;;  %v2522_v48 = vadd.f32 -1.0, %v2866_v15  ;;  %2879 = vpow2.f32 %v2091_v34  ;;  %v4395_v11 = vpop.f32.mrb[64].mxu0  ;;  %v1396_v15 = vsub.f32 0.0, %v1172_v8 }
 0x180   :  { %v2021_v56 = vmin.f32 %v4383_v42, 0.0  ;;  %v2263_v53 = vsel %vm1953_vm9, %v4265_v46, %v2519_v49  ;;  %v1575_v55 = vadd.f32 1.0, %v2868_v7  ;;  %v1473_v57 = vmul.f32 1.442695, %v1393_v38  ;;  %v4400_v43 = vpop.f32.mrb[65].mxu1  ;;  %v595_v26 = vpop.f32.mrb[65].mxu0 }
 0x181   :  { %2881 = vpow2.f32 %v2097_v29  ;;  %v2870_v62 = vpop.eup %2869  ;;  %2325 = vst.msk [vmem:[%s5372_s8 + $0x30] sm:$0xff] %vm813_vm1, %v2263_v53  ;;  %v2266_v58 = vsel %vm1956_vm10, %v4269_v0, %v2522_v48  ;;  %v1167_v29 = vadd.f32 %v4048_v24, %v4222_v17  ;;  %v1182_v38 = vadd.f32 %v4237_v4, %v4048_v24 }
 0x182   :  { %v2095_v34 = vmul.f32 1.442695, %v2021_v56  ;;  %2883 = vrcp.f32 %v1576_v28  ;;  %v2872_v46 = vpop.eup %2871  ;;  %2328 = vst.msk [vmem:[%s5372_s8 + $0x48] sm:$0xff] %vm813_vm1, %v2266_v58  ;;  %v2521_v49 = vadd.f32 -1.0, %v2870_v62  ;;  %v1479_v0 = vmul.f32 1.442695, %v1396_v15 }
 0x183   :  { %2885 = vrcp.f32 %v1575_v55  ;;  %v2874_v7 = vpop.eup %2873  ;;  %v1578_v48 = vadd.f32 1.0, %v2872_v46  ;;  %v1177_v28 = vadd.f32 %v4048_v24, %v4244_v33  ;;  %v4419_v8 = vpop.f32.mrb[66].mxu1  ;;  %v1395_v26 = vsub.f32 0.0, %v1167_v29 }
 0x184   :  { %2887 = vpow2.f32 %v2095_v34  ;;  %v4421_v56 = vpop.f32.mrb[66].mxu0  ;;  %v2876_v53 = vpop.eup %2875  ;;  %v2265_v55 = vsel %vm1955_vm11, %v4288_v25, %v2521_v49  ;;  %v1577_v17 = vadd.f32 1.0, %v2874_v7  ;;  %v1398_v58 = vsub.f32 0.0, %v1182_v38 }
 0x185   :  { %2889 = vpow2.f32 %v1473_v57  ;;  %v4426_v4 = vpop.f32.mrb[67].mxu1  ;;  %v600_v62 = vpop.f32.mrb[67].mxu0  ;;  %2327 = vst.msk [vmem:[%s5372_s8 + $0x40] sm:$0xff] %vm813_vm1, %v2265_v55  ;;  %v2524_v33 = vadd.f32 -1.0, %v2876_v53  ;;  %v1397_v34 = vsub.f32 0.0, %v1177_v28  ;;  %v1192_v25 = vadd.f32 %v4254_v59, %v4048_v24 }
 0x186   :  { %2891 = vrcp.f32 %v1578_v48  ;;  %v2878_v15 = vpop.eup %2877  ;;  %v1477_v46 = vmul.f32 1.442695, %v1395_v26  ;;  %v1187_v57 = vadd.f32 %v4048_v24, %v4261_v19  ;;  %v1483_v7 = vmul.f32 1.442695, %v1398_v58  ;;  %v4439_v53 = vpop.f32.mrb[68].mxu1 }
 0x187   :  { %2893 = vrcp.f32 %v1577_v17  ;;  %v2268_v49 = vsel %vm1958_vm12, %v4311_v2, %v2524_v33  ;;  %v1580_v29 = vadd.f32 1.0, %v2878_v15  ;;  %v4441_v38 = vpop.f32.mrb[68].mxu0  ;;  %v1481_v59 = vmul.f32 1.442695, %v1397_v34  ;;  %v4447_v28 = vpop.f32.mrb[69].mxu1 }
 0x188   :  { %2895 = vpow2.f32 %v1479_v0  ;;  %2330 = vst.msk [vmem:[%s5372_s8 + $0x58] sm:$0xff] %vm813_vm1, %v2268_v49  ;;  %v1400_v48 = vsub.f32 0.0, %v1192_v25  ;;  %v1399_v19 = vsub.f32 0.0, %v1187_v57  ;;  %v605_v55 = vpop.f32.mrb[69].mxu0  ;;  %v1202_v0 = vadd.f32 %v4275_v60, %v4048_v24 }
 0x189   :  { %2897 = vpow2.f32 %v1477_v46  ;;  %v2880_v2 = vpop.eup %2879  ;;  %v1197_v17 = vadd.f32 %v4048_v24, %v4281_v37  ;;  %vm1960_vm14 = vcmp.gt.f32.partialorder %v4360_v47, 0.0  ;;  %vm1959_vm15 = vcmp.gt.f32.partialorder %v4383_v42, 0.0 }
 0x18a   :  { %2899 = vrcp.f32 %v1580_v29  ;;  %v2523_v62 = vadd.f32 -1.0, %v2880_v2  ;;  %v1487_v33 = vmul.f32 1.442695, %v1400_v48  ;;  %v1485_v58 = vmul.f32 1.442695, %v1399_v19  ;;  %v4454_v57 = vpop.f32.mrb[70].mxu1 }
 0x18b   :  { %v2882_v26 = vpop.eup %2881  ;;  %2901 = vpow2.f32 %v1483_v7  ;;  %v1402_v46 = vsub.f32 0.0, %v1202_v0  ;;  %v1401_v25 = vsub.f32 0.0, %v1197_v17  ;;  %v4456_v49 = vpop.f32.mrb[70].mxu0 }
 0x18c   :  { %v2884_v34 = vpop.eup %2883  ;;  %v2526_v15 = vadd.f32 -1.0, %v2882_v26  ;;  %2903 = vpow2.f32 %v1481_v59  ;;  %5386 = vst [vmem:[#allocation14_spill] sm:$0xff] %v4456_v49  ;;  %v2267_v60 = vsel %vm1957_vm13, %v4349_v30, %v2523_v62  ;;  %v4464_v7 = vpop.f32.mrb[71].mxu1 }
 0x18d   :  { %v2886_v29 = vpop.eup %2885  ;;  %v1762_v37 = vmul.f32 %v2884_v34, %v4173_v21  ;;  %v610_v59 = vpop.f32.mrb[71].mxu0  ;;  %2329 = vst.msk [vmem:[%s5372_s8 + $0x50] sm:$0xff] %vm813_vm1, %v2267_v60  ;;  %2905 = vpow2.f32 %v1485_v58  ;;  %v1491_v30 = vmul.f32 1.442695, %v1402_v46  ;;  %v1489_v17 = vmul.f32 1.442695, %v1401_v25 }
 0x18e   :  { %v2888_v48 = vpop.eup %2887  ;;  %v2270_v19 = vsel %vm1960_vm14, %v4360_v47, %v2526_v15  ;;  %v1761_v55 = vmul.f32 %v2886_v29, %v4164_v10  ;;  %2907 = vpow2.f32 %v1487_v33  ;;  %v4480_v10 = vadd.f32 %v4306_v13, %v4048_v24  ;;  %v4482_v47 = vpop.f32.mrb[72].mxu1 }
 0x18f   :  { %v2890_v2 = vpop.eup %2889  ;;  %2332 = vst.msk [vmem:[%s5372_s8 + $0x68] sm:$0xff] %vm813_vm1, %v2270_v19  ;;  %v2525_v21 = vadd.f32 -1.0, %v2888_v48  ;;  %v1831_v0 = vmul.f32 %v4141_v1, %v1762_v37  ;;  %2909 = vpow2.f32 %v1491_v30  ;;  %v4484_v58 = vpop.f32.mrb[72].mxu0  ;;  %v4505_v59 = vadd.f32 %v4069_v31, %v4062_v18 }
 0x190   :  { %v2892_v26 = vpop.eup %2891  ;;  %v1830_v62 = vmul.f32 %v4141_v1, %v1761_v55  ;;  %v1579_v34 = vadd.f32 1.0, %v2890_v2  ;;  %5387 = vst [vmem:[#allocation15_spill] sm:$0xff] %v4484_v58  ;;  %2911 = vpow2.f32 %v1489_v17  ;;  %v4493_v29 = vpop.f32.mrb[73].mxu1  ;;  %v529_v30 = vadd.f32 %v4069_v31, %v4071_v39 }
 0x191   :  { %v2894_v15 = vpop.eup %2893  ;;  %v2269_v46 = vsel %vm1959_vm15, %v4383_v42, %v2525_v21  ;;  %v4490_v33 = vadd.f32 %v4159_v9, %v1831_v0  ;;  %v1764_v25 = vmul.f32 %v2892_v26, %v4185_v35  ;;  %v615_v60 = vpop.f32.mrb[73].mxu0  ;;  %v1404_v17 = vsub.f32 0.0, %v4480_v10 }
 0x192   :  { %v2896_v13 = vpop.eup %2895  ;;  %2331 = vst.msk [vmem:[%s5372_s8 + $0x60] sm:$0xff] %vm813_vm1, %v2269_v46  ;;  %v4500_v37 = vadd.f32 %v4159_v9, %v1830_v62  ;;  %v1763_v42 = vmul.f32 %v2894_v15, %v4177_v27  ;;  %2913 = vrcp.f32 %v1579_v34  ;;  %v4514_v18 = vpop.f32.mrb[74].mxu1 }
 0x193   :  { %v2898_v35 = vpop.eup %2897  ;;  %v2024_v48 = vmin.f32 %v4490_v33, 0.0  ;;  %v1833_v19 = vmul.f32 %v4141_v1, %v1764_v25  ;;  %v1582_v55 = vadd.f32 1.0, %v2896_v13  ;;  %v4516_v26 = vpop.f32.mrb[74].mxu0  ;;  %vm1962_vm0 = vcmp.gt.f32.partialorder %v4490_v33, 0.0 }
 0x194   :  { %v2900_v2 = vpop.eup %2899  ;;  %v2023_v21 = vmin.f32 %v4500_v37, 0.0  ;;  %v1832_v0 = vmul.f32 %v4141_v1, %v1763_v42  ;;  %v1581_v27 = vadd.f32 1.0, %v2898_v35  ;;  %5388 = vst [vmem:[#allocation16_spill] sm:$0xff] %v4516_v26  ;;  %v4521_v39 = vpop.f32.mrb[75].mxu1  ;;  %vm1961_vm2 = vcmp.gt.f32.partialorder %v4500_v37, 0.0 }
 0x195   :  { %v2902_v62 = vpop.eup %2901  ;;  %v2101_v34 = vmul.f32 1.442695, %v2024_v48  ;;  %v4519_v15 = vadd.f32 %v4159_v9, %v1833_v19  ;;  %2915 = vrcp.f32 %v1582_v55  ;;  %v1766_v46 = vmul.f32 %v2900_v2, %v529_v30  ;;  %v620_v25 = vpop.f32.mrb[75].mxu0 }
 0x196   :  { %v2904_v60 = vpop.eup %2903  ;;  %v2099_v13 = vmul.f32 1.442695, %v2023_v21  ;;  %v4524_v42 = vadd.f32 %v4159_v9, %v1832_v0  ;;  %2917 = vrcp.f32 %v1581_v27  ;;  %v1584_v10 = vadd.f32 1.0, %v2902_v62  ;;  %v4533_v0 = vpop.f32.mrb[76].mxu1 }
 0x197   :  { %2919 = vpow2.f32 %v2101_v34  ;;  %v2026_v35 = vmin.f32 %v4519_v15, 0.0  ;;  %v1835_v48 = vmul.f32 %v4141_v1, %v1766_v46  ;;  %v1207_v19 = vadd.f32 %v4048_v24, %v4315_v41  ;;  %v2906_v55 = vpop.eup %2905  ;;  %v4535_v27 = vpop.f32.mrb[76].mxu0 }
 0x198   :  { %2921 = vpow2.f32 %v2099_v13  ;;  %v2025_v30 = vmin.f32 %v4524_v42, 0.0  ;;  %v534_v2 = vadd.f32 %v4069_v31, %v4091_v14  ;;  %v1583_v21 = vadd.f32 1.0, %v2904_v60  ;;  %5389 = vst [vmem:[#allocation17_spill] sm:$0xff] %v4535_v27  ;;  %v2908_v62 = vpop.eup %2907  ;;  %v4542_v41 = vpop.f32.mrb[77].mxu1 }
 0x199   :  { %v2105_v34 = vmul.f32 1.442695, %v2026_v35  ;;  %v4538_v25 = vadd.f32 %v4159_v9, %v1835_v48  ;;  %2923 = vrcp.f32 %v1584_v10  ;;  %v539_v24 = vadd.f32 %v4069_v31, %v4111_v50  ;;  %v625_v46 = vpop.f32.mrb[77].mxu0  ;;  %v2910_v13 = vpop.eup %2909 }
 0x19a   :  { %v2103_v26 = vmul.f32 1.442695, %v2025_v30  ;;  %2925 = vrcp.f32 %v1583_v21  ;;  %v1585_v14 = vadd.f32 1.0, %v2906_v55  ;;  %v4546_v60 = vadd.f32 %v4069_v31, %v4131_v23  ;;  %v2912_v27 = vpop.eup %2911  ;;  %v4554_v55 = vld [vmem:[%s5368_s5] ss:$0 sm:$0xff]  ;;  %v4558_v30 = vpop.f32.mrb[78].mxu1 }
 0x19b   :  { %2927 = vpow2.f32 %v2105_v34  ;;  %v2028_v35 = vmin.f32 %v4538_v25, 0.0  ;;  %v1495_v48 = vmul.f32 1.442695, %v1404_v17  ;;  %v1403_v10 = vsub.f32 0.0, %v1207_v19  ;;  %5390 = vst [vmem:[#allocation18_spill] sm:$0xff] %v4558_v30  ;;  %v4560_v21 = vpop.f32.mrb[78].mxu0 }
 0x19c   :  { %v2914_v58 = vpop.eup %2913  ;;  %2929 = vpow2.f32 %v2103_v26  ;;  %v1586_v50 = vadd.f32 1.0, %v2908_v62  ;;  %v549_v46 = vadd.f32 %v4069_v31, %v4167_v3  ;;  %v1222_v23 = vadd.f32 %v4554_v55, %v4338_v6  ;;  %5391 = vst [vmem:[#allocation19_spill] sm:$0xff] %v4560_v21  ;;  %v4564_v62 = vpop.f32.mrb[79].mxu1 }
 0x19d   :  { %v1765_v17 = vmul.f32 %v2914_v58, %v4505_v59  ;;  %v2109_v26 = vmul.f32 1.442695, %v2028_v35  ;;  %v1588_v19 = vadd.f32 1.0, %v2910_v13  ;;  %v630_v3 = vpop.f32.mrb[79].mxu0  ;;  %2931 = vrcp.f32 %v1585_v14 }
 0x19e   :  { %v1406_v34 = vsub.f32 0.0, %v1222_v23  ;;  %v1217_v6 = vadd.f32 %v4554_v55, %v4343_v32  ;;  %vm1964_vm3 = vcmp.gt.f32.partialorder %v4519_v15, 0.0  ;;  %v1587_v30 = vadd.f32 1.0, %v2912_v27  ;;  %v4578_v32 = vpop.f32.mrb[80].mxu1  ;;  %v4580_v23 = vpop.f32.mrb[80].mxu0 }
 0x19f   :  { %v2916_v49 = vpop.eup %2915  ;;  %v1834_v21 = vmul.f32 %v4141_v1, %v1765_v17  ;;  %2933 = vpow2.f32 %v2109_v26  ;;  %v1493_v58 = vmul.f32 1.442695, %v1403_v10  ;;  %vm1963_vm4 = vcmp.gt.f32.partialorder %v4524_v42, 0.0  ;;  %5392 = vst [vmem:[#allocation20_spill] sm:$0xff] %v4578_v32  ;;  %5393 = vst [vmem:[#allocation21_spill] sm:$0xff] %v4580_v23 }
 0x1a0   :  { %v2918_v59 = vpop.eup %2917  ;;  %2935 = vrcp.f32 %v1586_v50  ;;  %v1768_v13 = vmul.f32 %v2916_v49, %v539_v24  ;;  %v554_v14 = vadd.f32 %v4069_v31, %v4193_v51  ;;  %v4576_v35 = vadd.f32 %v4554_v55, %v4369_v16  ;;  %v4585_v50 = vpop.f32.mrb[81].mxu1 }
 0x1a1   :  { %v2920_v17 = vpop.eup %2919  ;;  %v4583_v27 = vadd.f32 %v4159_v9, %v1834_v21  ;;  %v1767_v10 = vmul.f32 %v2918_v59, %v534_v2  ;;  %2937 = vrcp.f32 %v1588_v19  ;;  %v1499_v26 = vmul.f32 1.442695, %v1406_v34  ;;  %v635_v49 = vpop.f32.mrb[81].mxu0 }
 0x1a2   :  { %v2922_v24 = vpop.eup %2921  ;;  %v2528_v31 = vadd.f32 -1.0, %v2920_v17  ;;  %v1837_v51 = vmul.f32 %v4141_v1, %v1768_v13  ;;  %2939 = vpow2.f32 %v1495_v48  ;;  %v1405_v16 = vsub.f32 0.0, %v1217_v6  ;;  %v4597_v48 = vpop.f32.mrb[82].mxu1 }
 0x1a3   :  { %v2924_v3 = vpop.eup %2923  ;;  %v2527_v32 = vadd.f32 -1.0, %v2922_v24  ;;  %v2027_v23 = vmin.f32 %v4583_v27, 0.0  ;;  %vm1966_vm5 = vcmp.gt.f32.partialorder %v4538_v25, 0.0  ;;  %v1836_v21 = vmul.f32 %v4141_v1, %v1767_v10  ;;  %v4599_v6 = vpop.f32.mrb[82].mxu0 }
 0x1a4   :  { %2941 = vrcp.f32 %v1587_v30  ;;  %v2926_v2 = vpop.eup %2925  ;;  %v2272_v19 = vsel %vm1962_vm0, %v4490_v33, %v2528_v31  ;;  %v4595_v34 = vadd.f32 %v4159_v9, %v1837_v51  ;;  %v1770_v59 = vmul.f32 %v2924_v3, %v549_v46  ;;  %v640_v10 = vpop.f32.mrb[83].mxu0 }
 0x1a5   :  { %2943 = vpow2.f32 %v1493_v58  ;;  %v2928_v13 = vpop.eup %2927  ;;  %2334 = vst.msk [vmem:[%s5372_s8 + $0x78] sm:$0xff] %vm813_vm1, %v2272_v19  ;;  %v2271_v30 = vsel %vm1961_vm2, %v4500_v37, %v2527_v32  ;;  %v2107_v33 = vmul.f32 1.442695, %v2027_v23  ;;  %v4609_v17 = vadd.f32 %v4159_v9, %v1836_v21  ;;  %v4612_v58 = vpop.f32.mrb[83].mxu1 }
 0x1a6   :  { %v1769_v46 = vmul.f32 %v2926_v2, %v4546_v60  ;;  %v2930_v49 = vpop.eup %2929  ;;  %2333 = vst.msk [vmem:[%s5372_s8 + $0x70] sm:$0xff] %vm813_vm1, %v2271_v30  ;;  %v2530_v24 = vadd.f32 -1.0, %v2928_v13  ;;  %v2030_v31 = vmin.f32 %v4595_v34, 0.0  ;;  %v1839_v37 = vmul.f32 %v4141_v1, %v1770_v59  ;;  %v4629_v30 = vpop.f32.mrb[84].mxu1 }
 0x1a7   :  { %v1408_v32 = vsub.f32 0.0, %v4576_v35  ;;  %v2529_v23 = vadd.f32 -1.0, %v2930_v49  ;;  %2945 = vpow2.f32 %v2107_v33  ;;  %v2029_v60 = vmin.f32 %v4609_v17, 0.0  ;;  %v2932_v3 = vpop.eup %2931  ;;  %v4631_v59 = vpop.f32.mrb[84].mxu0 }
 0x1a8   :  { %v1497_v51 = vmul.f32 1.442695, %v1405_v16  ;;  %v2274_v21 = vsel %vm1964_vm3, %v4519_v15, %v2530_v24  ;;  %v2113_v2 = vmul.f32 1.442695, %v2030_v31  ;;  %v1838_v19 = vmul.f32 %v4141_v1, %v1769_v46  ;;  %v4640_v46 = vpop.f32.mrb[85].mxu1  ;;  %v645_v10 = vpop.f32.mrb[85].mxu0 }
 0x1a9   :  { %v4627_v13 = vadd.f32 %v4159_v9, %v1839_v37  ;;  %v2934_v35 = vpop.eup %2933  ;;  %2336 = vst.msk [vmem:[%s5372_s8 + $0x88] sm:$0xff] %vm813_vm1, %v2274_v21  ;;  %v2273_v15 = vsel %vm1963_vm4, %v4524_v42, %v2529_v23  ;;  %v2111_v16 = vmul.f32 1.442695, %v2029_v60  ;;  %2947 = vpow2.f32 %v1499_v26 }
 0x1aa   :  { %v1771_v33 = vmul.f32 %v2932_v3, %v554_v14  ;;  %v2936_v49 = vpop.eup %2935  ;;  %2335 = vst.msk [vmem:[%s5372_s8 + $0x80] sm:$0xff] %vm813_vm1, %v2273_v15  ;;  %v2532_v24 = vadd.f32 -1.0, %v2934_v35  ;;  %2949 = vpow2.f32 %v2113_v2  ;;  %v4647_v31 = vadd.f32 %v4159_v9, %v1838_v19  ;;  %v4666_v19 = vpop.f32.mrb[86].mxu0 }
 0x1ab   :  { %v1227_v42 = vadd.f32 %v4554_v55, %v4377_v45  ;;  %v4651_v37 = vpop.eup %2937  ;;  %2951 = vpow2.f32 %v2111_v16  ;;  %v2032_v14 = vmin.f32 %v4627_v13, 0.0  ;;  %v1503_v23 = vmul.f32 1.442695, %v1408_v32  ;;  %v4662_v45 = vld [vmem:[%s5369_s3] ss:$0 sm:$0xff] }
 0x1ac   :  { %v1840_v26 = vmul.f32 %v4141_v1, %v1771_v33  ;;  %v2940_v60 = vpop.eup %2939  ;;  %v2276_v3 = vsel %vm1966_vm5, %v4538_v25, %v2532_v24  ;;  %v2031_v21 = vmin.f32 %v4647_v31, 0.0  ;;  %2953 = vpow2.f32 %v1497_v51  ;;  %v4668_v1 = vpop.f32.mrb[86].mxu1 }
 0x1ad   :  { %v559_v2 = vadd.f32 %v4662_v45, %v4216_v63  ;;  %5394 = vst [vmem:[#allocation22_spill] sm:$0xff] %v4668_v1  ;;  %vm1965_vm6 = vcmp.gt.f32.partialorder %v4583_v27, 0.0  ;;  %2338 = vst.msk [vmem:[%s5372_s8 + $0x98] sm:$0xff] %vm813_vm1, %v2276_v3  ;;  %v2117_v25 = vmul.f32 1.442695, %v2032_v14  ;;  %2955 = vpow2.f32 %v1503_v23  ;;  %v4678_v35 = vpop.f32.mrb[87].mxu1 }
 0x1ae   :  { %v2942_v32 = vpop.eup %2941  ;;  %v4676_v51 = vadd.f32 %v4159_v9, %v1840_v26  ;;  %5395 = vst [vmem:[#allocation23_spill] sm:$0xff] %v4678_v35  ;;  %v650_v63 = vpop.f32.mrb[87].mxu0  ;;  %vm1968_vm7 = vcmp.gt.f32.partialorder %v4595_v34, 0.0  ;;  %v2115_v16 = vmul.f32 1.442695, %v2031_v21  ;;  %v1407_v10 = vsub.f32 0.0, %v1227_v42 }
 0x1af   :  { %v2944_v15 = vpop.eup %2943  ;;  %v1772_v33 = vmul.f32 %v2936_v49, %v559_v2  ;;  %v1242_v24 = vadd.f32 %v4554_v55, %v4393_v54  ;;  %vm1967_vm8 = vcmp.gt.f32.partialorder %v4609_v17, 0.0  ;;  %v1590_v3 = vadd.f32 1.0, %v2940_v60  ;;  %v4688_v26 = vld [vmem:[%s5370_s6] ss:$0 sm:$0xff]  ;;  %v4691_v42 = vpop.f32.mrb[88].mxu1 }
 0x1b0   :  { %v1589_v14 = vadd.f32 1.0, %v2944_v15  ;;  %v2033_v9 = vmin.f32 %v4676_v51, 0.0  ;;  %2957 = vpow2.f32 %v2115_v16  ;;  %v1501_v21 = vmul.f32 1.442695, %v1407_v10  ;;  %5396 = vst [vmem:[#allocation24_spill] sm:$0xff] %v4691_v42  ;;  %v4693_v2 = vpop.f32.mrb[88].mxu0 }
 0x1b1   :  { %v1841_v23 = vmul.f32 %v4688_v26, %v1772_v33  ;;  %v1410_v49 = vsub.f32 0.0, %v1242_v24  ;;  %v2946_v54 = vpop.eup %2945  ;;  %2959 = vpow2.f32 %v2117_v25  ;;  %v564_v63 = vadd.f32 %v4662_v45, %v4239_v20  ;;  %v4699_v16 = vpop.f32.mrb[89].mxu1  ;;  %v4704_v33 = vld [vmem:[%s5371_s7] ss:$0 sm:$0xff] }
 0x1b2   :  { %v2119_v60 = vmul.f32 1.442695, %v2033_v9  ;;  %v1237_v15 = vadd.f32 %v4554_v55, %v4400_v43  ;;  %5397 = vst [vmem:[#allocation25_spill] sm:$0xff] %v4699_v16  ;;  %v655_v35 = vpop.f32.mrb[89].mxu0  ;;  %v2531_v1 = vadd.f32 -1.0, %v2946_v54  ;;  %2961 = vrcp.f32 %v1589_v14 }
 0x1b3   :  { %v4707_v10 = vadd.f32 %v4704_v33, %v1841_v23  ;;  %v1507_v25 = vmul.f32 1.442695, %v1410_v49  ;;  %v2948_v24 = vpop.eup %2947  ;;  %v1773_v20 = vmul.f32 %v2942_v32, %v564_v63  ;;  %v1252_v43 = vadd.f32 %v4554_v55, %v4419_v8  ;;  %v4716_v23 = vpop.f32.mrb[90].mxu0 }
 0x1b4   :  { %2963 = vpow2.f32 %v2119_v60  ;;  %v1409_v9 = vsub.f32 0.0, %v1237_v15  ;;  %v2950_v16 = vpop.eup %2949  ;;  %v2275_v35 = vsel %vm1965_vm6, %v4583_v27, %v2531_v1  ;;  %vm1969_vm9 = vcmp.gt.f32.partialorder %v4647_v31, 0.0  ;;  %5398 = vst [vmem:[#allocation26_spill] sm:$0xff] %v4716_v23  ;;  %v4718_v49 = vpop.f32.mrb[90].mxu1 }
 0x1b5   :  { %2965 = vrcp.f32 %v1590_v3  ;;  %v2034_v14 = vmin.f32 %v4707_v10, 0.0  ;;  %5399 = vst [vmem:[#allocation27_spill] sm:$0xff] %v4718_v49  ;;  %v2952_v54 = vpop.eup %2951  ;;  %2337 = vst.msk [vmem:[%s5372_s8 + $0x90] sm:$0xff] %vm813_vm1, %v2275_v35  ;;  %v2534_v8 = vadd.f32 -1.0, %v2950_v16  ;;  %vm1970_vm10 = vcmp.gt.f32.partialorder %v4627_v13, 0.0  ;;  %v4726_v1 = vpop.f32.mrb[91].mxu1 }
 0x1b6   :  { %v1592_v32 = vadd.f32 1.0, %v2948_v24  ;;  %2967 = vpow2.f32 %v1501_v21  ;;  %v1842_v27 = vmul.f32 %v4688_v26, %v1773_v20  ;;  %v660_v3 = vpop.f32.mrb[91].mxu0  ;;  %v2954_v60 = vpop.eup %2953  ;;  %v2533_v63 = vadd.f32 -1.0, %v2952_v54 }
 0x1b7   :  { %v2121_v15 = vmul.f32 1.442695, %v2034_v14  ;;  %v1505_v49 = vmul.f32 1.442695, %v1409_v9  ;;  %v1412_v23 = vsub.f32 0.0, %v1252_v43  ;;  %v2956_v42 = vpop.eup %2955  ;;  %v2278_v35 = vsel %vm1968_vm7, %v4595_v34, %v2534_v8  ;;  %v4742_v9 = vpop.f32.mrb[92].mxu0 }
 0x1b8   :  { %v1591_v16 = vadd.f32 1.0, %v2954_v60  ;;  %2969 = vpow2.f32 %v1507_v25  ;;  %v4732_v24 = vadd.f32 %v4704_v33, %v1842_v27  ;;  %v2277_v21 = vsel %vm1967_vm8, %v4609_v17, %v2533_v63  ;;  %2340 = vst.msk [vmem:[%s5372_s8 + $0xa8] sm:$0xff] %vm813_vm1, %v2278_v35  ;;  %v665_v43 = vpop.f32.mrb[93].mxu0 }
 0x1b9   :  { %vm1971_vm11 = vcmp.gt.f32.partialorder %v4676_v51, 0.0  ;;  %2971 = vpow2.f32 %v2121_v15  ;;  %v1511_v20 = vmul.f32 1.442695, %v1412_v23  ;;  %2339 = vst.msk [vmem:[%s5372_s8 + $0xa0] sm:$0xff] %vm813_vm1, %v2277_v21  ;;  %v1594_v34 = vadd.f32 1.0, %v2956_v42 }
 0x1ba   :  { %2973 = vrcp.f32 %v1592_v32  ;;  %v2035_v17 = vmin.f32 %v4732_v24, 0.0  ;;  %v569_v25 = vadd.f32 %v4662_v45, %v4256_v12  ;;  %v2958_v14 = vpop.eup %2957  ;;  %v1247_v23 = vadd.f32 %v4554_v55, %v4426_v4 }
 0x1bb   :  { %2975 = vrcp.f32 %v1591_v16  ;;  %v1262_v54 = vadd.f32 %v4554_v55, %v4439_v53  ;;  %v574_v8 = vadd.f32 %v4662_v45, %v4277_v52  ;;  %v2960_v27 = vpop.eup %2959  ;;  %v2535_v32 = vadd.f32 -1.0, %v2958_v14 }
 0x1bc   :  { %v2123_v42 = vmul.f32 1.442695, %v2035_v17  ;;  %2977 = vpow2.f32 %v1505_v49  ;;  %v1774_v3 = vmul.f32 %v4651_v37, %v569_v25  ;;  %v2962_v60 = vpop.eup %2961  ;;  %v2536_v12 = vadd.f32 -1.0, %v2960_v27 }
 0x1bd   :  { %2979 = vpow2.f32 %v1511_v20  ;;  %v1411_v63 = vsub.f32 0.0, %v1247_v23  ;;  %v1414_v15 = vsub.f32 0.0, %v1262_v54  ;;  %v2279_v4 = vsel %vm1969_vm9, %v4647_v31, %v2535_v32 }
 0x1be   :  { %v2964_v35 = vpop.eup %2963  ;;  %2981 = vpow2.f32 %v2123_v42  ;;  %v1843_v53 = vmul.f32 %v4688_v26, %v1774_v3  ;;  %v1775_v52 = vmul.f32 %v2962_v60, %v574_v8  ;;  %2341 = vst.msk [vmem:[%s5372_s8 + $0xb0] sm:$0xff] %vm813_vm1, %v2279_v4  ;;  %v2280_v37 = vsel %vm1970_vm10, %v4627_v13, %v2536_v12 }
 0x1bf   :  { %v2966_v16 = vpop.eup %2965  ;;  %v2537_v49 = vadd.f32 -1.0, %v2964_v35  ;;  %v1509_v21 = vmul.f32 1.442695, %v1411_v63  ;;  %v1515_v20 = vmul.f32 1.442695, %v1414_v15  ;;  %2342 = vst.msk [vmem:[%s5372_s8 + $0xb8] sm:$0xff] %vm813_vm1, %v2280_v37  ;;  %v1257_v43 = vadd.f32 %v4554_v55, %v4447_v28 }
 0x1c0   :  { %v2968_v17 = vpop.eup %2967  ;;  %v4774_v31 = vadd.f32 %v4704_v33, %v1843_v53  ;;  %v1844_v25 = vmul.f32 %v4688_v26, %v1775_v52  ;;  %v1272_v13 = vadd.f32 %v4554_v55, %v4454_v57  ;;  %vm1972_vm12 = vcmp.gt.f32.partialorder %v4707_v10, 0.0 }
 0x1c1   :  { %v2281_v14 = vsel %vm1971_vm11, %v4676_v51, %v2537_v49  ;;  %v1593_v23 = vadd.f32 1.0, %v2968_v17  ;;  %2983 = vpow2.f32 %v1509_v21  ;;  %vm1973_vm13 = vcmp.gt.f32.partialorder %v4732_v24, 0.0 }
 0x1c2   :  { %v2970_v54 = vpop.eup %2969  ;;  %2343 = vst.msk [vmem:[%s5372_s8 + $0xc0] sm:$0xff] %vm813_vm1, %v2281_v14  ;;  %2985 = vrcp.f32 %v1594_v34  ;;  %v2036_v28 = vmin.f32 %v4774_v31, 0.0  ;;  %v4792_v57 = vadd.f32 %v4704_v33, %v1844_v25  ;;  %v1413_v51 = vsub.f32 0.0, %v1257_v43 }
 0x1c3   :  { %v2972_v8 = vpop.eup %2971  ;;  %2987 = vpow2.f32 %v1515_v20  ;;  %v1416_v27 = vsub.f32 0.0, %v1272_v13  ;;  %v579_v32 = vadd.f32 %v4662_v45, %v4308_v5  ;;  %v1596_v63 = vadd.f32 1.0, %v2970_v54 }
 0x1c4   :  { %v2974_v42 = vpop.eup %2973  ;;  %v2538_v3 = vadd.f32 -1.0, %v2972_v8  ;;  %2989 = vrcp.f32 %v1593_v23  ;;  %v2125_v60 = vmul.f32 1.442695, %v2036_v28  ;;  %v2037_v34 = vmin.f32 %v4792_v57, 0.0 }
 0x1c5   :  { %v2976_v12 = vpop.eup %2975  ;;  %v1513_v15 = vmul.f32 1.442695, %v1413_v51  ;;  %v1519_v35 = vmul.f32 1.442695, %v1416_v27  ;;  %v1776_v4 = vmul.f32 %v2966_v16, %v579_v32  ;;  %v1267_v5 = vadd.f32 %v4554_v55, %v4464_v7 }
 0x1c6   :  { %v2978_v53 = vpop.eup %2977  ;;  %v2282_v52 = vsel %vm1972_vm12, %v4707_v10, %v2538_v3  ;;  %2991 = vpow2.f32 %v2125_v60  ;;  %v2127_v37 = vmul.f32 1.442695, %v2037_v34  ;;  %v1282_v20 = vadd.f32 %v4554_v55, %v4482_v47 }
 0x1c7   :  { %v2980_v49 = vpop.eup %2979  ;;  %2344 = vst.msk [vmem:[%s5372_s8 + $0xc8] sm:$0xff] %vm813_vm1, %v2282_v52  ;;  %v1595_v21 = vadd.f32 1.0, %v2978_v53  ;;  %2993 = vpow2.f32 %v1513_v15  ;;  %v1845_v16 = vmul.f32 %v4688_v26, %v1776_v4  ;;  %v1415_v25 = vsub.f32 0.0, %v1267_v5 }
 0x1c8   :  { %v2982_v17 = vpop.eup %2981  ;;  %v1598_v10 = vadd.f32 1.0, %v2980_v49  ;;  %2995 = vpow2.f32 %v2127_v37  ;;  %v584_v7 = vadd.f32 %v4662_v45, %v4340_v61  ;;  %v1418_v14 = vsub.f32 0.0, %v1282_v20 }
 0x1c9   :  { %2997 = vrcp.f32 %v1596_v63  ;;  %v2539_v43 = vadd.f32 -1.0, %v2982_v17  ;;  %v4812_v13 = vadd.f32 %v4704_v33, %v1845_v16  ;;  %v1517_v23 = vmul.f32 1.442695, %v1415_v25 }
 0x1ca   :  { %2999 = vrcp.f32 %v1595_v21  ;;  %v1777_v54 = vmul.f32 %v2976_v12, %v584_v7  ;;  %v1277_v28 = vadd.f32 %v4554_v55, %v4493_v29  ;;  %v4818_v8 = vadd.f32 %v4662_v45, %v3993_v36 }
 0x1cb   :  { %v2984_v47 = vpop.eup %2983  ;;  %v2283_v61 = vsel %vm1973_vm13, %v4732_v24, %v2539_v43  ;;  %3001 = vrcp.f32 %v1598_v10  ;;  %v2038_v51 = vmin.f32 %v4812_v13, 0.0  ;;  %v4826_v32 = vadd.f32 %v4662_v45, %v3997_v40 }
 0x1cc   :  { %v2986_v27 = vpop.eup %2985  ;;  %2345 = vst.msk [vmem:[%s5372_s8 + $0xd0] sm:$0xff] %vm813_vm1, %v2283_v61  ;;  %v1597_v29 = vadd.f32 1.0, %v2984_v47  ;;  %3003 = vpow2.f32 %v1519_v35  ;;  %v1846_v36 = vmul.f32 %v4688_v26, %v1777_v54  ;;  %v1523_v24 = vmul.f32 1.442695, %v1418_v14 }
 0x1cd   :  { %v2988_v3 = vpop.eup %2987  ;;  %v2129_v60 = vmul.f32 1.442695, %v2038_v51  ;;  %v1417_v34 = vsub.f32 0.0, %v1277_v28  ;;  %v589_v12 = vadd.f32 %v4662_v45, %v4371_v22  ;;  %3005 = vpow2.f32 %v1517_v23 }
 0x1ce   :  { %v2990_v63 = vpop.eup %2989  ;;  %v4836_v40 = vadd.f32 %v4704_v33, %v1846_v36  ;;  %v1292_v15 = vadd.f32 %v4554_v55, %v4514_v18  ;;  %v1287_v35 = vadd.f32 %v4554_v55, %v4521_v39  ;;  %vm1974_vm14 = vcmp.gt.f32.partialorder %v4774_v31, 0.0  ;;  %v5400_v36 = vld [vmem:[#allocation2_spill] sm:$0xff] }
 0x1cf   :  { %3007 = vrcp.f32 %v1597_v29  ;;  %v1521_v4 = vmul.f32 1.442695, %v1417_v34  ;;  %v1778_v53 = vmul.f32 %v2974_v42, %v589_v12  ;;  %v594_v5 = vadd.f32 %v4662_v45, %v4395_v11 }
 0x1d0   :  { %v2992_v52 = vpop.eup %2991  ;;  %3009 = vpow2.f32 %v2129_v60  ;;  %v2039_v22 = vmin.f32 %v4836_v40, 0.0  ;;  %v1420_v37 = vsub.f32 0.0, %v1292_v15  ;;  %vm1975_vm15 = vcmp.gt.f32.partialorder %v4792_v57, 0.0 }
 0x1d1   :  { %v2994_v49 = vpop.eup %2993  ;;  %v2540_v21 = vadd.f32 -1.0, %v2992_v52  ;;  %3011 = vpow2.f32 %v1523_v24  ;;  %v1847_v18 = vmul.f32 %v4688_v26, %v1778_v53  ;;  %v1600_v16 = vadd.f32 1.0, %v2988_v3  ;;  %v5401_v3 = vld [vmem:[#allocation3_spill] sm:$0xff] }
 0x1d2   :  { %v2996_v39 = vpop.eup %2995  ;;  %v2131_v20 = vmul.f32 1.442695, %v2039_v22  ;;  %3013 = vpow2.f32 %v1521_v4  ;;  %v1419_v42 = vsub.f32 0.0, %v1287_v35  ;;  %v1527_v7 = vmul.f32 1.442695, %v1420_v37 }
 0x1d3   :  { %v2998_v17 = vpop.eup %2997  ;;  %v2284_v10 = vsel %vm1974_vm14, %v4774_v31, %v2540_v21  ;;  %v2541_v25 = vadd.f32 -1.0, %v2996_v39  ;;  %v4852_v11 = vadd.f32 %v4704_v33, %v1847_v18  ;;  %v1599_v14 = vadd.f32 1.0, %v2994_v49  ;;  %v5402_v49 = vld [vmem:[#allocation14_spill] sm:$0xff] }
 0x1d4   :  { %v3000_v43 = vpop.eup %2999  ;;  %2346 = vst.msk [vmem:[%s5372_s8 + $0xd8] sm:$0xff] %vm813_vm1, %v2284_v10  ;;  %v1779_v23 = vmul.f32 %v2990_v63, %v594_v5  ;;  %v599_v54 = vadd.f32 %v4662_v45, %v4421_v56  ;;  %v1302_v28 = vadd.f32 %v4554_v55, %v4533_v0  ;;  %v4866_v47 = vadd.f32 %v4662_v45, %v4001_v44 }
 0x1d5   :  { %v4862_v31 = vpop.eup %3001  ;;  %v2285_v61 = vsel %vm1975_vm15, %v4792_v57, %v2541_v25  ;;  %3015 = vpow2.f32 %v2131_v20  ;;  %v2040_v51 = vmin.f32 %v4852_v11, 0.0  ;;  %v4874_v56 = vadd.f32 %v4662_v45, %v5400_v36  ;;  %v5404_v36 = vld [vmem:[#allocation15_spill] sm:$0xff] }
 0x1d6   :  { %v3004_v29 = vpop.eup %3003  ;;  %3017 = vrcp.f32 %v1600_v16  ;;  %2347 = vst.msk [vmem:[%s5372_s8 + $0xe0] sm:$0xff] %vm813_vm1, %v2285_v61  ;;  %v1848_v44 = vmul.f32 %v4688_v26, %v1779_v23  ;;  %v1780_v0 = vmul.f32 %v2986_v27, %v599_v54  ;;  %v4883_v57 = vadd.f32 %v4662_v45, %v5401_v3  ;;  %v5403_v54 = vld [vmem:[#allocation18_spill] sm:$0xff] }
 0x1d7   :  { %v2133_v60 = vmul.f32 1.442695, %v2040_v51  ;;  %3019 = vpow2.f32 %v1527_v7  ;;  %v1422_v24 = vsub.f32 0.0, %v1302_v28  ;;  %v3006_v34 = vpop.eup %3005  ;;  %v1525_v12 = vmul.f32 1.442695, %v1419_v42 }
 0x1d8   :  { %3021 = vrcp.f32 %v1599_v14  ;;  %v4886_v63 = vadd.f32 %v4704_v33, %v1848_v44  ;;  %v1849_v15 = vmul.f32 %v4688_v26, %v1780_v0  ;;  %v1602_v4 = vadd.f32 1.0, %v3004_v29 }
 0x1d9   :  { %v3008_v35 = vpop.eup %3007  ;;  %v1531_v53 = vmul.f32 1.442695, %v1422_v24  ;;  %v1297_v27 = vadd.f32 %v4554_v55, %v4542_v41  ;;  %v604_v52 = vadd.f32 %v4662_v45, %v4441_v38  ;;  %3023 = vpow2.f32 %v2133_v60 }
 0x1da   :  { %v3010_v22 = vpop.eup %3009  ;;  %v2041_v37 = vmin.f32 %v4886_v63, 0.0  ;;  %v4895_v5 = vadd.f32 %v4704_v33, %v1849_v15  ;;  %v609_v21 = vadd.f32 %v4662_v45, %v5402_v49  ;;  %vm1976_vm0 = vcmp.gt.f32.partialorder %v4812_v13, 0.0 }
 0x1db   :  { %v3012_v18 = vpop.eup %3011  ;;  %v2542_v39 = vadd.f32 -1.0, %v3010_v22  ;;  %3025 = vpow2.f32 %v1531_v53  ;;  %v1781_v16 = vmul.f32 %v3000_v43, %v604_v52  ;;  %v1601_v20 = vadd.f32 1.0, %v3006_v34 }
 0x1dc   :  { %v3014_v41 = vpop.eup %3013  ;;  %3027 = vpow2.f32 %v1525_v12  ;;  %v2135_v38 = vmul.f32 1.442695, %v2041_v37  ;;  %v2042_v42 = vmin.f32 %v4895_v5, 0.0  ;;  %v1421_v25 = vsub.f32 0.0, %v1297_v27 }
 0x1dd   :  { %3029 = vrcp.f32 %v1602_v4  ;;  %v2286_v10 = vsel %vm1976_vm0, %v4812_v13, %v2542_v39  ;;  %v1850_v7 = vmul.f32 %v4688_v26, %v1781_v16  ;;  %v1604_v14 = vadd.f32 1.0, %v3012_v18  ;;  %v5405_v16 = vld [vmem:[#allocation16_spill] sm:$0xff] }
 0x1de   :  { %2348 = vst.msk [vmem:[%s5372_s8 + $0xe8] sm:$0xff] %vm813_vm1, %v2286_v10  ;;  %v2137_v23 = vmul.f32 1.442695, %v2042_v42  ;;  %v1782_v43 = vmul.f32 %v2998_v17, %v609_v21  ;;  %v1312_v28 = vadd.f32 %v4554_v55, %v5403_v54  ;;  %v1603_v51 = vadd.f32 1.0, %v3014_v41 }
 0x1df   :  { %v3016_v61 = vpop.eup %3015  ;;  %v4910_v29 = vadd.f32 %v4704_v33, %v1850_v7  ;;  %v1307_v13 = vadd.f32 %v4554_v55, %v4564_v62  ;;  %v614_v44 = vadd.f32 %v4662_v45, %v5404_v36  ;;  %3031 = vpow2.f32 %v2135_v38 }
 0x1e0   :  { %v3018_v0 = vpop.eup %3017  ;;  %v2543_v3 = vadd.f32 -1.0, %v3016_v61  ;;  %v1851_v60 = vmul.f32 %v4688_v26, %v1782_v43  ;;  %v1424_v17 = vsub.f32 0.0, %v1312_v28  ;;  %vm1977_vm2 = vcmp.gt.f32.partialorder %v4836_v40, 0.0  ;;  %v5407_v28 = vld [vmem:[#allocation17_spill] sm:$0xff] }
 0x1e1   :  { %v3020_v24 = vpop.eup %3019  ;;  %vm1978_vm3 = vcmp.gt.f32.partialorder %v4852_v11, 0.0  ;;  %3033 = vpow2.f32 %v2137_v23  ;;  %v2043_v34 = vmin.f32 %v4910_v29, 0.0  ;;  %v1529_v15 = vmul.f32 1.442695, %v1421_v25 }
 0x1e2   :  { %v3022_v12 = vpop.eup %3021  ;;  %3035 = vrcp.f32 %v1601_v20  ;;  %v2287_v62 = vsel %vm1977_vm2, %v4836_v40, %v2543_v3  ;;  %v4922_v4 = vadd.f32 %v4704_v33, %v1851_v60  ;;  %v1535_v27 = vmul.f32 1.442695, %v1424_v17 }
 0x1e3   :  { %3037 = vrcp.f32 %v1604_v14  ;;  %2349 = vst.msk [vmem:[%s5372_s8 + $0xf0] sm:$0xff] %vm813_vm1, %v2287_v62  ;;  %v2139_v53 = vmul.f32 1.442695, %v2043_v34  ;;  %v1423_v52 = vsub.f32 0.0, %v1307_v13  ;;  %v3024_v22 = vpop.eup %3023  ;;  %v1606_v37 = vadd.f32 1.0, %v3020_v24  ;;  %v5406_v14 = vld [vmem:[#allocation20_spill] sm:$0xff] }
 0x1e4   :  { %3039 = vrcp.f32 %v1603_v51  ;;  %vm1979_vm4 = vcmp.gt.f32.partialorder %v4886_v63, 0.0  ;;  %v2044_v40 = vmin.f32 %v4922_v4, 0.0  ;;  %v1783_v49 = vmul.f32 %v3008_v35, %v614_v44  ;;  %v5408_v51 = vld [vmem:[#allocation19_spill] sm:$0xff] }
 0x1e5   :  { %v3026_v21 = vpop.eup %3025  ;;  %v2544_v18 = vadd.f32 -1.0, %v3024_v22  ;;  %vm1980_vm5 = vcmp.gt.f32.partialorder %v4895_v5, 0.0  ;;  %3041 = vpow2.f32 %v2139_v53  ;;  %v1533_v39 = vmul.f32 1.442695, %v1423_v52 }
 0x1e6   :  { %v619_v41 = vadd.f32 %v4662_v45, %v5405_v16  ;;  %v3028_v20 = vpop.eup %3027  ;;  %v1608_v38 = vadd.f32 1.0, %v3026_v21  ;;  %v2141_v42 = vmul.f32 1.442695, %v2044_v40  ;;  %3043 = vpow2.f32 %v1535_v27 }
 0x1e7   :  { %v1852_v10 = vmul.f32 %v4688_v26, %v1783_v49  ;;  %v4934_v25 = vpop.eup %3029  ;;  %v2288_v35 = vsel %vm1978_vm3, %v4852_v11, %v2544_v18  ;;  %3045 = vpow2.f32 %v1533_v39  ;;  %v1322_v23 = vadd.f32 %v4554_v55, %v5406_v14 }
 0x1e8   :  { %v1784_v7 = vmul.f32 %v4862_v31, %v619_v41  ;;  %2350 = vst.msk [vmem:[%s5372_s8 + $0xf8] sm:$0xff] %vm813_vm1, %v2288_v35  ;;  %3047 = vrcp.f32 %v1608_v38  ;;  %v1317_v54 = vadd.f32 %v4554_v55, %v4585_v50  ;;  %v624_v11 = vadd.f32 %v4662_v45, %v5407_v28 }
 0x1e9   :  { %v4947_v43 = vadd.f32 %v4704_v33, %v1852_v10  ;;  %vm1981_vm6 = vcmp.gt.f32.partialorder %v4910_v29, 0.0  ;;  %3049 = vpow2.f32 %v2141_v42  ;;  %v1426_v61 = vsub.f32 0.0, %v1322_v23  ;;  %v3032_v36 = vpop.eup %3031 }
 0x1ea   :  { %v1853_v31 = vmul.f32 %v4688_v26, %v1784_v7  ;;  %v629_v13 = vadd.f32 %v4662_v45, %v5408_v51  ;;  %v1605_v44 = vadd.f32 1.0, %v3028_v20  ;;  %v1425_v60 = vsub.f32 0.0, %v1317_v54 }
 0x1eb   :  { %v2045_v3 = vmin.f32 %v4947_v43, 0.0  ;;  %v1785_v17 = vmul.f32 %v3022_v12, %v624_v11  ;;  %v3034_v24 = vpop.eup %3033  ;;  %v2545_v50 = vadd.f32 -1.0, %v3032_v36  ;;  %3051 = vpow2.f32 %v1529_v15 }
 0x1ec   :  { %v4959_v34 = vadd.f32 %v4704_v33, %v1853_v31  ;;  %v1786_v62 = vmul.f32 %v3018_v0, %v629_v13  ;;  %v3036_v53 = vpop.eup %3035  ;;  %v2546_v27 = vadd.f32 -1.0, %v3034_v24  ;;  %v1539_v22 = vmul.f32 1.442695, %v1426_v61  ;;  %v5409_v31 = vld [vmem:[#allocation12_spill] sm:$0xff] }
 0x1ed   :  { %v2143_v52 = vmul.f32 1.442695, %v2045_v3  ;;  %v1854_v40 = vmul.f32 %v4688_v26, %v1785_v17  ;;  %v4962_v49 = vpop.eup %3037  ;;  %3053 = vrcp.f32 %v1606_v37  ;;  %v2289_v12 = vsel %vm1979_vm4, %v4886_v63, %v2545_v50 }
 0x1ee   :  { %v2046_v21 = vmin.f32 %v4959_v34, 0.0  ;;  %v1537_v15 = vmul.f32 1.442695, %v1425_v60  ;;  %v4968_v18 = vpop.eup %3039  ;;  %2351 = vst.msk [vmem:[%s5372_s8 + $0x100] sm:$0xff] %vm813_vm1, %v2289_v12  ;;  %v2290_v0 = vsel %vm1980_vm5, %v4895_v5, %v2546_v27  ;;  %v1855_v63 = vmul.f32 %v4688_v26, %v1786_v62  ;;  %v5410_v60 = vld [vmem:[#allocation21_spill] sm:$0xff] }
 0x1ef   :  { %3055 = vpow2.f32 %v2143_v52  ;;  %v4978_v37 = vadd.f32 %v4704_v33, %v1854_v40  ;;  %v3042_v39 = vpop.eup %3041  ;;  %2352 = vst.msk [vmem:[%s5372_s8 + $0x108] sm:$0xff] %vm813_vm1, %v2290_v0  ;;  %vm1982_vm7 = vcmp.gt.f32.partialorder %v4922_v4, 0.0  ;;  %v1332_v41 = vadd.f32 %v4554_v55, %v4597_v48 }
 0x1f0   :  { %3057 = vrcp.f32 %v1605_v44  ;;  %v2145_v16 = vmul.f32 1.442695, %v2046_v21  ;;  %v3044_v5 = vpop.eup %3043  ;;  %v2547_v20 = vadd.f32 -1.0, %v3042_v39  ;;  %v1327_v42 = vadd.f32 %v4554_v55, %v4612_v58 }
 0x1f1   :  { %3059 = vpow2.f32 %v1539_v22  ;;  %v2047_v38 = vmin.f32 %v4978_v37, 0.0  ;;  %v3046_v10 = vpop.eup %3045  ;;  %v1610_v35 = vadd.f32 1.0, %v3044_v5  ;;  %v4992_v7 = vadd.f32 %v4704_v33, %v1855_v63 }
 0x1f2   :  { %3061 = vpow2.f32 %v2145_v16  ;;  %v1428_v14 = vsub.f32 0.0, %v1332_v41  ;;  %v3048_v23 = vpop.eup %3047  ;;  %v2291_v48 = vsel %vm1981_vm6, %v4910_v29, %v2547_v20  ;;  %v1609_v54 = vadd.f32 1.0, %v3046_v10 }
 0x1f3   :  { %3063 = vpow2.f32 %v1537_v15  ;;  %v2147_v28 = vmul.f32 1.442695, %v2047_v38  ;;  %v3050_v11 = vpop.eup %3049  ;;  %v1794_v61 = vmul.f32 %v3048_v23, %v5409_v31  ;;  %2353 = vst.msk [vmem:[%s5372_s8 + $0x110] sm:$0xff] %vm813_vm1, %v2291_v48  ;;  %vm1983_vm8 = vcmp.gt.f32.partialorder %v4947_v43, 0.0  ;;  %v5411_v31 = vld [vmem:[#allocation13_spill] sm:$0xff] }
 0x1f4   :  { %3065 = vrcp.f32 %v1610_v35  ;;  %v2048_v58 = vmin.f32 %v4992_v7, 0.0  ;;  %v2548_v51 = vadd.f32 -1.0, %v3050_v11  ;;  %v1543_v13 = vmul.f32 1.442695, %v1428_v14 }
 0x1f5   :  { %3067 = vrcp.f32 %v1609_v54  ;;  %v1427_v29 = vsub.f32 0.0, %v1327_v42  ;;  %v5004_v36 = vpop.eup %3051  ;;  %v1863_v44 = vmul.f32 %v4688_v26, %v1794_v61  ;;  %v634_v17 = vadd.f32 %v4662_v45, %v5410_v60 }
 0x1f6   :  { %3069 = vpow2.f32 %v2147_v28  ;;  %v2149_v3 = vmul.f32 1.442695, %v2048_v58  ;;  %v2292_v24 = vsel %vm1982_vm7, %v4922_v4, %v2548_v51  ;;  %v639_v62 = vadd.f32 %v4662_v45, %v4599_v6 }
 0x1f7   :  { %3071 = vpow2.f32 %v1543_v13  ;;  %v1541_v50 = vmul.f32 1.442695, %v1427_v29  ;;  %v5014_v27 = vpop.eup %3053  ;;  %v5017_v52 = vadd.f32 %v4704_v33, %v1863_v44  ;;  %2354 = vst.msk [vmem:[%s5372_s8 + $0x118] sm:$0xff] %vm813_vm1, %v2292_v24  ;;  %v1787_v22 = vmul.f32 %v3036_v53, %v634_v17 }
 0x1f8   :  { %3073 = vpow2.f32 %v2149_v3  ;;  %v1342_v4 = vadd.f32 %v4554_v55, %v4629_v30  ;;  %v1788_v12 = vmul.f32 %v4934_v25, %v639_v62  ;;  %v1337_v6 = vadd.f32 %v4554_v55, %v4640_v46 }
 0x1f9   :  { %v3056_v40 = vpop.eup %3055  ;;  %3075 = vpow2.f32 %v1541_v50  ;;  %v644_v21 = vadd.f32 %v4662_v45, %v4631_v59  ;;  %v2056_v0 = vmin.f32 %v5017_v52, 0.0  ;;  %vm1984_vm9 = vcmp.gt.f32.partialorder %v4959_v34, 0.0 }
 0x1fa   :  { %v5030_v15 = vpop.eup %3057  ;;  %v2549_v63 = vadd.f32 -1.0, %v3056_v40  ;;  %v1856_v53 = vmul.f32 %v4688_v26, %v1787_v22  ;;  %v1857_v39 = vmul.f32 %v4688_v26, %v1788_v12  ;;  %v1430_v16 = vsub.f32 0.0, %v1342_v4 }
 0x1fb   :  { %v3060_v30 = vpop.eup %3059  ;;  %v1429_v25 = vsub.f32 0.0, %v1337_v6  ;;  %v1789_v41 = vmul.f32 %v4968_v18, %v644_v21  ;;  %v2165_v46 = vmul.f32 1.442695, %v2056_v0  ;;  %vm1985_vm10 = vcmp.gt.f32.partialorder %v4978_v37, 0.0  ;;  %v5412_v6 = vld [vmem:[#allocation5_spill] sm:$0xff] }
 0x1fc   :  { %v3062_v55 = vpop.eup %3061  ;;  %v2293_v59 = vsel %vm1983_vm8, %v4947_v43, %v2549_v63  ;;  %v1612_v5 = vadd.f32 1.0, %v3060_v30  ;;  %v5041_v20 = vadd.f32 %v4704_v33, %v1856_v53  ;;  %v5049_v18 = vadd.f32 %v4704_v33, %v1857_v39 }
 0x1fd   :  { %v3064_v38 = vpop.eup %3063  ;;  %2355 = vst.msk [vmem:[%s5372_s8 + $0x120] sm:$0xff] %vm813_vm1, %v2293_v59  ;;  %v2550_v42 = vadd.f32 -1.0, %v3062_v55  ;;  %v1547_v10 = vmul.f32 1.442695, %v1430_v16  ;;  %3077 = vpow2.f32 %v2165_v46  ;;  %vm1986_vm11 = vcmp.gt.f32.partialorder %v4992_v7, 0.0  ;;  %v5414_v46 = vld [vmem:[#allocation23_spill] sm:$0xff] }
 0x1fe   :  { %v3066_v35 = vpop.eup %3065  ;;  %v1611_v43 = vadd.f32 1.0, %v3064_v38  ;;  %v2049_v14 = vmin.f32 %v5041_v20, 0.0  ;;  %3079 = vrcp.f32 %v1612_v5  ;;  %v1545_v28 = vmul.f32 1.442695, %v1429_v25  ;;  %v5105_v16 = vld [vmem:[%s5368_s5] ss:$0 sm:$0xff] }
 0x1ff   :  { %v3068_v23 = vpop.eup %3067  ;;  %v1796_v48 = vmul.f32 %v3066_v35, %v4818_v8  ;;  %v2294_v54 = vsel %vm1984_vm9, %v4959_v34, %v2550_v42  ;;  %v2050_v51 = vmin.f32 %v5049_v18, 0.0  ;;  %v1858_v34 = vmul.f32 %v4688_v26, %v1789_v41 }
 0x200   :  { %v3070_v11 = vpop.eup %3069  ;;  %v1795_v61 = vmul.f32 %v3068_v23, %v5411_v31  ;;  %2356 = vst.msk [vmem:[%s5372_s8 + $0x128] sm:$0xff] %vm813_vm1, %v2294_v54  ;;  %3081 = vrcp.f32 %v1611_v43  ;;  %v2151_v58 = vmul.f32 1.442695, %v2049_v14  ;;  %v5084_v21 = vadd.f32 %v4662_v45, %v5412_v6 }
 0x201   :  { %v3072_v13 = vpop.eup %3071  ;;  %v1865_v8 = vmul.f32 %v4688_v26, %v1796_v48  ;;  %v2551_v29 = vadd.f32 -1.0, %v3070_v11  ;;  %3083 = vpow2.f32 %v1547_v10  ;;  %v2153_v17 = vmul.f32 1.442695, %v2050_v51  ;;  %v5415_v11 = vld [vmem:[#allocation24_spill] sm:$0xff] }
 0x202   :  { %v3074_v44 = vpop.eup %3073  ;;  %v1864_v3 = vmul.f32 %v4688_v26, %v1795_v61  ;;  %v1614_v60 = vadd.f32 1.0, %v3072_v13  ;;  %3085 = vpow2.f32 %v2151_v58  ;;  %v5080_v12 = vadd.f32 %v4704_v33, %v1858_v34 }
 0x203   :  { %v3076_v24 = vpop.eup %3075  ;;  %v5067_v50 = vadd.f32 %v4704_v33, %v1865_v8  ;;  %v2295_v62 = vsel %vm1985_vm10, %v4978_v37, %v2551_v29  ;;  %v2552_v22 = vadd.f32 -1.0, %v3074_v44  ;;  %3087 = vpow2.f32 %v1545_v28 }
 0x204   :  { %v5073_v4 = vadd.f32 %v4704_v33, %v1864_v3  ;;  %2357 = vst.msk [vmem:[%s5372_s8 + $0x130] sm:$0xff] %vm813_vm1, %v2295_v62  ;;  %3089 = vrcp.f32 %v1614_v60  ;;  %v1613_v40 = vadd.f32 1.0, %v3076_v24  ;;  %vm1994_vm12 = vcmp.gt.f32.partialorder %v5017_v52, 0.0 }
 0x205   :  { %v2058_v37 = vmin.f32 %v5067_v50, 0.0  ;;  %v2296_v0 = vsel %vm1986_vm11, %v4992_v7, %v2552_v22  ;;  %3091 = vpow2.f32 %v2153_v17  ;;  %v5092_v63 = vadd.f32 1.0, %v5004_v36  ;;  %v5413_v36 = vld [vmem:[#allocation22_spill] sm:$0xff] }
 0x206   :  { %v2057_v53 = vmin.f32 %v5073_v4, 0.0  ;;  %2358 = vst.msk [vmem:[%s5372_s8 + $0x138] sm:$0xff] %vm813_vm1, %v2296_v0  ;;  %3093 = vrcp.f32 %v1613_v40  ;;  %v2051_v39 = vmin.f32 %v5080_v12, 0.0  ;;  %v649_v7 = vadd.f32 %v4662_v45, %v4666_v19 }
 0x207   :  { %v2169_v30 = vmul.f32 1.442695, %v2058_v37  ;;  %v1352_v25 = vadd.f32 %v5105_v16, %v5413_v36  ;;  %v3078_v41 = vpop.eup %3077  ;;  %vm1987_vm13 = vcmp.gt.f32.partialorder %v5041_v20, 0.0  ;;  %v1347_v59 = vadd.f32 %v5105_v16, %v5414_v46 }
 0x208   :  { %v2167_v55 = vmul.f32 1.442695, %v2057_v53  ;;  %v654_v5 = vadd.f32 %v4662_v45, %v4693_v2  ;;  %v3080_v38 = vpop.eup %3079  ;;  %v2560_v19 = vadd.f32 -1.0, %v3078_v41  ;;  %v2155_v42 = vmul.f32 1.442695, %v2051_v39 }
 0x209   :  { %3095 = vpow2.f32 %v2169_v30  ;;  %v1790_v10 = vmul.f32 %v4962_v49, %v649_v7  ;;  %v1798_v43 = vmul.f32 %v3080_v38, %v4866_v47  ;;  %v1432_v14 = vsub.f32 0.0, %v1352_v25 }
 0x20a   :  { %v3082_v35 = vpop.eup %3081  ;;  %3097 = vpow2.f32 %v2167_v55  ;;  %v1431_v23 = vsub.f32 0.0, %v1347_v59  ;;  %v2304_v54 = vsel %vm1994_vm12, %v5017_v52, %v2560_v19  ;;  %vm1988_vm14 = vcmp.gt.f32.partialorder %v5049_v18, 0.0 }
 0x20b   :  { %v3084_v48 = vpop.eup %3083  ;;  %v1797_v28 = vmul.f32 %v3082_v35, %v4826_v32  ;;  %3099 = vpow2.f32 %v2155_v42  ;;  %v1859_v45 = vmul.f32 %v4688_v26, %v1790_v10  ;;  %2366 = vst.msk [vmem:[%s5372_s8 + $0x178] sm:$0xff] %vm813_vm1, %v2304_v54  ;;  %v1867_v47 = vmul.f32 %v4688_v26, %v1798_v43  ;;  %v5190_v35 = vld [vmem:[%s5369_s3] ss:$0 sm:$0xff]  ;;  %v5416_v43 = vld [vmem:[#allocation4_spill] sm:$0xff] }
 0x20c   :  { %v3086_v2 = vpop.eup %3085  ;;  %v1616_v49 = vadd.f32 1.0, %v3084_v48  ;;  %v1362_v31 = vadd.f32 %v5105_v16, %v5415_v11  ;;  %vm1996_vm15 = vcmp.gt.f32.partialorder %v5067_v50, 0.0  ;;  %v1551_v51 = vmul.f32 1.442695, %v1432_v14  ;;  %v5417_v48 = vld [vmem:[#allocation25_spill] sm:$0xff] }
 0x20d   :  { %v3088_v52 = vpop.eup %3087  ;;  %v1866_v32 = vmul.f32 %v4688_v26, %v1797_v28  ;;  %v2553_v61 = vadd.f32 -1.0, %v3086_v2  ;;  %v5132_v58 = vadd.f32 %v4704_v33, %v1859_v45  ;;  %v5135_v8 = vadd.f32 %v4704_v33, %v1867_v47  ;;  %v5212_v45 = vld [vmem:[%s5371_s7] ss:$0 sm:$0xff] }
 0x20e   :  { %v3090_v13 = vpop.eup %3089  ;;  %3101 = vrcp.f32 %v1616_v49  ;;  %v1615_v29 = vadd.f32 1.0, %v3088_v52  ;;  %v1791_v34 = vmul.f32 %v5030_v15, %v654_v5  ;;  %v1549_v24 = vmul.f32 1.442695, %v1431_v23 }
 0x20f   :  { %v3092_v44 = vpop.eup %3091  ;;  %v5139_v3 = vadd.f32 %v4704_v33, %v1866_v32  ;;  %v1800_v60 = vmul.f32 %v3090_v13, %v4883_v57  ;;  %v2297_v17 = vsel %vm1987_vm13, %v5041_v20, %v2553_v61  ;;  %v2060_v22 = vmin.f32 %v5135_v8, 0.0  ;;  %v5419_v32 = vld [vmem:[#allocation27_spill] sm:$0xff] }
 0x210   :  { %v3094_v62 = vpop.eup %3093  ;;  %2359 = vst.msk [vmem:[%s5372_s8 + $0x140] sm:$0xff] %vm813_vm1, %v2297_v17  ;;  %v2554_v15 = vadd.f32 -1.0, %v3092_v44  ;;  %3103 = vrcp.f32 %v1615_v29  ;;  %v1434_v40 = vsub.f32 0.0, %v1362_v31  ;;  %vm1995_vm0 = vcmp.gt.f32.partialorder %v5073_v4, 0.0 }
 0x211   :  { %v2059_v57 = vmin.f32 %v5139_v3, 0.0  ;;  %v1869_v6 = vmul.f32 %v4688_v26, %v1800_v60  ;;  %v1799_v20 = vmul.f32 %v3094_v62, %v4874_v56  ;;  %v2173_v37 = vmul.f32 1.442695, %v2060_v22 }
 0x212   :  { %v2298_v0 = vsel %vm1988_vm14, %v5049_v18, %v2554_v15  ;;  %v2052_v53 = vmin.f32 %v5132_v58, 0.0  ;;  %3105 = vpow2.f32 %v1551_v51  ;;  %v1555_v41 = vmul.f32 1.442695, %v1434_v40 }
 0x213   :  { %v3096_v30 = vpop.eup %3095  ;;  %v2171_v39 = vmul.f32 1.442695, %v2059_v57  ;;  %v5159_v7 = vadd.f32 %v4704_v33, %v1869_v6  ;;  %v1868_v36 = vmul.f32 %v4688_v26, %v1799_v20  ;;  %2360 = vst.msk [vmem:[%s5372_s8 + $0x148] sm:$0xff] %vm813_vm1, %v2298_v0  ;;  %3107 = vpow2.f32 %v1549_v24 }
 0x214   :  { %v3098_v56 = vpop.eup %3097  ;;  %v2562_v25 = vadd.f32 -1.0, %v3096_v30  ;;  %3109 = vpow2.f32 %v2173_v37  ;;  %v2157_v18 = vmul.f32 1.442695, %v2052_v53  ;;  %vm1989_vm2 = vcmp.gt.f32.partialorder %v5080_v12, 0.0 }
 0x215   :  { %v3100_v55 = vpop.eup %3099  ;;  %v2561_v46 = vadd.f32 -1.0, %v3098_v56  ;;  %3111 = vpow2.f32 %v2171_v39  ;;  %v2062_v59 = vmin.f32 %v5159_v7, 0.0  ;;  %v5172_v5 = vadd.f32 %v4704_v33, %v1868_v36 }
 0x216   :  { %v2306_v26 = vsel %vm1996_vm15, %v5067_v50, %v2562_v25  ;;  %v2555_v38 = vadd.f32 -1.0, %v3100_v55  ;;  %3113 = vpow2.f32 %v2157_v18  ;;  %v5184_v50 = vld [vmem:[%s5370_s6] ss:$0 sm:$0xff]  ;;  %v704_v14 = vadd.f32 %v5190_v35, %v5416_v43 }
 0x217   :  { %2368 = vst.msk [vmem:[%s5372_s8 + $0x188] sm:$0xff] %vm813_vm1, %v2306_v26  ;;  %v2305_v19 = vsel %vm1995_vm0, %v5073_v4, %v2561_v46  ;;  %v2177_v42 = vmul.f32 1.442695, %v2062_v59  ;;  %3115 = vpow2.f32 %v1555_v41  ;;  %v1860_v33 = vmul.f32 %v5184_v50, %v1791_v34 }
 0x218   :  { %v3102_v10 = vpop.eup %3101  ;;  %2367 = vst.msk [vmem:[%s5372_s8 + $0x180] sm:$0xff] %vm813_vm1, %v2305_v19  ;;  %v2061_v4 = vmin.f32 %v5172_v5, 0.0  ;;  %v2299_v23 = vsel %vm1989_vm2, %v5080_v12, %v2555_v38  ;;  %v1357_v54 = vadd.f32 %v5105_v16, %v5417_v48  ;;  %v5418_v12 = vld [vmem:[#allocation26_spill] sm:$0xff]  ;;  %vm1998_vm3 = vcmp.gt.f32.partialorder %v5135_v8, 0.0 }
 0x219   :  { %3117 = vpow2.f32 %v2177_v42  ;;  %v1802_v28 = vmul.f32 %v3102_v10, %v5084_v21  ;;  %2361 = vst.msk [vmem:[%s5372_s8 + $0x150] sm:$0xff] %vm813_vm1, %v2299_v23  ;;  %v5215_v2 = vadd.f32 %v5212_v45, %v1860_v33  ;;  %v659_v47 = vadd.f32 %v5190_v35, %v5418_v12  ;;  %v5420_v23 = vld [vmem:[#allocation7_spill] sm:$0xff]  ;;  %v5421_v12 = vld [vmem:[#allocation6_spill] sm:$0xff] }
 0x21a   :  { %v3104_v49 = vpop.eup %3103  ;;  %3119 = vrcp.f32 %v5092_v63  ;;  %v2175_v21 = vmul.f32 1.442695, %v2061_v4  ;;  %v1433_v11 = vsub.f32 0.0, %v1357_v54  ;;  %vm1990_vm4 = vcmp.gt.f32.partialorder %v5132_v58, 0.0 }
 0x21b   :  { %v1871_v31 = vmul.f32 %v5184_v50, %v1802_v28  ;;  %v1801_v52 = vmul.f32 %v3104_v49, %v704_v14  ;;  %v1372_v61 = vadd.f32 %v5105_v16, %v5419_v32  ;;  %v2053_v13 = vmin.f32 %v5215_v2, 0.0 }
 0x21c   :  { %v3106_v51 = vpop.eup %3105  ;;  %3121 = vpow2.f32 %v2175_v21  ;;  %v1553_v29 = vmul.f32 1.442695, %v1433_v11  ;;  %v1792_v34 = vmul.f32 %v5014_v27, %v659_v47  ;;  %v1367_v24 = vadd.f32 %v5105_v16, %v4726_v1 }
 0x21d   :  { %v3108_v63 = vpop.eup %3107  ;;  %v5228_v44 = vadd.f32 %v5212_v45, %v1871_v31  ;;  %v1870_v60 = vmul.f32 %v5184_v50, %v1801_v52  ;;  %v1618_v17 = vadd.f32 1.0, %v3106_v51  ;;  %vm1997_vm5 = vcmp.gt.f32.partialorder %v5139_v3, 0.0  ;;  %v5422_v31 = vld [vmem:[#allocation9_spill] sm:$0xff] }
 0x21e   :  { %v3110_v62 = vpop.eup %3109  ;;  %v1617_v22 = vadd.f32 1.0, %v3108_v63  ;;  %3123 = vpow2.f32 %v1553_v29  ;;  %v1861_v15 = vmul.f32 %v5184_v50, %v1792_v34  ;;  %v1436_v20 = vsub.f32 0.0, %v1372_v61 }
 0x21f   :  { %v3112_v40 = vpop.eup %3111  ;;  %v2564_v57 = vadd.f32 -1.0, %v3110_v62  ;;  %v2064_v27 = vmin.f32 %v5228_v44, 0.0  ;;  %v5237_v6 = vadd.f32 %v5212_v45, %v1870_v60  ;;  %3125 = vrcp.f32 %v1618_v17 }
 0x220   :  { %v3114_v37 = vpop.eup %3113  ;;  %v2563_v0 = vadd.f32 -1.0, %v3112_v40  ;;  %v2159_v53 = vmul.f32 1.442695, %v2053_v13  ;;  %v5240_v1 = vadd.f32 %v5212_v45, %v1861_v15  ;;  %v1435_v56 = vsub.f32 0.0, %v1367_v24 }
 0x221   :  { %v3116_v16 = vpop.eup %3115  ;;  %v2308_v30 = vsel %vm1998_vm3, %v5135_v8, %v2564_v57  ;;  %v2181_v39 = vmul.f32 1.442695, %v2064_v27  ;;  %v2063_v36 = vmin.f32 %v5237_v6, 0.0  ;;  %v2556_v18 = vadd.f32 -1.0, %v3114_v37 }
 0x222   :  { %2370 = vst.msk [vmem:[%s5372_s8 + $0x198] sm:$0xff] %vm813_vm1, %v2308_v30  ;;  %v2307_v25 = vsel %vm1997_vm5, %v5139_v3, %v2563_v0  ;;  %3127 = vrcp.f32 %v1617_v22  ;;  %v1620_v41 = vadd.f32 1.0, %v3116_v16  ;;  %vm2000_vm6 = vcmp.gt.f32.partialorder %v5159_v7, 0.0  ;;  %v5423_v22 = vld [vmem:[#allocation8_spill] sm:$0xff] }
 0x223   :  { %v3118_v55 = vpop.eup %3117  ;;  %2369 = vst.msk [vmem:[%s5372_s8 + $0x190] sm:$0xff] %vm813_vm1, %v2307_v25  ;;  %3129 = vpow2.f32 %v2181_v39  ;;  %v2179_v8 = vmul.f32 1.442695, %v2063_v36  ;;  %v2054_v46 = vmin.f32 %v5240_v1, 0.0  ;;  %v2300_v3 = vsel %vm1990_vm4, %v5132_v58, %v2556_v18 }
 0x224   :  { %v3120_v59 = vpop.eup %3119  ;;  %v2566_v26 = vadd.f32 -1.0, %v3118_v55  ;;  %3131 = vrcp.f32 %v1620_v41  ;;  %v1559_v38 = vmul.f32 1.442695, %v1436_v20  ;;  %2362 = vst.msk [vmem:[%s5372_s8 + $0x158] sm:$0xff] %vm813_vm1, %v2300_v3  ;;  %v1557_v42 = vmul.f32 1.442695, %v1435_v56 }
 0x225   :  { %3133 = vpow2.f32 %v2179_v8  ;;  %v2161_v19 = vmul.f32 1.442695, %v2054_v46  ;;  %v664_v33 = vadd.f32 %v5190_v35, %v4742_v9  ;;  %v719_v48 = vadd.f32 %v5190_v35, %v5420_v23 }
 0x226   :  { %v3122_v10 = vpop.eup %3121  ;;  %v2310_v43 = vsel %vm2000_vm6, %v5159_v7, %v2566_v26  ;;  %3135 = vpow2.f32 %v2159_v53  ;;  %vm1999_vm7 = vcmp.gt.f32.partialorder %v5172_v5, 0.0  ;;  %v714_v47 = vadd.f32 %v5190_v35, %v5421_v12 }
 0x227   :  { %2372 = vst.msk [vmem:[%s5372_s8 + $0x1a8] sm:$0xff] %vm813_vm1, %v2310_v43  ;;  %v2565_v58 = vadd.f32 -1.0, %v3122_v10  ;;  %3137 = vpow2.f32 %v2161_v19  ;;  %v1793_v14 = vmul.f32 %v3120_v59, %v664_v33  ;;  %v729_v52 = vadd.f32 %v5190_v35, %v5422_v31  ;;  %v5424_v43 = vld [vmem:[#allocation11_spill] sm:$0xff] }
 0x228   :  { %v3124_v4 = vpop.eup %3123  ;;  %3139 = vpow2.f32 %v1559_v38  ;;  %vm2002_vm8 = vcmp.gt.f32.partialorder %v5228_v44, 0.0  ;;  %v724_v15 = vadd.f32 %v5190_v35, %v5423_v22  ;;  %vm1991_vm9 = vcmp.gt.f32.partialorder %v5215_v2, 0.0 }
 0x229   :  { %v2309_v9 = vsel %vm1999_vm7, %v5172_v5, %v2565_v58  ;;  %v1619_v54 = vadd.f32 1.0, %v3124_v4  ;;  %3141 = vpow2.f32 %v1557_v42  ;;  %v1862_v7 = vmul.f32 %v5184_v50, %v1793_v14  ;;  %v3126_v28 = vpop.eup %3125 }
 0x22a   :  { %2371 = vst.msk [vmem:[%s5372_s8 + $0x1a0] sm:$0xff] %vm813_vm1, %v2309_v9  ;;  %v1804_v49 = vmul.f32 %v3126_v28, %v719_v48  ;;  %vm2001_vm10 = vcmp.gt.f32.partialorder %v5237_v6, 0.0  ;;  %vm1992_vm11 = vcmp.gt.f32.partialorder %v5240_v1, 0.0  ;;  %v739_v58 = vadd.f32 %v5190_v35, %v5424_v43  ;;  %v5425_v9 = vld [vmem:[#allocation10_spill] sm:$0xff] }
 0x22b   :  { %3143 = vrcp.f32 %v1619_v54  ;;  %v5285_v21 = vadd.f32 %v5212_v45, %v1862_v7  ;;  %v734_v54 = vadd.f32 %v5190_v35, %v5425_v9 }
 0x22c   :  { %v3128_v11 = vpop.eup %3127  ;;  %v1873_v32 = vmul.f32 %v5184_v50, %v1804_v49 }
 0x22d   :  { %v3130_v5 = vpop.eup %3129  ;;  %v1803_v61 = vmul.f32 %v3128_v11, %v714_v47  ;;  %v2055_v51 = vmin.f32 %v5285_v21, 0.0  ;;  %vm1993_vm12 = vcmp.gt.f32.partialorder %v5285_v21, 0.0 }
 0x22e   :  { %v3132_v13 = vpop.eup %3131  ;;  %v2568_v29 = vadd.f32 -1.0, %v3130_v5  ;;  %v1942_v63 = vadd.f32 %v5212_v45, %v1873_v32 }
 0x22f   :  { %v3134_v34 = vpop.eup %3133  ;;  %v1872_v60 = vmul.f32 %v5184_v50, %v1803_v61  ;;  %v1806_v17 = vmul.f32 %v3132_v13, %v729_v52  ;;  %v2163_v24 = vmul.f32 1.442695, %v2055_v51 }
 0x230   :  { %v3136_v62 = vpop.eup %3135  ;;  %v2312_v40 = vsel %vm2002_vm8, %v5228_v44, %v2568_v29  ;;  %v2567_v57 = vadd.f32 -1.0, %v3134_v34  ;;  %v2066_v20 = vmin.f32 %v1942_v63, 0.0  ;;  %vm2004_vm13 = vcmp.gt.f32.partialorder %v1942_v63, 0.0 }
 0x231   :  { %v3138_v27 = vpop.eup %3137  ;;  %2374 = vst.msk [vmem:[%s5372_s8 + $0x1b8] sm:$0xff] %vm813_vm1, %v2312_v40  ;;  %v1941_v37 = vadd.f32 %v5212_v45, %v1872_v60  ;;  %v1875_v0 = vmul.f32 %v5184_v50, %v1806_v17  ;;  %v2557_v44 = vadd.f32 -1.0, %v3136_v62  ;;  %3145 = vpow2.f32 %v2163_v24 }
 0x232   :  { %v3140_v53 = vpop.eup %3139  ;;  %v2311_v16 = vsel %vm2001_vm10, %v5237_v6, %v2567_v57  ;;  %v2558_v30 = vadd.f32 -1.0, %v3138_v27  ;;  %v2185_v36 = vmul.f32 1.442695, %v2066_v20 }
 0x233   :  { %v3142_v39 = vpop.eup %3141  ;;  %2373 = vst.msk [vmem:[%s5372_s8 + $0x1b0] sm:$0xff] %vm813_vm1, %v2311_v16  ;;  %v2065_v56 = vmin.f32 %v1941_v37, 0.0  ;;  %v1944_v25 = vadd.f32 %v5212_v45, %v1875_v0  ;;  %v2301_v18 = vsel %vm1991_vm9, %v5215_v2, %v2557_v44  ;;  %v1622_v41 = vadd.f32 1.0, %v3140_v53 }
 0x234   :  { %v2302_v6 = vsel %vm1992_vm11, %v5240_v1, %v2558_v30  ;;  %v1621_v55 = vadd.f32 1.0, %v3142_v39  ;;  %3147 = vpow2.f32 %v2185_v36  ;;  %2363 = vst.msk [vmem:[%s5372_s8 + $0x160] sm:$0xff] %vm813_vm1, %v2301_v18  ;;  %vm2003_vm14 = vcmp.gt.f32.partialorder %v1941_v37, 0.0 }
 0x235   :  { %v3144_v8 = vpop.eup %3143  ;;  %v2183_v46 = vmul.f32 1.442695, %v2065_v56  ;;  %v2068_v59 = vmin.f32 %v1944_v25, 0.0  ;;  %2364 = vst.msk [vmem:[%s5372_s8 + $0x168] sm:$0xff] %vm813_vm1, %v2302_v6  ;;  %3149 = vrcp.f32 %v1622_v41  ;;  %vm2006_vm15 = vcmp.gt.f32.partialorder %v1944_v25, 0.0 }
 0x236   :  { %v1805_v26 = vmul.f32 %v3144_v8, %v724_v15 }
 0x237   :  { %3151 = vpow2.f32 %v2183_v46  ;;  %v2189_v2 = vmul.f32 1.442695, %v2068_v59 }
 0x238   :  { %v1874_v1 = vmul.f32 %v5184_v50, %v1805_v26  ;;  %3153 = vrcp.f32 %v1621_v55 }
 0x239   :  { %3155 = vpow2.f32 %v2189_v2 }
 0x23a   :  { %v1943_v3 = vadd.f32 %v5212_v45, %v1874_v1 }
 0x23b   :  { %v3146_v38 = vpop.eup %3145 }
 0x23c   :  { %v2067_v19 = vmin.f32 %v1943_v3, 0.0  ;;  %v2559_v42 = vadd.f32 -1.0, %v3146_v38  ;;  %vm2005_vm0 = vcmp.gt.f32.partialorder %v1943_v3, 0.0 }
 0x23e   :  { %v2187_v33 = vmul.f32 1.442695, %v2067_v19  ;;  %v3148_v10 = vpop.eup %3147  ;;  %v2303_v14 = vsel %vm1993_vm12, %v5285_v21, %v2559_v42 }
 0x23f   :  { %v3150_v4 = vpop.eup %3149  ;;  %v2570_v23 = vadd.f32 -1.0, %v3148_v10  ;;  %2365 = vst.msk [vmem:[%s5372_s8 + $0x170] sm:$0xff] %vm813_vm1, %v2303_v14 }
 0x240   :  { %3157 = vpow2.f32 %v2187_v33  ;;  %v1808_v7 = vmul.f32 %v3150_v4, %v739_v58 }
 0x241   :  { %v3152_v48 = vpop.eup %3151  ;;  %v2314_v12 = vsel %vm2004_vm13, %v1942_v63, %v2570_v23 }
 0x242   :  { %v3154_v28 = vpop.eup %3153  ;;  %v2569_v47 = vadd.f32 -1.0, %v3152_v48  ;;  %2376 = vst.msk [vmem:[%s5372_s8 + $0x1c8] sm:$0xff] %vm813_vm1, %v2314_v12  ;;  %v1877_v21 = vmul.f32 %v5184_v50, %v1808_v7 }
 0x243   :  { %v3156_v49 = vpop.eup %3155  ;;  %v1807_v11 = vmul.f32 %v3154_v28, %v734_v54 }
 0x244   :  { %v2313_v5 = vsel %vm2003_vm14, %v1941_v37, %v2569_v47  ;;  %v2572_v31 = vadd.f32 -1.0, %v3156_v49  ;;  %v1946_v35 = vadd.f32 %v5212_v45, %v1877_v21 }
 0x245   :  { %2375 = vst.msk [vmem:[%s5372_s8 + $0x1c0] sm:$0xff] %vm813_vm1, %v2313_v5  ;;  %v1876_v52 = vmul.f32 %v5184_v50, %v1807_v11 }
 0x246   :  { %v2316_v32 = vsel %vm2006_vm15, %v1944_v25, %v2572_v31  ;;  %v2070_v61 = vmin.f32 %v1946_v35, 0.0  ;;  %vm2008_vm2 = vcmp.gt.f32.partialorder %v1946_v35, 0.0 }
 0x247   :  { %2378 = vst.msk [vmem:[%s5372_s8 + $0x1d8] sm:$0xff] %vm813_vm1, %v2316_v32  ;;  %v1945_v51 = vadd.f32 %v5212_v45, %v1876_v52 }
 0x248   :  { %v2193_v13 = vmul.f32 1.442695, %v2070_v61 }
 0x249   :  { %v2069_v29 = vmin.f32 %v1945_v51, 0.0  ;;  %vm2007_vm3 = vcmp.gt.f32.partialorder %v1945_v51, 0.0 }
 0x24a   :  { %v3158_v34 = vpop.eup %3157  ;;  %3159 = vpow2.f32 %v2193_v13 }
 0x24b   :  { %v2571_v63 = vadd.f32 -1.0, %v3158_v34  ;;  %v2191_v60 = vmul.f32 1.442695, %v2069_v29 }
 0x24d   :  { %v2315_v17 = vsel %vm2005_vm0, %v1943_v3, %v2571_v63  ;;  %3161 = vpow2.f32 %v2191_v60 }
 0x24e   :  { %2377 = vst.msk [vmem:[%s5372_s8 + $0x1d0] sm:$0xff] %vm813_vm1, %v2315_v17 }
 0x254   :  { %v3160_v50 = vpop.eup %3159 }
 0x255   :  { %v2574_v24 = vadd.f32 -1.0, %v3160_v50 }
 0x257   :  { %v3162_v62 = vpop.eup %3161  ;;  %v2318_v22 = vsel %vm2008_vm2, %v1946_v35, %v2574_v24 }
 0x258   :  { %v2573_v45 = vadd.f32 -1.0, %v3162_v62  ;;  %2380 = vst.msk [vmem:[%s5372_s8 + $0x1e8] sm:$0xff] %vm813_vm1, %v2318_v22 }
 0x25a   :  { %v2317_v15 = vsel %vm2007_vm3, %v1945_v51, %v2573_v45 }
 0x25b   :  { %2379 = vst.msk [vmem:[%s5372_s8 + $0x1e0] sm:$0xff] %vm813_vm1, %v2317_v15 }

// kernel: mencoder_forward.8
= control target key start
LH: loop header
LB: loop body
LE: loop exit
PB: predicated region body
PF: predicated region fallthrough
CT: control target
= control target key end

     0   :  { %v1687_v0 = vmov 0.0|0.0   ;;  %vm116_vm0 = vcmask 261120   ;;  %s2757_s2 = inlined_call_operand.vmem [shape: f32[160,32], index: 2, kind: input, shape index: {}]   ;;  %s2758_s0 = inlined_call_operand.vmem [shape: f32[240,160], index: 0, kind: input, shape index: {}]   ;;  %s2759_s4 = inlined_call_operand.vmem [shape: f32[32,32], index: 4, kind: input, shape index: {}]   ;;  %s2760_s1 = inlined_call_operand.vmem [shape: f32[240,32], index: 1, kind: input, shape index: {}]   ;;  %s2761_s5 = inlined_call_operand.vmem [shape: f32[1,32], index: 5, kind: input, shape index: {}]   ;;  %s2762_s3 = inlined_call_operand.vmem [shape: f32[1,32], index: 3, kind: input, shape index: {}]   ;;  %s2763_s6 = inlined_call_operand.vmem [shape: f32[1,32], index: 6, kind: input, shape index: {}]   ;;  %s2764_s7 = inlined_call_operand.vmem [shape: f32[1,32], index: 7, kind: input, shape index: {}]   ;;  %s2765_s8 = inlined_call_operand.vmem [shape: f32[240,32], index: 8, kind: output, shape index: {}]  }
   0x1   :  { %1485 = vmatprep.subr.bf16.mxu1 %v1687_v0  ;;  %v89_v1 = vld [vmem:[%s2757_s2] sm:$0xff]  ;;  %v90_v2 = vld [vmem:[%s2757_s2 + $0x8] sm:$0xff]  ;;  %v91_v3 = vld [vmem:[%s2757_s2 + $0x10] sm:$0xff]  ;;  %1447 = vmatprep.subr.bf16.mxu0 %v1687_v0 }
   0x2   :  { %v1448_v4 = vpack.c.bf16 %v90_v2, %v89_v1  ;;  %v92_v5 = vld [vmem:[%s2757_s2 + $0x18] sm:$0xff]  ;;  %v93_v7 = vld [vmem:[%s2757_s2 + $0x20] sm:$0xff]  ;;  %v94_v8 = vld [vmem:[%s2757_s2 + $0x28] sm:$0xff] }
   0x3   :  { %v1451_v6 = vpack.c.bf16 %v92_v5, %v91_v3  ;;  %v76_v9 = vld [vmem:[%s2758_s0 + $0x178] sm:$0xff]  ;;  %v1454_v10 = vpack.c.bf16 %v94_v8, %v93_v7  ;;  %v95_v11 = vld [vmem:[%s2757_s2 + $0x30] sm:$0xff]  ;;  %v30_v13 = vld [vmem:[%s2758_s0 + $0x8] sm:$0xff] }
   0x4   :  { %1495 = vmatpush1.bf16.msra.mxu1 %v1448_v4  ;;  %1449 = vmatpush1.bf16.msra.mxu0 %v1448_v4  ;;  %v96_v12 = vld [vmem:[%s2757_s2 + $0x38] sm:$0xff]  ;;  %v97_v15 = vld [vmem:[%s2757_s2 + $0x40] sm:$0xff]  ;;  %v98_v16 = vld [vmem:[%s2757_s2 + $0x48] sm:$0xff] }
   0x5   :  { %1486 = vmatprep.subr.bf16.mxu1 %v1687_v0  ;;  %1450 = vmatprep.subr.bf16.mxu0 %v1687_v0  ;;  %v1457_v14 = vpack.c.bf16 %v96_v12, %v95_v11  ;;  %v1460_v17 = vpack.c.bf16 %v98_v16, %v97_v15  ;;  %v99_v18 = vld [vmem:[%s2757_s2 + $0x50] sm:$0xff]  ;;  %v100_v19 = vld [vmem:[%s2757_s2 + $0x58] sm:$0xff]  ;;  %v101_v21 = vld [vmem:[%s2757_s2 + $0x60] sm:$0xff] }
   0x6   :  { %1290 = vmatprep.mubr.msk.f32.mxu1 %vm116_vm0, %v76_v9  ;;  %1267 = vmatprep.mubr.msk.f32.mxu0 %vm116_vm0, %v30_v13  ;;  %v1463_v20 = vpack.c.bf16 %v100_v19, %v99_v18  ;;  %v102_v22 = vld [vmem:[%s2757_s2 + $0x68] sm:$0xff]  ;;  %v103_v24 = vld [vmem:[%s2757_s2 + $0x70] sm:$0xff]  ;;  %v104_v25 = vld [vmem:[%s2757_s2 + $0x78] sm:$0xff] }
   0x7   :  { %v1466_v23 = vpack.c.bf16 %v102_v22, %v101_v21  ;;  %v1469_v26 = vpack.c.bf16 %v104_v25, %v103_v24  ;;  %v105_v27 = vld [vmem:[%s2757_s2 + $0x80] sm:$0xff]  ;;  %v106_v28 = vld [vmem:[%s2757_s2 + $0x88] sm:$0xff]  ;;  %v107_v30 = vld [vmem:[%s2757_s2 + $0x90] sm:$0xff] }
   0x8   :  { %1496 = vmatpush1.bf16.msra.mxu1 %v1451_v6  ;;  %1452 = vmatpush1.bf16.msra.mxu0 %v1451_v6  ;;  %v1472_v29 = vpack.c.bf16 %v106_v28, %v105_v27  ;;  %v108_v31 = vld [vmem:[%s2757_s2 + $0x98] sm:$0xff]  ;;  %v452_v32 = vld [vmem:[%s2759_s4] sm:$0xff]  ;;  %v453_v33 = vld [vmem:[%s2759_s4 + $0x8] sm:$0xff] }
   0x9   :  { %1487 = vmatprep.subr.bf16.mxu1 %v1687_v0  ;;  %1453 = vmatprep.subr.bf16.mxu0 %v1687_v0  ;;  %v1475_v34 = vpack.c.bf16 %v108_v31, %v107_v30  ;;  %v1477_v35 = vpack.c.bf16 %v453_v33, %v452_v32  ;;  %v454_v36 = vld [vmem:[%s2759_s4 + $0x10] sm:$0xff]  ;;  %v455_v37 = vld [vmem:[%s2759_s4 + $0x18] sm:$0xff]  ;;  %v29_v39 = vld [vmem:[%s2758_s0] sm:$0xff] }
   0xa   :  { %v75_v38 = vld [vmem:[%s2758_s0 + $0x170] sm:$0xff]  ;;  %v78_v40 = vld [vmem:[%s2758_s0 + $0x188] sm:$0xff]  ;;  %v1481_v41 = vpack.c.bf16 %v455_v37, %v454_v36  ;;  %v32_v42 = vld [vmem:[%s2758_s0 + $0x18] sm:$0xff] }
   0xb   :  { %v77_v43 = vld [vmem:[%s2758_s0 + $0x180] sm:$0xff]  ;;  %v31_v44 = vld [vmem:[%s2758_s0 + $0x10] sm:$0xff]  ;;  %v80_v45 = vld [vmem:[%s2758_s0 + $0x198] sm:$0xff] }
   0xc   :  { %1497 = vmatpush1.bf16.msra.mxu1 %v1454_v10  ;;  %1455 = vmatpush1.bf16.msra.mxu0 %v1454_v10  ;;  %v34_v46 = vld [vmem:[%s2758_s0 + $0x28] sm:$0xff]  ;;  %v79_v47 = vld [vmem:[%s2758_s0 + $0x190] sm:$0xff]  ;;  %v33_v48 = vld [vmem:[%s2758_s0 + $0x20] sm:$0xff] }
   0xd   :  { %1488 = vmatprep.subr.bf16.mxu1 %v1687_v0  ;;  %1456 = vmatprep.subr.bf16.mxu0 %v1687_v0  ;;  %v82_v49 = vld [vmem:[%s2758_s0 + $0x1a8] sm:$0xff]  ;;  %v36_v50 = vld [vmem:[%s2758_s0 + $0x38] sm:$0xff]  ;;  %v81_v51 = vld [vmem:[%s2758_s0 + $0x1a0] sm:$0xff] }
   0xe   :  { %v35_v52 = vld [vmem:[%s2758_s0 + $0x30] sm:$0xff]  ;;  %v84_v53 = vld [vmem:[%s2758_s0 + $0x1b8] sm:$0xff]  ;;  %v38_v54 = vld [vmem:[%s2758_s0 + $0x48] sm:$0xff] }
   0xf   :  { %v83_v55 = vld [vmem:[%s2758_s0 + $0x1b0] sm:$0xff]  ;;  %v37_v56 = vld [vmem:[%s2758_s0 + $0x40] sm:$0xff]  ;;  %v86_v57 = vld [vmem:[%s2758_s0 + $0x1c8] sm:$0xff] }
  0x10   :  { %1498 = vmatpush1.bf16.msra.mxu1 %v1457_v14  ;;  %1458 = vmatpush1.bf16.msra.mxu0 %v1457_v14  ;;  %v40_v58 = vld [vmem:[%s2758_s0 + $0x58] sm:$0xff]  ;;  %v85_v59 = vld [vmem:[%s2758_s0 + $0x1c0] sm:$0xff]  ;;  %v39_v60 = vld [vmem:[%s2758_s0 + $0x50] sm:$0xff] }
  0x11   :  { %1489 = vmatprep.subr.bf16.mxu1 %v1687_v0  ;;  %1459 = vmatprep.subr.bf16.mxu0 %v1687_v0  ;;  %v88_v61 = vld [vmem:[%s2758_s0 + $0x1d8] sm:$0xff]  ;;  %v42_v62 = vld [vmem:[%s2758_s0 + $0x68] sm:$0xff]  ;;  %v87_v63 = vld [vmem:[%s2758_s0 + $0x1d0] sm:$0xff] }
  0x12   :  { %v422_v1 = vld [vmem:[%s2760_s1] sm:$0xff]  ;;  %v44_v2 = vld [vmem:[%s2758_s0 + $0x78] sm:$0xff]  ;;  %v423_v3 = vld [vmem:[%s2760_s1 + $0x8] sm:$0xff] }
  0x13   :  { %v43_v4 = vld [vmem:[%s2758_s0 + $0x70] sm:$0xff]  ;;  %v46_v6 = vld [vmem:[%s2758_s0 + $0x88] sm:$0xff]  ;;  %v425_v7 = vld [vmem:[%s2760_s1 + $0x18] sm:$0xff] }
  0x14   :  { %1499 = vmatpush1.bf16.msra.mxu1 %v1460_v17  ;;  %1461 = vmatpush1.bf16.msra.mxu0 %v1460_v17  ;;  %v424_v5 = vld [vmem:[%s2760_s1 + $0x10] sm:$0xff]  ;;  %v45_v8 = vld [vmem:[%s2758_s0 + $0x80] sm:$0xff]  ;;  %v48_v10 = vld [vmem:[%s2758_s0 + $0x98] sm:$0xff] }
  0x15   :  { %1490 = vmatprep.subr.bf16.mxu1 %v1687_v0  ;;  %1462 = vmatprep.subr.bf16.mxu0 %v1687_v0  ;;  %v426_v9 = vld [vmem:[%s2760_s1 + $0x20] sm:$0xff]  ;;  %v427_v11 = vld [vmem:[%s2760_s1 + $0x28] sm:$0xff]  ;;  %v47_v12 = vld [vmem:[%s2758_s0 + $0x90] sm:$0xff] }
  0x16   :  { %v428_v13 = vld [vmem:[%s2760_s1 + $0x30] sm:$0xff]  ;;  %v50_v14 = vld [vmem:[%s2758_s0 + $0xa8] sm:$0xff]  ;;  %v429_v15 = vld [vmem:[%s2760_s1 + $0x38] sm:$0xff] }
  0x17   :  { %v49_v16 = vld [vmem:[%s2758_s0 + $0xa0] sm:$0xff]  ;;  %v52_v18 = vld [vmem:[%s2758_s0 + $0xb8] sm:$0xff]  ;;  %v431_v19 = vld [vmem:[%s2760_s1 + $0x48] sm:$0xff] }
  0x18   :  { %1500 = vmatpush1.bf16.msra.mxu1 %v1463_v20  ;;  %1464 = vmatpush1.bf16.msra.mxu0 %v1463_v20  ;;  %v430_v17 = vld [vmem:[%s2760_s1 + $0x40] sm:$0xff]  ;;  %v51_v20 = vld [vmem:[%s2758_s0 + $0xb0] sm:$0xff]  ;;  %v54_v22 = vld [vmem:[%s2758_s0 + $0xc8] sm:$0xff] }
  0x19   :  { %1491 = vmatprep.subr.bf16.mxu1 %v1687_v0  ;;  %1465 = vmatprep.subr.bf16.mxu0 %v1687_v0  ;;  %v432_v21 = vld [vmem:[%s2760_s1 + $0x50] sm:$0xff]  ;;  %v53_v24 = vld [vmem:[%s2758_s0 + $0xc0] sm:$0xff]  ;;  %v435_v27 = vld [vmem:[%s2760_s1 + $0x68] sm:$0xff] }
  0x1a   :  { %v434_v25 = vld [vmem:[%s2760_s1 + $0x60] sm:$0xff]  ;;  %v55_v28 = vld [vmem:[%s2758_s0 + $0xd0] sm:$0xff]  ;;  %v58_v30 = vld [vmem:[%s2758_s0 + $0xe8] sm:$0xff] }
  0x1b   :  { %v437_v31 = vld [vmem:[%s2760_s1 + $0x78] sm:$0xff]  ;;  %v57_v32 = vld [vmem:[%s2758_s0 + $0xe0] sm:$0xff]  ;;  %v59_v36 = vld [vmem:[%s2758_s0 + $0xf0] sm:$0xff] }
  0x1c   :  { %1501 = vmatpush1.bf16.msra.mxu1 %v1466_v23  ;;  %1467 = vmatpush1.bf16.msra.mxu0 %v1466_v23  ;;  %v433_v23 = vld [vmem:[%s2760_s1 + $0x58] sm:$0xff]  ;;  %v438_v33 = vld [vmem:[%s2760_s1 + $0x80] sm:$0xff]  ;;  %v440_v37 = vld [vmem:[%s2760_s1 + $0x90] sm:$0xff] }
  0x1d   :  { %1492 = vmatprep.subr.bf16.mxu1 %v1687_v0  ;;  %1468 = vmatprep.subr.bf16.mxu0 %v1687_v0 }
  0x20   :  { %1502 = vmatpush1.bf16.msra.mxu1 %v1469_v26  ;;  %1470 = vmatpush1.bf16.msra.mxu0 %v1469_v26  ;;  %v56_v26 = vld [vmem:[%s2758_s0 + $0xd8] sm:$0xff] }
  0x21   :  { %1493 = vmatprep.subr.bf16.mxu1 %v1687_v0  ;;  %1471 = vmatprep.subr.bf16.mxu0 %v1687_v0 }
  0x24   :  { %1503 = vmatpush1.bf16.msra.mxu1 %v1472_v29  ;;  %1473 = vmatpush1.bf16.msra.mxu0 %v1472_v29  ;;  %v436_v29 = vld [vmem:[%s2760_s1 + $0x70] sm:$0xff] }
  0x25   :  { %1494 = vmatprep.subr.bf16.mxu1 %v1687_v0  ;;  %1474 = vmatprep.subr.bf16.mxu0 %v1687_v0  ;;  %v41_v0 = vld [vmem:[%s2758_s0 + $0x60] sm:$0xff] }
  0x28   :  { %1504 = vmatpush1.bf16.msra.mxu1 %v1475_v34  ;;  %1476 = vmatpush1.bf16.msra.mxu0 %v1475_v34  ;;  %v60_v34 = vld [vmem:[%s2758_s0 + $0xf8] sm:$0xff] }
  0x29   :  { %1478 = vmatprep.subr.bf16.mxu1 %v1477_v35 }
  0x2b   :  { %387 = vmatmul.mubr.f32.vlgmr.msra.gmra.mrb[0].mxu1 %v75_v38  ;;  %272 = vmatmul.mubr.f32.vlgmr.msra.gmra.mrb[0].mxu0 %v29_v39  ;;  %v62_v38 = vld [vmem:[%s2758_s0 + $0x108] sm:$0xff]  ;;  %v441_v39 = vld [vmem:[%s2760_s1 + $0x98] sm:$0xff] }
  0x2c   :  { %1480 = vmatpush3.bf16.msra.mxu1 %v1477_v35  ;;  %1291 = vmatprep.mubr.msk.f32.mxu1 %vm116_vm0, %v78_v40  ;;  %v439_v35 = vld [vmem:[%s2760_s1 + $0x88] sm:$0xff]  ;;  %v61_v40 = vld [vmem:[%s2758_s0 + $0x100] sm:$0xff] }
  0x2d   :  { %1482 = vmatprep.subr.bf16.mxu1 %v1481_v41  ;;  %1268 = vmatprep.mubr.msk.f32.mxu0 %vm116_vm0, %v32_v42  ;;  %v64_v42 = vld [vmem:[%s2758_s0 + $0x118] sm:$0xff] }
  0x2f   :  { %392 = vmatmul.mubr.f32.gmra.mrb[2].mxu1 %v77_v43  ;;  %277 = vmatmul.mubr.f32.gmra.mrb[2].mxu0 %v31_v44  ;;  %v443_v43 = vld [vmem:[%s2760_s1 + $0xa8] sm:$0xff]  ;;  %v63_v44 = vld [vmem:[%s2758_s0 + $0x110] sm:$0xff] }
  0x30   :  { %1292 = vmatprep.mubr.msk.f32.mxu1 %vm116_vm0, %v80_v45  ;;  %1484 = vmatpush3.bf16.msra.mxu1 %v1481_v41  ;;  %v442_v41 = vld [vmem:[%s2760_s1 + $0xa0] sm:$0xff]  ;;  %v444_v45 = vld [vmem:[%s2760_s1 + $0xb0] sm:$0xff] }
  0x31   :  { %1269 = vmatprep.mubr.msk.f32.mxu0 %vm116_vm0, %v34_v46  ;;  %v66_v46 = vld [vmem:[%s2758_s0 + $0x128] sm:$0xff] }
  0x33   :  { %397 = vmatmul.mubr.f32.gmra.mrb[4].mxu1 %v79_v47  ;;  %282 = vmatmul.mubr.f32.gmra.mrb[4].mxu0 %v33_v48  ;;  %v445_v47 = vld [vmem:[%s2760_s1 + $0xb8] sm:$0xff]  ;;  %v65_v48 = vld [vmem:[%s2758_s0 + $0x120] sm:$0xff] }
  0x34   :  { %1293 = vmatprep.mubr.msk.f32.mxu1 %vm116_vm0, %v82_v49  ;;  %1270 = vmatprep.mubr.msk.f32.mxu0 %vm116_vm0, %v36_v50  ;;  %v446_v49 = vld [vmem:[%s2760_s1 + $0xc0] sm:$0xff]  ;;  %v68_v50 = vld [vmem:[%s2758_s0 + $0x138] sm:$0xff] }
  0x37   :  { %402 = vmatmul.mubr.f32.gmra.mrb[6].mxu1 %v81_v51  ;;  %287 = vmatmul.mubr.f32.gmra.mrb[6].mxu0 %v35_v52  ;;  %v447_v51 = vld [vmem:[%s2760_s1 + $0xc8] sm:$0xff]  ;;  %v67_v52 = vld [vmem:[%s2758_s0 + $0x130] sm:$0xff] }
  0x38   :  { %1294 = vmatprep.mubr.msk.f32.mxu1 %vm116_vm0, %v84_v53  ;;  %1271 = vmatprep.mubr.msk.f32.mxu0 %vm116_vm0, %v38_v54  ;;  %v448_v53 = vld [vmem:[%s2760_s1 + $0xd0] sm:$0xff]  ;;  %v70_v54 = vld [vmem:[%s2758_s0 + $0x148] sm:$0xff] }
  0x3b   :  { %407 = vmatmul.mubr.f32.gmra.mrb[8].mxu1 %v83_v55  ;;  %292 = vmatmul.mubr.f32.gmra.mrb[8].mxu0 %v37_v56  ;;  %v449_v55 = vld [vmem:[%s2760_s1 + $0xd8] sm:$0xff]  ;;  %v69_v56 = vld [vmem:[%s2758_s0 + $0x140] sm:$0xff] }
  0x3c   :  { %1295 = vmatprep.mubr.msk.f32.mxu1 %vm116_vm0, %v86_v57  ;;  %1272 = vmatprep.mubr.msk.f32.mxu0 %vm116_vm0, %v40_v58  ;;  %v450_v57 = vld [vmem:[%s2760_s1 + $0xe0] sm:$0xff]  ;;  %v72_v58 = vld [vmem:[%s2758_s0 + $0x158] sm:$0xff] }
  0x3f   :  { %412 = vmatmul.mubr.f32.gmra.mrb[10].mxu1 %v85_v59  ;;  %297 = vmatmul.mubr.f32.gmra.mrb[10].mxu0 %v39_v60  ;;  %v451_v59 = vld [vmem:[%s2760_s1 + $0xe8] sm:$0xff]  ;;  %v71_v60 = vld [vmem:[%s2758_s0 + $0x150] sm:$0xff] }
  0x40   :  { %1296 = vmatprep.mubr.msk.f32.mxu1 %vm116_vm0, %v88_v61  ;;  %1273 = vmatprep.mubr.msk.f32.mxu0 %vm116_vm0, %v42_v62  ;;  %v74_v61 = vld [vmem:[%s2758_s0 + $0x168] sm:$0xff]  ;;  %v73_v62 = vld [vmem:[%s2758_s0 + $0x160] sm:$0xff] }
  0x43   :  { %417 = vmatmul.mubr.f32.gmra.mrb[12].mxu1 %v87_v63  ;;  %302 = vmatmul.mubr.f32.gmra.mrb[12].mxu0 %v41_v0 }
  0x44   :  { %1402 = vmatprep.mubr.msk.f32.mxu1 %vm116_vm0, %v422_v1  ;;  %1274 = vmatprep.mubr.msk.f32.mxu0 %vm116_vm0, %v44_v2 }
  0x47   :  { %1403 = vmatmul.mubr.msk.f32.vlgmr.msra.gmra.mrb[14].mxu1 %vm116_vm0, %v423_v3  ;;  %307 = vmatmul.mubr.f32.gmra.mrb[14].mxu0 %v43_v4 }
  0x48   :  { %1405 = vmatprep.mubr.msk.f32.mxu1 %vm116_vm0, %v424_v5  ;;  %1275 = vmatprep.mubr.msk.f32.mxu0 %vm116_vm0, %v46_v6 }
  0x4b   :  { %1406 = vmatmul.mubr.msk.f32.gmra.mrb[16].mxu1 %vm116_vm0, %v425_v7  ;;  %312 = vmatmul.mubr.f32.gmra.mrb[16].mxu0 %v45_v8 }
  0x4c   :  { %1408 = vmatprep.mubr.msk.f32.mxu1 %vm116_vm0, %v426_v9  ;;  %1276 = vmatprep.mubr.msk.f32.mxu0 %vm116_vm0, %v48_v10 }
  0x4f   :  { %1409 = vmatmul.mubr.msk.f32.gmra.mrb[18].mxu1 %vm116_vm0, %v427_v11  ;;  %317 = vmatmul.mubr.f32.gmra.mrb[18].mxu0 %v47_v12 }
  0x50   :  { %1411 = vmatprep.mubr.msk.f32.mxu1 %vm116_vm0, %v428_v13  ;;  %1277 = vmatprep.mubr.msk.f32.mxu0 %vm116_vm0, %v50_v14 }
  0x53   :  { %1412 = vmatmul.mubr.msk.f32.gmra.mrb[20].mxu1 %vm116_vm0, %v429_v15  ;;  %322 = vmatmul.mubr.f32.gmra.mrb[20].mxu0 %v49_v16 }
  0x54   :  { %1414 = vmatprep.mubr.msk.f32.mxu1 %vm116_vm0, %v430_v17  ;;  %1278 = vmatprep.mubr.msk.f32.mxu0 %vm116_vm0, %v52_v18 }
  0x57   :  { %1415 = vmatmul.mubr.msk.f32.gmra.mrb[22].mxu1 %vm116_vm0, %v431_v19  ;;  %327 = vmatmul.mubr.f32.gmra.mrb[22].mxu0 %v51_v20 }
  0x58   :  { %1417 = vmatprep.mubr.msk.f32.mxu1 %vm116_vm0, %v432_v21  ;;  %1279 = vmatprep.mubr.msk.f32.mxu0 %vm116_vm0, %v54_v22 }
  0x5b   :  { %1418 = vmatmul.mubr.msk.f32.gmra.mrb[24].mxu1 %vm116_vm0, %v433_v23  ;;  %332 = vmatmul.mubr.f32.gmra.mrb[24].mxu0 %v53_v24 }
  0x5c   :  { %1420 = vmatprep.mubr.msk.f32.mxu1 %vm116_vm0, %v434_v25  ;;  %1280 = vmatprep.mubr.msk.f32.mxu0 %vm116_vm0, %v56_v26 }
  0x5f   :  { %1421 = vmatmul.mubr.msk.f32.gmra.mrb[26].mxu1 %vm116_vm0, %v435_v27  ;;  %337 = vmatmul.mubr.f32.gmra.mrb[26].mxu0 %v55_v28  ;;  %v2186_v27 = vld [vmem:[%s2761_s5] ss:$0 sm:$0xff] }
  0x60   :  { %1423 = vmatprep.mubr.msk.f32.mxu1 %vm116_vm0, %v436_v29  ;;  %1281 = vmatprep.mubr.msk.f32.mxu0 %vm116_vm0, %v58_v30 }
  0x63   :  { %1424 = vmatmul.mubr.msk.f32.gmra.mrb[28].mxu1 %vm116_vm0, %v437_v31  ;;  %342 = vmatmul.mubr.f32.gmra.mrb[28].mxu0 %v57_v32 }
  0x64   :  { %1426 = vmatprep.mubr.msk.f32.mxu1 %vm116_vm0, %v438_v33  ;;  %1282 = vmatprep.mubr.msk.f32.mxu0 %vm116_vm0, %v60_v34 }
  0x67   :  { %1427 = vmatmul.mubr.msk.f32.gmra.mrb[30].mxu1 %vm116_vm0, %v439_v35  ;;  %347 = vmatmul.mubr.f32.gmra.mrb[30].mxu0 %v59_v36 }
  0x68   :  { %1429 = vmatprep.mubr.msk.f32.mxu1 %vm116_vm0, %v440_v37  ;;  %1283 = vmatprep.mubr.msk.f32.mxu0 %vm116_vm0, %v62_v38 }
  0x6b   :  { %1430 = vmatmul.mubr.msk.f32.gmra.mrb[32].mxu1 %vm116_vm0, %v441_v39  ;;  %352 = vmatmul.mubr.f32.gmra.mrb[32].mxu0 %v61_v40 }
  0x6c   :  { %1432 = vmatprep.mubr.msk.f32.mxu1 %vm116_vm0, %v442_v41  ;;  %1284 = vmatprep.mubr.msk.f32.mxu0 %vm116_vm0, %v64_v42 }
  0x6f   :  { %1433 = vmatmul.mubr.msk.f32.gmra.mrb[34].mxu1 %vm116_vm0, %v443_v43  ;;  %357 = vmatmul.mubr.f32.gmra.mrb[34].mxu0 %v63_v44 }
  0x70   :  { %1435 = vmatprep.mubr.msk.f32.mxu1 %vm116_vm0, %v444_v45  ;;  %1285 = vmatprep.mubr.msk.f32.mxu0 %vm116_vm0, %v66_v46 }
  0x73   :  { %1436 = vmatmul.mubr.msk.f32.gmra.mrb[36].mxu1 %vm116_vm0, %v445_v47  ;;  %362 = vmatmul.mubr.f32.gmra.mrb[36].mxu0 %v65_v48 }
  0x74   :  { %1438 = vmatprep.mubr.msk.f32.mxu1 %vm116_vm0, %v446_v49  ;;  %1286 = vmatprep.mubr.msk.f32.mxu0 %vm116_vm0, %v68_v50 }
  0x77   :  { %1439 = vmatmul.mubr.msk.f32.gmra.mrb[38].mxu1 %vm116_vm0, %v447_v51  ;;  %367 = vmatmul.mubr.f32.gmra.mrb[38].mxu0 %v67_v52 }
  0x78   :  { %1441 = vmatprep.mubr.msk.f32.mxu1 %vm116_vm0, %v448_v53  ;;  %1287 = vmatprep.mubr.msk.f32.mxu0 %vm116_vm0, %v70_v54 }
  0x7b   :  { %1442 = vmatmul.mubr.msk.f32.gmra.mrb[40].mxu1 %vm116_vm0, %v449_v55  ;;  %372 = vmatmul.mubr.f32.gmra.mrb[40].mxu0 %v69_v56 }
  0x7c   :  { %1444 = vmatprep.mubr.msk.f32.mxu1 %vm116_vm0, %v450_v57  ;;  %1288 = vmatprep.mubr.msk.f32.mxu0 %vm116_vm0, %v72_v58 }
  0x7f   :  { %1445 = vmatmul.mubr.msk.f32.gmra.mrb[42].mxu1 %vm116_vm0, %v451_v59  ;;  %377 = vmatmul.mubr.f32.gmra.mrb[42].mxu0 %v71_v60 }
  0x80   :  { %1289 = vmatprep.mubr.msk.f32.mxu0 %vm116_vm0, %v74_v61 }
  0x83   :  { %382 = vmatmul.mubr.f32.gmra.mrb[44].mxu0 %v73_v62 }
  0xfe   :  { %v2155_v63 = vpop.f32.mrb[0].mxu1  ;;  %v2157_v0 = vpop.f32.mrb[0].mxu0 }
  0xff   :  { %v390_v1 = vpop.f32.mrb[1].mxu1  ;;  %v275_v2 = vpop.f32.mrb[1].mxu0 }
 0x102   :  { %v2159_v3 = vpop.f32.mrb[2].mxu1  ;;  %v2161_v4 = vpop.f32.mrb[2].mxu0 }
 0x103   :  { %v395_v5 = vpop.f32.mrb[3].mxu1  ;;  %v280_v6 = vpop.f32.mrb[3].mxu0 }
 0x106   :  { %v2163_v7 = vpop.f32.mrb[4].mxu1  ;;  %v2165_v8 = vpop.f32.mrb[4].mxu0 }
 0x107   :  { %v400_v9 = vpop.f32.mrb[5].mxu1  ;;  %v285_v10 = vpop.f32.mrb[5].mxu0 }
 0x10a   :  { %v2167_v11 = vpop.f32.mrb[6].mxu1  ;;  %v2169_v12 = vpop.f32.mrb[6].mxu0 }
 0x10b   :  { %v405_v13 = vpop.f32.mrb[7].mxu1  ;;  %v290_v14 = vpop.f32.mrb[7].mxu0 }
 0x10e   :  { %v2171_v15 = vpop.f32.mrb[8].mxu1  ;;  %v2173_v16 = vpop.f32.mrb[8].mxu0 }
 0x10f   :  { %v410_v17 = vpop.f32.mrb[9].mxu1  ;;  %v295_v18 = vpop.f32.mrb[9].mxu0 }
 0x112   :  { %v2175_v19 = vpop.f32.mrb[10].mxu1  ;;  %v2177_v20 = vpop.f32.mrb[10].mxu0 }
 0x113   :  { %v415_v21 = vpop.f32.mrb[11].mxu1  ;;  %v300_v22 = vpop.f32.mrb[11].mxu0 }
 0x116   :  { %v2179_v23 = vpop.f32.mrb[12].mxu1  ;;  %v2181_v24 = vpop.f32.mrb[12].mxu0 }
 0x117   :  { %v420_v25 = vpop.f32.mrb[13].mxu1  ;;  %v305_v26 = vpop.f32.mrb[13].mxu0 }
 0x11a   :  { %v1404_v28 = vpop.f32.mrb[14].mxu1  ;;  %v2188_v29 = vpop.f32.mrb[14].mxu0 }
 0x11b   :  { %v625_v30 = vadd.f32 %v1404_v28, %v2186_v27  ;;  %v619_v31 = vpop.f32.mrb[15].mxu1  ;;  %v310_v32 = vpop.f32.mrb[15].mxu0 }
 0x11c   :  { %v620_v33 = vadd.f32 %v2186_v27, %v619_v31 }
 0x11d   :  { %v769_v34 = vsub.f32 0.0, %v625_v30 }
 0x11e   :  { %v768_v35 = vsub.f32 0.0, %v620_v33  ;;  %v1407_v36 = vpop.f32.mrb[16].mxu1  ;;  %v2192_v37 = vpop.f32.mrb[16].mxu0 }
 0x11f   :  { %v800_v38 = vmul.f32 1.442695, %v769_v34  ;;  %v635_v39 = vadd.f32 %v1407_v36, %v2186_v27  ;;  %v629_v40 = vpop.f32.mrb[17].mxu1  ;;  %v315_v41 = vpop.f32.mrb[17].mxu0 }
 0x120   :  { %v798_v42 = vmul.f32 1.442695, %v768_v35  ;;  %v630_v43 = vadd.f32 %v2186_v27, %v629_v40  ;;  %v2213_v35 = vld [vmem:[%s2762_s3] ss:$0 sm:$0xff] }
 0x121   :  { %1506 = vpow2.f32 %v800_v38  ;;  %v771_v44 = vsub.f32 0.0, %v635_v39 }
 0x122   :  { %1508 = vpow2.f32 %v798_v42  ;;  %v770_v45 = vsub.f32 0.0, %v630_v43  ;;  %v1410_v46 = vpop.f32.mrb[18].mxu1  ;;  %v2196_v47 = vpop.f32.mrb[18].mxu0 }
 0x123   :  { %v804_v48 = vmul.f32 1.442695, %v771_v44  ;;  %v645_v49 = vadd.f32 %v1410_v46, %v2186_v27  ;;  %v639_v50 = vpop.f32.mrb[19].mxu1  ;;  %v320_v51 = vpop.f32.mrb[19].mxu0 }
 0x124   :  { %v802_v52 = vmul.f32 1.442695, %v770_v45  ;;  %v640_v53 = vadd.f32 %v2186_v27, %v639_v50 }
 0x125   :  { %1510 = vpow2.f32 %v804_v48  ;;  %v773_v54 = vsub.f32 0.0, %v645_v49  ;;  %v2219_v48 = vadd.f32 %v2213_v35, %v2155_v63  ;;  %v274_v49 = vadd.f32 %v2213_v35, %v2157_v0 }
 0x126   :  { %1512 = vpow2.f32 %v802_v52  ;;  %v772_v55 = vsub.f32 0.0, %v640_v53  ;;  %v1413_v56 = vpop.f32.mrb[20].mxu1  ;;  %v2200_v57 = vpop.f32.mrb[20].mxu0 }
 0x127   :  { %v808_v58 = vmul.f32 1.442695, %v773_v54  ;;  %v655_v59 = vadd.f32 %v1413_v56, %v2186_v27  ;;  %v649_v60 = vpop.f32.mrb[21].mxu1  ;;  %v325_v61 = vpop.f32.mrb[21].mxu0  ;;  %v2227_v54 = vadd.f32 %v2213_v35, %v2159_v3 }
 0x128   :  { %v806_v62 = vmul.f32 1.442695, %v772_v55  ;;  %v650_v1 = vadd.f32 %v2186_v27, %v649_v60  ;;  %v279_v55 = vadd.f32 %v2213_v35, %v2161_v4  ;;  %v289_v4 = vadd.f32 %v2213_v35, %v2169_v12 }
 0x129   :  { %1514 = vpow2.f32 %v808_v58  ;;  %v775_v2 = vsub.f32 0.0, %v655_v59  ;;  %v2251_v12 = vadd.f32 %v2213_v35, %v2188_v29  ;;  %v2264_v29 = vadd.f32 %v2213_v35, %v2196_v47 }
 0x12a   :  { %1516 = vpow2.f32 %v806_v62  ;;  %v774_v5 = vsub.f32 0.0, %v650_v1  ;;  %v1416_v6 = vpop.f32.mrb[22].mxu1  ;;  %v2204_v9 = vpop.f32.mrb[22].mxu0  ;;  %v284_v62 = vadd.f32 %v2213_v35, %v2165_v8  ;;  %v2247_v8 = vadd.f32 %v2213_v35, %v2181_v24 }
 0x12b   :  { %v1507_v10 = vpop.eup %1506  ;;  %v812_v13 = vmul.f32 1.442695, %v775_v2  ;;  %v665_v14 = vadd.f32 %v1416_v6, %v2186_v27  ;;  %v659_v17 = vpop.f32.mrb[23].mxu1  ;;  %v2243_v6 = vadd.f32 %v2213_v35, %v2177_v20  ;;  %v2256_v20 = vld [vmem:[%s2763_s6] ss:$0 sm:$0xff]  ;;  %v2260_v24 = vadd.f32 %v2213_v35, %v2192_v37 }
 0x12c   :  { %v330_v18 = vpop.f32.mrb[23].mxu0  ;;  %v1509_v21 = vpop.eup %1508  ;;  %v859_v22 = vadd.f32 1.0, %v1507_v10  ;;  %v810_v25 = vmul.f32 1.442695, %v774_v5  ;;  %v660_v26 = vadd.f32 %v2186_v27, %v659_v17  ;;  %v2239_v5 = vadd.f32 %v2213_v35, %v2173_v16 }
 0x12d   :  { %v858_v28 = vadd.f32 1.0, %v1509_v21  ;;  %1518 = vpow2.f32 %v812_v13  ;;  %v777_v30 = vsub.f32 0.0, %v665_v14 }
 0x12e   :  { %1520 = vrcp.f32 %v859_v22  ;;  %v776_v31 = vsub.f32 0.0, %v660_v26  ;;  %v1419_v32 = vpop.f32.mrb[24].mxu1  ;;  %v2208_v33 = vpop.f32.mrb[24].mxu0 }
 0x12f   :  { %v1511_v34 = vpop.eup %1510  ;;  %1522 = vrcp.f32 %v858_v28  ;;  %v816_v36 = vmul.f32 1.442695, %v777_v30  ;;  %v675_v38 = vadd.f32 %v1419_v32, %v2186_v27  ;;  %v669_v39 = vpop.f32.mrb[25].mxu1  ;;  %v2268_v30 = vadd.f32 %v2213_v35, %v2200_v57  ;;  %v2273_v32 = vld [vmem:[%s2764_s7] ss:$0 sm:$0xff] }
 0x130   :  { %v335_v40 = vpop.f32.mrb[25].mxu0  ;;  %v1513_v41 = vpop.eup %1512  ;;  %v861_v42 = vadd.f32 1.0, %v1511_v34  ;;  %1524 = vpow2.f32 %v810_v25  ;;  %v814_v43 = vmul.f32 1.442695, %v776_v31  ;;  %v670_v44 = vadd.f32 %v2186_v27, %v669_v39 }
 0x131   :  { %v860_v45 = vadd.f32 1.0, %v1513_v41  ;;  %1526 = vpow2.f32 %v816_v36  ;;  %v779_v46 = vsub.f32 0.0, %v675_v38  ;;  %v2278_v38 = vadd.f32 %v2213_v35, %v2204_v9 }
 0x132   :  { %1528 = vrcp.f32 %v861_v42  ;;  %v778_v50 = vsub.f32 0.0, %v670_v44  ;;  %v1422_v51 = vpop.f32.mrb[26].mxu1  ;;  %v2223_v52 = vpop.f32.mrb[26].mxu0  ;;  %v2285_v42 = vadd.f32 %v2213_v35, %v2208_v33 }
 0x133   :  { %v1515_v53 = vpop.eup %1514  ;;  %1530 = vrcp.f32 %v860_v45  ;;  %v685_v63 = vadd.f32 %v1422_v51, %v2186_v27  ;;  %v679_v56 = vpop.f32.mrb[27].mxu1  ;;  %v820_v3 = vmul.f32 1.442695, %v779_v46 }
 0x134   :  { %v340_v58 = vpop.f32.mrb[27].mxu0  ;;  %v1517_v59 = vpop.eup %1516  ;;  %v863_v0 = vadd.f32 1.0, %v1515_v53  ;;  %1532 = vpow2.f32 %v814_v43  ;;  %v818_v60 = vmul.f32 1.442695, %v778_v50  ;;  %v680_v61 = vadd.f32 %v2186_v27, %v679_v56 }
 0x135   :  { %v862_v1 = vadd.f32 1.0, %v1517_v59  ;;  %v781_v2 = vsub.f32 0.0, %v685_v63 }
 0x136   :  { %1534 = vrcp.f32 %v863_v0  ;;  %v1425_v10 = vpop.f32.mrb[28].mxu1  ;;  %v343_v13 = vpop.f32.mrb[28].mxu0  ;;  %v780_v25 = vsub.f32 0.0, %v680_v61 }
 0x137   :  { %v1519_v14 = vpop.eup %1518  ;;  %1536 = vrcp.f32 %v862_v1  ;;  %v824_v17 = vmul.f32 1.442695, %v781_v2  ;;  %v689_v18 = vpop.f32.mrb[29].mxu1  ;;  %v695_v37 = vadd.f32 %v1425_v10, %v2186_v27 }
 0x138   :  { %v345_v16 = vpop.f32.mrb[29].mxu0  ;;  %v1521_v21 = vpop.eup %1520  ;;  %v865_v22 = vadd.f32 1.0, %v1519_v14  ;;  %1538 = vpow2.f32 %v818_v60  ;;  %v690_v9 = vadd.f32 %v2186_v27, %v689_v18 }
 0x139   :  { %v1523_v26 = vpop.eup %1522  ;;  %v949_v28 = vmul.f32 %v1521_v21, %v279_v55  ;;  %1540 = vpow2.f32 %v820_v3  ;;  %v2294_v55 = vadd.f32 %v2213_v35, %v2223_v52  ;;  %v783_v58 = vsub.f32 0.0, %v695_v37 }
 0x13a   :  { %v1525_v31 = vpop.eup %1524  ;;  %v948_v34 = vmul.f32 %v1523_v26, %v274_v49  ;;  %1542 = vrcp.f32 %v865_v22  ;;  %v1428_v36 = vpop.f32.mrb[30].mxu1  ;;  %v822_v49 = vmul.f32 1.442695, %v780_v25  ;;  %v2308_v52 = vadd.f32 %v2213_v35, %v343_v13 }
 0x13b   :  { %v2280_v47 = vpop.f32.mrb[30].mxu0  ;;  %v1527_v39 = vpop.eup %1526  ;;  %v986_v57 = vmul.f32 %v2256_v20, %v949_v28  ;;  %v864_v40 = vadd.f32 1.0, %v1525_v31  ;;  %1544 = vpow2.f32 %v824_v17  ;;  %v782_v14 = vsub.f32 0.0, %v690_v9 }
 0x13c   :  { %v699_v41 = vpop.f32.mrb[31].mxu1  ;;  %v350_v43 = vpop.f32.mrb[31].mxu0  ;;  %v985_v45 = vmul.f32 %v2256_v20, %v948_v34  ;;  %v867_v46 = vadd.f32 1.0, %v1527_v39  ;;  %v2320_v28 = vmul.f32 1.442695, %v783_v58 }
 0x13d   :  { %v1529_v44 = vpop.eup %1528  ;;  %v2290_v51 = vadd.f32 %v2273_v32, %v986_v57  ;;  %1546 = vrcp.f32 %v864_v40  ;;  %v705_v57 = vadd.f32 %v1428_v36, %v2186_v27 }
 0x13e   :  { %v1531_v50 = vpop.eup %1530  ;;  %v951_v53 = vmul.f32 %v1529_v44, %v289_v4  ;;  %v2297_v63 = vadd.f32 %v2273_v32, %v985_v45  ;;  %1548 = vrcp.f32 %v867_v46  ;;  %v2299_v59 = vpop.f32.mrb[32].mxu1  ;;  %v2333_v46 = vmul.f32 1.442695, %v782_v14 }
 0x13f   :  { %v1533_v33 = vpop.eup %1532  ;;  %v950_v56 = vmul.f32 %v1531_v50, %v284_v62  ;;  %v2301_v0 = vpop.f32.mrb[32].mxu0  ;;  %v1083_v60 = vmin.f32 %v2290_v51, 0.0  ;;  %1550 = vpow2.f32 %v822_v49  ;;  %vm1053_vm1 = vcmp.gt.f32.partialorder %v2290_v51, 0.0 }
 0x140   :  { %v988_v61 = vmul.f32 %v2256_v20, %v951_v53  ;;  %v866_v1 = vadd.f32 1.0, %v1533_v33  ;;  %v2305_v3 = vpop.f32.mrb[33].mxu1  ;;  %v355_v2 = vpop.f32.mrb[33].mxu0  ;;  %v1082_v62 = vmin.f32 %v2297_v63, 0.0  ;;  %v2339_v33 = vadd.f32 %v2186_v27, %v699_v41 }
 0x141   :  { %v1535_v4 = vpop.eup %1534  ;;  %v987_v10 = vmul.f32 %v2256_v20, %v950_v56  ;;  %v1114_v18 = vmul.f32 1.442695, %v1083_v60  ;;  %vm1052_vm2 = vcmp.gt.f32.partialorder %v2297_v63, 0.0 }
 0x142   :  { %v1537_v17 = vpop.eup %1536  ;;  %v2313_v16 = vadd.f32 %v2273_v32, %v988_v61  ;;  %v953_v21 = vmul.f32 %v1535_v4, %v2243_v6  ;;  %1552 = vrcp.f32 %v866_v1  ;;  %v1112_v25 = vmul.f32 1.442695, %v1082_v62  ;;  %v2322_v31 = vpop.f32.mrb[34].mxu1 }
 0x143   :  { %v1539_v22 = vpop.eup %1538  ;;  %v2317_v13 = vadd.f32 %v2273_v32, %v987_v10  ;;  %v952_v26 = vmul.f32 %v1537_v17, %v2239_v5  ;;  %v2324_v34 = vpop.f32.mrb[34].mxu0  ;;  %1554 = vpow2.f32 %v1114_v18  ;;  %v785_v62 = vsub.f32 0.0, %v705_v57 }
 0x144   :  { %v1541_v37 = vpop.eup %1540  ;;  %v1085_v39 = vmin.f32 %v2313_v16, 0.0  ;;  %v990_v6 = vmul.f32 %v2256_v20, %v953_v21  ;;  %v2329_v40 = vpop.f32.mrb[35].mxu1  ;;  %1556 = vpow2.f32 %v1112_v25  ;;  %v868_v53 = vadd.f32 1.0, %v1539_v22 }
 0x145   :  { %v360_v43 = vpop.f32.mrb[35].mxu0  ;;  %v1543_v44 = vpop.eup %1542  ;;  %v1084_v5 = vmin.f32 %v2317_v13, 0.0  ;;  %v989_v45 = vmul.f32 %v2256_v20, %v952_v26  ;;  %v869_v58 = vadd.f32 1.0, %v1541_v37  ;;  %vm1055_vm3 = vcmp.gt.f32.partialorder %v2313_v16, 0.0 }
 0x146   :  { %v1545_v49 = vpop.eup %1544  ;;  %v1118_v9 = vmul.f32 1.442695, %v1085_v39  ;;  %v2336_v50 = vadd.f32 %v2273_v32, %v990_v6  ;;  %v955_v60 = vmul.f32 %v1543_v44, %v2251_v12  ;;  %v2345_v61 = vpop.f32.mrb[36].mxu1  ;;  %v832_v44 = vmul.f32 1.442695, %v785_v62 }
 0x147   :  { %v1116_v36 = vmul.f32 1.442695, %v1084_v5  ;;  %v2342_v56 = vadd.f32 %v2273_v32, %v989_v45  ;;  %v2347_v1 = vpop.f32.mrb[36].mxu0  ;;  %v1547_v2 = vpop.eup %1546  ;;  %v871_v18 = vadd.f32 1.0, %v1545_v49  ;;  %vm1054_vm4 = vcmp.gt.f32.partialorder %v2317_v13, 0.0 }
 0x148   :  { %1558 = vpow2.f32 %v1118_v9  ;;  %v1087_v4 = vmin.f32 %v2336_v50, 0.0  ;;  %v2351_v41 = vpop.f32.mrb[37].mxu1  ;;  %v365_v10 = vpop.f32.mrb[37].mxu0  ;;  %v954_v12 = vmul.f32 %v1547_v2, %v2247_v8  ;;  %v992_v22 = vmul.f32 %v2256_v20, %v955_v60 }
 0x149   :  { %v1549_v14 = vpop.eup %1548  ;;  %1560 = vpow2.f32 %v1116_v36  ;;  %v1086_v17 = vmin.f32 %v2342_v56, 0.0  ;;  %vm1057_vm5 = vcmp.gt.f32.partialorder %v2336_v50, 0.0  ;;  %vm1056_vm6 = vcmp.gt.f32.partialorder %v2342_v56, 0.0 }
 0x14a   :  { %v1122_v21 = vmul.f32 1.442695, %v1087_v4  ;;  %1562 = vrcp.f32 %v868_v53  ;;  %v957_v25 = vmul.f32 %v1549_v14, %v2264_v29  ;;  %v1551_v26 = vpop.eup %1550  ;;  %v991_v39 = vmul.f32 %v2256_v20, %v954_v12  ;;  %v2359_v6 = vpop.f32.mrb[38].mxu1 }
 0x14b   :  { %v1120_v37 = vmul.f32 1.442695, %v1086_v17  ;;  %1564 = vrcp.f32 %v869_v58  ;;  %v2361_v57 = vpop.f32.mrb[38].mxu0  ;;  %v2365_v8 = vadd.f32 %v2273_v32, %v992_v22  ;;  %v2368_v5 = vpop.f32.mrb[39].mxu1  ;;  %v784_v53 = vsub.f32 0.0, %v2339_v33 }
 0x14c   :  { %v1553_v43 = vpop.eup %1552  ;;  %1566 = vpow2.f32 %v1122_v21  ;;  %v994_v29 = vmul.f32 %v2256_v20, %v957_v25  ;;  %v370_v45 = vpop.f32.mrb[39].mxu0  ;;  %v2372_v49 = vadd.f32 %v2273_v32, %v991_v39  ;;  %v870_v60 = vadd.f32 1.0, %v1551_v26 }
 0x14d   :  { %1568 = vpow2.f32 %v1120_v37  ;;  %v956_v9 = vmul.f32 %v1553_v43, %v2260_v24  ;;  %v1555_v36 = vpop.eup %1554  ;;  %v1089_v58 = vmin.f32 %v2365_v8, 0.0  ;;  %v715_v14 = vadd.f32 %v2299_v59, %v2186_v27 }
 0x14e   :  { %1570 = vrcp.f32 %v871_v18  ;;  %v2378_v2 = vadd.f32 %v2273_v32, %v994_v29  ;;  %v1557_v4 = vpop.eup %1556  ;;  %v1331_v62 = vadd.f32 -1.0, %v1555_v36  ;;  %v1088_v10 = vmin.f32 %v2372_v49, 0.0  ;;  %v2384_v24 = vpop.f32.mrb[40].mxu1 }
 0x14f   :  { %1572 = vpow2.f32 %v2320_v28  ;;  %v2386_v33 = vpop.f32.mrb[40].mxu0  ;;  %v1330_v17 = vadd.f32 -1.0, %v1557_v4  ;;  %v1126_v12 = vmul.f32 1.442695, %v1089_v58  ;;  %v993_v18 = vmul.f32 %v2256_v20, %v956_v9  ;;  %v2391_v21 = vpop.f32.mrb[41].mxu1 }
 0x150   :  { %1574 = vpow2.f32 %v2333_v46  ;;  %v375_v22 = vpop.f32.mrb[41].mxu0  ;;  %v1203_v28 = vsel %vm1053_vm1, %v2290_v51, %v1331_v62  ;;  %v1124_v59 = vmul.f32 1.442695, %v1088_v10  ;;  %v830_v25 = vmul.f32 1.442695, %v784_v53 }
 0x151   :  { %1576 = vpow2.f32 %v832_v44  ;;  %1233 = vst.msk [vmem:[%s2765_s8 + $0x8] sm:$0xff] %vm116_vm0, %v1203_v28  ;;  %v1202_v46 = vsel %vm1052_vm2, %v2297_v63, %v1330_v17  ;;  %v2405_v37 = vadd.f32 %v2273_v32, %v993_v18  ;;  %v1091_v51 = vmin.f32 %v2378_v2, 0.0 }
 0x152   :  { %v1559_v26 = vpop.eup %1558  ;;  %1578 = vpow2.f32 %v1126_v12  ;;  %1232 = vst.msk [vmem:[%s2765_s8] sm:$0xff] %vm116_vm0, %v1202_v46  ;;  %v787_v44 = vsub.f32 0.0, %v715_v14  ;;  %v710_v29 = vadd.f32 %v2186_v27, %v2305_v3  ;;  %v2414_v45 = vpop.f32.mrb[42].mxu1  ;;  %vm1059_vm7 = vcmp.gt.f32.partialorder %v2365_v8, 0.0 }
 0x153   :  { %v1561_v39 = vpop.eup %1560  ;;  %v1333_v43 = vadd.f32 -1.0, %v1559_v26  ;;  %1580 = vpow2.f32 %v1124_v59  ;;  %v2416_v63 = vpop.f32.mrb[42].mxu0  ;;  %v1090_v36 = vmin.f32 %v2405_v37, 0.0  ;;  %v1130_v58 = vmul.f32 1.442695, %v1091_v51 }
 0x154   :  { %v1563_v9 = vpop.eup %1562  ;;  %v1332_v53 = vadd.f32 -1.0, %v1561_v39  ;;  %1582 = vrcp.f32 %v870_v60  ;;  %v2419_v4 = vpop.f32.mrb[43].mxu1  ;;  %v836_v14 = vmul.f32 1.442695, %v787_v44  ;;  %v725_v28 = vadd.f32 %v2322_v31, %v2186_v27 }
 0x155   :  { %v1565_v62 = vpop.eup %1564  ;;  %v1205_v10 = vsel %vm1055_vm3, %v2313_v16, %v1333_v43  ;;  %1584 = vpow2.f32 %v830_v25  ;;  %v958_v3 = vmul.f32 %v1563_v9, %v2268_v30  ;;  %v380_v17 = vpop.f32.mrb[43].mxu0  ;;  %v1128_v18 = vmul.f32 1.442695, %v1090_v36 }
 0x156   :  { %v1567_v12 = vpop.eup %1566  ;;  %v1204_v60 = vsel %vm1054_vm4, %v2317_v13, %v1332_v53  ;;  %1235 = vst.msk [vmem:[%s2765_s8 + $0x18] sm:$0xff] %vm116_vm0, %v1205_v10  ;;  %1586 = vpow2.f32 %v1130_v58  ;;  %v786_v16 = vsub.f32 0.0, %v710_v29  ;;  %v2440_v59 = vpop.f32.mrb[44].mxu0  ;;  %v959_v51 = vmul.f32 %v1565_v62, %v2278_v38 }
 0x157   :  { %v1569_v22 = vpop.eup %1568  ;;  %1234 = vst.msk [vmem:[%s2765_s8 + $0x10] sm:$0xff] %vm116_vm0, %v1204_v60  ;;  %v1335_v30 = vadd.f32 -1.0, %v1567_v12  ;;  %1588 = vpow2.f32 %v836_v14  ;;  %v995_v13 = vmul.f32 %v2256_v20, %v958_v3  ;;  %v385_v39 = vpop.f32.mrb[45].mxu0  ;;  %v789_v9 = vsub.f32 0.0, %v725_v28 }
 0x158   :  { %v2442_v25 = vpop.eup %1570  ;;  %v1334_v26 = vadd.f32 -1.0, %v1569_v22  ;;  %1590 = vpow2.f32 %v1128_v18  ;;  %v834_v46 = vmul.f32 1.442695, %v786_v16  ;;  %v720_v31 = vadd.f32 %v2186_v27, %v2329_v40 }
 0x159   :  { %v1573_v43 = vpop.eup %1572  ;;  %v1207_v44 = vsel %vm1057_vm5, %v2336_v50, %v1335_v30  ;;  %v2449_v29 = vadd.f32 %v2273_v32, %v995_v13  ;;  %v996_v50 = vmul.f32 %v2256_v20, %v959_v51  ;;  %vm1058_vm8 = vcmp.gt.f32.partialorder %v2372_v49, 0.0 }
 0x15a   :  { %v1575_v53 = vpop.eup %1574  ;;  %v1206_v36 = vsel %vm1056_vm6, %v2342_v56, %v1334_v26  ;;  %1237 = vst.msk [vmem:[%s2765_s8 + $0x28] sm:$0xff] %vm116_vm0, %v1207_v44  ;;  %v873_v38 = vadd.f32 1.0, %v1573_v43  ;;  %1592 = vpow2.f32 %v834_v46  ;;  %vm1061_vm9 = vcmp.gt.f32.partialorder %v2378_v2, 0.0 }
 0x15b   :  { %v1577_v58 = vpop.eup %1576  ;;  %1236 = vst.msk [vmem:[%s2765_s8 + $0x20] sm:$0xff] %vm116_vm0, %v1206_v36  ;;  %v872_v40 = vadd.f32 1.0, %v1575_v53  ;;  %v1092_v56 = vmin.f32 %v2449_v29, 0.0  ;;  %vm1060_vm10 = vcmp.gt.f32.partialorder %v2405_v37, 0.0  ;;  %v2470_v14 = vadd.f32 %v2273_v32, %v996_v50 }
 0x15c   :  { %v1579_v62 = vpop.eup %1578  ;;  %v875_v10 = vadd.f32 1.0, %v1577_v58  ;;  %v788_v3 = vsub.f32 0.0, %v720_v31  ;;  %v735_v18 = vadd.f32 %v2345_v61, %v2186_v27  ;;  %v840_v30 = vmul.f32 1.442695, %v789_v9 }
 0x15d   :  { %v1581_v17 = vpop.eup %1580  ;;  %v1337_v12 = vadd.f32 -1.0, %v1579_v62  ;;  %1594 = vrcp.f32 %v872_v40  ;;  %v1132_v60 = vmul.f32 1.442695, %v1092_v56  ;;  %v1093_v13 = vmin.f32 %v2470_v14, 0.0 }
 0x15e   :  { %v1583_v16 = vpop.eup %1582  ;;  %v1336_v22 = vadd.f32 -1.0, %v1581_v17  ;;  %1596 = vrcp.f32 %v873_v38  ;;  %v838_v46 = vmul.f32 1.442695, %v788_v3  ;;  %v791_v51 = vsub.f32 0.0, %v735_v18 }
 0x15f   :  { %v1585_v28 = vpop.eup %1584  ;;  %v1209_v26 = vsel %vm1059_vm7, %v2365_v8, %v1337_v12  ;;  %1598 = vpow2.f32 %v1132_v60  ;;  %v1134_v44 = vmul.f32 1.442695, %v1093_v13  ;;  %v960_v53 = vmul.f32 %v1583_v16, %v2285_v42 }
 0x160   :  { %v1587_v39 = vpop.eup %1586  ;;  %v1208_v43 = vsel %vm1058_vm8, %v2372_v49, %v1336_v22  ;;  %1239 = vst.msk [vmem:[%s2765_s8 + $0x38] sm:$0xff] %vm116_vm0, %v1209_v26  ;;  %1600 = vrcp.f32 %v875_v10  ;;  %v874_v61 = vadd.f32 1.0, %v1585_v28  ;;  %v844_v31 = vmul.f32 1.442695, %v791_v51 }
 0x161   :  { %v1589_v9 = vpop.eup %1588  ;;  %1238 = vst.msk [vmem:[%s2765_s8 + $0x30] sm:$0xff] %vm116_vm0, %v1208_v43  ;;  %v1339_v8 = vadd.f32 -1.0, %v1587_v39  ;;  %1602 = vpow2.f32 %v838_v46  ;;  %v730_v38 = vadd.f32 %v2186_v27, %v2351_v41  ;;  %v745_v50 = vadd.f32 %v2359_v6, %v2186_v27 }
 0x162   :  { %v1591_v49 = vpop.eup %1590  ;;  %v877_v36 = vadd.f32 1.0, %v1589_v9  ;;  %1604 = vpow2.f32 %v840_v30  ;;  %v997_v56 = vmul.f32 %v2256_v20, %v960_v53  ;;  %v961_v6 = vmul.f32 %v2442_v25, %v2294_v55 }
 0x163   :  { %v1338_v58 = vadd.f32 -1.0, %v1591_v49  ;;  %v1211_v40 = vsel %vm1061_vm9, %v2378_v2, %v1339_v8  ;;  %1606 = vpow2.f32 %v1134_v44  ;;  %v790_v42 = vsub.f32 0.0, %v730_v38 }
 0x164   :  { %v1593_v62 = vpop.eup %1592  ;;  %1241 = vst.msk [vmem:[%s2765_s8 + $0x48] sm:$0xff] %vm116_vm0, %v1211_v40  ;;  %1608 = vrcp.f32 %v874_v61  ;;  %v793_v41 = vsub.f32 0.0, %v745_v50  ;;  %v2508_v3 = vadd.f32 %v2273_v32, %v997_v56  ;;  %v998_v60 = vmul.f32 %v2256_v20, %v961_v6 }
 0x165   :  { %v1210_v10 = vsel %vm1060_vm10, %v2405_v37, %v1338_v58  ;;  %v876_v2 = vadd.f32 1.0, %v1593_v62  ;;  %1610 = vpow2.f32 %v844_v31  ;;  %v842_v17 = vmul.f32 1.442695, %v790_v42 }
 0x166   :  { %1240 = vst.msk [vmem:[%s2765_s8 + $0x40] sm:$0xff] %vm116_vm0, %v1210_v10  ;;  %v848_v12 = vmul.f32 1.442695, %v793_v41  ;;  %v740_v55 = vadd.f32 %v2186_v27, %v2368_v5  ;;  %v2519_v37 = vadd.f32 %v2213_v35, %v2163_v7  ;;  %1612 = vrcp.f32 %v877_v36 }
 0x167   :  { %v1595_v25 = vpop.eup %1594  ;;  %v1094_v18 = vmin.f32 %v2508_v3, 0.0  ;;  %v755_v16 = vadd.f32 %v2384_v24, %v2186_v27  ;;  %1614 = vpow2.f32 %v842_v17  ;;  %v2525_v30 = vadd.f32 %v2273_v32, %v998_v60 }
 0x168   :  { %v1597_v22 = vpop.eup %1596  ;;  %v792_v13 = vsub.f32 0.0, %v740_v55  ;;  %v962_v28 = vmul.f32 %v1595_v25, %v2308_v52  ;;  %1616 = vpow2.f32 %v848_v12  ;;  %v750_v7 = vadd.f32 %v2186_v27, %v2391_v21 }
 0x169   :  { %v1599_v5 = vpop.eup %1598  ;;  %v1136_v26 = vmul.f32 1.442695, %v1094_v18  ;;  %v795_v46 = vsub.f32 0.0, %v755_v16  ;;  %1618 = vrcp.f32 %v876_v2  ;;  %v1095_v24 = vmin.f32 %v2525_v30, 0.0 }
 0x16a   :  { %v1601_v51 = vpop.eup %1600  ;;  %v1340_v39 = vadd.f32 -1.0, %v1599_v5  ;;  %v846_v43 = vmul.f32 1.442695, %v792_v13  ;;  %vm1062_vm11 = vcmp.gt.f32.partialorder %v2449_v29, 0.0  ;;  %v999_v52 = vmul.f32 %v2256_v20, %v962_v28 }
 0x16b   :  { %v1603_v61 = vpop.eup %1602  ;;  %1620 = vpow2.f32 %v1136_v26  ;;  %v852_v44 = vmul.f32 1.442695, %v795_v46  ;;  %v1138_v53 = vmul.f32 1.442695, %v1095_v24  ;;  %vm1063_vm12 = vcmp.gt.f32.partialorder %v2470_v14, 0.0 }
 0x16c   :  { %v1605_v9 = vpop.eup %1604  ;;  %v1212_v8 = vsel %vm1062_vm11, %v2449_v29, %v1340_v39  ;;  %v878_v31 = vadd.f32 1.0, %v1603_v61  ;;  %1622 = vpow2.f32 %v846_v43  ;;  %v2540_v49 = vadd.f32 %v2273_v32, %v999_v52 }
 0x16d   :  { %v1607_v21 = vpop.eup %1606  ;;  %1242 = vst.msk [vmem:[%s2765_s8 + $0x50] sm:$0xff] %vm116_vm0, %v1212_v8  ;;  %v794_v36 = vsub.f32 0.0, %v750_v7  ;;  %v349_v38 = vadd.f32 %v2213_v35, %v2280_v47  ;;  %v765_v58 = vadd.f32 %v2414_v45, %v2186_v27  ;;  %v760_v40 = vadd.f32 %v2186_v27, %v2419_v4 }
 0x16e   :  { %v1609_v50 = vpop.eup %1608  ;;  %v1341_v29 = vadd.f32 -1.0, %v1607_v21  ;;  %1624 = vrcp.f32 %v878_v31  ;;  %v879_v62 = vadd.f32 1.0, %v1605_v9  ;;  %v1096_v42 = vmin.f32 %v2540_v49, 0.0 }
 0x16f   :  { %v1611_v56 = vpop.eup %1610  ;;  %1626 = vpow2.f32 %v1138_v53  ;;  %v850_v41 = vmul.f32 1.442695, %v794_v36  ;;  %v963_v47 = vmul.f32 %v1597_v22, %v349_v38  ;;  %v797_v27 = vsub.f32 0.0, %v765_v58 }
 0x170   :  { %v1213_v6 = vsel %vm1063_vm12, %v2470_v14, %v1341_v29  ;;  %v881_v10 = vadd.f32 1.0, %v1611_v56  ;;  %1628 = vpow2.f32 %v852_v44  ;;  %v1613_v2 = vpop.eup %1612  ;;  %v1140_v45 = vmul.f32 1.442695, %v1096_v42 }
 0x171   :  { %1243 = vst.msk [vmem:[%s2765_s8 + $0x58] sm:$0xff] %vm116_vm0, %v1213_v6  ;;  %1630 = vpow2.f32 %v850_v41  ;;  %v796_v4 = vsub.f32 0.0, %v760_v40  ;;  %v1615_v17 = vpop.eup %1614  ;;  %v1000_v12 = vmul.f32 %v2256_v20, %v963_v47  ;;  %v354_v14 = vadd.f32 %v2213_v35, %v2301_v0 }
 0x172   :  { %1632 = vrcp.f32 %v881_v10  ;;  %v359_v60 = vadd.f32 %v2213_v35, %v2324_v34  ;;  %v1617_v55 = vpop.eup %1616  ;;  %vm1064_vm13 = vcmp.gt.f32.partialorder %v2508_v3, 0.0  ;;  %v856_v25 = vmul.f32 1.442695, %v797_v27 }
 0x173   :  { %1634 = vpow2.f32 %v1140_v45  ;;  %v854_v18 = vmul.f32 1.442695, %v796_v4  ;;  %v1619_v16 = vpop.eup %1618  ;;  %v883_v22 = vadd.f32 1.0, %v1617_v55  ;;  %v2561_v13 = vadd.f32 %v2273_v32, %v1000_v12 }
 0x174   :  { %v964_v28 = vmul.f32 %v1609_v50, %v354_v14  ;;  %v965_v5 = vmul.f32 %v1601_v51, %v359_v60  ;;  %1636 = vrcp.f32 %v879_v62  ;;  %v880_v46 = vadd.f32 1.0, %v1615_v17 }
 0x175   :  { %v1621_v26 = vpop.eup %1620  ;;  %v364_v0 = vadd.f32 %v2213_v35, %v2347_v1  ;;  %v369_v34 = vadd.f32 %v2213_v35, %v2361_v57  ;;  %1638 = vrcp.f32 %v883_v22  ;;  %v1097_v24 = vmin.f32 %v2561_v13, 0.0 }
 0x176   :  { %v1623_v7 = vpop.eup %1622  ;;  %v1342_v39 = vadd.f32 -1.0, %v1621_v26  ;;  %v374_v43 = vadd.f32 %v2213_v35, %v2386_v33  ;;  %1640 = vpow2.f32 %v856_v25  ;;  %v1001_v51 = vmul.f32 %v2256_v20, %v964_v28 }
 0x177   :  { %v882_v61 = vadd.f32 1.0, %v1623_v7  ;;  %v1002_v44 = vmul.f32 %v2256_v20, %v965_v5  ;;  %v1142_v57 = vmul.f32 1.442695, %v1097_v24  ;;  %1642 = vpow2.f32 %v854_v18 }
 0x178   :  { %v1625_v52 = vpop.eup %1624  ;;  %v1214_v1 = vsel %vm1064_vm13, %v2508_v3, %v1342_v39  ;;  %v966_v9 = vmul.f32 %v1619_v16, %v364_v0  ;;  %v2580_v33 = vadd.f32 %v2273_v32, %v1001_v51  ;;  %v967_v53 = vmul.f32 %v1613_v2, %v369_v34 }
 0x179   :  { %v1627_v8 = vpop.eup %1626  ;;  %1244 = vst.msk [vmem:[%s2765_s8 + $0x60] sm:$0xff] %vm116_vm0, %v1214_v1  ;;  %1644 = vrcp.f32 %v882_v61  ;;  %v2583_v31 = vadd.f32 %v2273_v32, %v1002_v44  ;;  %v968_v38 = vmul.f32 %v1625_v52, %v374_v43  ;;  %vm1065_vm14 = vcmp.gt.f32.partialorder %v2525_v30, 0.0 }
 0x17a   :  { %v1629_v21 = vpop.eup %1628  ;;  %v1343_v36 = vadd.f32 -1.0, %v1627_v8  ;;  %1646 = vpow2.f32 %v1142_v57  ;;  %v1003_v3 = vmul.f32 %v2256_v20, %v966_v9  ;;  %v1098_v58 = vmin.f32 %v2580_v33, 0.0 }
 0x17b   :  { %v1631_v50 = vpop.eup %1630  ;;  %1648 = vrcp.f32 %v880_v46  ;;  %v885_v29 = vadd.f32 1.0, %v1629_v21  ;;  %v1099_v42 = vmin.f32 %v2583_v31, 0.0  ;;  %v1004_v2 = vmul.f32 %v2256_v20, %v967_v53 }
 0x17c   :  { %v1633_v40 = vpop.eup %1632  ;;  %v1215_v56 = vsel %vm1065_vm14, %v2525_v30, %v1343_v36  ;;  %v884_v62 = vadd.f32 1.0, %v1631_v50  ;;  %v2591_v41 = vadd.f32 %v2273_v32, %v1003_v3  ;;  %v1144_v47 = vmul.f32 1.442695, %v1098_v58 }
 0x17d   :  { %v1635_v6 = vpop.eup %1634  ;;  %v971_v10 = vmul.f32 %v1633_v40, %v2219_v48  ;;  %1245 = vst.msk [vmem:[%s2765_s8 + $0x68] sm:$0xff] %vm116_vm0, %v1215_v56  ;;  %1650 = vrcp.f32 %v885_v29  ;;  %vm1066_vm15 = vcmp.gt.f32.partialorder %v2540_v49, 0.0  ;;  %v1146_v45 = vmul.f32 1.442695, %v1099_v42 }
 0x17e   :  { %v1344_v30 = vadd.f32 -1.0, %v1635_v6  ;;  %1652 = vrcp.f32 %v884_v62  ;;  %v1637_v27 = vpop.eup %1636  ;;  %v1100_v48 = vmin.f32 %v2591_v41, 0.0  ;;  %v2603_v17 = vadd.f32 %v2273_v32, %v1004_v2 }
 0x17f   :  { %v1008_v4 = vmul.f32 %v2256_v20, %v971_v10  ;;  %1654 = vpow2.f32 %v1144_v47  ;;  %v1639_v12 = vpop.eup %1638  ;;  %v1005_v60 = vmul.f32 %v2256_v20, %v968_v38  ;;  %v379_v55 = vadd.f32 %v2213_v35, %v2416_v63 }
 0x180   :  { %v1216_v14 = vsel %vm1066_vm15, %v2540_v49, %v1344_v30  ;;  %1656 = vpow2.f32 %v1146_v45  ;;  %v1641_v25 = vpop.eup %1640  ;;  %v404_v18 = vadd.f32 %v2213_v35, %v2167_v11  ;;  %v973_v22 = vmul.f32 %v1639_v12, %v2519_v37 }
 0x181   :  { %v2612_v16 = vadd.f32 %v2273_v32, %v1008_v4  ;;  %1246 = vst.msk [vmem:[%s2765_s8 + $0x70] sm:$0xff] %vm116_vm0, %v1216_v14  ;;  %v1148_v49 = vmul.f32 1.442695, %v1100_v48  ;;  %v1643_v28 = vpop.eup %1642  ;;  %v887_v5 = vadd.f32 1.0, %v1641_v25  ;;  %v1101_v26 = vmin.f32 %v2603_v17, 0.0 }
 0x182   :  { %v2621_v63 = vadd.f32 %v2273_v32, %v1005_v60  ;;  %v969_v46 = vmul.f32 %v1637_v27, %v379_v55  ;;  %v409_v0 = vadd.f32 %v2213_v35, %v2171_v15  ;;  %v1010_v34 = vmul.f32 %v2256_v20, %v973_v22  ;;  %v1686_v48 = vld [vmem:[%s2762_s3] ss:$0 sm:$0xff] }
 0x183   :  { %v1645_v11 = vpop.eup %1644  ;;  %v1105_v37 = vmin.f32 %v2612_v16, 0.0  ;;  %v886_v7 = vadd.f32 1.0, %v1643_v28  ;;  %vm1067_vm1 = vcmp.gt.f32.partialorder %v2561_v13, 0.0  ;;  %1658 = vrcp.f32 %v887_v5 }
 0x184   :  { %v1647_v39 = vpop.eup %1646  ;;  %v972_v24 = vmul.f32 %v1645_v11, %v2227_v54  ;;  %v1150_v43 = vmul.f32 1.442695, %v1101_v26  ;;  %v2630_v44 = vadd.f32 %v2273_v32, %v1010_v34  ;;  %v1102_v1 = vmin.f32 %v2621_v63, 0.0 }
 0x185   :  { %v1649_v61 = vpop.eup %1648  ;;  %v1158_v51 = vmul.f32 1.442695, %v1105_v37  ;;  %v1345_v52 = vadd.f32 -1.0, %v1647_v39  ;;  %1660 = vrcp.f32 %v886_v7  ;;  %v1006_v57 = vmul.f32 %v2256_v20, %v969_v46 }
 0x186   :  { %v1009_v15 = vmul.f32 %v2256_v20, %v972_v24  ;;  %1662 = vpow2.f32 %v1148_v49  ;;  %v419_v54 = vadd.f32 %v2213_v35, %v2179_v23  ;;  %v1107_v8 = vmin.f32 %v2630_v44, 0.0 }
 0x187   :  { %v1651_v9 = vpop.eup %1650  ;;  %1664 = vpow2.f32 %v1158_v51  ;;  %v1217_v53 = vsel %vm1067_vm1, %v2561_v13, %v1345_v52  ;;  %v1152_v38 = vmul.f32 1.442695, %v1102_v1  ;;  %v2649_v58 = vadd.f32 %v2273_v32, %v1006_v57 }
 0x188   :  { %v1653_v21 = vpop.eup %1652  ;;  %v2642_v36 = vadd.f32 %v2273_v32, %v1009_v15  ;;  %v975_v3 = vmul.f32 %v1651_v9, %v409_v0  ;;  %1247 = vst.msk [vmem:[%s2765_s8 + $0x78] sm:$0xff] %vm116_vm0, %v1217_v53  ;;  %1666 = vpow2.f32 %v1150_v43  ;;  %v1162_v50 = vmul.f32 1.442695, %v1107_v8 }
 0x189   :  { %v1655_v23 = vpop.eup %1654  ;;  %v974_v29 = vmul.f32 %v1653_v21, %v404_v18  ;;  %v384_v13 = vadd.f32 %v2213_v35, %v2440_v59  ;;  %vm1068_vm2 = vcmp.gt.f32.partialorder %v2580_v33, 0.0  ;;  %vm1069_vm3 = vcmp.gt.f32.partialorder %v2583_v31, 0.0 }
 0x18a   :  { %v1657_v40 = vpop.eup %1656  ;;  %v1106_v56 = vmin.f32 %v2642_v36, 0.0  ;;  %v1012_v62 = vmul.f32 %v2256_v20, %v975_v3  ;;  %v1346_v42 = vadd.f32 -1.0, %v1655_v23  ;;  %1668 = vpow2.f32 %v1162_v50 }
 0x18b   :  { %v1011_v6 = vmul.f32 %v2256_v20, %v974_v29  ;;  %v1347_v10 = vadd.f32 -1.0, %v1657_v40  ;;  %1670 = vpow2.f32 %v1152_v38  ;;  %v1103_v45 = vmin.f32 %v2649_v58, 0.0 }
 0x18c   :  { %v1160_v47 = vmul.f32 1.442695, %v1106_v56  ;;  %v2659_v2 = vadd.f32 %v2273_v32, %v1012_v62  ;;  %v1218_v35 = vsel %vm1068_vm2, %v2580_v33, %v1346_v42  ;;  %v970_v27 = vmul.f32 %v1649_v61, %v384_v13 }
 0x18d   :  { %v2663_v59 = vadd.f32 %v2273_v32, %v1011_v6  ;;  %1248 = vst.msk [vmem:[%s2765_s8 + $0x80] sm:$0xff] %vm116_vm0, %v1218_v35  ;;  %v1219_v30 = vsel %vm1069_vm3, %v2583_v31, %v1347_v10  ;;  %v1659_v4 = vpop.eup %1658  ;;  %v414_v33 = vadd.f32 %v1686_v48, %v2175_v19  ;;  %vm1070_vm4 = vcmp.gt.f32.partialorder %v2591_v41, 0.0 }
 0x18e   :  { %1672 = vpow2.f32 %v1160_v47  ;;  %v1109_v12 = vmin.f32 %v2659_v2, 0.0  ;;  %1249 = vst.msk [vmem:[%s2765_s8 + $0x88] sm:$0xff] %vm116_vm0, %v1219_v30  ;;  %v977_v60 = vmul.f32 %v1659_v4, %v419_v54  ;;  %v1154_v55 = vmul.f32 1.442695, %v1103_v45 }
 0x18f   :  { %v1661_v14 = vpop.eup %1660  ;;  %v1108_v31 = vmin.f32 %v2663_v59, 0.0  ;;  %vm1075_vm5 = vcmp.gt.f32.partialorder %v2612_v16, 0.0  ;;  %v1007_v22 = vmul.f32 %v2256_v20, %v970_v27  ;;  %vm1071_vm6 = vcmp.gt.f32.partialorder %v2603_v17, 0.0 }
 0x190   :  { %v1663_v25 = vpop.eup %1662  ;;  %v1166_v18 = vmul.f32 1.442695, %v1109_v12  ;;  %v976_v19 = vmul.f32 %v1661_v14, %v414_v33  ;;  %v1014_v5 = vmul.f32 %v2256_v20, %v977_v60  ;;  %1674 = vpow2.f32 %v1154_v55 }
 0x191   :  { %v1665_v49 = vpop.eup %1664  ;;  %v1164_v28 = vmul.f32 1.442695, %v1108_v31  ;;  %v1348_v26 = vadd.f32 -1.0, %v1663_v25  ;;  %v1044_v37 = vadd.f32 %v2273_v32, %v1007_v22  ;;  %vm1077_vm7 = vcmp.gt.f32.partialorder %v2630_v44, 0.0 }
 0x192   :  { %v1667_v46 = vpop.eup %1666  ;;  %v1353_v11 = vadd.f32 -1.0, %v1665_v49  ;;  %1676 = vpow2.f32 %v1166_v18  ;;  %v1013_v0 = vmul.f32 %v2256_v20, %v976_v19  ;;  %v1051_v34 = vadd.f32 %v2273_v32, %v1014_v5 }
 0x193   :  { %1678 = vpow2.f32 %v1164_v28  ;;  %v1220_v7 = vsel %vm1070_vm4, %v2591_v41, %v1348_v26  ;;  %v1349_v39 = vadd.f32 -1.0, %v1667_v46  ;;  %v1104_v20 = vmin.f32 %v1044_v37, 0.0 }
 0x194   :  { %v1225_v24 = vsel %vm1075_vm5, %v2612_v16, %v1353_v11  ;;  %v1050_v43 = vadd.f32 %v2273_v32, %v1013_v0  ;;  %1250 = vst.msk [vmem:[%s2765_s8 + $0x90] sm:$0xff] %vm116_vm0, %v1220_v7  ;;  %v1669_v61 = vpop.eup %1668  ;;  %v1111_v41 = vmin.f32 %v1051_v34, 0.0  ;;  %vm1072_vm8 = vcmp.gt.f32.partialorder %v2621_v63, 0.0 }
 0x195   :  { %1255 = vst.msk [vmem:[%s2765_s8 + $0xb8] sm:$0xff] %vm116_vm0, %v1225_v24  ;;  %v1221_v51 = vsel %vm1071_vm6, %v2603_v17, %v1349_v39  ;;  %v1671_v16 = vpop.eup %1670  ;;  %v1355_v52 = vadd.f32 -1.0, %v1669_v61  ;;  %v1156_v15 = vmul.f32 1.442695, %v1104_v20  ;;  %vm1076_vm9 = vcmp.gt.f32.partialorder %v2642_v36, 0.0 }
 0x196   :  { %v1110_v32 = vmin.f32 %v1050_v43, 0.0  ;;  %1251 = vst.msk [vmem:[%s2765_s8 + $0x98] sm:$0xff] %vm116_vm0, %v1221_v51  ;;  %v1170_v1 = vmul.f32 1.442695, %v1111_v41  ;;  %v1350_v57 = vadd.f32 -1.0, %v1671_v16  ;;  %vm1073_vm10 = vcmp.gt.f32.partialorder %v2649_v58, 0.0 }
 0x197   :  { %v1227_v54 = vsel %vm1077_vm7, %v2630_v44, %v1355_v52  ;;  %1680 = vpow2.f32 %v1156_v15  ;;  %vm1079_vm11 = vcmp.gt.f32.partialorder %v2659_v2, 0.0  ;;  %vm1078_vm12 = vcmp.gt.f32.partialorder %v2663_v59, 0.0 }
 0x198   :  { %v1673_v9 = vpop.eup %1672  ;;  %v1168_v8 = vmul.f32 1.442695, %v1110_v32  ;;  %1257 = vst.msk [vmem:[%s2765_s8 + $0xc8] sm:$0xff] %vm116_vm0, %v1227_v54  ;;  %1682 = vpow2.f32 %v1170_v1  ;;  %v1222_v53 = vsel %vm1072_vm8, %v2621_v63, %v1350_v57  ;;  %vm1074_vm13 = vcmp.gt.f32.partialorder %v1044_v37, 0.0 }
 0x199   :  { %v1354_v17 = vadd.f32 -1.0, %v1673_v9  ;;  %1252 = vst.msk [vmem:[%s2765_s8 + $0xa0] sm:$0xff] %vm116_vm0, %v1222_v53  ;;  %vm1081_vm14 = vcmp.gt.f32.partialorder %v1051_v34, 0.0  ;;  %vm1080_vm15 = vcmp.gt.f32.partialorder %v1050_v43, 0.0 }
 0x19a   :  { %1684 = vpow2.f32 %v1168_v8  ;;  %v1675_v44 = vpop.eup %1674 }
 0x19b   :  { %v1226_v21 = vsel %vm1076_vm9, %v2642_v36, %v1354_v17  ;;  %v1351_v38 = vadd.f32 -1.0, %v1675_v44 }
 0x19c   :  { %v1677_v3 = vpop.eup %1676  ;;  %1256 = vst.msk [vmem:[%s2765_s8 + $0xc0] sm:$0xff] %vm116_vm0, %v1226_v21 }
 0x19d   :  { %v1679_v23 = vpop.eup %1678  ;;  %v1357_v63 = vadd.f32 -1.0, %v1677_v3  ;;  %v1223_v29 = vsel %vm1073_vm10, %v2649_v58, %v1351_v38 }
 0x19e   :  { %v1356_v50 = vadd.f32 -1.0, %v1679_v23  ;;  %1253 = vst.msk [vmem:[%s2765_s8 + $0xa8] sm:$0xff] %vm116_vm0, %v1223_v29 }
 0x19f   :  { %v1229_v13 = vsel %vm1079_vm11, %v2659_v2, %v1357_v63 }
 0x1a0   :  { %1259 = vst.msk [vmem:[%s2765_s8 + $0xd8] sm:$0xff] %vm116_vm0, %v1229_v13  ;;  %v1228_v36 = vsel %vm1078_vm12, %v2663_v59, %v1356_v50 }
 0x1a1   :  { %1258 = vst.msk [vmem:[%s2765_s8 + $0xd0] sm:$0xff] %vm116_vm0, %v1228_v36  ;;  %v1681_v58 = vpop.eup %1680 }
 0x1a2   :  { %v1683_v40 = vpop.eup %1682  ;;  %v1352_v56 = vadd.f32 -1.0, %v1681_v58 }
 0x1a3   :  { %v1359_v42 = vadd.f32 -1.0, %v1683_v40 }
 0x1a4   :  { %v1685_v62 = vpop.eup %1684  ;;  %v1224_v10 = vsel %vm1074_vm13, %v1044_v37, %v1352_v56 }
 0x1a5   :  { %v1358_v6 = vadd.f32 -1.0, %v1685_v62  ;;  %v1231_v47 = vsel %vm1081_vm14, %v1051_v34, %v1359_v42  ;;  %1254 = vst.msk [vmem:[%s2765_s8 + $0xb0] sm:$0xff] %vm116_vm0, %v1224_v10 }
 0x1a6   :  { %1261 = vst.msk [vmem:[%s2765_s8 + $0xe8] sm:$0xff] %vm116_vm0, %v1231_v47 }
 0x1a7   :  { %v1230_v2 = vsel %vm1080_vm15, %v1050_v43, %v1358_v6 }
 0x1a8   :  { %1260 = vst.msk [vmem:[%s2765_s8 + $0xe0] sm:$0xff] %vm116_vm0, %v1230_v2 }

// kernel: mencoder_forward.9
= control target key start
LH: loop header
LB: loop body
LE: loop exit
PB: predicated region body
PF: predicated region fallthrough
CT: control target
= control target key end

     0   :  { %vm118_vm0 = vcmask 523264   ;;  %vm456_vm1 = vcmask 261120   ;;  %s1878_s2 = inlined_call_operand.vmem [shape: f32[320,32], index: 2, kind: input, shape index: {}]   ;;  %s1879_s0 = inlined_call_operand.vmem [shape: f32[112,320], index: 0, kind: input, shape index: {}]   ;;  %s1880_s4 = inlined_call_operand.vmem [shape: f32[32,32], index: 4, kind: input, shape index: {}]   ;;  %s1881_s1 = inlined_call_operand.vmem [shape: f32[112,32], index: 1, kind: input, shape index: {}]   ;;  %s1882_s3 = inlined_call_operand.vmem [shape: f32[1,32], index: 3, kind: input, shape index: {}]   ;;  %s1883_s5 = inlined_call_operand.vmem [shape: f32[1,32], index: 5, kind: input, shape index: {}]   ;;  %s1884_s6 = inlined_call_operand.vmem [shape: f32[1,32], index: 6, kind: input, shape index: {}]   ;;  %s1885_s7 = inlined_call_operand.vmem [shape: f32[1,32], index: 7, kind: input, shape index: {}]   ;;  %s1886_s8 = inlined_call_operand.vmem [shape: f32[112,32], index: 8, kind: output, shape index: {}]  }
   0x1   :  { %v87_v0 = vld [vmem:[%s1878_s2 + $0x80] sm:$0xff]  ;;  %v88_v1 = vld [vmem:[%s1878_s2 + $0x88] sm:$0xff]  ;;  %v89_v9 = vld [vmem:[%s1878_s2 + $0x90] sm:$0xff] }
   0x2   :  { %v103_v2 = vld [vmem:[%s1878_s2 + $0x100] sm:$0xff]  ;;  %v1102_v3 = vpack.c.bf16 %v88_v1, %v87_v0  ;;  %v104_v4 = vld [vmem:[%s1878_s2 + $0x108] sm:$0xff]  ;;  %v90_v10 = vld [vmem:[%s1878_s2 + $0x98] sm:$0xff] }
   0x3   :  { %v71_v5 = vld [vmem:[%s1878_s2] sm:$0xff]  ;;  %v72_v6 = vld [vmem:[%s1878_s2 + $0x8] sm:$0xff]  ;;  %v1134_v7 = vpack.c.bf16 %v104_v4, %v103_v2  ;;  %v105_v11 = vld [vmem:[%s1878_s2 + $0x110] sm:$0xff]  ;;  %v1106_v12 = vpack.c.bf16 %v90_v10, %v89_v9 }
   0x4   :  { %v1104_v8 = vpack.c.bf16 %v72_v6, %v71_v5  ;;  %1103 = vmatprep.subr.bf16.mxu0 %v1102_v3  ;;  %v106_v13 = vld [vmem:[%s1878_s2 + $0x118] sm:$0xff]  ;;  %v73_v14 = vld [vmem:[%s1878_s2 + $0x10] sm:$0xff]  ;;  %v91_v18 = vld [vmem:[%s1878_s2 + $0xa0] sm:$0xff] }
   0x5   :  { %v74_v15 = vld [vmem:[%s1878_s2 + $0x18] sm:$0xff]  ;;  %1135 = vmatprep.subr.bf16.mxu1 %v1134_v7  ;;  %v1138_v16 = vpack.c.bf16 %v106_v13, %v105_v11  ;;  %v92_v19 = vld [vmem:[%s1878_s2 + $0xa8] sm:$0xff]  ;;  %v107_v20 = vld [vmem:[%s1878_s2 + $0x120] sm:$0xff] }
   0x6   :  { %1105 = vmatpush3.bf16.msra.mxu0 %v1104_v8  ;;  %v1108_v17 = vpack.c.bf16 %v74_v15, %v73_v14  ;;  %1137 = vmatpush3.bf16.msra.mxu1 %v1134_v7  ;;  %v1110_v21 = vpack.c.bf16 %v92_v19, %v91_v18  ;;  %v108_v22 = vld [vmem:[%s1878_s2 + $0x128] sm:$0xff]  ;;  %v75_v23 = vld [vmem:[%s1878_s2 + $0x20] sm:$0xff]  ;;  %v93_v26 = vld [vmem:[%s1878_s2 + $0xb0] sm:$0xff] }
   0x7   :  { %1107 = vmatprep.subr.bf16.mxu0 %v1106_v12  ;;  %v76_v24 = vld [vmem:[%s1878_s2 + $0x28] sm:$0xff]  ;;  %1139 = vmatprep.subr.bf16.mxu1 %v1138_v16  ;;  %v1142_v25 = vpack.c.bf16 %v108_v22, %v107_v20  ;;  %v94_v27 = vld [vmem:[%s1878_s2 + $0xb8] sm:$0xff]  ;;  %v109_v28 = vld [vmem:[%s1878_s2 + $0x130] sm:$0xff] }
   0x8   :  { %v110_v29 = vld [vmem:[%s1878_s2 + $0x138] sm:$0xff]  ;;  %v1112_v30 = vpack.c.bf16 %v76_v24, %v75_v23  ;;  %v31_v31 = vld [vmem:[%s1879_s0 + $0x10] sm:$0xff]  ;;  %v1114_v32 = vpack.c.bf16 %v94_v27, %v93_v26  ;;  %v95_v36 = vld [vmem:[%s1878_s2 + $0xc0] sm:$0xff] }
   0x9   :  { %v77_v33 = vld [vmem:[%s1878_s2 + $0x30] sm:$0xff]  ;;  %v78_v34 = vld [vmem:[%s1878_s2 + $0x38] sm:$0xff]  ;;  %v1146_v35 = vpack.c.bf16 %v110_v29, %v109_v28  ;;  %1052 = vmatprep.mubr.msk.f32.mxu1 %vm118_vm0, %v31_v31  ;;  %v96_v37 = vld [vmem:[%s1878_s2 + $0xc8] sm:$0xff] }
   0xa   :  { %1109 = vmatpush3.bf16.msra.mxu0 %v1108_v17  ;;  %1141 = vmatpush3.bf16.msra.mxu1 %v1138_v16  ;;  %v445_v38 = vld [vmem:[%s1880_s4] sm:$0xff]  ;;  %v446_v39 = vld [vmem:[%s1880_s4 + $0x8] sm:$0xff]  ;;  %v1116_v40 = vpack.c.bf16 %v78_v34, %v77_v33  ;;  %v1118_v41 = vpack.c.bf16 %v96_v37, %v95_v36  ;;  %v97_v45 = vld [vmem:[%s1878_s2 + $0xd0] sm:$0xff] }
   0xb   :  { %1111 = vmatprep.subr.bf16.mxu0 %v1110_v21  ;;  %1143 = vmatprep.subr.bf16.mxu1 %v1142_v25  ;;  %v79_v42 = vld [vmem:[%s1878_s2 + $0x40] sm:$0xff]  ;;  %v80_v43 = vld [vmem:[%s1878_s2 + $0x48] sm:$0xff]  ;;  %v1150_v44 = vpack.c.bf16 %v446_v39, %v445_v38  ;;  %v98_v46 = vld [vmem:[%s1878_s2 + $0xd8] sm:$0xff] }
   0xc   :  { %v34_v47 = vld [vmem:[%s1879_s0 + $0x28] sm:$0xff]  ;;  %v1120_v48 = vpack.c.bf16 %v80_v43, %v79_v42  ;;  %v81_v49 = vld [vmem:[%s1878_s2 + $0x50] sm:$0xff]  ;;  %v82_v51 = vld [vmem:[%s1878_s2 + $0x58] sm:$0xff]  ;;  %v1122_v55 = vpack.c.bf16 %v98_v46, %v97_v45 }
   0xd   :  { %v447_v50 = vld [vmem:[%s1880_s4 + $0x10] sm:$0xff]  ;;  %v448_v52 = vld [vmem:[%s1880_s4 + $0x18] sm:$0xff]  ;;  %v30_v53 = vld [vmem:[%s1879_s0 + $0x8] sm:$0xff]  ;;  %v1124_v59 = vpack.c.bf16 %v82_v51, %v81_v49 }
   0xe   :  { %1113 = vmatpush3.bf16.msra.mxu0 %v1112_v30  ;;  %1145 = vmatpush3.bf16.msra.mxu1 %v1142_v25  ;;  %v37_v54 = vld [vmem:[%s1879_s0 + $0x40] sm:$0xff]  ;;  %v100_v57 = vld [vmem:[%s1878_s2 + $0xe8] sm:$0xff]  ;;  %v1154_v58 = vpack.c.bf16 %v448_v52, %v447_v50  ;;  %v40_v60 = vld [vmem:[%s1879_s0 + $0x58] sm:$0xff] }
   0xf   :  { %1115 = vmatprep.subr.bf16.mxu0 %v1114_v32  ;;  %1147 = vmatprep.subr.bf16.mxu1 %v1146_v35  ;;  %v99_v56 = vld [vmem:[%s1878_s2 + $0xe0] sm:$0xff]  ;;  %v84_v63 = vld [vmem:[%s1878_s2 + $0x68] sm:$0xff]  ;;  %v43_v0 = vld [vmem:[%s1879_s0 + $0x70] sm:$0xff] }
  0x10   :  { %225 = vmatprep.mubr.f32.mxu0 %v30_v53  ;;  %v1126_v61 = vpack.c.bf16 %v100_v57, %v99_v56  ;;  %v83_v62 = vld [vmem:[%s1878_s2 + $0x60] sm:$0xff]  ;;  %v101_v1 = vld [vmem:[%s1878_s2 + $0xf0] sm:$0xff]  ;;  %v102_v2 = vld [vmem:[%s1878_s2 + $0xf8] sm:$0xff] }
  0x11   :  { %v1128_v3 = vpack.c.bf16 %v84_v63, %v83_v62  ;;  %v46_v4 = vld [vmem:[%s1879_s0 + $0x88] sm:$0xff]  ;;  %v1130_v5 = vpack.c.bf16 %v102_v2, %v101_v1  ;;  %v85_v6 = vld [vmem:[%s1878_s2 + $0x70] sm:$0xff]  ;;  %v86_v7 = vld [vmem:[%s1878_s2 + $0x78] sm:$0xff] }
  0x12   :  { %1117 = vmatpush3.bf16.msra.mxu0 %v1116_v40  ;;  %1149 = vmatpush3.bf16.msra.mxu1 %v1146_v35  ;;  %v49_v8 = vld [vmem:[%s1879_s0 + $0xa0] sm:$0xff]  ;;  %v1132_v9 = vpack.c.bf16 %v86_v7, %v85_v6  ;;  %v52_v10 = vld [vmem:[%s1879_s0 + $0xb8] sm:$0xff]  ;;  %v55_v11 = vld [vmem:[%s1879_s0 + $0xd0] sm:$0xff] }
  0x13   :  { %1119 = vmatprep.subr.bf16.mxu0 %v1118_v41  ;;  %1151 = vmatprep.subr.bf16.mxu1 %v1150_v44  ;;  %v29_v12 = vld [vmem:[%s1879_s0] sm:$0xff]  ;;  %v58_v13 = vld [vmem:[%s1879_s0 + $0xe8] sm:$0xff]  ;;  %v32_v16 = vld [vmem:[%s1879_s0 + $0x18] sm:$0xff] }
  0x14   :  { %v33_v14 = vld [vmem:[%s1879_s0 + $0x20] sm:$0xff]  ;;  %v64_v17 = vld [vmem:[%s1879_s0 + $0x118] sm:$0xff]  ;;  %v67_v19 = vld [vmem:[%s1879_s0 + $0x130] sm:$0xff] }
  0x15   :  { %1053 = vmatmul.mubr.msk.f32.vlgmr.msra.gmra.mrb[0].mxu1 %vm118_vm0, %v34_v47  ;;  %v61_v15 = vld [vmem:[%s1879_s0 + $0x100] sm:$0xff]  ;;  %v36_v18 = vld [vmem:[%s1879_s0 + $0x38] sm:$0xff]  ;;  %v35_v20 = vld [vmem:[%s1879_s0 + $0x30] sm:$0xff] }
  0x16   :  { %1121 = vmatpush3.bf16.msra.mxu0 %v1120_v48  ;;  %1153 = vmatpush3.bf16.msra.mxu1 %v1150_v44  ;;  %v70_v21 = vld [vmem:[%s1879_s0 + $0x148] sm:$0xff]  ;;  %v39_v22 = vld [vmem:[%s1879_s0 + $0x50] sm:$0xff]  ;;  %v431_v23 = vld [vmem:[%s1881_s1] sm:$0xff] }
  0x17   :  { %1055 = vmatprep.mubr.msk.f32.mxu1 %vm118_vm0, %v37_v54  ;;  %1123 = vmatprep.subr.bf16.mxu0 %v1122_v55  ;;  %v38_v24 = vld [vmem:[%s1879_s0 + $0x48] sm:$0xff]  ;;  %v433_v27 = vld [vmem:[%s1881_s1 + $0x10] sm:$0xff]  ;;  %v41_v28 = vld [vmem:[%s1879_s0 + $0x60] sm:$0xff] }
  0x18   :  { %1155 = vmatprep.subr.bf16.mxu1 %v1154_v58  ;;  %v432_v25 = vld [vmem:[%s1881_s1 + $0x8] sm:$0xff]  ;;  %v434_v29 = vld [vmem:[%s1881_s1 + $0x18] sm:$0xff]  ;;  %v45_v30 = vld [vmem:[%s1879_s0 + $0x80] sm:$0xff] }
  0x19   :  { %1056 = vmatmul.mubr.msk.f32.gmra.mrb[2].mxu1 %vm118_vm0, %v40_v60  ;;  %v42_v26 = vld [vmem:[%s1879_s0 + $0x68] sm:$0xff]  ;;  %v435_v31 = vld [vmem:[%s1881_s1 + $0x20] sm:$0xff]  ;;  %v44_v32 = vld [vmem:[%s1879_s0 + $0x78] sm:$0xff] }
  0x1a   :  { %1125 = vmatpush3.bf16.msra.mxu0 %v1124_v59  ;;  %1058 = vmatprep.mubr.msk.f32.mxu1 %vm118_vm0, %v43_v0  ;;  %v436_v33 = vld [vmem:[%s1881_s1 + $0x28] sm:$0xff]  ;;  %v48_v34 = vld [vmem:[%s1879_s0 + $0x98] sm:$0xff]  ;;  %v437_v35 = vld [vmem:[%s1881_s1 + $0x30] sm:$0xff] }
  0x1b   :  { %1127 = vmatprep.subr.bf16.mxu0 %v1126_v61  ;;  %1157 = vmatpush3.bf16.msra.mxu1 %v1154_v58  ;;  %v47_v36 = vld [vmem:[%s1879_s0 + $0x90] sm:$0xff]  ;;  %v438_v37 = vld [vmem:[%s1881_s1 + $0x38] sm:$0xff]  ;;  %v439_v39 = vld [vmem:[%s1881_s1 + $0x40] sm:$0xff] }
  0x1c   :  { %v51_v38 = vld [vmem:[%s1879_s0 + $0xb0] sm:$0xff]  ;;  %v50_v40 = vld [vmem:[%s1879_s0 + $0xa8] sm:$0xff]  ;;  %v53_v44 = vld [vmem:[%s1879_s0 + $0xc0] sm:$0xff] }
  0x1d   :  { %1059 = vmatmul.mubr.msk.f32.gmra.mrb[4].mxu1 %vm118_vm0, %v46_v4  ;;  %v440_v41 = vld [vmem:[%s1881_s1 + $0x48] sm:$0xff]  ;;  %v441_v43 = vld [vmem:[%s1881_s1 + $0x50] sm:$0xff]  ;;  %v442_v45 = vld [vmem:[%s1881_s1 + $0x58] sm:$0xff] }
  0x1e   :  { %1129 = vmatpush3.bf16.msra.mxu0 %v1128_v3  ;;  %1061 = vmatprep.mubr.msk.f32.mxu1 %vm118_vm0, %v49_v8  ;;  %v54_v42 = vld [vmem:[%s1879_s0 + $0xc8] sm:$0xff]  ;;  %v57_v46 = vld [vmem:[%s1879_s0 + $0xe0] sm:$0xff]  ;;  %v56_v48 = vld [vmem:[%s1879_s0 + $0xd8] sm:$0xff] }
  0x1f   :  { %1131 = vmatprep.subr.bf16.mxu0 %v1130_v5  ;;  %v443_v47 = vld [vmem:[%s1881_s1 + $0x60] sm:$0xff]  ;;  %v444_v49 = vld [vmem:[%s1881_s1 + $0x68] sm:$0xff]  ;;  %v60_v50 = vld [vmem:[%s1879_s0 + $0xf8] sm:$0xff] }
  0x20   :  { %v59_v51 = vld [vmem:[%s1879_s0 + $0xf0] sm:$0xff]  ;;  %v62_v53 = vld [vmem:[%s1879_s0 + $0x108] sm:$0xff]  ;;  %v65_v55 = vld [vmem:[%s1879_s0 + $0x120] sm:$0xff] }
  0x21   :  { %1062 = vmatmul.mubr.msk.f32.gmra.mrb[6].mxu1 %vm118_vm0, %v52_v10  ;;  %v63_v52 = vld [vmem:[%s1879_s0 + $0x110] sm:$0xff]  ;;  %v66_v54 = vld [vmem:[%s1879_s0 + $0x128] sm:$0xff]  ;;  %v69_v56 = vld [vmem:[%s1879_s0 + $0x140] sm:$0xff] }
  0x22   :  { %1133 = vmatpush3.bf16.msra.mxu0 %v1132_v9  ;;  %1064 = vmatprep.mubr.msk.f32.mxu1 %vm118_vm0, %v55_v11  ;;  %v68_v57 = vld [vmem:[%s1879_s0 + $0x138] sm:$0xff]  ;;  %v1626_v4 = vld [vmem:[%s1882_s3] ss:$0 sm:$0xff] }
  0x25   :  { %226 = vmatmul.mubr.f32.vlgmr.msra.gmra.mrb[0].mxu0 %v29_v12  ;;  %1065 = vmatmul.mubr.msk.f32.gmra.mrb[8].mxu1 %vm118_vm0, %v58_v13 }
  0x26   :  { %230 = vmatprep.mubr.f32.mxu0 %v33_v14  ;;  %1067 = vmatprep.mubr.msk.f32.mxu1 %vm118_vm0, %v61_v15 }
  0x29   :  { %231 = vmatmul.mubr.f32.gmra.mrb[2].mxu0 %v32_v16  ;;  %1068 = vmatmul.mubr.msk.f32.gmra.mrb[10].mxu1 %vm118_vm0, %v64_v17 }
  0x2a   :  { %235 = vmatprep.mubr.f32.mxu0 %v36_v18  ;;  %1070 = vmatprep.mubr.msk.f32.mxu1 %vm118_vm0, %v67_v19 }
  0x2d   :  { %236 = vmatmul.mubr.f32.gmra.mrb[4].mxu0 %v35_v20  ;;  %1071 = vmatmul.mubr.msk.f32.gmra.mrb[12].mxu1 %vm118_vm0, %v70_v21 }
  0x2e   :  { %240 = vmatprep.mubr.f32.mxu0 %v39_v22  ;;  %1081 = vmatprep.mubr.msk.f32.mxu1 %vm456_vm1, %v431_v23  ;;  %v1647_v22 = vld [vmem:[%s1883_s5] ss:$0 sm:$0xff] }
  0x31   :  { %241 = vmatmul.mubr.f32.gmra.mrb[6].mxu0 %v38_v24  ;;  %1082 = vmatmul.mubr.msk.f32.vlgmr.msra.gmra.mrb[14].mxu1 %vm456_vm1, %v432_v25 }
  0x32   :  { %245 = vmatprep.mubr.f32.mxu0 %v42_v26  ;;  %1084 = vmatprep.mubr.msk.f32.mxu1 %vm456_vm1, %v433_v27 }
  0x35   :  { %246 = vmatmul.mubr.f32.gmra.mrb[8].mxu0 %v41_v28  ;;  %1085 = vmatmul.mubr.msk.f32.gmra.mrb[16].mxu1 %vm456_vm1, %v434_v29 }
  0x36   :  { %250 = vmatprep.mubr.f32.mxu0 %v45_v30  ;;  %1087 = vmatprep.mubr.msk.f32.mxu1 %vm456_vm1, %v435_v31 }
  0x39   :  { %251 = vmatmul.mubr.f32.gmra.mrb[10].mxu0 %v44_v32  ;;  %1088 = vmatmul.mubr.msk.f32.gmra.mrb[18].mxu1 %vm456_vm1, %v436_v33 }
  0x3a   :  { %255 = vmatprep.mubr.f32.mxu0 %v48_v34  ;;  %1090 = vmatprep.mubr.msk.f32.mxu1 %vm456_vm1, %v437_v35 }
  0x3d   :  { %256 = vmatmul.mubr.f32.gmra.mrb[12].mxu0 %v47_v36  ;;  %1091 = vmatmul.mubr.msk.f32.gmra.mrb[20].mxu1 %vm456_vm1, %v438_v37 }
  0x3e   :  { %260 = vmatprep.mubr.f32.mxu0 %v51_v38  ;;  %1093 = vmatprep.mubr.msk.f32.mxu1 %vm456_vm1, %v439_v39 }
  0x41   :  { %261 = vmatmul.mubr.f32.gmra.mrb[14].mxu0 %v50_v40  ;;  %1094 = vmatmul.mubr.msk.f32.gmra.mrb[22].mxu1 %vm456_vm1, %v440_v41 }
  0x42   :  { %265 = vmatprep.mubr.f32.mxu0 %v54_v42  ;;  %1096 = vmatprep.mubr.msk.f32.mxu1 %vm456_vm1, %v441_v43 }
  0x45   :  { %266 = vmatmul.mubr.f32.gmra.mrb[16].mxu0 %v53_v44  ;;  %1097 = vmatmul.mubr.msk.f32.gmra.mrb[24].mxu1 %vm456_vm1, %v442_v45 }
  0x46   :  { %270 = vmatprep.mubr.f32.mxu0 %v57_v46  ;;  %1099 = vmatprep.mubr.msk.f32.mxu1 %vm456_vm1, %v443_v47 }
  0x49   :  { %271 = vmatmul.mubr.f32.gmra.mrb[18].mxu0 %v56_v48  ;;  %1100 = vmatmul.mubr.msk.f32.gmra.mrb[26].mxu1 %vm456_vm1, %v444_v49 }
  0x4a   :  { %275 = vmatprep.mubr.f32.mxu0 %v60_v50 }
  0x4d   :  { %276 = vmatmul.mubr.f32.gmra.mrb[20].mxu0 %v59_v51 }
  0x4e   :  { %280 = vmatprep.mubr.f32.mxu0 %v63_v52 }
  0x51   :  { %281 = vmatmul.mubr.f32.gmra.mrb[22].mxu0 %v62_v53 }
  0x52   :  { %285 = vmatprep.mubr.f32.mxu0 %v66_v54 }
  0x55   :  { %286 = vmatmul.mubr.f32.gmra.mrb[24].mxu0 %v65_v55 }
  0x56   :  { %290 = vmatprep.mubr.f32.mxu0 %v69_v56 }
  0x59   :  { %291 = vmatmul.mubr.f32.gmra.mrb[26].mxu0 %v68_v57 }
  0xe8   :  { %v1054_v58 = vpop.f32.mrb[0].mxu1 }
  0xe9   :  { %v362_v59 = vpop.f32.mrb[1].mxu1 }
  0xec   :  { %v1057_v60 = vpop.f32.mrb[2].mxu1 }
  0xed   :  { %v372_v61 = vpop.f32.mrb[3].mxu1 }
  0xf0   :  { %v1615_v62 = vpop.f32.mrb[4].mxu1 }
  0xf1   :  { %v382_v63 = vpop.f32.mrb[5].mxu1 }
  0xf4   :  { %v1617_v0 = vpop.f32.mrb[6].mxu1 }
  0xf5   :  { %v1619_v1 = vpop.f32.mrb[7].mxu1 }
  0xf8   :  { %v954_v2 = vpop.f32.mrb[0].mxu0  ;;  %v1621_v3 = vpop.f32.mrb[8].mxu1 }
  0xf9   :  { %v955_v5 = vpop.f32.mrb[1].mxu0  ;;  %v1628_v7 = vpop.f32.mrb[9].mxu1 }
  0xfa   :  { %v956_v6 = vadd.f32 %v955_v5, %v954_v2 }
  0xfc   :  { %v228_v8 = vadd.f32 %v956_v6, %v1626_v4  ;;  %v957_v9 = vpop.f32.mrb[2].mxu0  ;;  %v1631_v10 = vpop.f32.mrb[10].mxu1 }
  0xfd   :  { %v958_v11 = vpop.f32.mrb[3].mxu0  ;;  %v1635_v14 = vpop.f32.mrb[11].mxu1 }
  0xfe   :  { %v1633_v12 = vadd.f32 %v362_v59, %v228_v8  ;;  %v959_v13 = vadd.f32 %v958_v11, %v957_v9 }
 0x100   :  { %v233_v15 = vadd.f32 %v959_v13, %v1626_v4  ;;  %v960_v16 = vpop.f32.mrb[4].mxu0  ;;  %v1638_v17 = vpop.f32.mrb[12].mxu1 }
 0x101   :  { %v961_v18 = vpop.f32.mrb[5].mxu0  ;;  %v1642_v21 = vpop.f32.mrb[13].mxu1 }
 0x102   :  { %v1640_v19 = vadd.f32 %v1054_v58, %v233_v15  ;;  %v962_v20 = vadd.f32 %v961_v18, %v960_v16 }
 0x104   :  { %v238_v23 = vadd.f32 %v962_v20, %v1626_v4  ;;  %v963_v24 = vpop.f32.mrb[6].mxu0  ;;  %v1083_v25 = vpop.f32.mrb[14].mxu1 }
 0x105   :  { %v964_v26 = vpop.f32.mrb[7].mxu0  ;;  %v571_v28 = vadd.f32 %v1083_v25, %v1647_v22  ;;  %v565_v30 = vpop.f32.mrb[15].mxu1 }
 0x106   :  { %v1650_v27 = vadd.f32 %v372_v61, %v238_v23  ;;  %v965_v29 = vadd.f32 %v964_v26, %v963_v24  ;;  %v566_v31 = vadd.f32 %v1647_v22, %v565_v30 }
 0x107   :  { %v635_v32 = vsub.f32 0.0, %v571_v28 }
 0x108   :  { %v243_v33 = vadd.f32 %v965_v29, %v1626_v4  ;;  %v966_v34 = vpop.f32.mrb[8].mxu0  ;;  %v634_v35 = vsub.f32 0.0, %v566_v31  ;;  %v1086_v36 = vpop.f32.mrb[16].mxu1 }
 0x109   :  { %v967_v37 = vpop.f32.mrb[9].mxu0  ;;  %v650_v38 = vmul.f32 1.442695, %v635_v32  ;;  %v581_v40 = vadd.f32 %v1086_v36, %v1647_v22  ;;  %v575_v42 = vpop.f32.mrb[17].mxu1 }
 0x10a   :  { %v1655_v39 = vadd.f32 %v1057_v60, %v243_v33  ;;  %v968_v41 = vadd.f32 %v967_v37, %v966_v34  ;;  %v648_v43 = vmul.f32 1.442695, %v634_v35  ;;  %v576_v44 = vadd.f32 %v1647_v22, %v575_v42 }
 0x10b   :  { %1158 = vpow2.f32 %v650_v38  ;;  %v637_v45 = vsub.f32 0.0, %v581_v40 }
 0x10c   :  { %v248_v46 = vadd.f32 %v968_v41, %v1626_v4  ;;  %v969_v47 = vpop.f32.mrb[10].mxu0  ;;  %1160 = vpow2.f32 %v648_v43  ;;  %v636_v48 = vsub.f32 0.0, %v576_v44  ;;  %v1089_v49 = vpop.f32.mrb[18].mxu1 }
 0x10d   :  { %v970_v50 = vpop.f32.mrb[11].mxu0  ;;  %v654_v51 = vmul.f32 1.442695, %v637_v45  ;;  %v591_v53 = vadd.f32 %v1089_v49, %v1647_v22  ;;  %v585_v55 = vpop.f32.mrb[19].mxu1 }
 0x10e   :  { %v1660_v52 = vadd.f32 %v382_v63, %v248_v46  ;;  %v971_v54 = vadd.f32 %v970_v50, %v969_v47  ;;  %v652_v56 = vmul.f32 1.442695, %v636_v48  ;;  %v586_v57 = vadd.f32 %v1647_v22, %v585_v55 }
 0x10f   :  { %1162 = vpow2.f32 %v654_v51  ;;  %v639_v58 = vsub.f32 0.0, %v591_v53 }
 0x110   :  { %v253_v59 = vadd.f32 %v971_v54, %v1626_v4  ;;  %v972_v60 = vpop.f32.mrb[12].mxu0  ;;  %1164 = vpow2.f32 %v652_v56  ;;  %v638_v61 = vsub.f32 0.0, %v586_v57  ;;  %v1092_v2 = vpop.f32.mrb[20].mxu1 }
 0x111   :  { %v973_v5 = vpop.f32.mrb[13].mxu0  ;;  %v658_v6 = vmul.f32 1.442695, %v639_v58  ;;  %v601_v8 = vadd.f32 %v1092_v2, %v1647_v22  ;;  %v595_v11 = vpop.f32.mrb[21].mxu1 }
 0x112   :  { %v1666_v63 = vadd.f32 %v1615_v62, %v253_v59  ;;  %v974_v9 = vadd.f32 %v973_v5, %v972_v60  ;;  %v656_v13 = vmul.f32 1.442695, %v638_v61  ;;  %v596_v15 = vadd.f32 %v1647_v22, %v595_v11 }
 0x113   :  { %1166 = vpow2.f32 %v658_v6  ;;  %v641_v16 = vsub.f32 0.0, %v601_v8 }
 0x114   :  { %v258_v18 = vadd.f32 %v974_v9, %v1626_v4  ;;  %v975_v20 = vpop.f32.mrb[14].mxu0  ;;  %1168 = vpow2.f32 %v656_v13  ;;  %v640_v23 = vsub.f32 0.0, %v596_v15  ;;  %v1095_v24 = vpop.f32.mrb[22].mxu1 }
 0x115   :  { %v976_v25 = vpop.f32.mrb[15].mxu0  ;;  %v1159_v26 = vpop.eup %1158  ;;  %v662_v28 = vmul.f32 1.442695, %v641_v16  ;;  %v611_v29 = vadd.f32 %v1095_v24, %v1647_v22 }
 0x116   :  { %v1672_v62 = vadd.f32 %v1619_v1, %v258_v18  ;;  %v977_v30 = vadd.f32 %v976_v25, %v975_v20  ;;  %v605_v31 = vpop.f32.mrb[23].mxu1  ;;  %v1161_v32 = vpop.eup %1160  ;;  %v677_v33 = vadd.f32 1.0, %v1159_v26  ;;  %v660_v34 = vmul.f32 1.442695, %v640_v23 }
 0x117   :  { %v606_v35 = vadd.f32 %v1647_v22, %v605_v31  ;;  %v676_v36 = vadd.f32 1.0, %v1161_v32  ;;  %1170 = vpow2.f32 %v662_v28  ;;  %v643_v37 = vsub.f32 0.0, %v611_v29 }
 0x118   :  { %v263_v38 = vadd.f32 %v977_v30, %v1626_v4  ;;  %v978_v40 = vpop.f32.mrb[16].mxu0  ;;  %1172 = vrcp.f32 %v677_v33  ;;  %v1098_v42 = vpop.f32.mrb[24].mxu1 }
 0x119   :  { %v642_v41 = vsub.f32 0.0, %v606_v35  ;;  %v979_v1 = vpop.f32.mrb[17].mxu0  ;;  %v1163_v43 = vpop.eup %1162  ;;  %1174 = vrcp.f32 %v676_v36  ;;  %v666_v44 = vmul.f32 1.442695, %v643_v37  ;;  %v621_v46 = vadd.f32 %v1098_v42, %v1647_v22  ;;  %v1702_v37 = vld [vmem:[%s1885_s7] ss:$0 sm:$0xff] }
 0x11a   :  { %v1678_v45 = vadd.f32 %v1617_v0, %v263_v38  ;;  %v615_v47 = vpop.f32.mrb[25].mxu1  ;;  %v1165_v48 = vpop.eup %1164  ;;  %v679_v49 = vadd.f32 1.0, %v1163_v43  ;;  %1176 = vpow2.f32 %v660_v34  ;;  %v980_v51 = vadd.f32 %v979_v1, %v978_v40 }
 0x11b   :  { %v664_v50 = vmul.f32 1.442695, %v642_v41  ;;  %v678_v53 = vadd.f32 1.0, %v1165_v48  ;;  %1178 = vpow2.f32 %v666_v44  ;;  %v645_v54 = vsub.f32 0.0, %v621_v46 }
 0x11c   :  { %v616_v55 = vadd.f32 %v1647_v22, %v615_v47  ;;  %v981_v56 = vpop.f32.mrb[18].mxu0  ;;  %1180 = vrcp.f32 %v679_v49  ;;  %v268_v57 = vadd.f32 %v980_v51, %v1626_v4  ;;  %v1101_v58 = vpop.f32.mrb[26].mxu1 }
 0x11d   :  { %v982_v0 = vpop.f32.mrb[19].mxu0  ;;  %v1167_v59 = vpop.eup %1166  ;;  %1182 = vrcp.f32 %v678_v53  ;;  %v670_v60 = vmul.f32 1.442695, %v645_v54  ;;  %v631_v2 = vadd.f32 %v1101_v58, %v1647_v22 }
 0x11e   :  { %v644_v61 = vsub.f32 0.0, %v616_v55  ;;  %v625_v5 = vpop.f32.mrb[27].mxu1  ;;  %v1169_v6 = vpop.eup %1168  ;;  %v681_v8 = vadd.f32 1.0, %v1167_v59  ;;  %1184 = vpow2.f32 %v664_v50  ;;  %v1685_v9 = vadd.f32 %v1628_v7, %v268_v57  ;;  %v1692_v7 = vld [vmem:[%s1884_s6] ss:$0 sm:$0xff] }
 0x11f   :  { %v983_v11 = vadd.f32 %v982_v0, %v981_v56  ;;  %v680_v13 = vadd.f32 1.0, %v1169_v6  ;;  %1186 = vpow2.f32 %v670_v60  ;;  %v647_v16 = vsub.f32 0.0, %v631_v2 }
 0x120   :  { %v668_v15 = vmul.f32 1.442695, %v644_v61  ;;  %v984_v18 = vpop.f32.mrb[20].mxu0  ;;  %1188 = vrcp.f32 %v681_v8  ;;  %v626_v23 = vadd.f32 %v1647_v22, %v625_v5 }
 0x121   :  { %v273_v20 = vadd.f32 %v983_v11, %v1626_v4  ;;  %v985_v24 = vpop.f32.mrb[21].mxu0  ;;  %v1171_v25 = vpop.eup %1170  ;;  %1190 = vrcp.f32 %v680_v13  ;;  %v674_v26 = vmul.f32 1.442695, %v647_v16 }
 0x122   :  { %v986_v28 = vadd.f32 %v985_v24, %v984_v18  ;;  %v1173_v29 = vpop.eup %1172  ;;  %v683_v30 = vadd.f32 1.0, %v1171_v25  ;;  %1192 = vpow2.f32 %v668_v15  ;;  %v646_v32 = vsub.f32 0.0, %v626_v23 }
 0x123   :  { %v1695_v31 = vadd.f32 %v1621_v3, %v273_v20  ;;  %v1175_v33 = vpop.eup %1174  ;;  %v719_v22 = vmul.f32 %v1173_v29, %v1640_v19  ;;  %1194 = vpow2.f32 %v674_v26 }
 0x124   :  { %v278_v34 = vadd.f32 %v986_v28, %v1626_v4  ;;  %v987_v35 = vpop.f32.mrb[22].mxu0  ;;  %v1177_v36 = vpop.eup %1176  ;;  %v718_v38 = vmul.f32 %v1175_v33, %v1633_v12  ;;  %1196 = vrcp.f32 %v683_v30  ;;  %v672_v40 = vmul.f32 1.442695, %v646_v32 }
 0x125   :  { %v988_v3 = vpop.f32.mrb[23].mxu0  ;;  %v1179_v41 = vpop.eup %1178  ;;  %v740_v42 = vmul.f32 %v1692_v7, %v719_v22  ;;  %v682_v1 = vadd.f32 1.0, %v1177_v36 }
 0x126   :  { %v1707_v19 = vadd.f32 %v1635_v14, %v278_v34  ;;  %v989_v43 = vadd.f32 %v988_v3, %v987_v35  ;;  %v1181_v44 = vpop.eup %1180  ;;  %v739_v46 = vmul.f32 %v1692_v7, %v718_v38  ;;  %v685_v47 = vadd.f32 1.0, %v1179_v41 }
 0x127   :  { %1198 = vpow2.f32 %v672_v40  ;;  %v1183_v48 = vpop.eup %1182  ;;  %v1711_v49 = vadd.f32 %v1702_v37, %v740_v42  ;;  %v721_v12 = vmul.f32 %v1181_v44, %v1655_v39 }
 0x128   :  { %1200 = vrcp.f32 %v682_v1  ;;  %v1714_v50 = vpop.f32.mrb[24].mxu0  ;;  %v1185_v51 = vpop.eup %1184  ;;  %v1717_v53 = vadd.f32 %v1702_v37, %v739_v46  ;;  %v720_v14 = vmul.f32 %v1183_v48, %v1650_v27  ;;  %v283_v61 = vadd.f32 %v989_v43, %v1626_v4 }
 0x129   :  { %1202 = vrcp.f32 %v685_v47  ;;  %v1720_v54 = vpop.f32.mrb[25].mxu0  ;;  %v1187_v55 = vpop.eup %1186  ;;  %v789_v56 = vmin.f32 %v1711_v49, 0.0  ;;  %v742_v57 = vmul.f32 %v1692_v7, %v721_v12  ;;  %v684_v58 = vadd.f32 1.0, %v1185_v51 }
 0x12a   :  { %v1189_v0 = vpop.eup %1188  ;;  %v788_v39 = vmin.f32 %v1717_v53, 0.0  ;;  %v741_v59 = vmul.f32 %v1692_v7, %v720_v14  ;;  %v687_v60 = vadd.f32 1.0, %v1187_v55  ;;  %v418_v35 = vadd.f32 %v1631_v10, %v283_v61 }
 0x12b   :  { %v1191_v2 = vpop.eup %1190  ;;  %v804_v5 = vmul.f32 1.442695, %v789_v56  ;;  %v1728_v27 = vadd.f32 %v1702_v37, %v742_v57  ;;  %v723_v6 = vmul.f32 %v1189_v0, %v1666_v63  ;;  %1204 = vrcp.f32 %v684_v58 }
 0x12c   :  { %v1731_v8 = vpop.f32.mrb[26].mxu0  ;;  %v1193_v11 = vpop.eup %1192  ;;  %v802_v13 = vmul.f32 1.442695, %v788_v39  ;;  %v1734_v15 = vadd.f32 %v1702_v37, %v741_v59  ;;  %v722_v16 = vmul.f32 %v1191_v2, %v1660_v52  ;;  %1206 = vrcp.f32 %v687_v60 }
 0x12d   :  { %v1737_v18 = vpop.f32.mrb[27].mxu0  ;;  %v1195_v20 = vpop.eup %1194  ;;  %1208 = vpow2.f32 %v804_v5  ;;  %v791_v23 = vmin.f32 %v1728_v27, 0.0  ;;  %v744_v24 = vmul.f32 %v1692_v7, %v723_v6  ;;  %v686_v30 = vadd.f32 1.0, %v1193_v11 }
 0x12e   :  { %v1197_v63 = vpop.eup %1196  ;;  %1210 = vpow2.f32 %v802_v13  ;;  %v790_v25 = vmin.f32 %v1734_v15, 0.0  ;;  %v743_v26 = vmul.f32 %v1692_v7, %v722_v16  ;;  %v689_v34 = vadd.f32 1.0, %v1195_v20 }
 0x12f   :  { %v808_v28 = vmul.f32 1.442695, %v791_v23  ;;  %v1744_v29 = vadd.f32 %v1702_v37, %v744_v24  ;;  %v725_v52 = vmul.f32 %v1197_v63, %v1678_v45  ;;  %vm775_vm2 = vcmp.gt.f32.partialorder %v1711_v49, 0.0 }
 0x130   :  { %v806_v33 = vmul.f32 1.442695, %v790_v25  ;;  %v1748_v22 = vadd.f32 %v1702_v37, %v743_v26  ;;  %v992_v14 = vadd.f32 %v1720_v54, %v1714_v50  ;;  %vm774_vm3 = vcmp.gt.f32.partialorder %v1717_v53, 0.0 }
 0x131   :  { %v1199_v32 = vpop.eup %1198  ;;  %1212 = vpow2.f32 %v808_v28  ;;  %v793_v38 = vmin.f32 %v1744_v29, 0.0  ;;  %v746_v40 = vmul.f32 %v1692_v7, %v725_v52  ;;  %vm777_vm4 = vcmp.gt.f32.partialorder %v1728_v27, 0.0 }
 0x132   :  { %v1201_v36 = vpop.eup %1200  ;;  %1214 = vpow2.f32 %v806_v33  ;;  %v792_v41 = vmin.f32 %v1748_v22, 0.0  ;;  %v688_v46 = vadd.f32 1.0, %v1199_v32  ;;  %v288_v16 = vadd.f32 %v992_v14, %v1626_v4 }
 0x133   :  { %v1203_v3 = vpop.eup %1202  ;;  %v724_v45 = vmul.f32 %v1201_v36, %v1672_v62  ;;  %v812_v42 = vmul.f32 1.442695, %v793_v38  ;;  %v1756_v1 = vadd.f32 %v1702_v37, %v746_v40  ;;  %1216 = vrcp.f32 %v686_v30 }
 0x134   :  { %v727_v43 = vmul.f32 %v1203_v3, %v1695_v31  ;;  %v810_v10 = vmul.f32 1.442695, %v792_v41  ;;  %1218 = vrcp.f32 %v689_v34  ;;  %vm776_vm5 = vcmp.gt.f32.partialorder %v1734_v15, 0.0 }
 0x135   :  { %v745_v44 = vmul.f32 %v1692_v7, %v724_v45  ;;  %v1205_v47 = vpop.eup %1204  ;;  %1220 = vpow2.f32 %v812_v42  ;;  %v795_v48 = vmin.f32 %v1756_v1, 0.0  ;;  %vm779_vm6 = vcmp.gt.f32.partialorder %v1744_v29, 0.0 }
 0x136   :  { %v748_v62 = vmul.f32 %v1692_v7, %v727_v43  ;;  %v1207_v12 = vpop.eup %1206  ;;  %1222 = vpow2.f32 %v810_v10  ;;  %v726_v31 = vmul.f32 %v1205_v47, %v1685_v9  ;;  %vm778_vm7 = vcmp.gt.f32.partialorder %v1748_v22, 0.0 }
 0x137   :  { %v1764_v51 = vadd.f32 %v1702_v37, %v745_v44  ;;  %v1209_v55 = vpop.eup %1208  ;;  %v816_v56 = vmul.f32 1.442695, %v795_v48  ;;  %1224 = vrcp.f32 %v688_v46  ;;  %v729_v58 = vmul.f32 %v1207_v12, %v418_v35 }
 0x138   :  { %v1770_v57 = vadd.f32 %v1702_v37, %v748_v62  ;;  %v1211_v0 = vpop.eup %1210  ;;  %v909_v39 = vadd.f32 -1.0, %v1209_v55  ;;  %v747_v60 = vmul.f32 %v1692_v7, %v726_v31  ;;  %vm781_vm8 = vcmp.gt.f32.partialorder %v1756_v1, 0.0 }
 0x139   :  { %v794_v59 = vmin.f32 %v1764_v51, 0.0  ;;  %v908_v61 = vadd.f32 -1.0, %v1211_v0  ;;  %1226 = vpow2.f32 %v816_v56  ;;  %v750_v5 = vmul.f32 %v1692_v7, %v729_v58 }
 0x13a   :  { %v797_v9 = vmin.f32 %v1770_v57, 0.0  ;;  %v845_v50 = vsel %vm775_vm2, %v1711_v49, %v909_v39  ;;  %v1781_v2 = vadd.f32 %v1702_v37, %v747_v60  ;;  %v995_v49 = vadd.f32 %v1737_v18, %v1731_v8 }
 0x13b   :  { %v814_v54 = vmul.f32 1.442695, %v794_v59  ;;  %v1213_v6 = vpop.eup %1212  ;;  %859 = vst.msk [vmem:[%s1886_s8 + $0x8] sm:$0xff] %vm456_vm1, %v845_v50  ;;  %v844_v11 = vsel %vm774_vm3, %v1717_v53, %v908_v61  ;;  %v1799_v25 = vadd.f32 %v1702_v37, %v750_v5  ;;  %v423_v8 = vadd.f32 %v1642_v21, %v288_v16 }
 0x13c   :  { %v820_v13 = vmul.f32 1.442695, %v797_v9  ;;  %v1215_v20 = vpop.eup %1214  ;;  %858 = vst.msk [vmem:[%s1886_s8] sm:$0xff] %vm456_vm1, %v844_v11  ;;  %v911_v23 = vadd.f32 -1.0, %v1213_v6  ;;  %v796_v24 = vmin.f32 %v1781_v2, 0.0  ;;  %v293_v30 = vadd.f32 %v995_v49, %v1626_v4 }
 0x13d   :  { %1228 = vpow2.f32 %v814_v54  ;;  %v1217_v63 = vpop.eup %1216  ;;  %v910_v53 = vadd.f32 -1.0, %v1215_v20  ;;  %v799_v21 = vmin.f32 %v1799_v25, 0.0  ;;  %vm780_vm9 = vcmp.gt.f32.partialorder %v1764_v51, 0.0 }
 0x13e   :  { %1230 = vpow2.f32 %v820_v13  ;;  %v1219_v18 = vpop.eup %1218  ;;  %v847_v26 = vsel %vm777_vm4, %v1728_v27, %v911_v23  ;;  %v818_v28 = vmul.f32 1.442695, %v796_v24  ;;  %v728_v52 = vmul.f32 %v1217_v63, %v1707_v19 }
 0x13f   :  { %v1221_v32 = vpop.eup %1220  ;;  %861 = vst.msk [vmem:[%s1886_s8 + $0x18] sm:$0xff] %vm456_vm1, %v847_v26  ;;  %v846_v33 = vsel %vm776_vm5, %v1734_v15, %v910_v53  ;;  %v428_v19 = vadd.f32 %v1638_v17, %v293_v30  ;;  %v824_v36 = vmul.f32 1.442695, %v799_v21  ;;  %vm783_vm10 = vcmp.gt.f32.partialorder %v1770_v57, 0.0 }
 0x140   :  { %v1223_v34 = vpop.eup %1222  ;;  %860 = vst.msk [vmem:[%s1886_s8 + $0x10] sm:$0xff] %vm456_vm1, %v846_v33  ;;  %v913_v27 = vadd.f32 -1.0, %v1221_v32  ;;  %1232 = vpow2.f32 %v818_v28  ;;  %v749_v4 = vmul.f32 %v1692_v7, %v728_v52  ;;  %vm782_vm11 = vcmp.gt.f32.partialorder %v1781_v2, 0.0 }
 0x141   :  { %v1225_v35 = vpop.eup %1224  ;;  %v912_v15 = vadd.f32 -1.0, %v1223_v34  ;;  %v731_v41 = vmul.f32 %v1219_v18, %v428_v19  ;;  %1234 = vpow2.f32 %v824_v36  ;;  %vm785_vm12 = vcmp.gt.f32.partialorder %v1799_v25, 0.0 }
 0x142   :  { %v849_v38 = vsel %vm779_vm6, %v1744_v29, %v913_v27  ;;  %v770_v40 = vadd.f32 %v1702_v37, %v749_v4  ;;  %v730_v3 = vmul.f32 %v1225_v35, %v423_v8 }
 0x143   :  { %v1227_v45 = vpop.eup %1226  ;;  %863 = vst.msk [vmem:[%s1886_s8 + $0x28] sm:$0xff] %vm456_vm1, %v849_v38  ;;  %v848_v17 = vsel %vm778_vm7, %v1748_v22, %v912_v15  ;;  %v752_v10 = vmul.f32 %v1692_v7, %v731_v41 }
 0x144   :  { %862 = vst.msk [vmem:[%s1886_s8 + $0x20] sm:$0xff] %vm456_vm1, %v848_v17  ;;  %v915_v42 = vadd.f32 -1.0, %v1227_v45  ;;  %v798_v29 = vmin.f32 %v770_v40, 0.0  ;;  %v751_v43 = vmul.f32 %v1692_v7, %v730_v3  ;;  %vm784_vm13 = vcmp.gt.f32.partialorder %v770_v40, 0.0 }
 0x145   :  { %v773_v12 = vadd.f32 %v1702_v37, %v752_v10 }
 0x146   :  { %v851_v46 = vsel %vm781_vm8, %v1756_v1, %v915_v42  ;;  %v822_v47 = vmul.f32 1.442695, %v798_v29  ;;  %v772_v22 = vadd.f32 %v1702_v37, %v751_v43 }
 0x147   :  { %v1229_v44 = vpop.eup %1228  ;;  %865 = vst.msk [vmem:[%s1886_s8 + $0x38] sm:$0xff] %vm456_vm1, %v851_v46  ;;  %v801_v1 = vmin.f32 %v773_v12, 0.0  ;;  %vm787_vm15 = vcmp.gt.f32.partialorder %v773_v12, 0.0 }
 0x148   :  { %v1231_v48 = vpop.eup %1230  ;;  %v914_v62 = vadd.f32 -1.0, %v1229_v44  ;;  %1236 = vpow2.f32 %v822_v47  ;;  %v800_v7 = vmin.f32 %v772_v22, 0.0  ;;  %vm786_vm14 = vcmp.gt.f32.partialorder %v772_v22, 0.0 }
 0x149   :  { %v917_v31 = vadd.f32 -1.0, %v1231_v48  ;;  %v828_v0 = vmul.f32 1.442695, %v801_v1 }
 0x14a   :  { %v850_v14 = vsel %vm780_vm9, %v1764_v51, %v914_v62  ;;  %v1233_v55 = vpop.eup %1232  ;;  %v826_v58 = vmul.f32 1.442695, %v800_v7 }
 0x14b   :  { %864 = vst.msk [vmem:[%s1886_s8 + $0x30] sm:$0xff] %vm456_vm1, %v850_v14  ;;  %v853_v56 = vsel %vm783_vm10, %v1770_v57, %v917_v31  ;;  %v916_v37 = vadd.f32 -1.0, %v1233_v55  ;;  %v1235_v51 = vpop.eup %1234 }
 0x14c   :  { %867 = vst.msk [vmem:[%s1886_s8 + $0x48] sm:$0xff] %vm456_vm1, %v853_v56  ;;  %1238 = vpow2.f32 %v826_v58  ;;  %v919_v57 = vadd.f32 -1.0, %v1235_v51 }
 0x14d   :  { %v852_v39 = vsel %vm782_vm11, %v1781_v2, %v916_v37  ;;  %1240 = vpow2.f32 %v828_v0 }
 0x14e   :  { %866 = vst.msk [vmem:[%s1886_s8 + $0x40] sm:$0xff] %vm456_vm1, %v852_v39  ;;  %v855_v59 = vsel %vm785_vm12, %v1799_v25, %v919_v57 }
 0x14f   :  { %869 = vst.msk [vmem:[%s1886_s8 + $0x58] sm:$0xff] %vm456_vm1, %v855_v59 }
 0x152   :  { %v1237_v60 = vpop.eup %1236 }
 0x153   :  { %v918_v61 = vadd.f32 -1.0, %v1237_v60 }
 0x155   :  { %v854_v9 = vsel %vm784_vm13, %v770_v40, %v918_v61 }
 0x156   :  { %v1239_v50 = vpop.eup %1238  ;;  %868 = vst.msk [vmem:[%s1886_s8 + $0x50] sm:$0xff] %vm456_vm1, %v854_v9 }
 0x157   :  { %v1241_v54 = vpop.eup %1240  ;;  %v920_v2 = vadd.f32 -1.0, %v1239_v50 }
 0x158   :  { %v921_v5 = vadd.f32 -1.0, %v1241_v54 }
 0x159   :  { %v856_v6 = vsel %vm786_vm14, %v772_v22, %v920_v2 }
 0x15a   :  { %870 = vst.msk [vmem:[%s1886_s8 + $0x60] sm:$0xff] %vm456_vm1, %v856_v6  ;;  %v857_v11 = vsel %vm787_vm15, %v773_v12, %v921_v5 }
 0x15b   :  { %871 = vst.msk [vmem:[%s1886_s8 + $0x68] sm:$0xff] %vm456_vm1, %v857_v11 }

// kernel: mencoder_forward.10
= control target key start
LH: loop header
LB: loop body
LE: loop exit
PB: predicated region body
PF: predicated region fallthrough
CT: control target
= control target key end

     0   :  { %vm94_vm0 = vcmask 523264   ;;  %s1127_s2 = inlined_call_operand.vmem [shape: f32[320,64], index: 2, kind: input, shape index: {}]   ;;  %s1128_s0 = inlined_call_operand.vmem [shape: f32[48,320], index: 0, kind: input, shape index: {}]   ;;  %s1129_s4 = inlined_call_operand.vmem [shape: f32[64,64], index: 4, kind: input, shape index: {}]   ;;  %s1130_s1 = inlined_call_operand.vmem [shape: f32[48,64], index: 1, kind: input, shape index: {}]   ;;  %s1131_s5 = inlined_call_operand.vmem [shape: f32[1,64], index: 5, kind: input, shape index: {}]   ;;  %s1132_s3 = inlined_call_operand.vmem [shape: f32[1,64], index: 3, kind: input, shape index: {}]   ;;  %s1133_s6 = inlined_call_operand.vmem [shape: f32[1,64], index: 6, kind: input, shape index: {}]   ;;  %s1134_s7 = inlined_call_operand.vmem [shape: f32[1,64], index: 7, kind: input, shape index: {}]   ;;  %s1135_s8 = inlined_call_operand.vmem [shape: f32[48,64], index: 8, kind: output, shape index: {}]  }
   0x1   :  { %v63_v0 = vld [vmem:[%s1127_s2 + $0x80] sm:$0xff]  ;;  %v64_v1 = vld [vmem:[%s1127_s2 + $0x88] sm:$0xff]  ;;  %v65_v9 = vld [vmem:[%s1127_s2 + $0x90] sm:$0xff] }
   0x2   :  { %v79_v2 = vld [vmem:[%s1127_s2 + $0x100] sm:$0xff]  ;;  %v701_v3 = vpack.c.bf16 %v64_v1, %v63_v0  ;;  %v80_v4 = vld [vmem:[%s1127_s2 + $0x108] sm:$0xff]  ;;  %v66_v10 = vld [vmem:[%s1127_s2 + $0x98] sm:$0xff] }
   0x3   :  { %v47_v5 = vld [vmem:[%s1127_s2] sm:$0xff]  ;;  %v48_v6 = vld [vmem:[%s1127_s2 + $0x8] sm:$0xff]  ;;  %v733_v7 = vpack.c.bf16 %v80_v4, %v79_v2  ;;  %v81_v11 = vld [vmem:[%s1127_s2 + $0x110] sm:$0xff]  ;;  %v705_v12 = vpack.c.bf16 %v66_v10, %v65_v9 }
   0x4   :  { %v703_v8 = vpack.c.bf16 %v48_v6, %v47_v5  ;;  %702 = vmatprep.subr.bf16.mxu0 %v701_v3  ;;  %v82_v13 = vld [vmem:[%s1127_s2 + $0x118] sm:$0xff]  ;;  %v49_v14 = vld [vmem:[%s1127_s2 + $0x10] sm:$0xff]  ;;  %v67_v18 = vld [vmem:[%s1127_s2 + $0xa0] sm:$0xff] }
   0x5   :  { %v50_v15 = vld [vmem:[%s1127_s2 + $0x18] sm:$0xff]  ;;  %734 = vmatprep.subr.bf16.mxu1 %v733_v7  ;;  %v737_v16 = vpack.c.bf16 %v82_v13, %v81_v11  ;;  %v68_v19 = vld [vmem:[%s1127_s2 + $0xa8] sm:$0xff]  ;;  %v83_v20 = vld [vmem:[%s1127_s2 + $0x120] sm:$0xff] }
   0x6   :  { %704 = vmatpush3.bf16.msra.mxu0 %v703_v8  ;;  %v707_v17 = vpack.c.bf16 %v50_v15, %v49_v14  ;;  %736 = vmatpush3.bf16.msra.mxu1 %v733_v7  ;;  %v709_v21 = vpack.c.bf16 %v68_v19, %v67_v18  ;;  %v84_v22 = vld [vmem:[%s1127_s2 + $0x128] sm:$0xff]  ;;  %v51_v23 = vld [vmem:[%s1127_s2 + $0x20] sm:$0xff]  ;;  %v69_v26 = vld [vmem:[%s1127_s2 + $0xb0] sm:$0xff] }
   0x7   :  { %706 = vmatprep.subr.bf16.mxu0 %v705_v12  ;;  %v52_v24 = vld [vmem:[%s1127_s2 + $0x28] sm:$0xff]  ;;  %738 = vmatprep.subr.bf16.mxu1 %v737_v16  ;;  %v741_v25 = vpack.c.bf16 %v84_v22, %v83_v20  ;;  %v70_v27 = vld [vmem:[%s1127_s2 + $0xb8] sm:$0xff]  ;;  %v85_v28 = vld [vmem:[%s1127_s2 + $0x130] sm:$0xff] }
   0x8   :  { %v86_v29 = vld [vmem:[%s1127_s2 + $0x138] sm:$0xff]  ;;  %v711_v30 = vpack.c.bf16 %v52_v24, %v51_v23  ;;  %v31_v31 = vld [vmem:[%s1128_s0 + $0x10] sm:$0xff]  ;;  %v713_v32 = vpack.c.bf16 %v70_v27, %v69_v26  ;;  %v71_v36 = vld [vmem:[%s1127_s2 + $0xc0] sm:$0xff] }
   0x9   :  { %v53_v33 = vld [vmem:[%s1127_s2 + $0x30] sm:$0xff]  ;;  %v54_v34 = vld [vmem:[%s1127_s2 + $0x38] sm:$0xff]  ;;  %v745_v35 = vpack.c.bf16 %v86_v29, %v85_v28  ;;  %667 = vmatprep.mubr.msk.f32.mxu1 %vm94_vm0, %v31_v31  ;;  %v72_v37 = vld [vmem:[%s1127_s2 + $0xc8] sm:$0xff] }
   0xa   :  { %708 = vmatpush3.bf16.msra.mxu0 %v707_v17  ;;  %740 = vmatpush3.bf16.msra.mxu1 %v737_v16  ;;  %v309_v38 = vld [vmem:[%s1129_s4] sm:$0xff]  ;;  %v310_v39 = vld [vmem:[%s1129_s4 + $0x8] sm:$0xff]  ;;  %v715_v40 = vpack.c.bf16 %v54_v34, %v53_v33  ;;  %v717_v41 = vpack.c.bf16 %v72_v37, %v71_v36  ;;  %v73_v45 = vld [vmem:[%s1127_s2 + $0xd0] sm:$0xff] }
   0xb   :  { %710 = vmatprep.subr.bf16.mxu0 %v709_v21  ;;  %742 = vmatprep.subr.bf16.mxu1 %v741_v25  ;;  %v55_v42 = vld [vmem:[%s1127_s2 + $0x40] sm:$0xff]  ;;  %v56_v43 = vld [vmem:[%s1127_s2 + $0x48] sm:$0xff]  ;;  %v749_v44 = vpack.c.bf16 %v310_v39, %v309_v38  ;;  %v74_v46 = vld [vmem:[%s1127_s2 + $0xd8] sm:$0xff] }
   0xc   :  { %v311_v47 = vld [vmem:[%s1129_s4 + $0x10] sm:$0xff]  ;;  %v312_v48 = vld [vmem:[%s1129_s4 + $0x18] sm:$0xff]  ;;  %v719_v49 = vpack.c.bf16 %v56_v43, %v55_v42  ;;  %v34_v50 = vld [vmem:[%s1128_s0 + $0x28] sm:$0xff]  ;;  %v721_v51 = vpack.c.bf16 %v74_v46, %v73_v45 }
   0xd   :  { %v57_v52 = vld [vmem:[%s1127_s2 + $0x50] sm:$0xff]  ;;  %v58_v53 = vld [vmem:[%s1127_s2 + $0x58] sm:$0xff]  ;;  %v753_v54 = vpack.c.bf16 %v312_v48, %v311_v47  ;;  %v75_v55 = vld [vmem:[%s1127_s2 + $0xe0] sm:$0xff] }
   0xe   :  { %712 = vmatpush3.bf16.msra.mxu0 %v711_v30  ;;  %744 = vmatpush3.bf16.msra.mxu1 %v741_v25  ;;  %v76_v56 = vld [vmem:[%s1127_s2 + $0xe8] sm:$0xff]  ;;  %v37_v58 = vld [vmem:[%s1128_s0 + $0x40] sm:$0xff]  ;;  %v723_v61 = vpack.c.bf16 %v58_v53, %v57_v52  ;;  %v40_v62 = vld [vmem:[%s1128_s0 + $0x58] sm:$0xff] }
   0xf   :  { %714 = vmatprep.subr.bf16.mxu0 %v713_v32  ;;  %746 = vmatprep.subr.bf16.mxu1 %v745_v35  ;;  %v30_v57 = vld [vmem:[%s1128_s0 + $0x8] sm:$0xff]  ;;  %v313_v59 = vld [vmem:[%s1129_s4 + $0x20] sm:$0xff]  ;;  %v725_v63 = vpack.c.bf16 %v76_v56, %v75_v55  ;;  %v77_v3 = vld [vmem:[%s1127_s2 + $0xf0] sm:$0xff] }
  0x10   :  { %v314_v60 = vld [vmem:[%s1129_s4 + $0x28] sm:$0xff]  ;;  %177 = vmatprep.mubr.f32.mxu0 %v30_v57  ;;  %v59_v0 = vld [vmem:[%s1127_s2 + $0x60] sm:$0xff]  ;;  %v78_v4 = vld [vmem:[%s1127_s2 + $0xf8] sm:$0xff] }
  0x11   :  { %v60_v1 = vld [vmem:[%s1127_s2 + $0x68] sm:$0xff]  ;;  %v757_v2 = vpack.c.bf16 %v314_v60, %v313_v59  ;;  %v43_v5 = vld [vmem:[%s1128_s0 + $0x70] sm:$0xff]  ;;  %v316_v7 = vld [vmem:[%s1129_s4 + $0x38] sm:$0xff]  ;;  %v729_v10 = vpack.c.bf16 %v78_v4, %v77_v3 }
  0x12   :  { %716 = vmatpush3.bf16.msra.mxu0 %v715_v40  ;;  %748 = vmatpush3.bf16.msra.mxu1 %v745_v35  ;;  %v315_v6 = vld [vmem:[%s1129_s4 + $0x30] sm:$0xff]  ;;  %v727_v8 = vpack.c.bf16 %v60_v1, %v59_v0  ;;  %v46_v9 = vld [vmem:[%s1128_s0 + $0x88] sm:$0xff]  ;;  %v62_v12 = vld [vmem:[%s1127_s2 + $0x78] sm:$0xff] }
  0x13   :  { %718 = vmatprep.subr.bf16.mxu0 %v717_v41  ;;  %750 = vmatprep.subr.bf16.mxu1 %v749_v44  ;;  %v61_v11 = vld [vmem:[%s1127_s2 + $0x70] sm:$0xff]  ;;  %v761_v13 = vpack.c.bf16 %v316_v7, %v315_v6  ;;  %v303_v14 = vld [vmem:[%s1130_s1] sm:$0xff]  ;;  %v304_v17 = vld [vmem:[%s1130_s1 + $0x8] sm:$0xff] }
  0x14   :  { %v731_v15 = vpack.c.bf16 %v62_v12, %v61_v11  ;;  %v29_v16 = vld [vmem:[%s1128_s0] sm:$0xff]  ;;  %v305_v19 = vld [vmem:[%s1130_s1 + $0x10] sm:$0xff]  ;;  %v32_v20 = vld [vmem:[%s1128_s0 + $0x18] sm:$0xff] }
  0x15   :  { %668 = vmatmul.mubr.msk.f32.vlgmr.msra.gmra.mrb[0].mxu1 %vm94_vm0, %v34_v50  ;;  %v33_v18 = vld [vmem:[%s1128_s0 + $0x20] sm:$0xff]  ;;  %v306_v21 = vld [vmem:[%s1130_s1 + $0x18] sm:$0xff]  ;;  %v35_v24 = vld [vmem:[%s1128_s0 + $0x30] sm:$0xff] }
  0x16   :  { %720 = vmatpush3.bf16.msra.mxu0 %v719_v49  ;;  %752 = vmatpush3.bf16.msra.mxu1 %v749_v44  ;;  %v36_v22 = vld [vmem:[%s1128_s0 + $0x38] sm:$0xff]  ;;  %v307_v23 = vld [vmem:[%s1130_s1 + $0x20] sm:$0xff]  ;;  %v308_v25 = vld [vmem:[%s1130_s1 + $0x28] sm:$0xff] }
  0x17   :  { %722 = vmatprep.subr.bf16.mxu0 %v721_v51  ;;  %754 = vmatprep.subr.bf16.mxu1 %v753_v54  ;;  %v39_v26 = vld [vmem:[%s1128_s0 + $0x50] sm:$0xff]  ;;  %v38_v27 = vld [vmem:[%s1128_s0 + $0x48] sm:$0xff]  ;;  %v41_v29 = vld [vmem:[%s1128_s0 + $0x60] sm:$0xff] }
  0x18   :  { %670 = vmatprep.mubr.msk.f32.mxu1 %vm94_vm0, %v37_v58  ;;  %v42_v28 = vld [vmem:[%s1128_s0 + $0x68] sm:$0xff]  ;;  %v45_v30 = vld [vmem:[%s1128_s0 + $0x80] sm:$0xff]  ;;  %v44_v31 = vld [vmem:[%s1128_s0 + $0x78] sm:$0xff] }
  0x19   :  { %671 = vmatmul.mubr.msk.f32.gmra.mrb[2].mxu1 %vm94_vm0, %v40_v62  ;;  %v558_v38 = vld [vmem:[%s1131_s5] ss:$0 sm:$0xff] }
  0x1a   :  { %724 = vmatpush3.bf16.msra.mxu0 %v723_v61  ;;  %756 = vmatpush3.bf16.msra.mxu1 %v753_v54  ;;  %v1084_v41 = vld [vmem:[%s1132_s3] ss:$0 sm:$0xff] }
  0x1b   :  { %726 = vmatprep.subr.bf16.mxu0 %v725_v63  ;;  %758 = vmatprep.subr.bf16.mxu1 %v757_v2 }
  0x1c   :  { %673 = vmatprep.mubr.msk.f32.mxu1 %vm94_vm0, %v43_v5 }
  0x1d   :  { %674 = vmatmul.mubr.msk.f32.gmra.mrb[4].mxu1 %vm94_vm0, %v46_v9 }
  0x1e   :  { %728 = vmatpush3.bf16.msra.mxu0 %v727_v8  ;;  %760 = vmatpush3.bf16.msra.mxu1 %v757_v2 }
  0x1f   :  { %730 = vmatprep.subr.bf16.mxu0 %v729_v10  ;;  %762 = vmatprep.subr.bf16.mxu1 %v761_v13 }
  0x20   :  { %692 = vmatprep.mubr.msk.f32.mxu1 %vm94_vm0, %v303_v14 }
  0x22   :  { %732 = vmatpush3.bf16.msra.mxu0 %v731_v15  ;;  %764 = vmatpush3.bf16.msra.mxu1 %v761_v13 }
  0x25   :  { %178 = vmatmul.mubr.f32.vlgmr.msra.gmra.mrb[0].mxu0 %v29_v16  ;;  %693 = vmatmul.mubr.msk.f32.vlgmr.msra.gmra.mrb[6].mxu1 %vm94_vm0, %v304_v17 }
  0x26   :  { %182 = vmatprep.mubr.f32.mxu0 %v33_v18  ;;  %695 = vmatprep.mubr.msk.f32.mxu1 %vm94_vm0, %v305_v19 }
  0x29   :  { %183 = vmatmul.mubr.f32.gmra.mrb[2].mxu0 %v32_v20  ;;  %696 = vmatmul.mubr.msk.f32.gmra.mrb[8].mxu1 %vm94_vm0, %v306_v21 }
  0x2a   :  { %187 = vmatprep.mubr.f32.mxu0 %v36_v22  ;;  %698 = vmatprep.mubr.msk.f32.mxu1 %vm94_vm0, %v307_v23 }
  0x2d   :  { %188 = vmatmul.mubr.f32.gmra.mrb[4].mxu0 %v35_v24  ;;  %699 = vmatmul.mubr.msk.f32.gmra.mrb[10].mxu1 %vm94_vm0, %v308_v25 }
  0x2e   :  { %192 = vmatprep.mubr.f32.mxu0 %v39_v26 }
  0x31   :  { %193 = vmatmul.mubr.f32.gmra.mrb[6].mxu0 %v38_v27 }
  0x32   :  { %197 = vmatprep.mubr.f32.mxu0 %v42_v28 }
  0x35   :  { %198 = vmatmul.mubr.f32.gmra.mrb[8].mxu0 %v41_v29 }
  0x36   :  { %202 = vmatprep.mubr.f32.mxu0 %v45_v30 }
  0x39   :  { %203 = vmatmul.mubr.f32.gmra.mrb[10].mxu0 %v44_v31 }
  0xe8   :  { %v669_v32 = vpop.f32.mrb[0].mxu1 }
  0xe9   :  { %v274_v33 = vpop.f32.mrb[1].mxu1 }
  0xec   :  { %v672_v34 = vpop.f32.mrb[2].mxu1 }
  0xed   :  { %v284_v35 = vpop.f32.mrb[3].mxu1 }
  0xf0   :  { %v1074_v36 = vpop.f32.mrb[4].mxu1 }
  0xf1   :  { %v1076_v37 = vpop.f32.mrb[5].mxu1 }
  0xf8   :  { %v605_v39 = vpop.f32.mrb[0].mxu0  ;;  %v694_v40 = vpop.f32.mrb[6].mxu1 }
  0xf9   :  { %v606_v42 = vpop.f32.mrb[1].mxu0  ;;  %v414_v43 = vadd.f32 %v694_v40, %v558_v38  ;;  %v408_v45 = vpop.f32.mrb[7].mxu1 }
  0xfa   :  { %v607_v44 = vadd.f32 %v606_v42, %v605_v39  ;;  %v409_v46 = vadd.f32 %v558_v38, %v408_v45 }
  0xfb   :  { %v438_v47 = vsub.f32 0.0, %v414_v43 }
  0xfc   :  { %v180_v48 = vadd.f32 %v607_v44, %v1084_v41  ;;  %v608_v49 = vpop.f32.mrb[2].mxu0  ;;  %v437_v50 = vsub.f32 0.0, %v409_v46  ;;  %v697_v51 = vpop.f32.mrb[8].mxu1 }
  0xfd   :  { %v609_v52 = vpop.f32.mrb[3].mxu0  ;;  %v445_v53 = vmul.f32 1.442695, %v438_v47  ;;  %v424_v55 = vadd.f32 %v697_v51, %v558_v38  ;;  %v418_v57 = vpop.f32.mrb[9].mxu1 }
  0xfe   :  { %v1087_v54 = vadd.f32 %v274_v33, %v180_v48  ;;  %v610_v56 = vadd.f32 %v609_v52, %v608_v49  ;;  %v443_v58 = vmul.f32 1.442695, %v437_v50  ;;  %v419_v59 = vadd.f32 %v558_v38, %v418_v57 }
  0xff   :  { %765 = vpow2.f32 %v445_v53  ;;  %v440_v60 = vsub.f32 0.0, %v424_v55 }
 0x100   :  { %v185_v61 = vadd.f32 %v610_v56, %v1084_v41  ;;  %v611_v62 = vpop.f32.mrb[4].mxu0  ;;  %767 = vpow2.f32 %v443_v58  ;;  %v439_v63 = vsub.f32 0.0, %v419_v59  ;;  %v700_v0 = vpop.f32.mrb[10].mxu1 }
 0x101   :  { %v612_v1 = vpop.f32.mrb[5].mxu0  ;;  %v449_v2 = vmul.f32 1.442695, %v440_v60  ;;  %v434_v4 = vadd.f32 %v700_v0, %v558_v38  ;;  %v428_v6 = vpop.f32.mrb[11].mxu1 }
 0x102   :  { %v280_v3 = vadd.f32 %v669_v32, %v185_v61  ;;  %v613_v5 = vadd.f32 %v612_v1, %v611_v62  ;;  %v447_v7 = vmul.f32 1.442695, %v439_v63  ;;  %v429_v8 = vadd.f32 %v558_v38, %v428_v6 }
 0x103   :  { %769 = vpow2.f32 %v449_v2  ;;  %v442_v9 = vsub.f32 0.0, %v434_v4 }
 0x104   :  { %v190_v10 = vadd.f32 %v613_v5, %v1084_v41  ;;  %v614_v11 = vpop.f32.mrb[6].mxu0  ;;  %771 = vpow2.f32 %v447_v7  ;;  %v441_v12 = vsub.f32 0.0, %v429_v8 }
 0x105   :  { %v615_v13 = vpop.f32.mrb[7].mxu0  ;;  %v453_v14 = vmul.f32 1.442695, %v442_v9 }
 0x106   :  { %v285_v15 = vadd.f32 %v284_v35, %v190_v10  ;;  %v616_v16 = vadd.f32 %v615_v13, %v614_v11  ;;  %v451_v17 = vmul.f32 1.442695, %v441_v12 }
 0x107   :  { %773 = vpow2.f32 %v453_v14 }
 0x108   :  { %v195_v18 = vadd.f32 %v616_v16, %v1084_v41  ;;  %v617_v19 = vpop.f32.mrb[8].mxu0  ;;  %775 = vpow2.f32 %v451_v17 }
 0x109   :  { %v618_v20 = vpop.f32.mrb[9].mxu0  ;;  %v766_v21 = vpop.eup %765 }
 0x10a   :  { %v290_v22 = vadd.f32 %v672_v34, %v195_v18  ;;  %v619_v23 = vadd.f32 %v618_v20, %v617_v19  ;;  %v768_v24 = vpop.eup %767  ;;  %v456_v25 = vadd.f32 1.0, %v766_v21 }
 0x10b   :  { %v455_v26 = vadd.f32 1.0, %v768_v24 }
 0x10c   :  { %v200_v27 = vadd.f32 %v619_v23, %v1084_v41  ;;  %v620_v28 = vpop.f32.mrb[10].mxu0  ;;  %777 = vrcp.f32 %v456_v25 }
 0x10d   :  { %v621_v29 = vpop.f32.mrb[11].mxu0  ;;  %v770_v30 = vpop.eup %769  ;;  %779 = vrcp.f32 %v455_v26 }
 0x10e   :  { %v295_v31 = vadd.f32 %v1076_v37, %v200_v27  ;;  %v622_v32 = vadd.f32 %v621_v29, %v620_v28  ;;  %v772_v33 = vpop.eup %771  ;;  %v458_v35 = vadd.f32 1.0, %v770_v30  ;;  %v565_v37 = vld [vmem:[%s1133_s6] ss:$0 sm:$0xff] }
 0x10f   :  { %v457_v38 = vadd.f32 1.0, %v772_v33 }
 0x110   :  { %v205_v39 = vadd.f32 %v622_v32, %v1084_v41  ;;  %781 = vrcp.f32 %v458_v35  ;;  %v566_v41 = vld [vmem:[%s1134_s7] ss:$0 sm:$0xff] }
 0x111   :  { %v774_v34 = vpop.eup %773  ;;  %783 = vrcp.f32 %v457_v38 }
 0x112   :  { %v300_v40 = vadd.f32 %v1074_v36, %v205_v39  ;;  %v776_v42 = vpop.eup %775  ;;  %v460_v43 = vadd.f32 1.0, %v774_v34 }
 0x113   :  { %v459_v44 = vadd.f32 1.0, %v776_v42 }
 0x114   :  { %785 = vrcp.f32 %v460_v43 }
 0x115   :  { %787 = vrcp.f32 %v459_v44 }
 0x116   :  { %v778_v45 = vpop.eup %777 }
 0x117   :  { %v780_v46 = vpop.eup %779  ;;  %v474_v47 = vmul.f32 %v778_v45, %v280_v3 }
 0x118   :  { %v473_v48 = vmul.f32 %v780_v46, %v1087_v54 }
 0x119   :  { %v487_v49 = vmul.f32 %v565_v37, %v474_v47 }
 0x11a   :  { %v782_v36 = vpop.eup %781  ;;  %v486_v50 = vmul.f32 %v565_v37, %v473_v48 }
 0x11b   :  { %v784_v51 = vpop.eup %783  ;;  %v500_v52 = vadd.f32 %v566_v41, %v487_v49  ;;  %v476_v53 = vmul.f32 %v782_v36, %v290_v22 }
 0x11c   :  { %v499_v55 = vadd.f32 %v566_v41, %v486_v50  ;;  %v475_v56 = vmul.f32 %v784_v51, %v285_v15 }
 0x11d   :  { %v512_v57 = vmin.f32 %v500_v52, 0.0  ;;  %v489_v58 = vmul.f32 %v565_v37, %v476_v53  ;;  %vm506_vm1 = vcmp.gt.f32.partialorder %v500_v52, 0.0 }
 0x11e   :  { %v786_v59 = vpop.eup %785  ;;  %v511_v60 = vmin.f32 %v499_v55, 0.0  ;;  %v488_v61 = vmul.f32 %v565_v37, %v475_v56  ;;  %vm505_vm2 = vcmp.gt.f32.partialorder %v499_v55, 0.0 }
 0x11f   :  { %v788_v62 = vpop.eup %787  ;;  %v519_v63 = vmul.f32 1.442695, %v512_v57  ;;  %v502_v54 = vadd.f32 %v566_v41, %v489_v58  ;;  %v478_v0 = vmul.f32 %v786_v59, %v300_v40 }
 0x120   :  { %v517_v1 = vmul.f32 1.442695, %v511_v60  ;;  %v501_v2 = vadd.f32 %v566_v41, %v488_v61  ;;  %v477_v3 = vmul.f32 %v788_v62, %v295_v31 }
 0x121   :  { %789 = vpow2.f32 %v519_v63  ;;  %v514_v4 = vmin.f32 %v502_v54, 0.0  ;;  %v491_v5 = vmul.f32 %v565_v37, %v478_v0  ;;  %vm508_vm3 = vcmp.gt.f32.partialorder %v502_v54, 0.0 }
 0x122   :  { %791 = vpow2.f32 %v517_v1  ;;  %v513_v6 = vmin.f32 %v501_v2, 0.0  ;;  %v490_v7 = vmul.f32 %v565_v37, %v477_v3  ;;  %vm507_vm4 = vcmp.gt.f32.partialorder %v501_v2, 0.0 }
 0x123   :  { %v523_v8 = vmul.f32 1.442695, %v514_v4  ;;  %v504_v9 = vadd.f32 %v566_v41, %v491_v5 }
 0x124   :  { %v521_v10 = vmul.f32 1.442695, %v513_v6  ;;  %v503_v11 = vadd.f32 %v566_v41, %v490_v7 }
 0x125   :  { %793 = vpow2.f32 %v523_v8  ;;  %v516_v12 = vmin.f32 %v504_v9, 0.0  ;;  %vm510_vm5 = vcmp.gt.f32.partialorder %v504_v9, 0.0 }
 0x126   :  { %795 = vpow2.f32 %v521_v10  ;;  %v515_v13 = vmin.f32 %v503_v11, 0.0  ;;  %vm509_vm6 = vcmp.gt.f32.partialorder %v503_v11, 0.0 }
 0x127   :  { %v527_v14 = vmul.f32 1.442695, %v516_v12 }
 0x128   :  { %v525_v15 = vmul.f32 1.442695, %v515_v13 }
 0x129   :  { %797 = vpow2.f32 %v527_v14 }
 0x12a   :  { %799 = vpow2.f32 %v525_v15 }
 0x12b   :  { %v790_v16 = vpop.eup %789 }
 0x12c   :  { %v792_v17 = vpop.eup %791  ;;  %v568_v18 = vadd.f32 -1.0, %v790_v16 }
 0x12d   :  { %v567_v19 = vadd.f32 -1.0, %v792_v17 }
 0x12e   :  { %v536_v20 = vsel %vm506_vm1, %v500_v52, %v568_v18 }
 0x12f   :  { %v794_v21 = vpop.eup %793  ;;  %v535_v22 = vsel %vm505_vm2, %v499_v55, %v567_v19  ;;  %542 = vst.msk [vmem:[%s1135_s8 + $0x8] sm:$0xff] %vm94_vm0, %v536_v20 }
 0x130   :  { %v796_v23 = vpop.eup %795  ;;  %541 = vst.msk [vmem:[%s1135_s8] sm:$0xff] %vm94_vm0, %v535_v22  ;;  %v570_v24 = vadd.f32 -1.0, %v794_v21 }
 0x131   :  { %v569_v25 = vadd.f32 -1.0, %v796_v23 }
 0x132   :  { %v538_v26 = vsel %vm508_vm3, %v502_v54, %v570_v24 }
 0x133   :  { %v798_v27 = vpop.eup %797  ;;  %v537_v28 = vsel %vm507_vm4, %v501_v2, %v569_v25  ;;  %544 = vst.msk [vmem:[%s1135_s8 + $0x18] sm:$0xff] %vm94_vm0, %v538_v26 }
 0x134   :  { %v800_v29 = vpop.eup %799  ;;  %543 = vst.msk [vmem:[%s1135_s8 + $0x10] sm:$0xff] %vm94_vm0, %v537_v28  ;;  %v572_v30 = vadd.f32 -1.0, %v798_v27 }
 0x135   :  { %v571_v31 = vadd.f32 -1.0, %v800_v29 }
 0x136   :  { %v540_v32 = vsel %vm510_vm5, %v504_v9, %v572_v30 }
 0x137   :  { %v539_v33 = vsel %vm509_vm6, %v503_v11, %v571_v31  ;;  %546 = vst.msk [vmem:[%s1135_s8 + $0x28] sm:$0xff] %vm94_vm0, %v540_v32 }
 0x138   :  { %545 = vst.msk [vmem:[%s1135_s8 + $0x20] sm:$0xff] %vm94_vm0, %v539_v33 }

// kernel: mencoder_forward.11
= control target key start
LH: loop header
LB: loop body
LE: loop exit
PB: predicated region body
PF: predicated region fallthrough
CT: control target
= control target key end

     0   :  { %vm372_vm0 = vcmask 523264   ;;  %s928_s1 = inlined_call_operand.vmem [shape: f32[640,64], index: 1, kind: input, shape index: {}]   ;;  %s929_s0 = inlined_call_operand.vmem [shape: f32[16,640], index: 0, kind: input, shape index: {}]   ;;  %s930_s2 = inlined_call_operand.vmem [shape: f32[1,64], index: 2, kind: input, shape index: {}]   ;;  %s931_s3 = inlined_call_operand.vmem [shape: f32[1,64], index: 3, kind: input, shape index: {}]   ;;  %s932_s4 = inlined_call_operand.vmem [shape: f32[1,64], index: 4, kind: input, shape index: {}]   ;;  %s933_s5 = inlined_call_operand.vmem [shape: f32[16,64], index: 5, kind: output, shape index: {}]  }
   0x1   :  { %v46_v0 = vld [vmem:[%s928_s1 + $0x80] sm:$0xff]  ;;  %v47_v1 = vld [vmem:[%s928_s1 + $0x88] sm:$0xff]  ;;  %v48_v11 = vld [vmem:[%s928_s1 + $0x90] sm:$0xff] }
   0x2   :  { %v30_v2 = vld [vmem:[%s928_s1] sm:$0xff]  ;;  %v513_v3 = vpack.c.bf16 %v47_v1, %v46_v0  ;;  %v31_v4 = vld [vmem:[%s928_s1 + $0x8] sm:$0xff]  ;;  %v49_v13 = vld [vmem:[%s928_s1 + $0x98] sm:$0xff] }
   0x3   :  { %v78_v5 = vld [vmem:[%s928_s1 + $0x180] sm:$0xff]  ;;  %v79_v6 = vld [vmem:[%s928_s1 + $0x188] sm:$0xff]  ;;  %v515_v7 = vpack.c.bf16 %v31_v4, %v30_v2  ;;  %v32_v14 = vld [vmem:[%s928_s1 + $0x10] sm:$0xff]  ;;  %v517_v16 = vpack.c.bf16 %v49_v13, %v48_v11 }
   0x4   :  { %v545_v8 = vpack.c.bf16 %v79_v6, %v78_v5  ;;  %v62_v9 = vld [vmem:[%s928_s1 + $0x100] sm:$0xff]  ;;  %v63_v10 = vld [vmem:[%s928_s1 + $0x108] sm:$0xff]  ;;  %514 = vmatprep.subr.bf16.mxu0 %v513_v3  ;;  %v33_v15 = vld [vmem:[%s928_s1 + $0x18] sm:$0xff] }
   0x5   :  { %v547_v12 = vpack.c.bf16 %v63_v10, %v62_v9  ;;  %516 = vmatpush3.bf16.msra.mxu0 %v515_v7  ;;  %v519_v17 = vpack.c.bf16 %v33_v15, %v32_v14  ;;  %v80_v18 = vld [vmem:[%s928_s1 + $0x190] sm:$0xff]  ;;  %v81_v19 = vld [vmem:[%s928_s1 + $0x198] sm:$0xff]  ;;  %v50_v23 = vld [vmem:[%s928_s1 + $0xa0] sm:$0xff] }
   0x6   :  { %546 = vmatprep.subr.bf16.mxu1 %v545_v8  ;;  %v64_v20 = vld [vmem:[%s928_s1 + $0x110] sm:$0xff]  ;;  %v549_v21 = vpack.c.bf16 %v81_v19, %v80_v18  ;;  %v65_v22 = vld [vmem:[%s928_s1 + $0x118] sm:$0xff]  ;;  %v51_v24 = vld [vmem:[%s928_s1 + $0xa8] sm:$0xff]  ;;  %518 = vmatprep.subr.bf16.mxu0 %v517_v16 }
   0x7   :  { %548 = vmatpush3.bf16.msra.mxu1 %v547_v12  ;;  %v551_v25 = vpack.c.bf16 %v65_v22, %v64_v20  ;;  %v521_v26 = vpack.c.bf16 %v51_v24, %v50_v23  ;;  %v34_v27 = vld [vmem:[%s928_s1 + $0x20] sm:$0xff]  ;;  %v35_v28 = vld [vmem:[%s928_s1 + $0x28] sm:$0xff]  ;;  %v52_v35 = vld [vmem:[%s928_s1 + $0xb0] sm:$0xff] }
   0x8   :  { %v82_v29 = vld [vmem:[%s928_s1 + $0x1a0] sm:$0xff]  ;;  %550 = vmatprep.subr.bf16.mxu1 %v549_v21  ;;  %v83_v30 = vld [vmem:[%s928_s1 + $0x1a8] sm:$0xff]  ;;  %v523_v33 = vpack.c.bf16 %v35_v28, %v34_v27  ;;  %v53_v36 = vld [vmem:[%s928_s1 + $0xb8] sm:$0xff] }
   0x9   :  { %v66_v31 = vld [vmem:[%s928_s1 + $0x120] sm:$0xff]  ;;  %v67_v32 = vld [vmem:[%s928_s1 + $0x128] sm:$0xff]  ;;  %520 = vmatpush3.bf16.msra.mxu0 %v519_v17  ;;  %v553_v34 = vpack.c.bf16 %v83_v30, %v82_v29  ;;  %v36_v37 = vld [vmem:[%s928_s1 + $0x30] sm:$0xff]  ;;  %v525_v39 = vpack.c.bf16 %v53_v36, %v52_v35 }
   0xa   :  { %522 = vmatprep.subr.bf16.mxu0 %v521_v26  ;;  %v555_v38 = vpack.c.bf16 %v67_v32, %v66_v31  ;;  %v37_v40 = vld [vmem:[%s928_s1 + $0x38] sm:$0xff]  ;;  %v84_v41 = vld [vmem:[%s928_s1 + $0x1b0] sm:$0xff]  ;;  %v54_v46 = vld [vmem:[%s928_s1 + $0xc0] sm:$0xff] }
   0xb   :  { %552 = vmatpush3.bf16.msra.mxu1 %v551_v25  ;;  %v85_v42 = vld [vmem:[%s928_s1 + $0x1b8] sm:$0xff]  ;;  %v68_v44 = vld [vmem:[%s928_s1 + $0x130] sm:$0xff]  ;;  %v55_v47 = vld [vmem:[%s928_s1 + $0xc8] sm:$0xff]  ;;  %v527_v48 = vpack.c.bf16 %v37_v40, %v36_v37 }
   0xc   :  { %554 = vmatprep.subr.bf16.mxu1 %v553_v34  ;;  %v557_v43 = vpack.c.bf16 %v85_v42, %v84_v41  ;;  %v69_v45 = vld [vmem:[%s928_s1 + $0x138] sm:$0xff]  ;;  %v86_v49 = vld [vmem:[%s928_s1 + $0x1c0] sm:$0xff]  ;;  %v87_v50 = vld [vmem:[%s928_s1 + $0x1c8] sm:$0xff]  ;;  %v529_v52 = vpack.c.bf16 %v55_v47, %v54_v46 }
   0xd   :  { %524 = vmatpush3.bf16.msra.mxu0 %v523_v33  ;;  %v559_v51 = vpack.c.bf16 %v69_v45, %v68_v44  ;;  %v38_v53 = vld [vmem:[%s928_s1 + $0x40] sm:$0xff]  ;;  %v39_v54 = vld [vmem:[%s928_s1 + $0x48] sm:$0xff]  ;;  %v561_v56 = vpack.c.bf16 %v87_v50, %v86_v49  ;;  %v56_v58 = vld [vmem:[%s928_s1 + $0xd0] sm:$0xff] }
   0xe   :  { %526 = vmatprep.subr.bf16.mxu0 %v525_v39  ;;  %v70_v55 = vld [vmem:[%s928_s1 + $0x140] sm:$0xff]  ;;  %v71_v57 = vld [vmem:[%s928_s1 + $0x148] sm:$0xff]  ;;  %v57_v59 = vld [vmem:[%s928_s1 + $0xd8] sm:$0xff]  ;;  %v531_v62 = vpack.c.bf16 %v39_v54, %v38_v53 }
   0xf   :  { %556 = vmatpush3.bf16.msra.mxu1 %v555_v38  ;;  %v88_v60 = vld [vmem:[%s928_s1 + $0x1d0] sm:$0xff]  ;;  %v89_v61 = vld [vmem:[%s928_s1 + $0x1d8] sm:$0xff]  ;;  %v563_v63 = vpack.c.bf16 %v71_v57, %v70_v55  ;;  %v533_v0 = vpack.c.bf16 %v57_v59, %v56_v58  ;;  %v58_v6 = vld [vmem:[%s928_s1 + $0xe0] sm:$0xff] }
  0x10   :  { %558 = vmatprep.subr.bf16.mxu1 %v557_v43  ;;  %v40_v1 = vld [vmem:[%s928_s1 + $0x50] sm:$0xff]  ;;  %v41_v2 = vld [vmem:[%s928_s1 + $0x58] sm:$0xff]  ;;  %v565_v4 = vpack.c.bf16 %v89_v61, %v88_v60  ;;  %v59_v7 = vld [vmem:[%s928_s1 + $0xe8] sm:$0xff] }
  0x11   :  { %528 = vmatpush3.bf16.msra.mxu0 %v527_v48  ;;  %v72_v3 = vld [vmem:[%s928_s1 + $0x150] sm:$0xff]  ;;  %v73_v5 = vld [vmem:[%s928_s1 + $0x158] sm:$0xff]  ;;  %v90_v8 = vld [vmem:[%s928_s1 + $0x1e0] sm:$0xff]  ;;  %v535_v10 = vpack.c.bf16 %v41_v2, %v40_v1  ;;  %v537_v14 = vpack.c.bf16 %v59_v7, %v58_v6 }
  0x12   :  { %530 = vmatprep.subr.bf16.mxu0 %v529_v52  ;;  %v91_v9 = vld [vmem:[%s928_s1 + $0x1e8] sm:$0xff]  ;;  %v42_v11 = vld [vmem:[%s928_s1 + $0x60] sm:$0xff]  ;;  %v567_v13 = vpack.c.bf16 %v73_v5, %v72_v3  ;;  %v60_v19 = vld [vmem:[%s928_s1 + $0xf0] sm:$0xff] }
  0x13   :  { %560 = vmatpush3.bf16.msra.mxu1 %v559_v51  ;;  %v21_v12 = vld [vmem:[%s929_s0 + $0x8] sm:$0xff]  ;;  %v74_v16 = vld [vmem:[%s928_s1 + $0x160] sm:$0xff]  ;;  %v569_v18 = vpack.c.bf16 %v91_v9, %v90_v8  ;;  %v61_v20 = vld [vmem:[%s928_s1 + $0xf8] sm:$0xff] }
  0x14   :  { %562 = vmatprep.subr.bf16.mxu1 %v561_v56  ;;  %v43_v15 = vld [vmem:[%s928_s1 + $0x68] sm:$0xff]  ;;  %181 = vmatprep.mubr.f32.mxu0 %v21_v12  ;;  %v23_v21 = vld [vmem:[%s929_s0 + $0x18] sm:$0xff]  ;;  %v92_v22 = vld [vmem:[%s928_s1 + $0x1f0] sm:$0xff]  ;;  %v541_v26 = vpack.c.bf16 %v61_v20, %v60_v19 }
  0x15   :  { %532 = vmatpush3.bf16.msra.mxu0 %v531_v62  ;;  %v75_v17 = vld [vmem:[%s928_s1 + $0x168] sm:$0xff]  ;;  %v93_v23 = vld [vmem:[%s928_s1 + $0x1f8] sm:$0xff]  ;;  %256 = vmatprep.mubr.f32.mxu1 %v23_v21  ;;  %v539_v24 = vpack.c.bf16 %v43_v15, %v42_v11  ;;  %v44_v27 = vld [vmem:[%s928_s1 + $0x70] sm:$0xff] }
  0x16   :  { %534 = vmatprep.subr.bf16.mxu0 %v533_v0  ;;  %v571_v25 = vpack.c.bf16 %v75_v17, %v74_v16  ;;  %v45_v28 = vld [vmem:[%s928_s1 + $0x78] sm:$0xff]  ;;  %v76_v29 = vld [vmem:[%s928_s1 + $0x170] sm:$0xff]  ;;  %v573_v30 = vpack.c.bf16 %v93_v23, %v92_v22  ;;  %v94_v32 = vld [vmem:[%s928_s1 + $0x200] sm:$0xff] }
  0x17   :  { %564 = vmatpush3.bf16.msra.mxu1 %v563_v63  ;;  %v77_v31 = vld [vmem:[%s928_s1 + $0x178] sm:$0xff]  ;;  %v95_v33 = vld [vmem:[%s928_s1 + $0x208] sm:$0xff]  ;;  %v543_v34 = vpack.c.bf16 %v45_v28, %v44_v27  ;;  %v96_v37 = vld [vmem:[%s928_s1 + $0x210] sm:$0xff] }
  0x18   :  { %566 = vmatprep.subr.bf16.mxu1 %v565_v4  ;;  %v575_v35 = vpack.c.bf16 %v77_v31, %v76_v29  ;;  %v577_v36 = vpack.c.bf16 %v95_v33, %v94_v32  ;;  %v97_v38 = vld [vmem:[%s928_s1 + $0x218] sm:$0xff]  ;;  %v20_v39 = vld [vmem:[%s929_s0] sm:$0xff]  ;;  %v22_v40 = vld [vmem:[%s929_s0 + $0x10] sm:$0xff] }
  0x19   :  { %536 = vmatpush3.bf16.msra.mxu0 %v535_v10  ;;  %v581_v41 = vpack.c.bf16 %v97_v38, %v96_v37  ;;  %v98_v42 = vld [vmem:[%s928_s1 + $0x220] sm:$0xff]  ;;  %v99_v43 = vld [vmem:[%s928_s1 + $0x228] sm:$0xff]  ;;  %v26_v44 = vld [vmem:[%s929_s0 + $0x30] sm:$0xff] }
  0x1a   :  { %538 = vmatprep.subr.bf16.mxu0 %v537_v14  ;;  %v28_v45 = vld [vmem:[%s929_s0 + $0x40] sm:$0xff]  ;;  %v25_v46 = vld [vmem:[%s929_s0 + $0x28] sm:$0xff]  ;;  %v585_v47 = vpack.c.bf16 %v99_v43, %v98_v42  ;;  %v27_v48 = vld [vmem:[%s929_s0 + $0x38] sm:$0xff] }
  0x1b   :  { %568 = vmatpush3.bf16.msra.mxu1 %v567_v13  ;;  %v100_v49 = vld [vmem:[%s928_s1 + $0x230] sm:$0xff]  ;;  %v101_v50 = vld [vmem:[%s928_s1 + $0x238] sm:$0xff]  ;;  %v24_v51 = vld [vmem:[%s929_s0 + $0x20] sm:$0xff] }
  0x1c   :  { %570 = vmatprep.subr.bf16.mxu1 %v569_v18  ;;  %v589_v52 = vpack.c.bf16 %v101_v50, %v100_v49  ;;  %v102_v53 = vld [vmem:[%s928_s1 + $0x240] sm:$0xff]  ;;  %v103_v54 = vld [vmem:[%s928_s1 + $0x248] sm:$0xff]  ;;  %v104_v56 = vld [vmem:[%s928_s1 + $0x250] sm:$0xff] }
  0x1d   :  { %540 = vmatpush3.bf16.msra.mxu0 %v539_v24  ;;  %v593_v55 = vpack.c.bf16 %v103_v54, %v102_v53  ;;  %v105_v57 = vld [vmem:[%s928_s1 + $0x258] sm:$0xff]  ;;  %v106_v59 = vld [vmem:[%s928_s1 + $0x260] sm:$0xff]  ;;  %v107_v60 = vld [vmem:[%s928_s1 + $0x268] sm:$0xff] }
  0x1e   :  { %542 = vmatprep.subr.bf16.mxu0 %v541_v26  ;;  %v597_v58 = vpack.c.bf16 %v105_v57, %v104_v56  ;;  %v601_v61 = vpack.c.bf16 %v107_v60, %v106_v59  ;;  %v108_v62 = vld [vmem:[%s928_s1 + $0x270] sm:$0xff]  ;;  %v109_v63 = vld [vmem:[%s928_s1 + $0x278] sm:$0xff]  ;;  %v29_v1 = vld [vmem:[%s929_s0 + $0x48] sm:$0xff] }
  0x1f   :  { %572 = vmatpush3.bf16.msra.mxu1 %v571_v25  ;;  %v605_v0 = vpack.c.bf16 %v109_v63, %v108_v62  ;;  %v379_v3 = vld [vmem:[%s930_s2] ss:$0 sm:$0xff] }
  0x20   :  { %574 = vmatprep.subr.bf16.mxu1 %v573_v30  ;;  %v380_v20 = vld [vmem:[%s931_s3] ss:$0 sm:$0xff] }
  0x21   :  { %544 = vmatpush3.bf16.msra.mxu0 %v543_v34  ;;  %v381_v23 = vld [vmem:[%s932_s4] ss:$0 sm:$0xff] }
  0x22   :  { %578 = vmatprep.subr.bf16.mxu0 %v577_v36 }
  0x23   :  { %576 = vmatpush3.bf16.msra.mxu1 %v575_v35 }
  0x24   :  { %182 = vmatmul.mubr.f32.vlgmr.msra.gmra.mrb[0].mxu0 %v20_v39 }
  0x25   :  { %580 = vmatpush3.bf16.msra.mxu0 %v577_v36  ;;  %186 = vmatprep.mubr.f32.mxu0 %v26_v44 }
  0x26   :  { %257 = vmatmul.mubr.f32.vlgmr.msra.gmra.mrb[0].mxu1 %v22_v40  ;;  %582 = vmatprep.subr.bf16.mxu0 %v581_v41 }
  0x27   :  { %261 = vmatprep.mubr.f32.mxu1 %v28_v45 }
  0x28   :  { %187 = vmatmul.mubr.f32.gmra.mrb[2].mxu0 %v25_v46 }
  0x29   :  { %584 = vmatpush3.bf16.msra.mxu0 %v581_v41  ;;  %510 = vmatprep.mubr.f32.mxu0 %v24_v51 }
  0x2a   :  { %262 = vmatmul.mubr.f32.gmra.mrb[2].mxu1 %v27_v48  ;;  %586 = vmatprep.subr.bf16.mxu0 %v585_v47 }
  0x2d   :  { %588 = vmatpush3.bf16.msra.mxu0 %v585_v47 }
  0x2e   :  { %590 = vmatprep.subr.bf16.mxu0 %v589_v52 }
  0x31   :  { %592 = vmatpush3.bf16.msra.mxu0 %v589_v52 }
  0x32   :  { %594 = vmatprep.subr.bf16.mxu0 %v593_v55 }
  0x35   :  { %596 = vmatpush3.bf16.msra.mxu0 %v593_v55 }
  0x36   :  { %598 = vmatprep.subr.bf16.mxu0 %v597_v58 }
  0x39   :  { %600 = vmatpush3.bf16.msra.mxu0 %v597_v58 }
  0x3a   :  { %602 = vmatprep.subr.bf16.mxu0 %v601_v61 }
  0x3d   :  { %604 = vmatpush3.bf16.msra.mxu0 %v601_v61 }
  0x3e   :  { %606 = vmatprep.subr.bf16.mxu0 %v605_v0 }
  0x41   :  { %608 = vmatpush3.bf16.msra.mxu0 %v605_v0 }
  0x44   :  { %511 = vmatmul.mubr.f32.vlgmr.msra.gmra.mrb[4].mxu0 %v29_v1 }
  0xf7   :  { %v416_v2 = vpop.f32.mrb[0].mxu0 }
  0xf8   :  { %v417_v4 = vpop.f32.mrb[1].mxu0 }
  0xf9   :  { %v454_v5 = vpop.f32.mrb[0].mxu1  ;;  %v418_v6 = vadd.f32 %v417_v4, %v416_v2 }
  0xfa   :  { %v455_v7 = vpop.f32.mrb[1].mxu1 }
  0xfb   :  { %v456_v8 = vadd.f32 %v455_v7, %v454_v5  ;;  %v184_v9 = vadd.f32 %v418_v6, %v379_v3  ;;  %v419_v10 = vpop.f32.mrb[2].mxu0 }
  0xfc   :  { %v420_v11 = vpop.f32.mrb[3].mxu0 }
  0xfd   :  { %v457_v12 = vpop.f32.mrb[2].mxu1  ;;  %v421_v13 = vadd.f32 %v420_v11, %v419_v10  ;;  %v259_v15 = vadd.f32 %v456_v8, %v184_v9 }
  0xfe   :  { %v458_v14 = vpop.f32.mrb[3].mxu1 }
  0xff   :  { %v459_v16 = vadd.f32 %v458_v14, %v457_v12  ;;  %v189_v17 = vadd.f32 %v421_v13, %v379_v3 }
 0x101   :  { %v264_v18 = vadd.f32 %v459_v16, %v189_v17 }
 0x117   :  { %v512_v19 = vpop.f32.mrb[4].mxu0 }
 0x118   :  { %v339_v21 = vadd.f32 %v512_v19, %v264_v18  ;;  %v333_v22 = vpop.f32.mrb[5].mxu0 }
 0x119   :  { %v334_v24 = vadd.f32 %v333_v22, %v259_v15 }
 0x11a   :  { %v350_v25 = vmul.f32 %v380_v20, %v339_v21 }
 0x11b   :  { %v349_v26 = vmul.f32 %v380_v20, %v334_v24 }
 0x11c   :  { %v359_v27 = vadd.f32 %v381_v23, %v350_v25 }
 0x11d   :  { %v358_v28 = vadd.f32 %v381_v23, %v349_v26 }
 0x11e   :  { %v363_v29 = vmin.f32 %v359_v27, 0.0  ;;  %vm361_vm1 = vcmp.gt.f32.partialorder %v359_v27, 0.0 }
 0x11f   :  { %v362_v30 = vmin.f32 %v358_v28, 0.0  ;;  %vm360_vm2 = vcmp.gt.f32.partialorder %v358_v28, 0.0 }
 0x120   :  { %v366_v31 = vmul.f32 1.442695, %v363_v29 }
 0x121   :  { %v364_v32 = vmul.f32 1.442695, %v362_v30 }
 0x122   :  { %609 = vpow2.f32 %v366_v31 }
 0x123   :  { %611 = vpow2.f32 %v364_v32 }
 0x12c   :  { %v610_v33 = vpop.eup %609 }
 0x12d   :  { %v612_v34 = vpop.eup %611  ;;  %v383_v35 = vadd.f32 -1.0, %v610_v33 }
 0x12e   :  { %v382_v36 = vadd.f32 -1.0, %v612_v34 }
 0x12f   :  { %v371_v37 = vsel %vm361_vm1, %v359_v27, %v383_v35 }
 0x130   :  { %374 = vst.msk [vmem:[%s933_s5 + $0x8] sm:$0xff] %vm372_vm0, %v371_v37  ;;  %v370_v38 = vsel %vm360_vm2, %v358_v28, %v382_v36 }
 0x131   :  { %373 = vst.msk [vmem:[%s933_s5] sm:$0xff] %vm372_vm0, %v370_v38 }

</bundles_post_ra>
